<compile_context>
chip_gen: v7x
topology: tpu7x:2x2x1
jax: 0.10.0
libtpu: 0.0.40
codegen_flags: <defaults>
</compile_context>

<pallas_src>
import jax
import jax.numpy as jnp
from jax import lax
from jax.experimental import pallas as pl
from jax.experimental.pallas import tpu as pltpu

BN_EPS = 1e-5
_SQRT_2_OVER_PI = 0.7978845608028654
_VMEM_LIMIT = 48 * 1024 * 1024


def _gelu(x):
    # TODO(synk): PyTorch F.gelu defaults to the exact erf form; the tanh
    # approximation is used here (and in the reference) since erf lowering on
    # Mosaic is not guaranteed. Max deviation ~1e-3.
    return 0.5 * x * (1.0 + jnp.tanh(_SQRT_2_OVER_PI * (x + 0.044715 * x * x * x)))


# ----------------------------- ConvBlock kernel ------------------------------

def _conv_block_pallas(x, blk, *, pool, proj_w=None, proj_b=None):
    """Fused ConvBlock (+ optional MaxPool1d(2)) (+ optional output projection).

    x      : (B, T, Ci) f32, channel-minor (lane-dense).
    blk    : dict with w0 (3,Ci,Co) bf16, w1 (3,Co,Co) bf16 and folded BN
             scale/shift s0,t0,s1,t1 (1,Co) f32 (conv biases folded into shift).
    proj_w : optional (Co, G) bf16 — when given, the kernel emits
             a1 @ proj_w + proj_b instead of the raw activations (used to fuse
             the hoisted LSTM layer-0 input projection into the last block).
    """
    B, T, Ci = x.shape
    w0, w1 = blk["w0"], blk["w1"]
    Co = w0.shape[-1]
    residual0 = (Ci == Co)            # static: PyTorch `if in_dim == out_dim`
    T_out = T // 2 if pool else T
    has_proj = proj_w is not None
    C_out = proj_w.shape[-1] if has_proj else Co

    def kernel(*refs):
        if has_proj:
            (x_ref, w0_ref, w1_ref, s0_ref, t0_ref, s1_ref, t1_ref,
             pw_ref, pb_ref, o_ref) = refs
        else:
            (x_ref, w0_ref, w1_ref, s0_ref, t0_ref, s1_ref, t1_ref,
             o_ref) = refs

        x_blk = x_ref[0]                                        # (T, Ci) f32

        def conv3(v, w_ref):
            # k=3 'same' conv: +/-1 taps come from XLU rolls + edge masks
            # (no padded scratch, no full-tile zeroing, no misaligned slices).
            row = lax.broadcasted_iota(jnp.int32, v.shape, 0)
            zero = jnp.zeros_like(v)
            v_m = jnp.where(row == 0, zero, pltpu.roll(v, shift=1, axis=0))
            v_p = jnp.where(row == T - 1, zero,
                            pltpu.roll(v, shift=T - 1, axis=0))
            z = jnp.dot(v_m.astype(jnp.bfloat16), w_ref[0],
                        preferred_element_type=jnp.float32)
            z = z + jnp.dot(v.astype(jnp.bfloat16), w_ref[1],
                            preferred_element_type=jnp.float32)
            z = z + jnp.dot(v_p.astype(jnp.bfloat16), w_ref[2],
                            preferred_element_type=jnp.float32)
            return z

        z0 = conv3(x_blk, w0_ref)
        if residual0:
            z0 = z0 + x_blk
        a0 = _gelu(z0 * s0_ref[...] + t0_ref[...])              # BN0 folded

        z1 = conv3(a0, w1_ref) + a0
        a1 = _gelu(z1 * s1_ref[...] + t1_ref[...])              # BN1 folded
        # Dropout is the identity in eval/inference mode.

        if pool:                                                # fused MaxPool1d(2)
            a1 = jnp.max(a1[:2 * T_out].reshape(T_out, 2, Co), axis=1)

        if has_proj:                                            # fused x @ Wih0 + b0
            a1 = jnp.dot(a1.astype(jnp.bfloat16), pw_ref[...],
                         preferred_element_type=jnp.float32) + pb_ref[...]

        o_ref[0] = a1

    in_specs = [
        pl.BlockSpec((1, T, Ci), lambda b: (b, 0, 0)),
        pl.BlockSpec((3, Ci, Co), lambda b: (0, 0, 0)),
        pl.BlockSpec((3, Co, Co), lambda b: (0, 0, 0)),
        pl.BlockSpec((1, Co), lambda b: (0, 0)),
        pl.BlockSpec((1, Co), lambda b: (0, 0)),
        pl.BlockSpec((1, Co), lambda b: (0, 0)),
        pl.BlockSpec((1, Co), lambda b: (0, 0)),
    ]
    args = [x, w0, w1, blk["s0"], blk["t0"], blk["s1"], blk["t1"]]
    if has_proj:
        in_specs += [pl.BlockSpec((Co, C_out), lambda b: (0, 0)),
                     pl.BlockSpec((1, C_out), lambda b: (0, 0))]
        args += [proj_w, proj_b]

    return pl.pallas_call(
        kernel,
        out_shape=jax.ShapeDtypeStruct((B, T_out, C_out), jnp.float32),
        grid=(B,),
        in_specs=in_specs,
        out_specs=pl.BlockSpec((1, T_out, C_out), lambda b: (b, 0, 0)),
        compiler_params=pltpu.CompilerParams(
            dimension_semantics=("parallel",),
            vmem_limit_bytes=_VMEM_LIMIT),
    )(*args)


# ------------------------------ 2-layer LSTM ---------------------------------

def _lstm2_last(gih, whh0, w1s, b1):
    """Two-layer LSTM recurrence over precomputed layer-0 input gates.

    gih  : (B, T, 4H) f32 — x_t @ Wih0 + bih0 + bhh0 (batch-major, lane-dense).
    whh0 : (H, 4H) bf16   — layer-0 recurrent weights.
    w1s  : (2H, 4H) bf16  — stacked [Wih1; Whh1] for the fused layer-1 matmul.
    b1   : (1, 4H) f32    — bih1 + bhh1.
    Returns the final top-layer hidden state (B, H) f32.
    """
    B, T, G = gih.shape
    H = whh0.shape[0]

    # Block TT timesteps per grid step to amortize per-step grid/DMA overhead.
    TT = 16 if T % 16 == 0 else (8 if T % 8 == 0 else T)
    nT = T // TT
    # Optional leading "parallel" batch axis (both v7x cores) when each half
    # keeps (8, lane)-aligned blocks; 1 (inactive) at small test scale.
    NB = 2 if (B % 2 == 0 and (B // 2) % 8 == 0) else 1
    BB = B // NB

    def kernel(gih_ref, whh0_hbm, w1s_hbm, b1_ref, o_ref,
               whh0_v, w1s_v, wsem, h0, c0, h1, c1):
        s = pl.program_id(1)

        @pl.when(s == 0)
        def _init():
            # One-time DMA of the constant gate weights into VMEM scratch:
            # single residency (no per-step refetch, no double buffering).
            cp_w0 = pltpu.make_async_copy(whh0_hbm, whh0_v, wsem.at[0])
            cp_w1 = pltpu.make_async_copy(w1s_hbm, w1s_v, wsem.at[1])
            cp_w0.start()
            cp_w1.start()
            cp_w0.wait()
            cp_w1.wait()
            h0[...] = jnp.zeros_like(h0)
            c0[...] = jnp.zeros_like(c0)
            h1[...] = jnp.zeros_like(h1)
            c1[...] = jnp.zeros_like(c1)

        def gates(g):
            i = jax.nn.sigmoid(g[:, 0:H])
            f = jax.nn.sigmoid(g[:, H:2 * H])
            gg = jnp.tanh(g[:, 2 * H:3 * H])
            o = jax.nn.sigmoid(g[:, 3 * H:4 * H])
            return i, f, gg, o

        for tt in range(TT):            # static unroll inside the time block
            # Layer 0: the input projection is precomputed -> only h @ Whh here.
            g0 = gih_ref[:, tt, :] + jnp.dot(
                h0[...].astype(jnp.bfloat16), whh0_v[...],
                preferred_element_type=jnp.float32)
            i0, f0, gg0, o0 = gates(g0)
            c0[...] = f0 * c0[...] + i0 * gg0
            h0[...] = o0 * jnp.tanh(c0[...])
            # Inter-layer LSTM dropout is the identity in eval mode.
            # Layer 1: fused ih/hh matmul on [h0, h1] against [Wih1; Whh1].
            xh = jnp.concatenate([h0[...], h1[...]], axis=-1).astype(jnp.bfloat16)
            g1 = jnp.dot(xh, w1s_v[...],
                         preferred_element_type=jnp.float32) + b1_ref[...]
            i1, f1, gg1, o1 = gates(g1)
            c1[...] = f1 * c1[...] + i1 * gg1
            h1[...] = o1 * jnp.tanh(c1[...])

        # The output block index only depends on the batch axis, so the buffer
        # is written back exactly once per batch block (after its last step).
        @pl.when(s == pl.num_programs(1) - 1)
        def _finalize():
            o_ref[...] = h1[...]

    return pl.pallas_call(
        kernel,
        out_shape=jax.ShapeDtypeStruct((B, H), jnp.float32),
        grid=(NB, nT),
        in_specs=[
            pl.BlockSpec((BB, TT, G), lambda b, s: (b, s, 0)),
            pl.BlockSpec(memory_space=pl.ANY),       # whh0 (manual one-time DMA)
            pl.BlockSpec(memory_space=pl.ANY),       # w1s  (manual one-time DMA)
            pl.BlockSpec((1, G), lambda b, s: (0, 0)),
        ],
        out_specs=pl.BlockSpec((BB, H), lambda b, s: (b, 0)),
        scratch_shapes=[
            pltpu.VMEM((H, G), jnp.bfloat16),        # resident Whh0
            pltpu.VMEM((2 * H, G), jnp.bfloat16),    # resident [Wih1; Whh1]
            pltpu.SemaphoreType.DMA((2,)),
            pltpu.VMEM((BB, H), jnp.float32),        # h0
            pltpu.VMEM((BB, H), jnp.float32),        # c0
            pltpu.VMEM((BB, H), jnp.float32),        # h1
            pltpu.VMEM((BB, H), jnp.float32),        # c1
        ],
        compiler_params=pltpu.CompilerParams(
            dimension_semantics=("parallel", "arbitrary"),
            vmem_limit_bytes=_VMEM_LIMIT),
    )(gih, whh0, w1s, b1)


# --------------------------------- MLP head ----------------------------------

def _mlp_head(feats, w1, b1, w2, b2):
    """Linear -> GELU -> Linear; weights fit VMEM whole, single grid step."""
    B, R = feats.shape
    M1 = w1.shape[1]
    C = w2.shape[1]

    def kernel(x_ref, w1_ref, b1_ref, w2_ref, b2_ref, o_ref):
        h = _gelu(jnp.dot(x_ref[...].astype(jnp.bfloat16), w1_ref[...],
                          preferred_element_type=jnp.float32) + b1_ref[...])
        o_ref[...] = jnp.dot(h.astype(jnp.bfloat16), w2_ref[...],
                             preferred_element_type=jnp.float32) + b2_ref[...]

    return pl.pallas_call(
        kernel,
        out_shape=jax.ShapeDtypeStruct((B, C), jnp.float32),
        grid=(1,),
        in_specs=[
            pl.BlockSpec((B, R), lambda i: (0, 0)),
            pl.BlockSpec((R, M1), lambda i: (0, 0)),
            pl.BlockSpec((1, M1), lambda i: (0, 0)),
            pl.BlockSpec((M1, C), lambda i: (0, 0)),
            pl.BlockSpec((1, C), lambda i: (0, 0)),
        ],
        out_specs=pl.BlockSpec((B, C), lambda i: (0, 0)),
        compiler_params=pltpu.CompilerParams(
            dimension_semantics=("arbitrary",),
            vmem_limit_bytes=_VMEM_LIMIT),
    )(feats, w1, b1, w2, b2)


# ----------------------------- parameter prep --------------------------------

def prepare_params(p):
    """One-time (outside jit) weight re-layout: transposes, BN/bias folding and
    bf16 casts, so no per-forward-call HBM traffic is spent re-laying out
    static weights."""
    bf16 = jnp.bfloat16
    prep = {}
    for name in ("block1", "block2", "block3"):
        q = p[name]
        s0 = q["bn0_gamma"] / jnp.sqrt(q["bn0_var"] + BN_EPS)
        t0 = q["bn0_beta"] + (q["b0"] - q["bn0_mean"]) * s0
        s1 = q["bn1_gamma"] / jnp.sqrt(q["bn1_var"] + BN_EPS)
        t1 = q["bn1_beta"] + (q["b1"] - q["bn1_mean"]) * s1
        prep[name] = {
            "w0": jnp.transpose(q["w0"], (2, 1, 0)).astype(bf16),   # (3, Ci, Co)
            "w1": jnp.transpose(q["w1"], (2, 1, 0)).astype(bf16),   # (3, Co, Co)
            "s0": s0[None, :], "t0": t0[None, :],
            "s1": s1[None, :], "t1": t1[None, :],
        }
    prep["wih0"] = p["lstm_wih0"].T.astype(bf16)                    # (D, 4H)
    prep["b0l"] = (p["lstm_bih0"] + p["lstm_bhh0"])[None, :]        # (1, 4H) f32
    prep["whh0"] = p["lstm_whh0"].T.astype(bf16)                    # (H, 4H)
    prep["w1s"] = jnp.concatenate(
        [p["lstm_wih1"].T, p["lstm_whh1"].T], axis=0).astype(bf16)  # (2H, 4H)
    prep["b1l"] = (p["lstm_bih1"] + p["lstm_bhh1"])[None, :]        # (1, 4H) f32
    prep["lin1_w"] = p["lin1_w"].T.astype(bf16)
    prep["lin1_b"] = p["lin1_b"][None, :]
    prep["lin2_w"] = p["lin2_w"].T.astype(bf16)
    prep["lin2_b"] = p["lin2_b"][None, :]
    return prep


# ---------------------------------- forward ----------------------------------

def conv_rnn_classifier_forward(x, w):
    """x: (B, in_channels, seq_len) — same NCL layout as the PyTorch module.
    `w` is the output of prepare_params()."""
    y = jnp.transpose(x, (0, 2, 1))                        # (B, T, C) lane-dense
    y = _conv_block_pallas(y, w["block1"], pool=False)
    y = _conv_block_pallas(y, w["block2"], pool=True)      # MaxPool1d(2) fused
    # Last block also emits the hoisted LSTM layer-0 input projection:
    #   gih[b, t] = block3(y)[b, t] @ Wih0 + (bih0 + bhh0)   -> (B, T', 4H)
    gih = _conv_block_pallas(y, w["block3"], pool=False,
                             proj_w=w["wih0"], proj_b=w["b0l"])
    feats = _lstm2_last(gih, w["whh0"], w["w1s"], w["b1l"])  # (B, rnn_hidden)
    return _mlp_head(feats, w["lin1_w"], w["lin1_b"],
                     w["lin2_w"], w["lin2_b"])


# --------------------------- pure-JAX reference ------------------------------

def reference_forward(x, p):
    hp = lax.Precision.HIGHEST

    def conv1d_same(z, w, b):
        y = lax.conv_general_dilated(z, w, (1,), ((1, 1),),
                                     dimension_numbers=("NCH", "OIH", "NCH"),
                                     precision=hp)
        return y + b[None, :, None]

    def bn(z, q, idx):
        inv = q[f"bn{idx}_gamma"] / jnp.sqrt(q[f"bn{idx}_var"] + BN_EPS)
        return ((z - q[f"bn{idx}_mean"][None, :, None]) * inv[None, :, None]
                + q[f"bn{idx}_beta"][None, :, None])

    def conv_block(z, q):
        co, ci = q["w0"].shape[0], q["w0"].shape[1]
        z0 = conv1d_same(z, q["w0"], q["b0"])
        if ci == co:
            z0 = z0 + z
        a0 = _gelu(bn(z0, q, 0))
        z1 = conv1d_same(a0, q["w1"], q["b1"]) + a0
        return _gelu(bn(z1, q, 1))                             # dropout = identity

    y = conv_block(x, p["block1"])
    y = conv_block(y, p["block2"])
    B, C, T = y.shape
    y = jnp.max(y[:, :, :(T // 2) * 2].reshape(B, C, T // 2, 2), axis=-1)
    y = conv_block(y, p["block3"])

    seq = jnp.transpose(y, (0, 2, 1))                          # (B, T', hid3)

    def lstm_layer(s, wih, whh, bih, bhh):
        H = whh.shape[1]

        def step(carry, x_t):
            h, c = carry
            g = (jnp.dot(x_t, wih.T, precision=hp)
                 + jnp.dot(h, whh.T, precision=hp) + bih + bhh)
            i = jax.nn.sigmoid(g[:, 0:H])
            f = jax.nn.sigmoid(g[:, H:2 * H])
            gg = jnp.tanh(g[:, 2 * H:3 * H])
            o = jax.nn.sigmoid(g[:, 3 * H:4 * H])
            c = f * c + i * gg
            h = o * jnp.tanh(c)
            return (h, c), h

        Bq = s.shape[0]
        init = (jnp.zeros((Bq, H), jnp.float32), jnp.zeros((Bq, H), jnp.float32))
        _, hs = lax.scan(step, init, jnp.transpose(s, (1, 0, 2)))
        return jnp.transpose(hs, (1, 0, 2))

    h = lstm_layer(seq, p["lstm_wih0"], p["lstm_whh0"], p["lstm_bih0"], p["lstm_bhh0"])
    h = lstm_layer(h, p["lstm_wih1"], p["lstm_whh1"], p["lstm_bih1"], p["lstm_bhh1"])
    last = h[:, -1, :]
    hid = _gelu(jnp.dot(last, p["lin1_w"].T, precision=hp) + p["lin1_b"])
    return jnp.dot(hid, p["lin2_w"].T, precision=hp) + p["lin2_b"]


# ----------------------------------- params ----------------------------------

def init_params(key, in_channels, hid1, hid2, hid3, rnn_hidden, mlp_hidden,
                num_classes):
    f32 = jnp.float32
    kit = iter(jax.random.split(key, 64))

    def conv_block(ci, co):
        sc0 = 1.0 / (3 * ci) ** 0.5
        sc1 = 1.0 / (3 * co) ** 0.5
        return {
            "w0": sc0 * jax.random.normal(next(kit), (co, ci, 3), f32),
            "b0": 0.1 * jax.random.normal(next(kit), (co,), f32),
            "w1": sc1 * jax.random.normal(next(kit), (co, co, 3), f32),
            "b1": 0.1 * jax.random.normal(next(kit), (co,), f32),
            "bn0_gamma": jax.random.uniform(next(kit), (co,), f32, 0.5, 1.5),
            "bn0_beta": 0.1 * jax.random.normal(next(kit), (co,), f32),
            "bn0_mean": 0.1 * jax.random.normal(next(kit), (co,), f32),
            "bn0_var": jax.random.uniform(next(kit), (co,), f32, 0.5, 1.5),
            "bn1_gamma": jax.random.uniform(next(kit), (co,), f32, 0.5, 1.5),
            "bn1_beta": 0.1 * jax.random.normal(next(kit), (co,), f32),
            "bn1_mean": 0.1 * jax.random.normal(next(kit), (co,), f32),
            "bn1_var": jax.random.uniform(next(kit), (co,), f32, 0.5, 1.5),
        }

    sl = 1.0 / rnn_hidden ** 0.5
    return {
        "block1": conv_block(in_channels, hid1),
        "block2": conv_block(hid1, hid2),
        "block3": conv_block(hid2, hid3),
        "lstm_wih0": sl * jax.random.normal(next(kit), (4 * rnn_hidden, hid3), f32),
        "lstm_whh0": sl * jax.random.normal(next(kit), (4 * rnn_hidden, rnn_hidden), f32),
        "lstm_bih0": sl * jax.random.normal(next(kit), (4 * rnn_hidden,), f32),
        "lstm_bhh0": sl * jax.random.normal(next(kit), (4 * rnn_hidden,), f32),
        "lstm_wih1": sl * jax.random.normal(next(kit), (4 * rnn_hidden, rnn_hidden), f32),
        "lstm_whh1": sl * jax.random.normal(next(kit), (4 * rnn_hidden, rnn_hidden), f32),
        "lstm_bih1": sl * jax.random.normal(next(kit), (4 * rnn_hidden,), f32),
        "lstm_bhh1": sl * jax.random.normal(next(kit), (4 * rnn_hidden,), f32),
        "lin1_w": (1.0 / rnn_hidden ** 0.5)
                  * jax.random.normal(next(kit), (mlp_hidden, rnn_hidden), f32),
        "lin1_b": 0.1 * jax.random.normal(next(kit), (mlp_hidden,), f32),
        "lin2_w": (1.0 / mlp_hidden ** 0.5)
                  * jax.random.normal(next(kit), (num_classes, mlp_hidden), f32),
        "lin2_b": 0.1 * jax.random.normal(next(kit), (num_classes,), f32),
    }


if __name__ == "__main__":
    # Scaled-down shapes (full model: hid 256/128/64, rnn_hidden=1024, mlp=2048).
    B = 2
    IN_CHANNELS = 16
    SEQ_LEN = 32
    HID1, HID2, HID3 = 32, 16, 16      # block3 exercises the residual conv0 path
    RNN_HIDDEN = 32                    # 4H = 128 -> lane-dense gate tensor
    MLP_HIDDEN = 64
    NUM_CLASSES = 4

    key = jax.random.PRNGKey(0)
    kx, kp = jax.random.split(key)
    x = jax.random.normal(kx, (B, IN_CHANNELS, SEQ_LEN), jnp.float32)
    params = init_params(kp, IN_CHANNELS, HID1, HID2, HID3,
                         RNN_HIDDEN, MLP_HIDDEN, NUM_CLASSES)

    prep = prepare_params(params)                 # one-time weight re-layout
    fwd = jax.jit(conv_rnn_classifier_forward)
    out = jax.block_until_ready(fwd(x, prep))
    ref = jax.block_until_ready(reference_forward(x, params))

    assert out.shape == (B, NUM_CLASSES), out.shape
    max_err = float(jnp.max(jnp.abs(out - ref)))
    # bf16 matmul operands vs. f32 HIGHEST reference -> loosened tolerance.
    assert jnp.allclose(out, ref, rtol=5e-2, atol=5e-2), f"max |err| = {max_err}"
    print("KERNEL_OK")
</pallas_src>

<mosaic_0001>
module attributes {stable_mosaic.version = 11 : i64} {
  func.func @kernel(%arg0: i32, %arg1: memref<1x32x16xf32, #tpu.memory_space<vmem>>, %arg2: memref<3x16x32xbf16, #tpu.memory_space<vmem>>, %arg3: memref<3x32x32xbf16, #tpu.memory_space<vmem>>, %arg4: memref<1x32xf32, #tpu.memory_space<vmem>>, %arg5: memref<1x32xf32, #tpu.memory_space<vmem>>, %arg6: memref<1x32xf32, #tpu.memory_space<vmem>>, %arg7: memref<1x32xf32, #tpu.memory_space<vmem>>, %arg8: memref<1x32x32xf32, #tpu.memory_space<vmem>>) attributes {dimension_semantics = [#tpu.dimension_semantics<parallel>], iteration_bounds = array<i64: 2>, scalar_prefetch = 0 : i64, scratch_operands = 0 : i64, tpu.core_type = #tpu.core_type<tc>, window_params = [{transform_indices = @transform_0, window_bounds = array<i64: 1, 32, 16>}, {pipeline_mode = #tpu.pipeline_mode<synchronous>, transform_indices = @transform_1, window_bounds = array<i64: 3, 16, 32>}, {pipeline_mode = #tpu.pipeline_mode<synchronous>, transform_indices = @transform_2, window_bounds = array<i64: 3, 32, 32>}, {pipeline_mode = #tpu.pipeline_mode<synchronous>, transform_indices = @transform_3, window_bounds = array<i64: 1, 32>}, {pipeline_mode = #tpu.pipeline_mode<synchronous>, transform_indices = @transform_4, window_bounds = array<i64: 1, 32>}, {pipeline_mode = #tpu.pipeline_mode<synchronous>, transform_indices = @transform_5, window_bounds = array<i64: 1, 32>}, {pipeline_mode = #tpu.pipeline_mode<synchronous>, transform_indices = @transform_6, window_bounds = array<i64: 1, 32>}, {transform_indices = @transform_7, window_bounds = array<i64: 1, 32, 32>}]} {
    %c0 = arith.constant 0 : index
    %c0_0 = arith.constant 0 : index
    %c0_1 = arith.constant 0 : index
    %0 = vector.load %arg1[%c0, %c0_0, %c0_1] : memref<1x32x16xf32, #tpu.memory_space<vmem>>, vector<1x32x16xf32>
    %1 = vector.shape_cast %0 : vector<1x32x16xf32> to vector<32x16xf32>
    %2 = tpu.iota {dimensions = array<i32: 0>} : vector<32x16xi32>
    %cst = arith.constant 0.000000e+00 : f32
    %3 = vector.broadcast %cst : f32 to vector<32x16xf32>
    %c0_i32 = arith.constant 0 : i32
    %4 = vector.broadcast %c0_i32 : i32 to vector<32x16xi32>
    %5 = arith.cmpi eq, %2, %4 : vector<32x16xi32>
    %c1_i32 = arith.constant 1 : i32
    %6 = tpu.dynamic_rotate %1 by %c1_i32 dim 0 : vector<32x16xf32>, i32 -> vector<32x16xf32>
    %7 = arith.select %5, %3, %6 : vector<32x16xi1>, vector<32x16xf32>
    %c31_i32 = arith.constant 31 : i32
    %8 = vector.broadcast %c31_i32 : i32 to vector<32x16xi32>
    %9 = arith.cmpi eq, %2, %8 : vector<32x16xi32>
    %c31_i32_2 = arith.constant 31 : i32
    %10 = tpu.dynamic_rotate %1 by %c31_i32_2 dim 0 : vector<32x16xf32>, i32 -> vector<32x16xf32>
    %11 = arith.select %9, %3, %10 : vector<32x16xi1>, vector<32x16xf32>
    %12 = arith.truncf %7 : vector<32x16xf32> to vector<32x16xbf16>
    %c0_3 = arith.constant 0 : index
    %c0_4 = arith.constant 0 : index
    %c0_5 = arith.constant 0 : index
    %13 = vector.load %arg2[%c0_3, %c0_4, %c0_5] : memref<3x16x32xbf16, #tpu.memory_space<vmem>>, vector<1x16x32xbf16>
    %14 = vector.shape_cast %13 : vector<1x16x32xbf16> to vector<16x32xbf16>
    %cst_6 = arith.constant dense<0.000000e+00> : vector<32x32xf32>
    %15 = tpu.matmul %12, %14, %cst_6 {dimension_numbers = #tpu.dot_dimension_numbers<[1], [0], [0], [1], [0, 0, 1, 1], [], []>} : vector<32x16xbf16>, vector<16x32xbf16>, vector<32x32xf32> -> vector<32x32xf32>
    %16 = arith.truncf %1 : vector<32x16xf32> to vector<32x16xbf16>
    %c1 = arith.constant 1 : index
    %c0_7 = arith.constant 0 : index
    %c0_8 = arith.constant 0 : index
    %17 = vector.load %arg2[%c1, %c0_7, %c0_8] : memref<3x16x32xbf16, #tpu.memory_space<vmem>>, vector<1x16x32xbf16>
    %18 = vector.shape_cast %17 : vector<1x16x32xbf16> to vector<16x32xbf16>
    %cst_9 = arith.constant dense<0.000000e+00> : vector<32x32xf32>
    %19 = tpu.matmul %16, %18, %cst_9 {dimension_numbers = #tpu.dot_dimension_numbers<[1], [0], [0], [1], [0, 0, 1, 1], [], []>} : vector<32x16xbf16>, vector<16x32xbf16>, vector<32x32xf32> -> vector<32x32xf32>
    %20 = arith.addf %15, %19 : vector<32x32xf32>
    %21 = arith.truncf %11 : vector<32x16xf32> to vector<32x16xbf16>
    %c2 = arith.constant 2 : index
    %c0_10 = arith.constant 0 : index
    %c0_11 = arith.constant 0 : index
    %22 = vector.load %arg2[%c2, %c0_10, %c0_11] : memref<3x16x32xbf16, #tpu.memory_space<vmem>>, vector<1x16x32xbf16>
    %23 = vector.shape_cast %22 : vector<1x16x32xbf16> to vector<16x32xbf16>
    %cst_12 = arith.constant dense<0.000000e+00> : vector<32x32xf32>
    %24 = tpu.matmul %21, %23, %cst_12 {dimension_numbers = #tpu.dot_dimension_numbers<[1], [0], [0], [1], [0, 0, 1, 1], [], []>} : vector<32x16xbf16>, vector<16x32xbf16>, vector<32x32xf32> -> vector<32x32xf32>
    %25 = arith.addf %20, %24 : vector<32x32xf32>
    %c0_13 = arith.constant 0 : index
    %c0_14 = arith.constant 0 : index
    %26 = vector.load %arg4[%c0_13, %c0_14] : memref<1x32xf32, #tpu.memory_space<vmem>>, vector<1x32xf32>
    %27 = vector.broadcast %26 : vector<1x32xf32> to vector<32x32xf32>
    %28 = arith.mulf %25, %27 : vector<32x32xf32>
    %c0_15 = arith.constant 0 : index
    %c0_16 = arith.constant 0 : index
    %29 = vector.load %arg5[%c0_15, %c0_16] : memref<1x32xf32, #tpu.memory_space<vmem>>, vector<1x32xf32>
    %30 = vector.broadcast %29 : vector<1x32xf32> to vector<32x32xf32>
    %31 = arith.addf %28, %30 : vector<32x32xf32>
    %cst_17 = arith.constant 5.000000e-01 : f32
    %32 = vector.broadcast %cst_17 : f32 to vector<32x32xf32>
    %33 = arith.mulf %32, %31 : vector<32x32xf32>
    %cst_18 = arith.constant 4.471500e-02 : f32
    %34 = vector.broadcast %cst_18 : f32 to vector<32x32xf32>
    %35 = arith.mulf %34, %31 : vector<32x32xf32>
    %36 = arith.mulf %35, %31 : vector<32x32xf32>
    %37 = arith.mulf %36, %31 : vector<32x32xf32>
    %38 = arith.addf %31, %37 : vector<32x32xf32>
    %cst_19 = arith.constant 0.797884583 : f32
    %39 = vector.broadcast %cst_19 : f32 to vector<32x32xf32>
    %40 = arith.mulf %39, %38 : vector<32x32xf32>
    %41 = math.tanh %40 : vector<32x32xf32>
    %cst_20 = arith.constant 1.000000e+00 : f32
    %42 = vector.broadcast %cst_20 : f32 to vector<32x32xf32>
    %43 = arith.addf %42, %41 : vector<32x32xf32>
    %44 = arith.mulf %33, %43 : vector<32x32xf32>
    %45 = tpu.iota {dimensions = array<i32: 0>} : vector<32x32xi32>
    %cst_21 = arith.constant 0.000000e+00 : f32
    %46 = vector.broadcast %cst_21 : f32 to vector<32x32xf32>
    %c0_i32_22 = arith.constant 0 : i32
    %47 = vector.broadcast %c0_i32_22 : i32 to vector<32x32xi32>
    %48 = arith.cmpi eq, %45, %47 : vector<32x32xi32>
    %c1_i32_23 = arith.constant 1 : i32
    %49 = tpu.dynamic_rotate %44 by %c1_i32_23 dim 0 : vector<32x32xf32>, i32 -> vector<32x32xf32>
    %50 = arith.select %48, %46, %49 : vector<32x32xi1>, vector<32x32xf32>
    %c31_i32_24 = arith.constant 31 : i32
    %51 = vector.broadcast %c31_i32_24 : i32 to vector<32x32xi32>
    %52 = arith.cmpi eq, %45, %51 : vector<32x32xi32>
    %c31_i32_25 = arith.constant 31 : i32
    %53 = tpu.dynamic_rotate %44 by %c31_i32_25 dim 0 : vector<32x32xf32>, i32 -> vector<32x32xf32>
    %54 = arith.select %52, %46, %53 : vector<32x32xi1>, vector<32x32xf32>
    %55 = arith.truncf %50 : vector<32x32xf32> to vector<32x32xbf16>
    %c0_26 = arith.constant 0 : index
    %c0_27 = arith.constant 0 : index
    %c0_28 = arith.constant 0 : index
    %56 = vector.load %arg3[%c0_26, %c0_27, %c0_28] : memref<3x32x32xbf16, #tpu.memory_space<vmem>>, vector<1x32x32xbf16>
    %57 = vector.shape_cast %56 : vector<1x32x32xbf16> to vector<32x32xbf16>
    %cst_29 = arith.constant dense<0.000000e+00> : vector<32x32xf32>
    %58 = tpu.matmul %55, %57, %cst_29 {dimension_numbers = #tpu.dot_dimension_numbers<[1], [0], [0], [1], [0, 0, 1, 1], [], []>} : vector<32x32xbf16>, vector<32x32xbf16>, vector<32x32xf32> -> vector<32x32xf32>
    %59 = arith.truncf %44 : vector<32x32xf32> to vector<32x32xbf16>
    %c1_30 = arith.constant 1 : index
    %c0_31 = arith.constant 0 : index
    %c0_32 = arith.constant 0 : index
    %60 = vector.load %arg3[%c1_30, %c0_31, %c0_32] : memref<3x32x32xbf16, #tpu.memory_space<vmem>>, vector<1x32x32xbf16>
    %61 = vector.shape_cast %60 : vector<1x32x32xbf16> to vector<32x32xbf16>
    %cst_33 = arith.constant dense<0.000000e+00> : vector<32x32xf32>
    %62 = tpu.matmul %59, %61, %cst_33 {dimension_numbers = #tpu.dot_dimension_numbers<[1], [0], [0], [1], [0, 0, 1, 1], [], []>} : vector<32x32xbf16>, vector<32x32xbf16>, vector<32x32xf32> -> vector<32x32xf32>
    %63 = arith.addf %58, %62 : vector<32x32xf32>
    %64 = arith.truncf %54 : vector<32x32xf32> to vector<32x32xbf16>
    %c2_34 = arith.constant 2 : index
    %c0_35 = arith.constant 0 : index
    %c0_36 = arith.constant 0 : index
    %65 = vector.load %arg3[%c2_34, %c0_35, %c0_36] : memref<3x32x32xbf16, #tpu.memory_space<vmem>>, vector<1x32x32xbf16>
    %66 = vector.shape_cast %65 : vector<1x32x32xbf16> to vector<32x32xbf16>
    %cst_37 = arith.constant dense<0.000000e+00> : vector<32x32xf32>
    %67 = tpu.matmul %64, %66, %cst_37 {dimension_numbers = #tpu.dot_dimension_numbers<[1], [0], [0], [1], [0, 0, 1, 1], [], []>} : vector<32x32xbf16>, vector<32x32xbf16>, vector<32x32xf32> -> vector<32x32xf32>
    %68 = arith.addf %63, %67 : vector<32x32xf32>
    %69 = arith.addf %68, %44 : vector<32x32xf32>
    %c0_38 = arith.constant 0 : index
    %c0_39 = arith.constant 0 : index
    %70 = vector.load %arg6[%c0_38, %c0_39] : memref<1x32xf32, #tpu.memory_space<vmem>>, vector<1x32xf32>
    %71 = vector.broadcast %70 : vector<1x32xf32> to vector<32x32xf32>
    %72 = arith.mulf %69, %71 : vector<32x32xf32>
    %c0_40 = arith.constant 0 : index
    %c0_41 = arith.constant 0 : index
    %73 = vector.load %arg7[%c0_40, %c0_41] : memref<1x32xf32, #tpu.memory_space<vmem>>, vector<1x32xf32>
    %74 = vector.broadcast %73 : vector<1x32xf32> to vector<32x32xf32>
    %75 = arith.addf %72, %74 : vector<32x32xf32>
    %cst_42 = arith.constant 5.000000e-01 : f32
    %76 = vector.broadcast %cst_42 : f32 to vector<32x32xf32>
    %77 = arith.mulf %76, %75 : vector<32x32xf32>
    %cst_43 = arith.constant 4.471500e-02 : f32
    %78 = vector.broadcast %cst_43 : f32 to vector<32x32xf32>
    %79 = arith.mulf %78, %75 : vector<32x32xf32>
    %80 = arith.mulf %79, %75 : vector<32x32xf32>
    %81 = arith.mulf %80, %75 : vector<32x32xf32>
    %82 = arith.addf %75, %81 : vector<32x32xf32>
    %cst_44 = arith.constant 0.797884583 : f32
    %83 = vector.broadcast %cst_44 : f32 to vector<32x32xf32>
    %84 = arith.mulf %83, %82 : vector<32x32xf32>
    %85 = math.tanh %84 : vector<32x32xf32>
    %cst_45 = arith.constant 1.000000e+00 : f32
    %86 = vector.broadcast %cst_45 : f32 to vector<32x32xf32>
    %87 = arith.addf %86, %85 : vector<32x32xf32>
    %88 = arith.mulf %77, %87 : vector<32x32xf32>
    %c0_46 = arith.constant 0 : index
    %c0_47 = arith.constant 0 : index
    %c0_48 = arith.constant 0 : index
    %89 = vector.load %arg8[%c0_46, %c0_47, %c0_48] : memref<1x32x32xf32, #tpu.memory_space<vmem>>, vector<1x32x32xf32>
    %90 = vector.shape_cast %89 : vector<1x32x32xf32> to vector<32x32xf32>
    %91 = vector.shape_cast %88 : vector<32x32xf32> to vector<1x32x32xf32>
    tpu.vector_store %arg8[%c0_46, %c0_47, %c0_48], %91 {strides = array<i32>} : memref<1x32x32xf32, #tpu.memory_space<vmem>>, vector<1x32x32xf32>,
    return
  }
  func.func @transform_0(%arg0: i32) -> (i32, i32, i32) {
    %c0_i32 = arith.constant 0 : i32
    %c0_i32_0 = arith.constant 0 : i32
    %c0_i32_1 = arith.constant 0 : i32
    return %arg0, %c0_i32, %c0_i32_0 : i32, i32, i32
  }
  func.func @transform_1(%arg0: i32) -> (i32, i32, i32) {
    %c0_i32 = arith.constant 0 : i32
    %c0_i32_0 = arith.constant 0 : i32
    %c0_i32_1 = arith.constant 0 : i32
    %c0_i32_2 = arith.constant 0 : i32
    return %c0_i32, %c0_i32_0, %c0_i32_1 : i32, i32, i32
  }
  func.func @transform_2(%arg0: i32) -> (i32, i32, i32) {
    %c0_i32 = arith.constant 0 : i32
    %c0_i32_0 = arith.constant 0 : i32
    %c0_i32_1 = arith.constant 0 : i32
    %c0_i32_2 = arith.constant 0 : i32
    return %c0_i32, %c0_i32_0, %c0_i32_1 : i32, i32, i32
  }
  func.func @transform_3(%arg0: i32) -> (i32, i32) {
    %c0_i32 = arith.constant 0 : i32
    %c0_i32_0 = arith.constant 0 : i32
    %c0_i32_1 = arith.constant 0 : i32
    return %c0_i32, %c0_i32_0 : i32, i32
  }
  func.func @transform_4(%arg0: i32) -> (i32, i32) {
    %c0_i32 = arith.constant 0 : i32
    %c0_i32_0 = arith.constant 0 : i32
    %c0_i32_1 = arith.constant 0 : i32
    return %c0_i32, %c0_i32_0 : i32, i32
  }
  func.func @transform_5(%arg0: i32) -> (i32, i32) {
    %c0_i32 = arith.constant 0 : i32
    %c0_i32_0 = arith.constant 0 : i32
    %c0_i32_1 = arith.constant 0 : i32
    return %c0_i32, %c0_i32_0 : i32, i32
  }
  func.func @transform_6(%arg0: i32) -> (i32, i32) {
    %c0_i32 = arith.constant 0 : i32
    %c0_i32_0 = arith.constant 0 : i32
    %c0_i32_1 = arith.constant 0 : i32
    return %c0_i32, %c0_i32_0 : i32, i32
  }
  func.func @transform_7(%arg0: i32) -> (i32, i32, i32) {
    %c0_i32 = arith.constant 0 : i32
    %c0_i32_0 = arith.constant 0 : i32
    %c0_i32_1 = arith.constant 0 : i32
    return %arg0, %c0_i32, %c0_i32_0 : i32, i32, i32
  }
}

module attributes {stable_mosaic.version = 11 : i64} {
  func.func @kernel(%arg0: i32, %arg1: memref<1x32x32xf32, #tpu.memory_space<vmem>>, %arg2: memref<3x32x16xbf16, #tpu.memory_space<vmem>>, %arg3: memref<3x16x16xbf16, #tpu.memory_space<vmem>>, %arg4: memref<1x16xf32, #tpu.memory_space<vmem>>, %arg5: memref<1x16xf32, #tpu.memory_space<vmem>>, %arg6: memref<1x16xf32, #tpu.memory_space<vmem>>, %arg7: memref<1x16xf32, #tpu.memory_space<vmem>>, %arg8: memref<1x16x16xf32, #tpu.memory_space<vmem>>) attributes {dimension_semantics = [#tpu.dimension_semantics<parallel>], iteration_bounds = array<i64: 2>, scalar_prefetch = 0 : i64, scratch_operands = 0 : i64, tpu.core_type = #tpu.core_type<tc>, window_params = [{transform_indices = @transform_0, window_bounds = array<i64: 1, 32, 32>}, {pipeline_mode = #tpu.pipeline_mode<synchronous>, transform_indices = @transform_1, window_bounds = array<i64: 3, 32, 16>}, {pipeline_mode = #tpu.pipeline_mode<synchronous>, transform_indices = @transform_2, window_bounds = array<i64: 3, 16, 16>}, {pipeline_mode = #tpu.pipeline_mode<synchronous>, transform_indices = @transform_3, window_bounds = array<i64: 1, 16>}, {pipeline_mode = #tpu.pipeline_mode<synchronous>, transform_indices = @transform_4, window_bounds = array<i64: 1, 16>}, {pipeline_mode = #tpu.pipeline_mode<synchronous>, transform_indices = @transform_5, window_bounds = array<i64: 1, 16>}, {pipeline_mode = #tpu.pipeline_mode<synchronous>, transform_indices = @transform_6, window_bounds = array<i64: 1, 16>}, {transform_indices = @transform_7, window_bounds = array<i64: 1, 16, 16>}]} {
    %c0 = arith.constant 0 : index
    %c0_0 = arith.constant 0 : index
    %c0_1 = arith.constant 0 : index
    %0 = vector.load %arg1[%c0, %c0_0, %c0_1] : memref<1x32x32xf32, #tpu.memory_space<vmem>>, vector<1x32x32xf32>
    %1 = vector.shape_cast %0 : vector<1x32x32xf32> to vector<32x32xf32>
    %2 = tpu.iota {dimensions = array<i32: 0>} : vector<32x32xi32>
    %cst = arith.constant 0.000000e+00 : f32
    %3 = vector.broadcast %cst : f32 to vector<32x32xf32>
    %c0_i32 = arith.constant 0 : i32
    %4 = vector.broadcast %c0_i32 : i32 to vector<32x32xi32>
    %5 = arith.cmpi eq, %2, %4 : vector<32x32xi32>
    %c1_i32 = arith.constant 1 : i32
    %6 = tpu.dynamic_rotate %1 by %c1_i32 dim 0 : vector<32x32xf32>, i32 -> vector<32x32xf32>
    %7 = arith.select %5, %3, %6 : vector<32x32xi1>, vector<32x32xf32>
    %c31_i32 = arith.constant 31 : i32
    %8 = vector.broadcast %c31_i32 : i32 to vector<32x32xi32>
    %9 = arith.cmpi eq, %2, %8 : vector<32x32xi32>
    %c31_i32_2 = arith.constant 31 : i32
    %10 = tpu.dynamic_rotate %1 by %c31_i32_2 dim 0 : vector<32x32xf32>, i32 -> vector<32x32xf32>
    %11 = arith.select %9, %3, %10 : vector<32x32xi1>, vector<32x32xf32>
    %12 = arith.truncf %7 : vector<32x32xf32> to vector<32x32xbf16>
    %c0_3 = arith.constant 0 : index
    %c0_4 = arith.constant 0 : index
    %c0_5 = arith.constant 0 : index
    %13 = vector.load %arg2[%c0_3, %c0_4, %c0_5] : memref<3x32x16xbf16, #tpu.memory_space<vmem>>, vector<1x32x16xbf16>
    %14 = vector.shape_cast %13 : vector<1x32x16xbf16> to vector<32x16xbf16>
    %cst_6 = arith.constant dense<0.000000e+00> : vector<32x16xf32>
    %15 = tpu.matmul %12, %14, %cst_6 {dimension_numbers = #tpu.dot_dimension_numbers<[1], [0], [0], [1], [0, 0, 1, 1], [], []>} : vector<32x32xbf16>, vector<32x16xbf16>, vector<32x16xf32> -> vector<32x16xf32>
    %16 = arith.truncf %1 : vector<32x32xf32> to vector<32x32xbf16>
    %c1 = arith.constant 1 : index
    %c0_7 = arith.constant 0 : index
    %c0_8 = arith.constant 0 : index
    %17 = vector.load %arg2[%c1, %c0_7, %c0_8] : memref<3x32x16xbf16, #tpu.memory_space<vmem>>, vector<1x32x16xbf16>
    %18 = vector.shape_cast %17 : vector<1x32x16xbf16> to vector<32x16xbf16>
    %cst_9 = arith.constant dense<0.000000e+00> : vector<32x16xf32>
    %19 = tpu.matmul %16, %18, %cst_9 {dimension_numbers = #tpu.dot_dimension_numbers<[1], [0], [0], [1], [0, 0, 1, 1], [], []>} : vector<32x32xbf16>, vector<32x16xbf16>, vector<32x16xf32> -> vector<32x16xf32>
    %20 = arith.addf %15, %19 : vector<32x16xf32>
    %21 = arith.truncf %11 : vector<32x32xf32> to vector<32x32xbf16>
    %c2 = arith.constant 2 : index
    %c0_10 = arith.constant 0 : index
    %c0_11 = arith.constant 0 : index
    %22 = vector.load %arg2[%c2, %c0_10, %c0_11] : memref<3x32x16xbf16, #tpu.memory_space<vmem>>, vector<1x32x16xbf16>
    %23 = vector.shape_cast %22 : vector<1x32x16xbf16> to vector<32x16xbf16>
    %cst_12 = arith.constant dense<0.000000e+00> : vector<32x16xf32>
    %24 = tpu.matmul %21, %23, %cst_12 {dimension_numbers = #tpu.dot_dimension_numbers<[1], [0], [0], [1], [0, 0, 1, 1], [], []>} : vector<32x32xbf16>, vector<32x16xbf16>, vector<32x16xf32> -> vector<32x16xf32>
    %25 = arith.addf %20, %24 : vector<32x16xf32>
    %c0_13 = arith.constant 0 : index
    %c0_14 = arith.constant 0 : index
    %26 = vector.load %arg4[%c0_13, %c0_14] : memref<1x16xf32, #tpu.memory_space<vmem>>, vector<1x16xf32>
    %27 = vector.broadcast %26 : vector<1x16xf32> to vector<32x16xf32>
    %28 = arith.mulf %25, %27 : vector<32x16xf32>
    %c0_15 = arith.constant 0 : index
    %c0_16 = arith.constant 0 : index
    %29 = vector.load %arg5[%c0_15, %c0_16] : memref<1x16xf32, #tpu.memory_space<vmem>>, vector<1x16xf32>
    %30 = vector.broadcast %29 : vector<1x16xf32> to vector<32x16xf32>
    %31 = arith.addf %28, %30 : vector<32x16xf32>
    %cst_17 = arith.constant 5.000000e-01 : f32
    %32 = vector.broadcast %cst_17 : f32 to vector<32x16xf32>
    %33 = arith.mulf %32, %31 : vector<32x16xf32>
    %cst_18 = arith.constant 4.471500e-02 : f32
    %34 = vector.broadcast %cst_18 : f32 to vector<32x16xf32>
    %35 = arith.mulf %34, %31 : vector<32x16xf32>
    %36 = arith.mulf %35, %31 : vector<32x16xf32>
    %37 = arith.mulf %36, %31 : vector<32x16xf32>
    %38 = arith.addf %31, %37 : vector<32x16xf32>
    %cst_19 = arith.constant 0.797884583 : f32
    %39 = vector.broadcast %cst_19 : f32 to vector<32x16xf32>
    %40 = arith.mulf %39, %38 : vector<32x16xf32>
    %41 = math.tanh %40 : vector<32x16xf32>
    %cst_20 = arith.constant 1.000000e+00 : f32
    %42 = vector.broadcast %cst_20 : f32 to vector<32x16xf32>
    %43 = arith.addf %42, %41 : vector<32x16xf32>
    %44 = arith.mulf %33, %43 : vector<32x16xf32>
    %45 = tpu.iota {dimensions = array<i32: 0>} : vector<32x16xi32>
    %cst_21 = arith.constant 0.000000e+00 : f32
    %46 = vector.broadcast %cst_21 : f32 to vector<32x16xf32>
    %c0_i32_22 = arith.constant 0 : i32
    %47 = vector.broadcast %c0_i32_22 : i32 to vector<32x16xi32>
    %48 = arith.cmpi eq, %45, %47 : vector<32x16xi32>
    %c1_i32_23 = arith.constant 1 : i32
    %49 = tpu.dynamic_rotate %44 by %c1_i32_23 dim 0 : vector<32x16xf32>, i32 -> vector<32x16xf32>
    %50 = arith.select %48, %46, %49 : vector<32x16xi1>, vector<32x16xf32>
    %c31_i32_24 = arith.constant 31 : i32
    %51 = vector.broadcast %c31_i32_24 : i32 to vector<32x16xi32>
    %52 = arith.cmpi eq, %45, %51 : vector<32x16xi32>
    %c31_i32_25 = arith.constant 31 : i32
    %53 = tpu.dynamic_rotate %44 by %c31_i32_25 dim 0 : vector<32x16xf32>, i32 -> vector<32x16xf32>
    %54 = arith.select %52, %46, %53 : vector<32x16xi1>, vector<32x16xf32>
    %55 = arith.truncf %50 : vector<32x16xf32> to vector<32x16xbf16>
    %c0_26 = arith.constant 0 : index
    %c0_27 = arith.constant 0 : index
    %c0_28 = arith.constant 0 : index
    %56 = vector.load %arg3[%c0_26, %c0_27, %c0_28] : memref<3x16x16xbf16, #tpu.memory_space<vmem>>, vector<1x16x16xbf16>
    %57 = vector.shape_cast %56 : vector<1x16x16xbf16> to vector<16x16xbf16>
    %cst_29 = arith.constant dense<0.000000e+00> : vector<32x16xf32>
    %58 = tpu.matmul %55, %57, %cst_29 {dimension_numbers = #tpu.dot_dimension_numbers<[1], [0], [0], [1], [0, 0, 1, 1], [], []>} : vector<32x16xbf16>, vector<16x16xbf16>, vector<32x16xf32> -> vector<32x16xf32>
    %59 = arith.truncf %44 : vector<32x16xf32> to vector<32x16xbf16>
    %c1_30 = arith.constant 1 : index
    %c0_31 = arith.constant 0 : index
    %c0_32 = arith.constant 0 : index
    %60 = vector.load %arg3[%c1_30, %c0_31, %c0_32] : memref<3x16x16xbf16, #tpu.memory_space<vmem>>, vector<1x16x16xbf16>
    %61 = vector.shape_cast %60 : vector<1x16x16xbf16> to vector<16x16xbf16>
    %cst_33 = arith.constant dense<0.000000e+00> : vector<32x16xf32>
    %62 = tpu.matmul %59, %61, %cst_33 {dimension_numbers = #tpu.dot_dimension_numbers<[1], [0], [0], [1], [0, 0, 1, 1], [], []>} : vector<32x16xbf16>, vector<16x16xbf16>, vector<32x16xf32> -> vector<32x16xf32>
    %63 = arith.addf %58, %62 : vector<32x16xf32>
    %64 = arith.truncf %54 : vector<32x16xf32> to vector<32x16xbf16>
    %c2_34 = arith.constant 2 : index
    %c0_35 = arith.constant 0 : index
    %c0_36 = arith.constant 0 : index
    %65 = vector.load %arg3[%c2_34, %c0_35, %c0_36] : memref<3x16x16xbf16, #tpu.memory_space<vmem>>, vector<1x16x16xbf16>
    %66 = vector.shape_cast %65 : vector<1x16x16xbf16> to vector<16x16xbf16>
    %cst_37 = arith.constant dense<0.000000e+00> : vector<32x16xf32>
    %67 = tpu.matmul %64, %66, %cst_37 {dimension_numbers = #tpu.dot_dimension_numbers<[1], [0], [0], [1], [0, 0, 1, 1], [], []>} : vector<32x16xbf16>, vector<16x16xbf16>, vector<32x16xf32> -> vector<32x16xf32>
    %68 = arith.addf %63, %67 : vector<32x16xf32>
    %69 = arith.addf %68, %44 : vector<32x16xf32>
    %c0_38 = arith.constant 0 : index
    %c0_39 = arith.constant 0 : index
    %70 = vector.load %arg6[%c0_38, %c0_39] : memref<1x16xf32, #tpu.memory_space<vmem>>, vector<1x16xf32>
    %71 = vector.broadcast %70 : vector<1x16xf32> to vector<32x16xf32>
    %72 = arith.mulf %69, %71 : vector<32x16xf32>
    %c0_40 = arith.constant 0 : index
    %c0_41 = arith.constant 0 : index
    %73 = vector.load %arg7[%c0_40, %c0_41] : memref<1x16xf32, #tpu.memory_space<vmem>>, vector<1x16xf32>
    %74 = vector.broadcast %73 : vector<1x16xf32> to vector<32x16xf32>
    %75 = arith.addf %72, %74 : vector<32x16xf32>
    %cst_42 = arith.constant 5.000000e-01 : f32
    %76 = vector.broadcast %cst_42 : f32 to vector<32x16xf32>
    %77 = arith.mulf %76, %75 : vector<32x16xf32>
    %cst_43 = arith.constant 4.471500e-02 : f32
    %78 = vector.broadcast %cst_43 : f32 to vector<32x16xf32>
    %79 = arith.mulf %78, %75 : vector<32x16xf32>
    %80 = arith.mulf %79, %75 : vector<32x16xf32>
    %81 = arith.mulf %80, %75 : vector<32x16xf32>
    %82 = arith.addf %75, %81 : vector<32x16xf32>
    %cst_44 = arith.constant 0.797884583 : f32
    %83 = vector.broadcast %cst_44 : f32 to vector<32x16xf32>
    %84 = arith.mulf %83, %82 : vector<32x16xf32>
    %85 = math.tanh %84 : vector<32x16xf32>
    %cst_45 = arith.constant 1.000000e+00 : f32
    %86 = vector.broadcast %cst_45 : f32 to vector<32x16xf32>
    %87 = arith.addf %86, %85 : vector<32x16xf32>
    %88 = arith.mulf %77, %87 : vector<32x16xf32>
    %89 = vector.shape_cast %88 : vector<32x16xf32> to vector<16x2x16xf32>
    %cst_46 = arith.constant dense<0xFF800000> : vector<16x16xf32>
    %90 = vector.multi_reduction <maximumf>, %89, %cst_46 [1] : vector<16x2x16xf32> to vector<16x16xf32>
    %c0_47 = arith.constant 0 : index
    %c0_48 = arith.constant 0 : index
    %c0_49 = arith.constant 0 : index
    %91 = vector.load %arg8[%c0_47, %c0_48, %c0_49] : memref<1x16x16xf32, #tpu.memory_space<vmem>>, vector<1x16x16xf32>
    %92 = vector.shape_cast %91 : vector<1x16x16xf32> to vector<16x16xf32>
    %93 = vector.shape_cast %90 : vector<16x16xf32> to vector<1x16x16xf32>
    tpu.vector_store %arg8[%c0_47, %c0_48, %c0_49], %93 {strides = array<i32>} : memref<1x16x16xf32, #tpu.memory_space<vmem>>, vector<1x16x16xf32>,
    return
  }
  func.func @transform_0(%arg0: i32) -> (i32, i32, i32) {
    %c0_i32 = arith.constant 0 : i32
    %c0_i32_0 = arith.constant 0 : i32
    %c0_i32_1 = arith.constant 0 : i32
    return %arg0, %c0_i32, %c0_i32_0 : i32, i32, i32
  }
  func.func @transform_1(%arg0: i32) -> (i32, i32, i32) {
    %c0_i32 = arith.constant 0 : i32
    %c0_i32_0 = arith.constant 0 : i32
    %c0_i32_1 = arith.constant 0 : i32
    %c0_i32_2 = arith.constant 0 : i32
    return %c0_i32, %c0_i32_0, %c0_i32_1 : i32, i32, i32
  }
  func.func @transform_2(%arg0: i32) -> (i32, i32, i32) {
    %c0_i32 = arith.constant 0 : i32
    %c0_i32_0 = arith.constant 0 : i32
    %c0_i32_1 = arith.constant 0 : i32
    %c0_i32_2 = arith.constant 0 : i32
    return %c0_i32, %c0_i32_0, %c0_i32_1 : i32, i32, i32
  }
  func.func @transform_3(%arg0: i32) -> (i32, i32) {
    %c0_i32 = arith.constant 0 : i32
    %c0_i32_0 = arith.constant 0 : i32
    %c0_i32_1 = arith.constant 0 : i32
    return %c0_i32, %c0_i32_0 : i32, i32
  }
  func.func @transform_4(%arg0: i32) -> (i32, i32) {
    %c0_i32 = arith.constant 0 : i32
    %c0_i32_0 = arith.constant 0 : i32
    %c0_i32_1 = arith.constant 0 : i32
    return %c0_i32, %c0_i32_0 : i32, i32
  }
  func.func @transform_5(%arg0: i32) -> (i32, i32) {
    %c0_i32 = arith.constant 0 : i32
    %c0_i32_0 = arith.constant 0 : i32
    %c0_i32_1 = arith.constant 0 : i32
    return %c0_i32, %c0_i32_0 : i32, i32
  }
  func.func @transform_6(%arg0: i32) -> (i32, i32) {
    %c0_i32 = arith.constant 0 : i32
    %c0_i32_0 = arith.constant 0 : i32
    %c0_i32_1 = arith.constant 0 : i32
    return %c0_i32, %c0_i32_0 : i32, i32
  }
  func.func @transform_7(%arg0: i32) -> (i32, i32, i32) {
    %c0_i32 = arith.constant 0 : i32
    %c0_i32_0 = arith.constant 0 : i32
    %c0_i32_1 = arith.constant 0 : i32
    return %arg0, %c0_i32, %c0_i32_0 : i32, i32, i32
  }
}

module attributes {stable_mosaic.version = 11 : i64} {
  func.func @kernel(%arg0: i32, %arg1: memref<1x16x16xf32, #tpu.memory_space<vmem>>, %arg2: memref<3x16x16xbf16, #tpu.memory_space<vmem>>, %arg3: memref<3x16x16xbf16, #tpu.memory_space<vmem>>, %arg4: memref<1x16xf32, #tpu.memory_space<vmem>>, %arg5: memref<1x16xf32, #tpu.memory_space<vmem>>, %arg6: memref<1x16xf32, #tpu.memory_space<vmem>>, %arg7: memref<1x16xf32, #tpu.memory_space<vmem>>, %arg8: memref<16x128xbf16, #tpu.memory_space<vmem>>, %arg9: memref<1x128xf32, #tpu.memory_space<vmem>>, %arg10: memref<1x16x128xf32, #tpu.memory_space<vmem>>) attributes {dimension_semantics = [#tpu.dimension_semantics<parallel>], iteration_bounds = array<i64: 2>, scalar_prefetch = 0 : i64, scratch_operands = 0 : i64, tpu.core_type = #tpu.core_type<tc>, window_params = [{transform_indices = @transform_0, window_bounds = array<i64: 1, 16, 16>}, {pipeline_mode = #tpu.pipeline_mode<synchronous>, transform_indices = @transform_1, window_bounds = array<i64: 3, 16, 16>}, {pipeline_mode = #tpu.pipeline_mode<synchronous>, transform_indices = @transform_2, window_bounds = array<i64: 3, 16, 16>}, {pipeline_mode = #tpu.pipeline_mode<synchronous>, transform_indices = @transform_3, window_bounds = array<i64: 1, 16>}, {pipeline_mode = #tpu.pipeline_mode<synchronous>, transform_indices = @transform_4, window_bounds = array<i64: 1, 16>}, {pipeline_mode = #tpu.pipeline_mode<synchronous>, transform_indices = @transform_5, window_bounds = array<i64: 1, 16>}, {pipeline_mode = #tpu.pipeline_mode<synchronous>, transform_indices = @transform_6, window_bounds = array<i64: 1, 16>}, {pipeline_mode = #tpu.pipeline_mode<synchronous>, transform_indices = @transform_7, window_bounds = array<i64: 16, 128>}, {pipeline_mode = #tpu.pipeline_mode<synchronous>, transform_indices = @transform_8, window_bounds = array<i64: 1, 128>}, {transform_indices = @transform_9, window_bounds = array<i64: 1, 16, 128>}]} {
    %c0 = arith.constant 0 : index
    %c0_0 = arith.constant 0 : index
    %c0_1 = arith.constant 0 : index
    %0 = vector.load %arg1[%c0, %c0_0, %c0_1] : memref<1x16x16xf32, #tpu.memory_space<vmem>>, vector<1x16x16xf32>
    %1 = vector.shape_cast %0 : vector<1x16x16xf32> to vector<16x16xf32>
    %2 = tpu.iota {dimensions = array<i32: 0>} : vector<16x16xi32>
    %cst = arith.constant 0.000000e+00 : f32
    %3 = vector.broadcast %cst : f32 to vector<16x16xf32>
    %c0_i32 = arith.constant 0 : i32
    %4 = vector.broadcast %c0_i32 : i32 to vector<16x16xi32>
    %5 = arith.cmpi eq, %2, %4 : vector<16x16xi32>
    %c1_i32 = arith.constant 1 : i32
    %6 = tpu.dynamic_rotate %1 by %c1_i32 dim 0 : vector<16x16xf32>, i32 -> vector<16x16xf32>
    %7 = arith.select %5, %3, %6 : vector<16x16xi1>, vector<16x16xf32>
    %c15_i32 = arith.constant 15 : i32
    %8 = vector.broadcast %c15_i32 : i32 to vector<16x16xi32>
    %9 = arith.cmpi eq, %2, %8 : vector<16x16xi32>
    %c15_i32_2 = arith.constant 15 : i32
    %10 = tpu.dynamic_rotate %1 by %c15_i32_2 dim 0 : vector<16x16xf32>, i32 -> vector<16x16xf32>
    %11 = arith.select %9, %3, %10 : vector<16x16xi1>, vector<16x16xf32>
    %12 = arith.truncf %7 : vector<16x16xf32> to vector<16x16xbf16>
    %c0_3 = arith.constant 0 : index
    %c0_4 = arith.constant 0 : index
    %c0_5 = arith.constant 0 : index
    %13 = vector.load %arg2[%c0_3, %c0_4, %c0_5] : memref<3x16x16xbf16, #tpu.memory_space<vmem>>, vector<1x16x16xbf16>
    %14 = vector.shape_cast %13 : vector<1x16x16xbf16> to vector<16x16xbf16>
    %cst_6 = arith.constant dense<0.000000e+00> : vector<16x16xf32>
    %15 = tpu.matmul %12, %14, %cst_6 {dimension_numbers = #tpu.dot_dimension_numbers<[1], [0], [0], [1], [0, 0, 1, 1], [], []>} : vector<16x16xbf16>, vector<16x16xbf16>, vector<16x16xf32> -> vector<16x16xf32>
    %16 = arith.truncf %1 : vector<16x16xf32> to vector<16x16xbf16>
    %c1 = arith.constant 1 : index
    %c0_7 = arith.constant 0 : index
    %c0_8 = arith.constant 0 : index
    %17 = vector.load %arg2[%c1, %c0_7, %c0_8] : memref<3x16x16xbf16, #tpu.memory_space<vmem>>, vector<1x16x16xbf16>
    %18 = vector.shape_cast %17 : vector<1x16x16xbf16> to vector<16x16xbf16>
    %cst_9 = arith.constant dense<0.000000e+00> : vector<16x16xf32>
    %19 = tpu.matmul %16, %18, %cst_9 {dimension_numbers = #tpu.dot_dimension_numbers<[1], [0], [0], [1], [0, 0, 1, 1], [], []>} : vector<16x16xbf16>, vector<16x16xbf16>, vector<16x16xf32> -> vector<16x16xf32>
    %20 = arith.addf %15, %19 : vector<16x16xf32>
    %21 = arith.truncf %11 : vector<16x16xf32> to vector<16x16xbf16>
    %c2 = arith.constant 2 : index
    %c0_10 = arith.constant 0 : index
    %c0_11 = arith.constant 0 : index
    %22 = vector.load %arg2[%c2, %c0_10, %c0_11] : memref<3x16x16xbf16, #tpu.memory_space<vmem>>, vector<1x16x16xbf16>
    %23 = vector.shape_cast %22 : vector<1x16x16xbf16> to vector<16x16xbf16>
    %cst_12 = arith.constant dense<0.000000e+00> : vector<16x16xf32>
    %24 = tpu.matmul %21, %23, %cst_12 {dimension_numbers = #tpu.dot_dimension_numbers<[1], [0], [0], [1], [0, 0, 1, 1], [], []>} : vector<16x16xbf16>, vector<16x16xbf16>, vector<16x16xf32> -> vector<16x16xf32>
    %25 = arith.addf %20, %24 : vector<16x16xf32>
    %26 = arith.addf %25, %1 : vector<16x16xf32>
    %c0_13 = arith.constant 0 : index
    %c0_14 = arith.constant 0 : index
    %27 = vector.load %arg4[%c0_13, %c0_14] : memref<1x16xf32, #tpu.memory_space<vmem>>, vector<1x16xf32>
    %28 = vector.broadcast %27 : vector<1x16xf32> to vector<16x16xf32>
    %29 = arith.mulf %26, %28 : vector<16x16xf32>
    %c0_15 = arith.constant 0 : index
    %c0_16 = arith.constant 0 : index
    %30 = vector.load %arg5[%c0_15, %c0_16] : memref<1x16xf32, #tpu.memory_space<vmem>>, vector<1x16xf32>
    %31 = vector.broadcast %30 : vector<1x16xf32> to vector<16x16xf32>
    %32 = arith.addf %29, %31 : vector<16x16xf32>
    %cst_17 = arith.constant 5.000000e-01 : f32
    %33 = vector.broadcast %cst_17 : f32 to vector<16x16xf32>
    %34 = arith.mulf %33, %32 : vector<16x16xf32>
    %cst_18 = arith.constant 4.471500e-02 : f32
    %35 = vector.broadcast %cst_18 : f32 to vector<16x16xf32>
    %36 = arith.mulf %35, %32 : vector<16x16xf32>
    %37 = arith.mulf %36, %32 : vector<16x16xf32>
    %38 = arith.mulf %37, %32 : vector<16x16xf32>
    %39 = arith.addf %32, %38 : vector<16x16xf32>
    %cst_19 = arith.constant 0.797884583 : f32
    %40 = vector.broadcast %cst_19 : f32 to vector<16x16xf32>
    %41 = arith.mulf %40, %39 : vector<16x16xf32>
    %42 = math.tanh %41 : vector<16x16xf32>
    %cst_20 = arith.constant 1.000000e+00 : f32
    %43 = vector.broadcast %cst_20 : f32 to vector<16x16xf32>
    %44 = arith.addf %43, %42 : vector<16x16xf32>
    %45 = arith.mulf %34, %44 : vector<16x16xf32>
    %46 = tpu.iota {dimensions = array<i32: 0>} : vector<16x16xi32>
    %cst_21 = arith.constant 0.000000e+00 : f32
    %47 = vector.broadcast %cst_21 : f32 to vector<16x16xf32>
    %c0_i32_22 = arith.constant 0 : i32
    %48 = vector.broadcast %c0_i32_22 : i32 to vector<16x16xi32>
    %49 = arith.cmpi eq, %46, %48 : vector<16x16xi32>
    %c1_i32_23 = arith.constant 1 : i32
    %50 = tpu.dynamic_rotate %45 by %c1_i32_23 dim 0 : vector<16x16xf32>, i32 -> vector<16x16xf32>
    %51 = arith.select %49, %47, %50 : vector<16x16xi1>, vector<16x16xf32>
    %c15_i32_24 = arith.constant 15 : i32
    %52 = vector.broadcast %c15_i32_24 : i32 to vector<16x16xi32>
    %53 = arith.cmpi eq, %46, %52 : vector<16x16xi32>
    %c15_i32_25 = arith.constant 15 : i32
    %54 = tpu.dynamic_rotate %45 by %c15_i32_25 dim 0 : vector<16x16xf32>, i32 -> vector<16x16xf32>
    %55 = arith.select %53, %47, %54 : vector<16x16xi1>, vector<16x16xf32>
    %56 = arith.truncf %51 : vector<16x16xf32> to vector<16x16xbf16>
    %c0_26 = arith.constant 0 : index
    %c0_27 = arith.constant 0 : index
    %c0_28 = arith.constant 0 : index
    %57 = vector.load %arg3[%c0_26, %c0_27, %c0_28] : memref<3x16x16xbf16, #tpu.memory_space<vmem>>, vector<1x16x16xbf16>
    %58 = vector.shape_cast %57 : vector<1x16x16xbf16> to vector<16x16xbf16>
    %cst_29 = arith.constant dense<0.000000e+00> : vector<16x16xf32>
    %59 = tpu.matmul %56, %58, %cst_29 {dimension_numbers = #tpu.dot_dimension_numbers<[1], [0], [0], [1], [0, 0, 1, 1], [], []>} : vector<16x16xbf16>, vector<16x16xbf16>, vector<16x16xf32> -> vector<16x16xf32>
    %60 = arith.truncf %45 : vector<16x16xf32> to vector<16x16xbf16>
    %c1_30 = arith.constant 1 : index
    %c0_31 = arith.constant 0 : index
    %c0_32 = arith.constant 0 : index
    %61 = vector.load %arg3[%c1_30, %c0_31, %c0_32] : memref<3x16x16xbf16, #tpu.memory_space<vmem>>, vector<1x16x16xbf16>
    %62 = vector.shape_cast %61 : vector<1x16x16xbf16> to vector<16x16xbf16>
    %cst_33 = arith.constant dense<0.000000e+00> : vector<16x16xf32>
    %63 = tpu.matmul %60, %62, %cst_33 {dimension_numbers = #tpu.dot_dimension_numbers<[1], [0], [0], [1], [0, 0, 1, 1], [], []>} : vector<16x16xbf16>, vector<16x16xbf16>, vector<16x16xf32> -> vector<16x16xf32>
    %64 = arith.addf %59, %63 : vector<16x16xf32>
    %65 = arith.truncf %55 : vector<16x16xf32> to vector<16x16xbf16>
    %c2_34 = arith.constant 2 : index
    %c0_35 = arith.constant 0 : index
    %c0_36 = arith.constant 0 : index
    %66 = vector.load %arg3[%c2_34, %c0_35, %c0_36] : memref<3x16x16xbf16, #tpu.memory_space<vmem>>, vector<1x16x16xbf16>
    %67 = vector.shape_cast %66 : vector<1x16x16xbf16> to vector<16x16xbf16>
    %cst_37 = arith.constant dense<0.000000e+00> : vector<16x16xf32>
    %68 = tpu.matmul %65, %67, %cst_37 {dimension_numbers = #tpu.dot_dimension_numbers<[1], [0], [0], [1], [0, 0, 1, 1], [], []>} : vector<16x16xbf16>, vector<16x16xbf16>, vector<16x16xf32> -> vector<16x16xf32>
    %69 = arith.addf %64, %68 : vector<16x16xf32>
    %70 = arith.addf %69, %45 : vector<16x16xf32>
    %c0_38 = arith.constant 0 : index
    %c0_39 = arith.constant 0 : index
    %71 = vector.load %arg6[%c0_38, %c0_39] : memref<1x16xf32, #tpu.memory_space<vmem>>, vector<1x16xf32>
    %72 = vector.broadcast %71 : vector<1x16xf32> to vector<16x16xf32>
    %73 = arith.mulf %70, %72 : vector<16x16xf32>
    %c0_40 = arith.constant 0 : index
    %c0_41 = arith.constant 0 : index
    %74 = vector.load %arg7[%c0_40, %c0_41] : memref<1x16xf32, #tpu.memory_space<vmem>>, vector<1x16xf32>
    %75 = vector.broadcast %74 : vector<1x16xf32> to vector<16x16xf32>
    %76 = arith.addf %73, %75 : vector<16x16xf32>
    %cst_42 = arith.constant 5.000000e-01 : f32
    %77 = vector.broadcast %cst_42 : f32 to vector<16x16xf32>
    %78 = arith.mulf %77, %76 : vector<16x16xf32>
    %cst_43 = arith.constant 4.471500e-02 : f32
    %79 = vector.broadcast %cst_43 : f32 to vector<16x16xf32>
    %80 = arith.mulf %79, %76 : vector<16x16xf32>
    %81 = arith.mulf %80, %76 : vector<16x16xf32>
    %82 = arith.mulf %81, %76 : vector<16x16xf32>
    %83 = arith.addf %76, %82 : vector<16x16xf32>
    %cst_44 = arith.constant 0.797884583 : f32
    %84 = vector.broadcast %cst_44 : f32 to vector<16x16xf32>
    %85 = arith.mulf %84, %83 : vector<16x16xf32>
    %86 = math.tanh %85 : vector<16x16xf32>
    %cst_45 = arith.constant 1.000000e+00 : f32
    %87 = vector.broadcast %cst_45 : f32 to vector<16x16xf32>
    %88 = arith.addf %87, %86 : vector<16x16xf32>
    %89 = arith.mulf %78, %88 : vector<16x16xf32>
    %90 = arith.truncf %89 : vector<16x16xf32> to vector<16x16xbf16>
    %c0_46 = arith.constant 0 : index
    %c0_47 = arith.constant 0 : index
    %91 = vector.load %arg8[%c0_46, %c0_47] : memref<16x128xbf16, #tpu.memory_space<vmem>>, vector<16x128xbf16>
    %cst_48 = arith.constant dense<0.000000e+00> : vector<16x128xf32>
    %92 = tpu.matmul %90, %91, %cst_48 {dimension_numbers = #tpu.dot_dimension_numbers<[1], [0], [0], [1], [0, 0, 1, 1], [], []>} : vector<16x16xbf16>, vector<16x128xbf16>, vector<16x128xf32> -> vector<16x128xf32>
    %c0_49 = arith.constant 0 : index
    %c0_50 = arith.constant 0 : index
    %93 = vector.load %arg9[%c0_49, %c0_50] : memref<1x128xf32, #tpu.memory_space<vmem>>, vector<1x128xf32>
    %94 = vector.broadcast %93 : vector<1x128xf32> to vector<16x128xf32>
    %95 = arith.addf %92, %94 : vector<16x128xf32>
    %c0_51 = arith.constant 0 : index
    %c0_52 = arith.constant 0 : index
    %c0_53 = arith.constant 0 : index
    %96 = vector.load %arg10[%c0_51, %c0_52, %c0_53] : memref<1x16x128xf32, #tpu.memory_space<vmem>>, vector<1x16x128xf32>
    %97 = vector.shape_cast %96 : vector<1x16x128xf32> to vector<16x128xf32>
    %98 = vector.shape_cast %95 : vector<16x128xf32> to vector<1x16x128xf32>
    tpu.vector_store %arg10[%c0_51, %c0_52, %c0_53], %98 {strides = array<i32>} : memref<1x16x128xf32, #tpu.memory_space<vmem>>, vector<1x16x128xf32>,
    return
  }
  func.func @transform_0(%arg0: i32) -> (i32, i32, i32) {
    %c0_i32 = arith.constant 0 : i32
    %c0_i32_0 = arith.constant 0 : i32
    %c0_i32_1 = arith.constant 0 : i32
    return %arg0, %c0_i32, %c0_i32_0 : i32, i32, i32
  }
  func.func @transform_1(%arg0: i32) -> (i32, i32, i32) {
    %c0_i32 = arith.constant 0 : i32
    %c0_i32_0 = arith.constant 0 : i32
    %c0_i32_1 = arith.constant 0 : i32
    %c0_i32_2 = arith.constant 0 : i32
    return %c0_i32, %c0_i32_0, %c0_i32_1 : i32, i32, i32
  }
  func.func @transform_2(%arg0: i32) -> (i32, i32, i32) {
    %c0_i32 = arith.constant 0 : i32
    %c0_i32_0 = arith.constant 0 : i32
    %c0_i32_1 = arith.constant 0 : i32
    %c0_i32_2 = arith.constant 0 : i32
    return %c0_i32, %c0_i32_0, %c0_i32_1 : i32, i32, i32
  }
  func.func @transform_3(%arg0: i32) -> (i32, i32) {
    %c0_i32 = arith.constant 0 : i32
    %c0_i32_0 = arith.constant 0 : i32
    %c0_i32_1 = arith.constant 0 : i32
    return %c0_i32, %c0_i32_0 : i32, i32
  }
  func.func @transform_4(%arg0: i32) -> (i32, i32) {
    %c0_i32 = arith.constant 0 : i32
    %c0_i32_0 = arith.constant 0 : i32
    %c0_i32_1 = arith.constant 0 : i32
    return %c0_i32, %c0_i32_0 : i32, i32
  }
  func.func @transform_5(%arg0: i32) -> (i32, i32) {
    %c0_i32 = arith.constant 0 : i32
    %c0_i32_0 = arith.constant 0 : i32
    %c0_i32_1 = arith.constant 0 : i32
    return %c0_i32, %c0_i32_0 : i32, i32
  }
  func.func @transform_6(%arg0: i32) -> (i32, i32) {
    %c0_i32 = arith.constant 0 : i32
    %c0_i32_0 = arith.constant 0 : i32
    %c0_i32_1 = arith.constant 0 : i32
    return %c0_i32, %c0_i32_0 : i32, i32
  }
  func.func @transform_7(%arg0: i32) -> (i32, i32) {
    %c0_i32 = arith.constant 0 : i32
    %c0_i32_0 = arith.constant 0 : i32
    %c0_i32_1 = arith.constant 0 : i32
    return %c0_i32, %c0_i32_0 : i32, i32
  }
  func.func @transform_8(%arg0: i32) -> (i32, i32) {
    %c0_i32 = arith.constant 0 : i32
    %c0_i32_0 = arith.constant 0 : i32
    %c0_i32_1 = arith.constant 0 : i32
    return %c0_i32, %c0_i32_0 : i32, i32
  }
  func.func @transform_9(%arg0: i32) -> (i32, i32, i32) {
    %c0_i32 = arith.constant 0 : i32
    %c0_i32_0 = arith.constant 0 : i32
    %c0_i32_1 = arith.constant 0 : i32
    return %arg0, %c0_i32, %c0_i32_0 : i32, i32, i32
  }
}

module attributes {stable_mosaic.version = 11 : i64} {
  func.func @kernel(%arg0: i32, %arg1: i32, %arg2: memref<2x16x128xf32, #tpu.memory_space<vmem>>, %arg3: memref<32x128xbf16, #tpu.memory_space<any>>, %arg4: memref<64x128xbf16, #tpu.memory_space<any>>, %arg5: memref<1x128xf32, #tpu.memory_space<vmem>>, %arg6: memref<2x32xf32, #tpu.memory_space<vmem>>, %arg7: memref<32x128xbf16, #tpu.memory_space<vmem>>, %arg8: memref<64x128xbf16, #tpu.memory_space<vmem>>, %arg9: memref<2x!tpu.dma_semaphore, #tpu.memory_space<semaphore_mem>>, %arg10: memref<2x32xf32, #tpu.memory_space<vmem>>, %arg11: memref<2x32xf32, #tpu.memory_space<vmem>>, %arg12: memref<2x32xf32, #tpu.memory_space<vmem>>, %arg13: memref<2x32xf32, #tpu.memory_space<vmem>>) attributes {dimension_semantics = [#tpu.dimension_semantics<parallel>, #tpu.dimension_semantics<arbitrary>], iteration_bounds = array<i64: 1, 1>, scalar_prefetch = 0 : i64, scratch_operands = 7 : i64, tpu.core_type = #tpu.core_type<tc>, window_params = [{transform_indices = @transform_0, window_bounds = array<i64: 2, 16, 128>}, {}, {}, {pipeline_mode = #tpu.pipeline_mode<synchronous>, transform_indices = @transform_3, window_bounds = array<i64: 1, 128>}, {transform_indices = @transform_4, window_bounds = array<i64: 2, 32>}]} {
    %c0_i32 = arith.constant 0 : i32
    %0 = arith.cmpi eq, %arg1, %c0_i32 : i32
    %1 = arith.extui %0 : i1 to i32
    %c0_i32_0 = arith.constant 0 : i32
    %2 = arith.cmpi ne, %1, %c0_i32_0 : i32
    scf.if %2 {
      %c0_i32_610 = arith.constant 0 : i32
      %1190 = tpu.memref_slice %arg9[%c0_i32_610] : memref<2x!tpu.dma_semaphore, #tpu.memory_space<semaphore_mem>> -> memref<1x!tpu.dma_semaphore, #tpu.memory_space<semaphore_mem>>
      %1191 = tpu.memref_squeeze %1190 : memref<1x!tpu.dma_semaphore, #tpu.memory_space<semaphore_mem>> -> memref<!tpu.dma_semaphore, #tpu.memory_space<semaphore_mem>>
      tpu.enqueue_dma source(%arg3 : memref<32x128xbf16, #tpu.memory_space<any>>) target(%arg7 : memref<32x128xbf16, #tpu.memory_space<vmem>>) target_semaphore(%1191 : memref<!tpu.dma_semaphore, #tpu.memory_space<semaphore_mem>>)
      %c1_i32 = arith.constant 1 : i32
      %1192 = tpu.memref_slice %arg9[%c1_i32] : memref<2x!tpu.dma_semaphore, #tpu.memory_space<semaphore_mem>> -> memref<1x!tpu.dma_semaphore, #tpu.memory_space<semaphore_mem>>
      %1193 = tpu.memref_squeeze %1192 : memref<1x!tpu.dma_semaphore, #tpu.memory_space<semaphore_mem>> -> memref<!tpu.dma_semaphore, #tpu.memory_space<semaphore_mem>>
      tpu.enqueue_dma source(%arg4 : memref<64x128xbf16, #tpu.memory_space<any>>) target(%arg8 : memref<64x128xbf16, #tpu.memory_space<vmem>>) target_semaphore(%1193 : memref<!tpu.dma_semaphore, #tpu.memory_space<semaphore_mem>>)
      %c0_i32_611 = arith.constant 0 : i32
      %1194 = tpu.memref_slice %arg9[%c0_i32_611] : memref<2x!tpu.dma_semaphore, #tpu.memory_space<semaphore_mem>> -> memref<1x!tpu.dma_semaphore, #tpu.memory_space<semaphore_mem>>
      %1195 = tpu.memref_squeeze %1194 : memref<1x!tpu.dma_semaphore, #tpu.memory_space<semaphore_mem>> -> memref<!tpu.dma_semaphore, #tpu.memory_space<semaphore_mem>>
      tpu.wait_dma2 semaphore(%1195 : memref<!tpu.dma_semaphore, #tpu.memory_space<semaphore_mem>>) src(%arg3 : memref<32x128xbf16, #tpu.memory_space<any>>) dst(%arg7 : memref<32x128xbf16, #tpu.memory_space<vmem>>)
      %c1_i32_612 = arith.constant 1 : i32
      %1196 = tpu.memref_slice %arg9[%c1_i32_612] : memref<2x!tpu.dma_semaphore, #tpu.memory_space<semaphore_mem>> -> memref<1x!tpu.dma_semaphore, #tpu.memory_space<semaphore_mem>>
      %1197 = tpu.memref_squeeze %1196 : memref<1x!tpu.dma_semaphore, #tpu.memory_space<semaphore_mem>> -> memref<!tpu.dma_semaphore, #tpu.memory_space<semaphore_mem>>
      tpu.wait_dma2 semaphore(%1197 : memref<!tpu.dma_semaphore, #tpu.memory_space<semaphore_mem>>) src(%arg4 : memref<64x128xbf16, #tpu.memory_space<any>>) dst(%arg8 : memref<64x128xbf16, #tpu.memory_space<vmem>>)
      %cst_613 = arith.constant 0.000000e+00 : f32
      %1198 = vector.broadcast %cst_613 : f32 to vector<2x32xf32>
      %c0_614 = arith.constant 0 : index
      %c0_615 = arith.constant 0 : index
      %1199 = vector.load %arg10[%c0_614, %c0_615] : memref<2x32xf32, #tpu.memory_space<vmem>>, vector<2x32xf32>
      tpu.vector_store %arg10[%c0_614, %c0_615], %1198 {strides = array<i32>} : memref<2x32xf32, #tpu.memory_space<vmem>>, vector<2x32xf32>,
      %cst_616 = arith.constant 0.000000e+00 : f32
      %1200 = vector.broadcast %cst_616 : f32 to vector<2x32xf32>
      %c0_617 = arith.constant 0 : index
      %c0_618 = arith.constant 0 : index
      %1201 = vector.load %arg11[%c0_617, %c0_618] : memref<2x32xf32, #tpu.memory_space<vmem>>, vector<2x32xf32>
      tpu.vector_store %arg11[%c0_617, %c0_618], %1200 {strides = array<i32>} : memref<2x32xf32, #tpu.memory_space<vmem>>, vector<2x32xf32>,
      %cst_619 = arith.constant 0.000000e+00 : f32
      %1202 = vector.broadcast %cst_619 : f32 to vector<2x32xf32>
      %c0_620 = arith.constant 0 : index
      %c0_621 = arith.constant 0 : index
      %1203 = vector.load %arg12[%c0_620, %c0_621] : memref<2x32xf32, #tpu.memory_space<vmem>>, vector<2x32xf32>
      tpu.vector_store %arg12[%c0_620, %c0_621], %1202 {strides = array<i32>} : memref<2x32xf32, #tpu.memory_space<vmem>>, vector<2x32xf32>,
      %cst_622 = arith.constant 0.000000e+00 : f32
      %1204 = vector.broadcast %cst_622 : f32 to vector<2x32xf32>
      %c0_623 = arith.constant 0 : index
      %c0_624 = arith.constant 0 : index
      %1205 = vector.load %arg13[%c0_623, %c0_624] : memref<2x32xf32, #tpu.memory_space<vmem>>, vector<2x32xf32>
      tpu.vector_store %arg13[%c0_623, %c0_624], %1204 {strides = array<i32>} : memref<2x32xf32, #tpu.memory_space<vmem>>, vector<2x32xf32>,
    } else {
    }
    %c0 = arith.constant 0 : index
    %c0_1 = arith.constant 0 : index
    %c0_2 = arith.constant 0 : index
    %3 = vector.load %arg2[%c0, %c0_1, %c0_2] : memref<2x16x128xf32, #tpu.memory_space<vmem>>, vector<2x1x128xf32>
    %4 = vector.shape_cast %3 : vector<2x1x128xf32> to vector<2x128xf32>
    %c0_3 = arith.constant 0 : index
    %c0_4 = arith.constant 0 : index
    %5 = vector.load %arg10[%c0_3, %c0_4] : memref<2x32xf32, #tpu.memory_space<vmem>>, vector<2x32xf32>
    %6 = arith.truncf %5 : vector<2x32xf32> to vector<2x32xbf16>
    %c0_5 = arith.constant 0 : index
    %c0_6 = arith.constant 0 : index
    %7 = vector.load %arg7[%c0_5, %c0_6] : memref<32x128xbf16, #tpu.memory_space<vmem>>, vector<32x128xbf16>
    %cst = arith.constant dense<0.000000e+00> : vector<2x128xf32>
    %8 = tpu.matmul %6, %7, %cst {dimension_numbers = #tpu.dot_dimension_numbers<[1], [0], [0], [1], [0, 0, 1, 1], [], []>} : vector<2x32xbf16>, vector<32x128xbf16>, vector<2x128xf32> -> vector<2x128xf32>
    %9 = arith.addf %4, %8 : vector<2x128xf32>
    %10 = vector.extract_strided_slice %9 {offsets = [0, 0], sizes = [2, 32], strides = [1, 1]} : vector<2x128xf32> to vector<2x32xf32>
    %11 = arith.negf %10 : vector<2x32xf32>
    %12 = math.exp %11 : vector<2x32xf32>
    %cst_7 = arith.constant 1.000000e+00 : f32
    %13 = vector.broadcast %cst_7 : f32 to vector<2x32xf32>
    %14 = arith.addf %13, %12 : vector<2x32xf32>
    %15 = arith.divf %13, %14 : vector<2x32xf32>
    %16 = vector.extract_strided_slice %9 {offsets = [0, 32], sizes = [2, 32], strides = [1, 1]} : vector<2x128xf32> to vector<2x32xf32>
    %17 = arith.negf %16 : vector<2x32xf32>
    %18 = math.exp %17 : vector<2x32xf32>
    %cst_8 = arith.constant 1.000000e+00 : f32
    %19 = vector.broadcast %cst_8 : f32 to vector<2x32xf32>
    %20 = arith.addf %19, %18 : vector<2x32xf32>
    %21 = arith.divf %19, %20 : vector<2x32xf32>
    %22 = vector.extract_strided_slice %9 {offsets = [0, 64], sizes = [2, 32], strides = [1, 1]} : vector<2x128xf32> to vector<2x32xf32>
    %23 = math.tanh %22 : vector<2x32xf32>
    %24 = vector.extract_strided_slice %9 {offsets = [0, 96], sizes = [2, 32], strides = [1, 1]} : vector<2x128xf32> to vector<2x32xf32>
    %25 = arith.negf %24 : vector<2x32xf32>
    %26 = math.exp %25 : vector<2x32xf32>
    %cst_9 = arith.constant 1.000000e+00 : f32
    %27 = vector.broadcast %cst_9 : f32 to vector<2x32xf32>
    %28 = arith.addf %27, %26 : vector<2x32xf32>
    %29 = arith.divf %27, %28 : vector<2x32xf32>
    %c0_10 = arith.constant 0 : index
    %c0_11 = arith.constant 0 : index
    %30 = vector.load %arg11[%c0_10, %c0_11] : memref<2x32xf32, #tpu.memory_space<vmem>>, vector<2x32xf32>
    %31 = arith.mulf %21, %30 : vector<2x32xf32>
    %32 = arith.mulf %15, %23 : vector<2x32xf32>
    %33 = arith.addf %31, %32 : vector<2x32xf32>
    %c0_12 = arith.constant 0 : index
    %c0_13 = arith.constant 0 : index
    %34 = vector.load %arg11[%c0_12, %c0_13] : memref<2x32xf32, #tpu.memory_space<vmem>>, vector<2x32xf32>
    tpu.vector_store %arg11[%c0_12, %c0_13], %33 {strides = array<i32>} : memref<2x32xf32, #tpu.memory_space<vmem>>, vector<2x32xf32>,
    %c0_14 = arith.constant 0 : index
    %c0_15 = arith.constant 0 : index
    %35 = vector.load %arg11[%c0_14, %c0_15] : memref<2x32xf32, #tpu.memory_space<vmem>>, vector<2x32xf32>
    %36 = math.tanh %35 : vector<2x32xf32>
    %37 = arith.mulf %29, %36 : vector<2x32xf32>
    %c0_16 = arith.constant 0 : index
    %c0_17 = arith.constant 0 : index
    %38 = vector.load %arg10[%c0_16, %c0_17] : memref<2x32xf32, #tpu.memory_space<vmem>>, vector<2x32xf32>
    tpu.vector_store %arg10[%c0_16, %c0_17], %37 {strides = array<i32>} : memref<2x32xf32, #tpu.memory_space<vmem>>, vector<2x32xf32>,
    %c0_18 = arith.constant 0 : index
    %c0_19 = arith.constant 0 : index
    %39 = vector.load %arg10[%c0_18, %c0_19] : memref<2x32xf32, #tpu.memory_space<vmem>>, vector<2x32xf32>
    %c0_20 = arith.constant 0 : index
    %c0_21 = arith.constant 0 : index
    %40 = vector.load %arg12[%c0_20, %c0_21] : memref<2x32xf32, #tpu.memory_space<vmem>>, vector<2x32xf32>
    %41 = tpu.concatenate %39, %40 in 1 : vector<2x32xf32>, vector<2x32xf32> -> vector<2x64xf32>
    %42 = arith.truncf %41 : vector<2x64xf32> to vector<2x64xbf16>
    %c0_22 = arith.constant 0 : index
    %c0_23 = arith.constant 0 : index
    %43 = vector.load %arg8[%c0_22, %c0_23] : memref<64x128xbf16, #tpu.memory_space<vmem>>, vector<64x128xbf16>
    %cst_24 = arith.constant dense<0.000000e+00> : vector<2x128xf32>
    %44 = tpu.matmul %42, %43, %cst_24 {dimension_numbers = #tpu.dot_dimension_numbers<[1], [0], [0], [1], [0, 0, 1, 1], [], []>} : vector<2x64xbf16>, vector<64x128xbf16>, vector<2x128xf32> -> vector<2x128xf32>
    %c0_25 = arith.constant 0 : index
    %c0_26 = arith.constant 0 : index
    %45 = vector.load %arg5[%c0_25, %c0_26] : memref<1x128xf32, #tpu.memory_space<vmem>>, vector<1x128xf32>
    %46 = vector.broadcast %45 : vector<1x128xf32> to vector<2x128xf32>
    %47 = arith.addf %44, %46 : vector<2x128xf32>
    %48 = vector.extract_strided_slice %47 {offsets = [0, 0], sizes = [2, 32], strides = [1, 1]} : vector<2x128xf32> to vector<2x32xf32>
    %49 = arith.negf %48 : vector<2x32xf32>
    %50 = math.exp %49 : vector<2x32xf32>
    %cst_27 = arith.constant 1.000000e+00 : f32
    %51 = vector.broadcast %cst_27 : f32 to vector<2x32xf32>
    %52 = arith.addf %51, %50 : vector<2x32xf32>
    %53 = arith.divf %51, %52 : vector<2x32xf32>
    %54 = vector.extract_strided_slice %47 {offsets = [0, 32], sizes = [2, 32], strides = [1, 1]} : vector<2x128xf32> to vector<2x32xf32>
    %55 = arith.negf %54 : vector<2x32xf32>
    %56 = math.exp %55 : vector<2x32xf32>
    %cst_28 = arith.constant 1.000000e+00 : f32
    %57 = vector.broadcast %cst_28 : f32 to vector<2x32xf32>
    %58 = arith.addf %57, %56 : vector<2x32xf32>
    %59 = arith.divf %57, %58 : vector<2x32xf32>
    %60 = vector.extract_strided_slice %47 {offsets = [0, 64], sizes = [2, 32], strides = [1, 1]} : vector<2x128xf32> to vector<2x32xf32>
    %61 = math.tanh %60 : vector<2x32xf32>
    %62 = vector.extract_strided_slice %47 {offsets = [0, 96], sizes = [2, 32], strides = [1, 1]} : vector<2x128xf32> to vector<2x32xf32>
    %63 = arith.negf %62 : vector<2x32xf32>
    %64 = math.exp %63 : vector<2x32xf32>
    %cst_29 = arith.constant 1.000000e+00 : f32
    %65 = vector.broadcast %cst_29 : f32 to vector<2x32xf32>
    %66 = arith.addf %65, %64 : vector<2x32xf32>
    %67 = arith.divf %65, %66 : vector<2x32xf32>
    %c0_30 = arith.constant 0 : index
    %c0_31 = arith.constant 0 : index
    %68 = vector.load %arg13[%c0_30, %c0_31] : memref<2x32xf32, #tpu.memory_space<vmem>>, vector<2x32xf32>
    %69 = arith.mulf %59, %68 : vector<2x32xf32>
    %70 = arith.mulf %53, %61 : vector<2x32xf32>
    %71 = arith.addf %69, %70 : vector<2x32xf32>
    %c0_32 = arith.constant 0 : index
    %c0_33 = arith.constant 0 : index
    %72 = vector.load %arg13[%c0_32, %c0_33] : memref<2x32xf32, #tpu.memory_space<vmem>>, vector<2x32xf32>
    tpu.vector_store %arg13[%c0_32, %c0_33], %71 {strides = array<i32>} : memref<2x32xf32, #tpu.memory_space<vmem>>, vector<2x32xf32>,
    %c0_34 = arith.constant 0 : index
    %c0_35 = arith.constant 0 : index
    %73 = vector.load %arg13[%c0_34, %c0_35] : memref<2x32xf32, #tpu.memory_space<vmem>>, vector<2x32xf32>
    %74 = math.tanh %73 : vector<2x32xf32>
    %75 = arith.mulf %67, %74 : vector<2x32xf32>
    %c0_36 = arith.constant 0 : index
    %c0_37 = arith.constant 0 : index
    %76 = vector.load %arg12[%c0_36, %c0_37] : memref<2x32xf32, #tpu.memory_space<vmem>>, vector<2x32xf32>
    tpu.vector_store %arg12[%c0_36, %c0_37], %75 {strides = array<i32>} : memref<2x32xf32, #tpu.memory_space<vmem>>, vector<2x32xf32>,
    %c0_38 = arith.constant 0 : index
    %c1 = arith.constant 1 : index
    %c0_39 = arith.constant 0 : index
    %77 = vector.load %arg2[%c0_38, %c1, %c0_39] : memref<2x16x128xf32, #tpu.memory_space<vmem>>, vector<2x1x128xf32>
    %78 = vector.shape_cast %77 : vector<2x1x128xf32> to vector<2x128xf32>
    %c0_40 = arith.constant 0 : index
    %c0_41 = arith.constant 0 : index
    %79 = vector.load %arg10[%c0_40, %c0_41] : memref<2x32xf32, #tpu.memory_space<vmem>>, vector<2x32xf32>
    %80 = arith.truncf %79 : vector<2x32xf32> to vector<2x32xbf16>
    %c0_42 = arith.constant 0 : index
    %c0_43 = arith.constant 0 : index
    %81 = vector.load %arg7[%c0_42, %c0_43] : memref<32x128xbf16, #tpu.memory_space<vmem>>, vector<32x128xbf16>
    %cst_44 = arith.constant dense<0.000000e+00> : vector<2x128xf32>
    %82 = tpu.matmul %80, %81, %cst_44 {dimension_numbers = #tpu.dot_dimension_numbers<[1], [0], [0], [1], [0, 0, 1, 1], [], []>} : vector<2x32xbf16>, vector<32x128xbf16>, vector<2x128xf32> -> vector<2x128xf32>
    %83 = arith.addf %78, %82 : vector<2x128xf32>
    %84 = vector.extract_strided_slice %83 {offsets = [0, 0], sizes = [2, 32], strides = [1, 1]} : vector<2x128xf32> to vector<2x32xf32>
    %85 = arith.negf %84 : vector<2x32xf32>
    %86 = math.exp %85 : vector<2x32xf32>
    %cst_45 = arith.constant 1.000000e+00 : f32
    %87 = vector.broadcast %cst_45 : f32 to vector<2x32xf32>
    %88 = arith.addf %87, %86 : vector<2x32xf32>
    %89 = arith.divf %87, %88 : vector<2x32xf32>
    %90 = vector.extract_strided_slice %83 {offsets = [0, 32], sizes = [2, 32], strides = [1, 1]} : vector<2x128xf32> to vector<2x32xf32>
    %91 = arith.negf %90 : vector<2x32xf32>
    %92 = math.exp %91 : vector<2x32xf32>
    %cst_46 = arith.constant 1.000000e+00 : f32
    %93 = vector.broadcast %cst_46 : f32 to vector<2x32xf32>
    %94 = arith.addf %93, %92 : vector<2x32xf32>
    %95 = arith.divf %93, %94 : vector<2x32xf32>
    %96 = vector.extract_strided_slice %83 {offsets = [0, 64], sizes = [2, 32], strides = [1, 1]} : vector<2x128xf32> to vector<2x32xf32>
    %97 = math.tanh %96 : vector<2x32xf32>
    %98 = vector.extract_strided_slice %83 {offsets = [0, 96], sizes = [2, 32], strides = [1, 1]} : vector<2x128xf32> to vector<2x32xf32>
    %99 = arith.negf %98 : vector<2x32xf32>
    %100 = math.exp %99 : vector<2x32xf32>
    %cst_47 = arith.constant 1.000000e+00 : f32
    %101 = vector.broadcast %cst_47 : f32 to vector<2x32xf32>
    %102 = arith.addf %101, %100 : vector<2x32xf32>
    %103 = arith.divf %101, %102 : vector<2x32xf32>
    %c0_48 = arith.constant 0 : index
    %c0_49 = arith.constant 0 : index
    %104 = vector.load %arg11[%c0_48, %c0_49] : memref<2x32xf32, #tpu.memory_space<vmem>>, vector<2x32xf32>
    %105 = arith.mulf %95, %104 : vector<2x32xf32>
    %106 = arith.mulf %89, %97 : vector<2x32xf32>
    %107 = arith.addf %105, %106 : vector<2x32xf32>
    %c0_50 = arith.constant 0 : index
    %c0_51 = arith.constant 0 : index
    %108 = vector.load %arg11[%c0_50, %c0_51] : memref<2x32xf32, #tpu.memory_space<vmem>>, vector<2x32xf32>
    tpu.vector_store %arg11[%c0_50, %c0_51], %107 {strides = array<i32>} : memref<2x32xf32, #tpu.memory_space<vmem>>, vector<2x32xf32>,
    %c0_52 = arith.constant 0 : index
    %c0_53 = arith.constant 0 : index
    %109 = vector.load %arg11[%c0_52, %c0_53] : memref<2x32xf32, #tpu.memory_space<vmem>>, vector<2x32xf32>
    %110 = math.tanh %109 : vector<2x32xf32>
    %111 = arith.mulf %103, %110 : vector<2x32xf32>
    %c0_54 = arith.constant 0 : index
    %c0_55 = arith.constant 0 : index
    %112 = vector.load %arg10[%c0_54, %c0_55] : memref<2x32xf32, #tpu.memory_space<vmem>>, vector<2x32xf32>
    tpu.vector_store %arg10[%c0_54, %c0_55], %111 {strides = array<i32>} : memref<2x32xf32, #tpu.memory_space<vmem>>, vector<2x32xf32>,
    %c0_56 = arith.constant 0 : index
    %c0_57 = arith.constant 0 : index
    %113 = vector.load %arg10[%c0_56, %c0_57] : memref<2x32xf32, #tpu.memory_space<vmem>>, vector<2x32xf32>
    %c0_58 = arith.constant 0 : index
    %c0_59 = arith.constant 0 : index
    %114 = vector.load %arg12[%c0_58, %c0_59] : memref<2x32xf32, #tpu.memory_space<vmem>>, vector<2x32xf32>
    %115 = tpu.concatenate %113, %114 in 1 : vector<2x32xf32>, vector<2x32xf32> -> vector<2x64xf32>
    %116 = arith.truncf %115 : vector<2x64xf32> to vector<2x64xbf16>
    %c0_60 = arith.constant 0 : index
    %c0_61 = arith.constant 0 : index
    %117 = vector.load %arg8[%c0_60, %c0_61] : memref<64x128xbf16, #tpu.memory_space<vmem>>, vector<64x128xbf16>
    %cst_62 = arith.constant dense<0.000000e+00> : vector<2x128xf32>
    %118 = tpu.matmul %116, %117, %cst_62 {dimension_numbers = #tpu.dot_dimension_numbers<[1], [0], [0], [1], [0, 0, 1, 1], [], []>} : vector<2x64xbf16>, vector<64x128xbf16>, vector<2x128xf32> -> vector<2x128xf32>
    %c0_63 = arith.constant 0 : index
    %c0_64 = arith.constant 0 : index
    %119 = vector.load %arg5[%c0_63, %c0_64] : memref<1x128xf32, #tpu.memory_space<vmem>>, vector<1x128xf32>
    %120 = vector.broadcast %119 : vector<1x128xf32> to vector<2x128xf32>
    %121 = arith.addf %118, %120 : vector<2x128xf32>
    %122 = vector.extract_strided_slice %121 {offsets = [0, 0], sizes = [2, 32], strides = [1, 1]} : vector<2x128xf32> to vector<2x32xf32>
    %123 = arith.negf %122 : vector<2x32xf32>
    %124 = math.exp %123 : vector<2x32xf32>
    %cst_65 = arith.constant 1.000000e+00 : f32
    %125 = vector.broadcast %cst_65 : f32 to vector<2x32xf32>
    %126 = arith.addf %125, %124 : vector<2x32xf32>
    %127 = arith.divf %125, %126 : vector<2x32xf32>
    %128 = vector.extract_strided_slice %121 {offsets = [0, 32], sizes = [2, 32], strides = [1, 1]} : vector<2x128xf32> to vector<2x32xf32>
    %129 = arith.negf %128 : vector<2x32xf32>
    %130 = math.exp %129 : vector<2x32xf32>
    %cst_66 = arith.constant 1.000000e+00 : f32
    %131 = vector.broadcast %cst_66 : f32 to vector<2x32xf32>
    %132 = arith.addf %131, %130 : vector<2x32xf32>
    %133 = arith.divf %131, %132 : vector<2x32xf32>
    %134 = vector.extract_strided_slice %121 {offsets = [0, 64], sizes = [2, 32], strides = [1, 1]} : vector<2x128xf32> to vector<2x32xf32>
    %135 = math.tanh %134 : vector<2x32xf32>
    %136 = vector.extract_strided_slice %121 {offsets = [0, 96], sizes = [2, 32], strides = [1, 1]} : vector<2x128xf32> to vector<2x32xf32>
    %137 = arith.negf %136 : vector<2x32xf32>
    %138 = math.exp %137 : vector<2x32xf32>
    %cst_67 = arith.constant 1.000000e+00 : f32
    %139 = vector.broadcast %cst_67 : f32 to vector<2x32xf32>
    %140 = arith.addf %139, %138 : vector<2x32xf32>
    %141 = arith.divf %139, %140 : vector<2x32xf32>
    %c0_68 = arith.constant 0 : index
    %c0_69 = arith.constant 0 : index
    %142 = vector.load %arg13[%c0_68, %c0_69] : memref<2x32xf32, #tpu.memory_space<vmem>>, vector<2x32xf32>
    %143 = arith.mulf %133, %142 : vector<2x32xf32>
    %144 = arith.mulf %127, %135 : vector<2x32xf32>
    %145 = arith.addf %143, %144 : vector<2x32xf32>
    %c0_70 = arith.constant 0 : index
    %c0_71 = arith.constant 0 : index
    %146 = vector.load %arg13[%c0_70, %c0_71] : memref<2x32xf32, #tpu.memory_space<vmem>>, vector<2x32xf32>
    tpu.vector_store %arg13[%c0_70, %c0_71], %145 {strides = array<i32>} : memref<2x32xf32, #tpu.memory_space<vmem>>, vector<2x32xf32>,
    %c0_72 = arith.constant 0 : index
    %c0_73 = arith.constant 0 : index
    %147 = vector.load %arg13[%c0_72, %c0_73] : memref<2x32xf32, #tpu.memory_space<vmem>>, vector<2x32xf32>
    %148 = math.tanh %147 : vector<2x32xf32>
    %149 = arith.mulf %141, %148 : vector<2x32xf32>
    %c0_74 = arith.constant 0 : index
    %c0_75 = arith.constant 0 : index
    %150 = vector.load %arg12[%c0_74, %c0_75] : memref<2x32xf32, #tpu.memory_space<vmem>>, vector<2x32xf32>
    tpu.vector_store %arg12[%c0_74, %c0_75], %149 {strides = array<i32>} : memref<2x32xf32, #tpu.memory_space<vmem>>, vector<2x32xf32>,
    %c0_76 = arith.constant 0 : index
    %c2 = arith.constant 2 : index
    %c0_77 = arith.constant 0 : index
    %151 = vector.load %arg2[%c0_76, %c2, %c0_77] : memref<2x16x128xf32, #tpu.memory_space<vmem>>, vector<2x1x128xf32>
    %152 = vector.shape_cast %151 : vector<2x1x128xf32> to vector<2x128xf32>
    %c0_78 = arith.constant 0 : index
    %c0_79 = arith.constant 0 : index
    %153 = vector.load %arg10[%c0_78, %c0_79] : memref<2x32xf32, #tpu.memory_space<vmem>>, vector<2x32xf32>
    %154 = arith.truncf %153 : vector<2x32xf32> to vector<2x32xbf16>
    %c0_80 = arith.constant 0 : index
    %c0_81 = arith.constant 0 : index
    %155 = vector.load %arg7[%c0_80, %c0_81] : memref<32x128xbf16, #tpu.memory_space<vmem>>, vector<32x128xbf16>
    %cst_82 = arith.constant dense<0.000000e+00> : vector<2x128xf32>
    %156 = tpu.matmul %154, %155, %cst_82 {dimension_numbers = #tpu.dot_dimension_numbers<[1], [0], [0], [1], [0, 0, 1, 1], [], []>} : vector<2x32xbf16>, vector<32x128xbf16>, vector<2x128xf32> -> vector<2x128xf32>
    %157 = arith.addf %152, %156 : vector<2x128xf32>
    %158 = vector.extract_strided_slice %157 {offsets = [0, 0], sizes = [2, 32], strides = [1, 1]} : vector<2x128xf32> to vector<2x32xf32>
    %159 = arith.negf %158 : vector<2x32xf32>
    %160 = math.exp %159 : vector<2x32xf32>
    %cst_83 = arith.constant 1.000000e+00 : f32
    %161 = vector.broadcast %cst_83 : f32 to vector<2x32xf32>
    %162 = arith.addf %161, %160 : vector<2x32xf32>
    %163 = arith.divf %161, %162 : vector<2x32xf32>
    %164 = vector.extract_strided_slice %157 {offsets = [0, 32], sizes = [2, 32], strides = [1, 1]} : vector<2x128xf32> to vector<2x32xf32>
    %165 = arith.negf %164 : vector<2x32xf32>
    %166 = math.exp %165 : vector<2x32xf32>
    %cst_84 = arith.constant 1.000000e+00 : f32
    %167 = vector.broadcast %cst_84 : f32 to vector<2x32xf32>
    %168 = arith.addf %167, %166 : vector<2x32xf32>
    %169 = arith.divf %167, %168 : vector<2x32xf32>
    %170 = vector.extract_strided_slice %157 {offsets = [0, 64], sizes = [2, 32], strides = [1, 1]} : vector<2x128xf32> to vector<2x32xf32>
    %171 = math.tanh %170 : vector<2x32xf32>
    %172 = vector.extract_strided_slice %157 {offsets = [0, 96], sizes = [2, 32], strides = [1, 1]} : vector<2x128xf32> to vector<2x32xf32>
    %173 = arith.negf %172 : vector<2x32xf32>
    %174 = math.exp %173 : vector<2x32xf32>
    %cst_85 = arith.constant 1.000000e+00 : f32
    %175 = vector.broadcast %cst_85 : f32 to vector<2x32xf32>
    %176 = arith.addf %175, %174 : vector<2x32xf32>
    %177 = arith.divf %175, %176 : vector<2x32xf32>
    %c0_86 = arith.constant 0 : index
    %c0_87 = arith.constant 0 : index
    %178 = vector.load %arg11[%c0_86, %c0_87] : memref<2x32xf32, #tpu.memory_space<vmem>>, vector<2x32xf32>
    %179 = arith.mulf %169, %178 : vector<2x32xf32>
    %180 = arith.mulf %163, %171 : vector<2x32xf32>
    %181 = arith.addf %179, %180 : vector<2x32xf32>
    %c0_88 = arith.constant 0 : index
    %c0_89 = arith.constant 0 : index
    %182 = vector.load %arg11[%c0_88, %c0_89] : memref<2x32xf32, #tpu.memory_space<vmem>>, vector<2x32xf32>
    tpu.vector_store %arg11[%c0_88, %c0_89], %181 {strides = array<i32>} : memref<2x32xf32, #tpu.memory_space<vmem>>, vector<2x32xf32>,
    %c0_90 = arith.constant 0 : index
    %c0_91 = arith.constant 0 : index
    %183 = vector.load %arg11[%c0_90, %c0_91] : memref<2x32xf32, #tpu.memory_space<vmem>>, vector<2x32xf32>
    %184 = math.tanh %183 : vector<2x32xf32>
    %185 = arith.mulf %177, %184 : vector<2x32xf32>
    %c0_92 = arith.constant 0 : index
    %c0_93 = arith.constant 0 : index
    %186 = vector.load %arg10[%c0_92, %c0_93] : memref<2x32xf32, #tpu.memory_space<vmem>>, vector<2x32xf32>
    tpu.vector_store %arg10[%c0_92, %c0_93], %185 {strides = array<i32>} : memref<2x32xf32, #tpu.memory_space<vmem>>, vector<2x32xf32>,
    %c0_94 = arith.constant 0 : index
    %c0_95 = arith.constant 0 : index
    %187 = vector.load %arg10[%c0_94, %c0_95] : memref<2x32xf32, #tpu.memory_space<vmem>>, vector<2x32xf32>
    %c0_96 = arith.constant 0 : index
    %c0_97 = arith.constant 0 : index
    %188 = vector.load %arg12[%c0_96, %c0_97] : memref<2x32xf32, #tpu.memory_space<vmem>>, vector<2x32xf32>
    %189 = tpu.concatenate %187, %188 in 1 : vector<2x32xf32>, vector<2x32xf32> -> vector<2x64xf32>
    %190 = arith.truncf %189 : vector<2x64xf32> to vector<2x64xbf16>
    %c0_98 = arith.constant 0 : index
    %c0_99 = arith.constant 0 : index
    %191 = vector.load %arg8[%c0_98, %c0_99] : memref<64x128xbf16, #tpu.memory_space<vmem>>, vector<64x128xbf16>
    %cst_100 = arith.constant dense<0.000000e+00> : vector<2x128xf32>
    %192 = tpu.matmul %190, %191, %cst_100 {dimension_numbers = #tpu.dot_dimension_numbers<[1], [0], [0], [1], [0, 0, 1, 1], [], []>} : vector<2x64xbf16>, vector<64x128xbf16>, vector<2x128xf32> -> vector<2x128xf32>
    %c0_101 = arith.constant 0 : index
    %c0_102 = arith.constant 0 : index
    %193 = vector.load %arg5[%c0_101, %c0_102] : memref<1x128xf32, #tpu.memory_space<vmem>>, vector<1x128xf32>
    %194 = vector.broadcast %193 : vector<1x128xf32> to vector<2x128xf32>
    %195 = arith.addf %192, %194 : vector<2x128xf32>
    %196 = vector.extract_strided_slice %195 {offsets = [0, 0], sizes = [2, 32], strides = [1, 1]} : vector<2x128xf32> to vector<2x32xf32>
    %197 = arith.negf %196 : vector<2x32xf32>
    %198 = math.exp %197 : vector<2x32xf32>
    %cst_103 = arith.constant 1.000000e+00 : f32
    %199 = vector.broadcast %cst_103 : f32 to vector<2x32xf32>
    %200 = arith.addf %199, %198 : vector<2x32xf32>
    %201 = arith.divf %199, %200 : vector<2x32xf32>
    %202 = vector.extract_strided_slice %195 {offsets = [0, 32], sizes = [2, 32], strides = [1, 1]} : vector<2x128xf32> to vector<2x32xf32>
    %203 = arith.negf %202 : vector<2x32xf32>
    %204 = math.exp %203 : vector<2x32xf32>
    %cst_104 = arith.constant 1.000000e+00 : f32
    %205 = vector.broadcast %cst_104 : f32 to vector<2x32xf32>
    %206 = arith.addf %205, %204 : vector<2x32xf32>
    %207 = arith.divf %205, %206 : vector<2x32xf32>
    %208 = vector.extract_strided_slice %195 {offsets = [0, 64], sizes = [2, 32], strides = [1, 1]} : vector<2x128xf32> to vector<2x32xf32>
    %209 = math.tanh %208 : vector<2x32xf32>
    %210 = vector.extract_strided_slice %195 {offsets = [0, 96], sizes = [2, 32], strides = [1, 1]} : vector<2x128xf32> to vector<2x32xf32>
    %211 = arith.negf %210 : vector<2x32xf32>
    %212 = math.exp %211 : vector<2x32xf32>
    %cst_105 = arith.constant 1.000000e+00 : f32
    %213 = vector.broadcast %cst_105 : f32 to vector<2x32xf32>
    %214 = arith.addf %213, %212 : vector<2x32xf32>
    %215 = arith.divf %213, %214 : vector<2x32xf32>
    %c0_106 = arith.constant 0 : index
    %c0_107 = arith.constant 0 : index
    %216 = vector.load %arg13[%c0_106, %c0_107] : memref<2x32xf32, #tpu.memory_space<vmem>>, vector<2x32xf32>
    %217 = arith.mulf %207, %216 : vector<2x32xf32>
    %218 = arith.mulf %201, %209 : vector<2x32xf32>
    %219 = arith.addf %217, %218 : vector<2x32xf32>
    %c0_108 = arith.constant 0 : index
    %c0_109 = arith.constant 0 : index
    %220 = vector.load %arg13[%c0_108, %c0_109] : memref<2x32xf32, #tpu.memory_space<vmem>>, vector<2x32xf32>
    tpu.vector_store %arg13[%c0_108, %c0_109], %219 {strides = array<i32>} : memref<2x32xf32, #tpu.memory_space<vmem>>, vector<2x32xf32>,
    %c0_110 = arith.constant 0 : index
    %c0_111 = arith.constant 0 : index
    %221 = vector.load %arg13[%c0_110, %c0_111] : memref<2x32xf32, #tpu.memory_space<vmem>>, vector<2x32xf32>
    %222 = math.tanh %221 : vector<2x32xf32>
    %223 = arith.mulf %215, %222 : vector<2x32xf32>
    %c0_112 = arith.constant 0 : index
    %c0_113 = arith.constant 0 : index
    %224 = vector.load %arg12[%c0_112, %c0_113] : memref<2x32xf32, #tpu.memory_space<vmem>>, vector<2x32xf32>
    tpu.vector_store %arg12[%c0_112, %c0_113], %223 {strides = array<i32>} : memref<2x32xf32, #tpu.memory_space<vmem>>, vector<2x32xf32>,
    %c0_114 = arith.constant 0 : index
    %c3 = arith.constant 3 : index
    %c0_115 = arith.constant 0 : index
    %225 = vector.load %arg2[%c0_114, %c3, %c0_115] : memref<2x16x128xf32, #tpu.memory_space<vmem>>, vector<2x1x128xf32>
    %226 = vector.shape_cast %225 : vector<2x1x128xf32> to vector<2x128xf32>
    %c0_116 = arith.constant 0 : index
    %c0_117 = arith.constant 0 : index
    %227 = vector.load %arg10[%c0_116, %c0_117] : memref<2x32xf32, #tpu.memory_space<vmem>>, vector<2x32xf32>
    %228 = arith.truncf %227 : vector<2x32xf32> to vector<2x32xbf16>
    %c0_118 = arith.constant 0 : index
    %c0_119 = arith.constant 0 : index
    %229 = vector.load %arg7[%c0_118, %c0_119] : memref<32x128xbf16, #tpu.memory_space<vmem>>, vector<32x128xbf16>
    %cst_120 = arith.constant dense<0.000000e+00> : vector<2x128xf32>
    %230 = tpu.matmul %228, %229, %cst_120 {dimension_numbers = #tpu.dot_dimension_numbers<[1], [0], [0], [1], [0, 0, 1, 1], [], []>} : vector<2x32xbf16>, vector<32x128xbf16>, vector<2x128xf32> -> vector<2x128xf32>
    %231 = arith.addf %226, %230 : vector<2x128xf32>
    %232 = vector.extract_strided_slice %231 {offsets = [0, 0], sizes = [2, 32], strides = [1, 1]} : vector<2x128xf32> to vector<2x32xf32>
    %233 = arith.negf %232 : vector<2x32xf32>
    %234 = math.exp %233 : vector<2x32xf32>
    %cst_121 = arith.constant 1.000000e+00 : f32
    %235 = vector.broadcast %cst_121 : f32 to vector<2x32xf32>
    %236 = arith.addf %235, %234 : vector<2x32xf32>
    %237 = arith.divf %235, %236 : vector<2x32xf32>
    %238 = vector.extract_strided_slice %231 {offsets = [0, 32], sizes = [2, 32], strides = [1, 1]} : vector<2x128xf32> to vector<2x32xf32>
    %239 = arith.negf %238 : vector<2x32xf32>
    %240 = math.exp %239 : vector<2x32xf32>
    %cst_122 = arith.constant 1.000000e+00 : f32
    %241 = vector.broadcast %cst_122 : f32 to vector<2x32xf32>
    %242 = arith.addf %241, %240 : vector<2x32xf32>
    %243 = arith.divf %241, %242 : vector<2x32xf32>
    %244 = vector.extract_strided_slice %231 {offsets = [0, 64], sizes = [2, 32], strides = [1, 1]} : vector<2x128xf32> to vector<2x32xf32>
    %245 = math.tanh %244 : vector<2x32xf32>
    %246 = vector.extract_strided_slice %231 {offsets = [0, 96], sizes = [2, 32], strides = [1, 1]} : vector<2x128xf32> to vector<2x32xf32>
    %247 = arith.negf %246 : vector<2x32xf32>
    %248 = math.exp %247 : vector<2x32xf32>
    %cst_123 = arith.constant 1.000000e+00 : f32
    %249 = vector.broadcast %cst_123 : f32 to vector<2x32xf32>
    %250 = arith.addf %249, %248 : vector<2x32xf32>
    %251 = arith.divf %249, %250 : vector<2x32xf32>
    %c0_124 = arith.constant 0 : index
    %c0_125 = arith.constant 0 : index
    %252 = vector.load %arg11[%c0_124, %c0_125] : memref<2x32xf32, #tpu.memory_space<vmem>>, vector<2x32xf32>
    %253 = arith.mulf %243, %252 : vector<2x32xf32>
    %254 = arith.mulf %237, %245 : vector<2x32xf32>
    %255 = arith.addf %253, %254 : vector<2x32xf32>
    %c0_126 = arith.constant 0 : index
    %c0_127 = arith.constant 0 : index
    %256 = vector.load %arg11[%c0_126, %c0_127] : memref<2x32xf32, #tpu.memory_space<vmem>>, vector<2x32xf32>
    tpu.vector_store %arg11[%c0_126, %c0_127], %255 {strides = array<i32>} : memref<2x32xf32, #tpu.memory_space<vmem>>, vector<2x32xf32>,
    %c0_128 = arith.constant 0 : index
    %c0_129 = arith.constant 0 : index
    %257 = vector.load %arg11[%c0_128, %c0_129] : memref<2x32xf32, #tpu.memory_space<vmem>>, vector<2x32xf32>
    %258 = math.tanh %257 : vector<2x32xf32>
    %259 = arith.mulf %251, %258 : vector<2x32xf32>
    %c0_130 = arith.constant 0 : index
    %c0_131 = arith.constant 0 : index
    %260 = vector.load %arg10[%c0_130, %c0_131] : memref<2x32xf32, #tpu.memory_space<vmem>>, vector<2x32xf32>
    tpu.vector_store %arg10[%c0_130, %c0_131], %259 {strides = array<i32>} : memref<2x32xf32, #tpu.memory_space<vmem>>, vector<2x32xf32>,
    %c0_132 = arith.constant 0 : index
    %c0_133 = arith.constant 0 : index
    %261 = vector.load %arg10[%c0_132, %c0_133] : memref<2x32xf32, #tpu.memory_space<vmem>>, vector<2x32xf32>
    %c0_134 = arith.constant 0 : index
    %c0_135 = arith.constant 0 : index
    %262 = vector.load %arg12[%c0_134, %c0_135] : memref<2x32xf32, #tpu.memory_space<vmem>>, vector<2x32xf32>
    %263 = tpu.concatenate %261, %262 in 1 : vector<2x32xf32>, vector<2x32xf32> -> vector<2x64xf32>
    %264 = arith.truncf %263 : vector<2x64xf32> to vector<2x64xbf16>
    %c0_136 = arith.constant 0 : index
    %c0_137 = arith.constant 0 : index
    %265 = vector.load %arg8[%c0_136, %c0_137] : memref<64x128xbf16, #tpu.memory_space<vmem>>, vector<64x128xbf16>
    %cst_138 = arith.constant dense<0.000000e+00> : vector<2x128xf32>
    %266 = tpu.matmul %264, %265, %cst_138 {dimension_numbers = #tpu.dot_dimension_numbers<[1], [0], [0], [1], [0, 0, 1, 1], [], []>} : vector<2x64xbf16>, vector<64x128xbf16>, vector<2x128xf32> -> vector<2x128xf32>
    %c0_139 = arith.constant 0 : index
    %c0_140 = arith.constant 0 : index
    %267 = vector.load %arg5[%c0_139, %c0_140] : memref<1x128xf32, #tpu.memory_space<vmem>>, vector<1x128xf32>
    %268 = vector.broadcast %267 : vector<1x128xf32> to vector<2x128xf32>
    %269 = arith.addf %266, %268 : vector<2x128xf32>
    %270 = vector.extract_strided_slice %269 {offsets = [0, 0], sizes = [2, 32], strides = [1, 1]} : vector<2x128xf32> to vector<2x32xf32>
    %271 = arith.negf %270 : vector<2x32xf32>
    %272 = math.exp %271 : vector<2x32xf32>
    %cst_141 = arith.constant 1.000000e+00 : f32
    %273 = vector.broadcast %cst_141 : f32 to vector<2x32xf32>
    %274 = arith.addf %273, %272 : vector<2x32xf32>
    %275 = arith.divf %273, %274 : vector<2x32xf32>
    %276 = vector.extract_strided_slice %269 {offsets = [0, 32], sizes = [2, 32], strides = [1, 1]} : vector<2x128xf32> to vector<2x32xf32>
    %277 = arith.negf %276 : vector<2x32xf32>
    %278 = math.exp %277 : vector<2x32xf32>
    %cst_142 = arith.constant 1.000000e+00 : f32
    %279 = vector.broadcast %cst_142 : f32 to vector<2x32xf32>
    %280 = arith.addf %279, %278 : vector<2x32xf32>
    %281 = arith.divf %279, %280 : vector<2x32xf32>
    %282 = vector.extract_strided_slice %269 {offsets = [0, 64], sizes = [2, 32], strides = [1, 1]} : vector<2x128xf32> to vector<2x32xf32>
    %283 = math.tanh %282 : vector<2x32xf32>
    %284 = vector.extract_strided_slice %269 {offsets = [0, 96], sizes = [2, 32], strides = [1, 1]} : vector<2x128xf32> to vector<2x32xf32>
    %285 = arith.negf %284 : vector<2x32xf32>
    %286 = math.exp %285 : vector<2x32xf32>
    %cst_143 = arith.constant 1.000000e+00 : f32
    %287 = vector.broadcast %cst_143 : f32 to vector<2x32xf32>
    %288 = arith.addf %287, %286 : vector<2x32xf32>
    %289 = arith.divf %287, %288 : vector<2x32xf32>
    %c0_144 = arith.constant 0 : index
    %c0_145 = arith.constant 0 : index
    %290 = vector.load %arg13[%c0_144, %c0_145] : memref<2x32xf32, #tpu.memory_space<vmem>>, vector<2x32xf32>
    %291 = arith.mulf %281, %290 : vector<2x32xf32>
    %292 = arith.mulf %275, %283 : vector<2x32xf32>
    %293 = arith.addf %291, %292 : vector<2x32xf32>
    %c0_146 = arith.constant 0 : index
    %c0_147 = arith.constant 0 : index
    %294 = vector.load %arg13[%c0_146, %c0_147] : memref<2x32xf32, #tpu.memory_space<vmem>>, vector<2x32xf32>
    tpu.vector_store %arg13[%c0_146, %c0_147], %293 {strides = array<i32>} : memref<2x32xf32, #tpu.memory_space<vmem>>, vector<2x32xf32>,
    %c0_148 = arith.constant 0 : index
    %c0_149 = arith.constant 0 : index
    %295 = vector.load %arg13[%c0_148, %c0_149] : memref<2x32xf32, #tpu.memory_space<vmem>>, vector<2x32xf32>
    %296 = math.tanh %295 : vector<2x32xf32>
    %297 = arith.mulf %289, %296 : vector<2x32xf32>
    %c0_150 = arith.constant 0 : index
    %c0_151 = arith.constant 0 : index
    %298 = vector.load %arg12[%c0_150, %c0_151] : memref<2x32xf32, #tpu.memory_space<vmem>>, vector<2x32xf32>
    tpu.vector_store %arg12[%c0_150, %c0_151], %297 {strides = array<i32>} : memref<2x32xf32, #tpu.memory_space<vmem>>, vector<2x32xf32>,
    %c0_152 = arith.constant 0 : index
    %c4 = arith.constant 4 : index
    %c0_153 = arith.constant 0 : index
    %299 = vector.load %arg2[%c0_152, %c4, %c0_153] : memref<2x16x128xf32, #tpu.memory_space<vmem>>, vector<2x1x128xf32>
    %300 = vector.shape_cast %299 : vector<2x1x128xf32> to vector<2x128xf32>
    %c0_154 = arith.constant 0 : index
    %c0_155 = arith.constant 0 : index
    %301 = vector.load %arg10[%c0_154, %c0_155] : memref<2x32xf32, #tpu.memory_space<vmem>>, vector<2x32xf32>
    %302 = arith.truncf %301 : vector<2x32xf32> to vector<2x32xbf16>
    %c0_156 = arith.constant 0 : index
    %c0_157 = arith.constant 0 : index
    %303 = vector.load %arg7[%c0_156, %c0_157] : memref<32x128xbf16, #tpu.memory_space<vmem>>, vector<32x128xbf16>
    %cst_158 = arith.constant dense<0.000000e+00> : vector<2x128xf32>
    %304 = tpu.matmul %302, %303, %cst_158 {dimension_numbers = #tpu.dot_dimension_numbers<[1], [0], [0], [1], [0, 0, 1, 1], [], []>} : vector<2x32xbf16>, vector<32x128xbf16>, vector<2x128xf32> -> vector<2x128xf32>
    %305 = arith.addf %300, %304 : vector<2x128xf32>
    %306 = vector.extract_strided_slice %305 {offsets = [0, 0], sizes = [2, 32], strides = [1, 1]} : vector<2x128xf32> to vector<2x32xf32>
    %307 = arith.negf %306 : vector<2x32xf32>
    %308 = math.exp %307 : vector<2x32xf32>
    %cst_159 = arith.constant 1.000000e+00 : f32
    %309 = vector.broadcast %cst_159 : f32 to vector<2x32xf32>
    %310 = arith.addf %309, %308 : vector<2x32xf32>
    %311 = arith.divf %309, %310 : vector<2x32xf32>
    %312 = vector.extract_strided_slice %305 {offsets = [0, 32], sizes = [2, 32], strides = [1, 1]} : vector<2x128xf32> to vector<2x32xf32>
    %313 = arith.negf %312 : vector<2x32xf32>
    %314 = math.exp %313 : vector<2x32xf32>
    %cst_160 = arith.constant 1.000000e+00 : f32
    %315 = vector.broadcast %cst_160 : f32 to vector<2x32xf32>
    %316 = arith.addf %315, %314 : vector<2x32xf32>
    %317 = arith.divf %315, %316 : vector<2x32xf32>
    %318 = vector.extract_strided_slice %305 {offsets = [0, 64], sizes = [2, 32], strides = [1, 1]} : vector<2x128xf32> to vector<2x32xf32>
    %319 = math.tanh %318 : vector<2x32xf32>
    %320 = vector.extract_strided_slice %305 {offsets = [0, 96], sizes = [2, 32], strides = [1, 1]} : vector<2x128xf32> to vector<2x32xf32>
    %321 = arith.negf %320 : vector<2x32xf32>
    %322 = math.exp %321 : vector<2x32xf32>
    %cst_161 = arith.constant 1.000000e+00 : f32
    %323 = vector.broadcast %cst_161 : f32 to vector<2x32xf32>
    %324 = arith.addf %323, %322 : vector<2x32xf32>
    %325 = arith.divf %323, %324 : vector<2x32xf32>
    %c0_162 = arith.constant 0 : index
    %c0_163 = arith.constant 0 : index
    %326 = vector.load %arg11[%c0_162, %c0_163] : memref<2x32xf32, #tpu.memory_space<vmem>>, vector<2x32xf32>
    %327 = arith.mulf %317, %326 : vector<2x32xf32>
    %328 = arith.mulf %311, %319 : vector<2x32xf32>
    %329 = arith.addf %327, %328 : vector<2x32xf32>
    %c0_164 = arith.constant 0 : index
    %c0_165 = arith.constant 0 : index
    %330 = vector.load %arg11[%c0_164, %c0_165] : memref<2x32xf32, #tpu.memory_space<vmem>>, vector<2x32xf32>
    tpu.vector_store %arg11[%c0_164, %c0_165], %329 {strides = array<i32>} : memref<2x32xf32, #tpu.memory_space<vmem>>, vector<2x32xf32>,
    %c0_166 = arith.constant 0 : index
    %c0_167 = arith.constant 0 : index
    %331 = vector.load %arg11[%c0_166, %c0_167] : memref<2x32xf32, #tpu.memory_space<vmem>>, vector<2x32xf32>
    %332 = math.tanh %331 : vector<2x32xf32>
    %333 = arith.mulf %325, %332 : vector<2x32xf32>
    %c0_168 = arith.constant 0 : index
    %c0_169 = arith.constant 0 : index
    %334 = vector.load %arg10[%c0_168, %c0_169] : memref<2x32xf32, #tpu.memory_space<vmem>>, vector<2x32xf32>
    tpu.vector_store %arg10[%c0_168, %c0_169], %333 {strides = array<i32>} : memref<2x32xf32, #tpu.memory_space<vmem>>, vector<2x32xf32>,
    %c0_170 = arith.constant 0 : index
    %c0_171 = arith.constant 0 : index
    %335 = vector.load %arg10[%c0_170, %c0_171] : memref<2x32xf32, #tpu.memory_space<vmem>>, vector<2x32xf32>
    %c0_172 = arith.constant 0 : index
    %c0_173 = arith.constant 0 : index
    %336 = vector.load %arg12[%c0_172, %c0_173] : memref<2x32xf32, #tpu.memory_space<vmem>>, vector<2x32xf32>
    %337 = tpu.concatenate %335, %336 in 1 : vector<2x32xf32>, vector<2x32xf32> -> vector<2x64xf32>
    %338 = arith.truncf %337 : vector<2x64xf32> to vector<2x64xbf16>
    %c0_174 = arith.constant 0 : index
    %c0_175 = arith.constant 0 : index
    %339 = vector.load %arg8[%c0_174, %c0_175] : memref<64x128xbf16, #tpu.memory_space<vmem>>, vector<64x128xbf16>
    %cst_176 = arith.constant dense<0.000000e+00> : vector<2x128xf32>
    %340 = tpu.matmul %338, %339, %cst_176 {dimension_numbers = #tpu.dot_dimension_numbers<[1], [0], [0], [1], [0, 0, 1, 1], [], []>} : vector<2x64xbf16>, vector<64x128xbf16>, vector<2x128xf32> -> vector<2x128xf32>
    %c0_177 = arith.constant 0 : index
    %c0_178 = arith.constant 0 : index
    %341 = vector.load %arg5[%c0_177, %c0_178] : memref<1x128xf32, #tpu.memory_space<vmem>>, vector<1x128xf32>
    %342 = vector.broadcast %341 : vector<1x128xf32> to vector<2x128xf32>
    %343 = arith.addf %340, %342 : vector<2x128xf32>
    %344 = vector.extract_strided_slice %343 {offsets = [0, 0], sizes = [2, 32], strides = [1, 1]} : vector<2x128xf32> to vector<2x32xf32>
    %345 = arith.negf %344 : vector<2x32xf32>
    %346 = math.exp %345 : vector<2x32xf32>
    %cst_179 = arith.constant 1.000000e+00 : f32
    %347 = vector.broadcast %cst_179 : f32 to vector<2x32xf32>
    %348 = arith.addf %347, %346 : vector<2x32xf32>
    %349 = arith.divf %347, %348 : vector<2x32xf32>
    %350 = vector.extract_strided_slice %343 {offsets = [0, 32], sizes = [2, 32], strides = [1, 1]} : vector<2x128xf32> to vector<2x32xf32>
    %351 = arith.negf %350 : vector<2x32xf32>
    %352 = math.exp %351 : vector<2x32xf32>
    %cst_180 = arith.constant 1.000000e+00 : f32
    %353 = vector.broadcast %cst_180 : f32 to vector<2x32xf32>
    %354 = arith.addf %353, %352 : vector<2x32xf32>
    %355 = arith.divf %353, %354 : vector<2x32xf32>
    %356 = vector.extract_strided_slice %343 {offsets = [0, 64], sizes = [2, 32], strides = [1, 1]} : vector<2x128xf32> to vector<2x32xf32>
    %357 = math.tanh %356 : vector<2x32xf32>
    %358 = vector.extract_strided_slice %343 {offsets = [0, 96], sizes = [2, 32], strides = [1, 1]} : vector<2x128xf32> to vector<2x32xf32>
    %359 = arith.negf %358 : vector<2x32xf32>
    %360 = math.exp %359 : vector<2x32xf32>
    %cst_181 = arith.constant 1.000000e+00 : f32
    %361 = vector.broadcast %cst_181 : f32 to vector<2x32xf32>
    %362 = arith.addf %361, %360 : vector<2x32xf32>
    %363 = arith.divf %361, %362 : vector<2x32xf32>
    %c0_182 = arith.constant 0 : index
    %c0_183 = arith.constant 0 : index
    %364 = vector.load %arg13[%c0_182, %c0_183] : memref<2x32xf32, #tpu.memory_space<vmem>>, vector<2x32xf32>
    %365 = arith.mulf %355, %364 : vector<2x32xf32>
    %366 = arith.mulf %349, %357 : vector<2x32xf32>
    %367 = arith.addf %365, %366 : vector<2x32xf32>
    %c0_184 = arith.constant 0 : index
    %c0_185 = arith.constant 0 : index
    %368 = vector.load %arg13[%c0_184, %c0_185] : memref<2x32xf32, #tpu.memory_space<vmem>>, vector<2x32xf32>
    tpu.vector_store %arg13[%c0_184, %c0_185], %367 {strides = array<i32>} : memref<2x32xf32, #tpu.memory_space<vmem>>, vector<2x32xf32>,
    %c0_186 = arith.constant 0 : index
    %c0_187 = arith.constant 0 : index
    %369 = vector.load %arg13[%c0_186, %c0_187] : memref<2x32xf32, #tpu.memory_space<vmem>>, vector<2x32xf32>
    %370 = math.tanh %369 : vector<2x32xf32>
    %371 = arith.mulf %363, %370 : vector<2x32xf32>
    %c0_188 = arith.constant 0 : index
    %c0_189 = arith.constant 0 : index
    %372 = vector.load %arg12[%c0_188, %c0_189] : memref<2x32xf32, #tpu.memory_space<vmem>>, vector<2x32xf32>
    tpu.vector_store %arg12[%c0_188, %c0_189], %371 {strides = array<i32>} : memref<2x32xf32, #tpu.memory_space<vmem>>, vector<2x32xf32>,
    %c0_190 = arith.constant 0 : index
    %c5 = arith.constant 5 : index
    %c0_191 = arith.constant 0 : index
    %373 = vector.load %arg2[%c0_190, %c5, %c0_191] : memref<2x16x128xf32, #tpu.memory_space<vmem>>, vector<2x1x128xf32>
    %374 = vector.shape_cast %373 : vector<2x1x128xf32> to vector<2x128xf32>
    %c0_192 = arith.constant 0 : index
    %c0_193 = arith.constant 0 : index
    %375 = vector.load %arg10[%c0_192, %c0_193] : memref<2x32xf32, #tpu.memory_space<vmem>>, vector<2x32xf32>
    %376 = arith.truncf %375 : vector<2x32xf32> to vector<2x32xbf16>
    %c0_194 = arith.constant 0 : index
    %c0_195 = arith.constant 0 : index
    %377 = vector.load %arg7[%c0_194, %c0_195] : memref<32x128xbf16, #tpu.memory_space<vmem>>, vector<32x128xbf16>
    %cst_196 = arith.constant dense<0.000000e+00> : vector<2x128xf32>
    %378 = tpu.matmul %376, %377, %cst_196 {dimension_numbers = #tpu.dot_dimension_numbers<[1], [0], [0], [1], [0, 0, 1, 1], [], []>} : vector<2x32xbf16>, vector<32x128xbf16>, vector<2x128xf32> -> vector<2x128xf32>
    %379 = arith.addf %374, %378 : vector<2x128xf32>
    %380 = vector.extract_strided_slice %379 {offsets = [0, 0], sizes = [2, 32], strides = [1, 1]} : vector<2x128xf32> to vector<2x32xf32>
    %381 = arith.negf %380 : vector<2x32xf32>
    %382 = math.exp %381 : vector<2x32xf32>
    %cst_197 = arith.constant 1.000000e+00 : f32
    %383 = vector.broadcast %cst_197 : f32 to vector<2x32xf32>
    %384 = arith.addf %383, %382 : vector<2x32xf32>
    %385 = arith.divf %383, %384 : vector<2x32xf32>
    %386 = vector.extract_strided_slice %379 {offsets = [0, 32], sizes = [2, 32], strides = [1, 1]} : vector<2x128xf32> to vector<2x32xf32>
    %387 = arith.negf %386 : vector<2x32xf32>
    %388 = math.exp %387 : vector<2x32xf32>
    %cst_198 = arith.constant 1.000000e+00 : f32
    %389 = vector.broadcast %cst_198 : f32 to vector<2x32xf32>
    %390 = arith.addf %389, %388 : vector<2x32xf32>
    %391 = arith.divf %389, %390 : vector<2x32xf32>
    %392 = vector.extract_strided_slice %379 {offsets = [0, 64], sizes = [2, 32], strides = [1, 1]} : vector<2x128xf32> to vector<2x32xf32>
    %393 = math.tanh %392 : vector<2x32xf32>
    %394 = vector.extract_strided_slice %379 {offsets = [0, 96], sizes = [2, 32], strides = [1, 1]} : vector<2x128xf32> to vector<2x32xf32>
    %395 = arith.negf %394 : vector<2x32xf32>
    %396 = math.exp %395 : vector<2x32xf32>
    %cst_199 = arith.constant 1.000000e+00 : f32
    %397 = vector.broadcast %cst_199 : f32 to vector<2x32xf32>
    %398 = arith.addf %397, %396 : vector<2x32xf32>
    %399 = arith.divf %397, %398 : vector<2x32xf32>
    %c0_200 = arith.constant 0 : index
    %c0_201 = arith.constant 0 : index
    %400 = vector.load %arg11[%c0_200, %c0_201] : memref<2x32xf32, #tpu.memory_space<vmem>>, vector<2x32xf32>
    %401 = arith.mulf %391, %400 : vector<2x32xf32>
    %402 = arith.mulf %385, %393 : vector<2x32xf32>
    %403 = arith.addf %401, %402 : vector<2x32xf32>
    %c0_202 = arith.constant 0 : index
    %c0_203 = arith.constant 0 : index
    %404 = vector.load %arg11[%c0_202, %c0_203] : memref<2x32xf32, #tpu.memory_space<vmem>>, vector<2x32xf32>
    tpu.vector_store %arg11[%c0_202, %c0_203], %403 {strides = array<i32>} : memref<2x32xf32, #tpu.memory_space<vmem>>, vector<2x32xf32>,
    %c0_204 = arith.constant 0 : index
    %c0_205 = arith.constant 0 : index
    %405 = vector.load %arg11[%c0_204, %c0_205] : memref<2x32xf32, #tpu.memory_space<vmem>>, vector<2x32xf32>
    %406 = math.tanh %405 : vector<2x32xf32>
    %407 = arith.mulf %399, %406 : vector<2x32xf32>
    %c0_206 = arith.constant 0 : index
    %c0_207 = arith.constant 0 : index
    %408 = vector.load %arg10[%c0_206, %c0_207] : memref<2x32xf32, #tpu.memory_space<vmem>>, vector<2x32xf32>
    tpu.vector_store %arg10[%c0_206, %c0_207], %407 {strides = array<i32>} : memref<2x32xf32, #tpu.memory_space<vmem>>, vector<2x32xf32>,
    %c0_208 = arith.constant 0 : index
    %c0_209 = arith.constant 0 : index
    %409 = vector.load %arg10[%c0_208, %c0_209] : memref<2x32xf32, #tpu.memory_space<vmem>>, vector<2x32xf32>
    %c0_210 = arith.constant 0 : index
    %c0_211 = arith.constant 0 : index
    %410 = vector.load %arg12[%c0_210, %c0_211] : memref<2x32xf32, #tpu.memory_space<vmem>>, vector<2x32xf32>
    %411 = tpu.concatenate %409, %410 in 1 : vector<2x32xf32>, vector<2x32xf32> -> vector<2x64xf32>
    %412 = arith.truncf %411 : vector<2x64xf32> to vector<2x64xbf16>
    %c0_212 = arith.constant 0 : index
    %c0_213 = arith.constant 0 : index
    %413 = vector.load %arg8[%c0_212, %c0_213] : memref<64x128xbf16, #tpu.memory_space<vmem>>, vector<64x128xbf16>
    %cst_214 = arith.constant dense<0.000000e+00> : vector<2x128xf32>
    %414 = tpu.matmul %412, %413, %cst_214 {dimension_numbers = #tpu.dot_dimension_numbers<[1], [0], [0], [1], [0, 0, 1, 1], [], []>} : vector<2x64xbf16>, vector<64x128xbf16>, vector<2x128xf32> -> vector<2x128xf32>
    %c0_215 = arith.constant 0 : index
    %c0_216 = arith.constant 0 : index
    %415 = vector.load %arg5[%c0_215, %c0_216] : memref<1x128xf32, #tpu.memory_space<vmem>>, vector<1x128xf32>
    %416 = vector.broadcast %415 : vector<1x128xf32> to vector<2x128xf32>
    %417 = arith.addf %414, %416 : vector<2x128xf32>
    %418 = vector.extract_strided_slice %417 {offsets = [0, 0], sizes = [2, 32], strides = [1, 1]} : vector<2x128xf32> to vector<2x32xf32>
    %419 = arith.negf %418 : vector<2x32xf32>
    %420 = math.exp %419 : vector<2x32xf32>
    %cst_217 = arith.constant 1.000000e+00 : f32
    %421 = vector.broadcast %cst_217 : f32 to vector<2x32xf32>
    %422 = arith.addf %421, %420 : vector<2x32xf32>
    %423 = arith.divf %421, %422 : vector<2x32xf32>
    %424 = vector.extract_strided_slice %417 {offsets = [0, 32], sizes = [2, 32], strides = [1, 1]} : vector<2x128xf32> to vector<2x32xf32>
    %425 = arith.negf %424 : vector<2x32xf32>
    %426 = math.exp %425 : vector<2x32xf32>
    %cst_218 = arith.constant 1.000000e+00 : f32
    %427 = vector.broadcast %cst_218 : f32 to vector<2x32xf32>
    %428 = arith.addf %427, %426 : vector<2x32xf32>
    %429 = arith.divf %427, %428 : vector<2x32xf32>
    %430 = vector.extract_strided_slice %417 {offsets = [0, 64], sizes = [2, 32], strides = [1, 1]} : vector<2x128xf32> to vector<2x32xf32>
    %431 = math.tanh %430 : vector<2x32xf32>
    %432 = vector.extract_strided_slice %417 {offsets = [0, 96], sizes = [2, 32], strides = [1, 1]} : vector<2x128xf32> to vector<2x32xf32>
    %433 = arith.negf %432 : vector<2x32xf32>
    %434 = math.exp %433 : vector<2x32xf32>
    %cst_219 = arith.constant 1.000000e+00 : f32
    %435 = vector.broadcast %cst_219 : f32 to vector<2x32xf32>
    %436 = arith.addf %435, %434 : vector<2x32xf32>
    %437 = arith.divf %435, %436 : vector<2x32xf32>
    %c0_220 = arith.constant 0 : index
    %c0_221 = arith.constant 0 : index
    %438 = vector.load %arg13[%c0_220, %c0_221] : memref<2x32xf32, #tpu.memory_space<vmem>>, vector<2x32xf32>
    %439 = arith.mulf %429, %438 : vector<2x32xf32>
    %440 = arith.mulf %423, %431 : vector<2x32xf32>
    %441 = arith.addf %439, %440 : vector<2x32xf32>
    %c0_222 = arith.constant 0 : index
    %c0_223 = arith.constant 0 : index
    %442 = vector.load %arg13[%c0_222, %c0_223] : memref<2x32xf32, #tpu.memory_space<vmem>>, vector<2x32xf32>
    tpu.vector_store %arg13[%c0_222, %c0_223], %441 {strides = array<i32>} : memref<2x32xf32, #tpu.memory_space<vmem>>, vector<2x32xf32>,
    %c0_224 = arith.constant 0 : index
    %c0_225 = arith.constant 0 : index
    %443 = vector.load %arg13[%c0_224, %c0_225] : memref<2x32xf32, #tpu.memory_space<vmem>>, vector<2x32xf32>
    %444 = math.tanh %443 : vector<2x32xf32>
    %445 = arith.mulf %437, %444 : vector<2x32xf32>
    %c0_226 = arith.constant 0 : index
    %c0_227 = arith.constant 0 : index
    %446 = vector.load %arg12[%c0_226, %c0_227] : memref<2x32xf32, #tpu.memory_space<vmem>>, vector<2x32xf32>
    tpu.vector_store %arg12[%c0_226, %c0_227], %445 {strides = array<i32>} : memref<2x32xf32, #tpu.memory_space<vmem>>, vector<2x32xf32>,
    %c0_228 = arith.constant 0 : index
    %c6 = arith.constant 6 : index
    %c0_229 = arith.constant 0 : index
    %447 = vector.load %arg2[%c0_228, %c6, %c0_229] : memref<2x16x128xf32, #tpu.memory_space<vmem>>, vector<2x1x128xf32>
    %448 = vector.shape_cast %447 : vector<2x1x128xf32> to vector<2x128xf32>
    %c0_230 = arith.constant 0 : index
    %c0_231 = arith.constant 0 : index
    %449 = vector.load %arg10[%c0_230, %c0_231] : memref<2x32xf32, #tpu.memory_space<vmem>>, vector<2x32xf32>
    %450 = arith.truncf %449 : vector<2x32xf32> to vector<2x32xbf16>
    %c0_232 = arith.constant 0 : index
    %c0_233 = arith.constant 0 : index
    %451 = vector.load %arg7[%c0_232, %c0_233] : memref<32x128xbf16, #tpu.memory_space<vmem>>, vector<32x128xbf16>
    %cst_234 = arith.constant dense<0.000000e+00> : vector<2x128xf32>
    %452 = tpu.matmul %450, %451, %cst_234 {dimension_numbers = #tpu.dot_dimension_numbers<[1], [0], [0], [1], [0, 0, 1, 1], [], []>} : vector<2x32xbf16>, vector<32x128xbf16>, vector<2x128xf32> -> vector<2x128xf32>
    %453 = arith.addf %448, %452 : vector<2x128xf32>
    %454 = vector.extract_strided_slice %453 {offsets = [0, 0], sizes = [2, 32], strides = [1, 1]} : vector<2x128xf32> to vector<2x32xf32>
    %455 = arith.negf %454 : vector<2x32xf32>
    %456 = math.exp %455 : vector<2x32xf32>
    %cst_235 = arith.constant 1.000000e+00 : f32
    %457 = vector.broadcast %cst_235 : f32 to vector<2x32xf32>
    %458 = arith.addf %457, %456 : vector<2x32xf32>
    %459 = arith.divf %457, %458 : vector<2x32xf32>
    %460 = vector.extract_strided_slice %453 {offsets = [0, 32], sizes = [2, 32], strides = [1, 1]} : vector<2x128xf32> to vector<2x32xf32>
    %461 = arith.negf %460 : vector<2x32xf32>
    %462 = math.exp %461 : vector<2x32xf32>
    %cst_236 = arith.constant 1.000000e+00 : f32
    %463 = vector.broadcast %cst_236 : f32 to vector<2x32xf32>
    %464 = arith.addf %463, %462 : vector<2x32xf32>
    %465 = arith.divf %463, %464 : vector<2x32xf32>
    %466 = vector.extract_strided_slice %453 {offsets = [0, 64], sizes = [2, 32], strides = [1, 1]} : vector<2x128xf32> to vector<2x32xf32>
    %467 = math.tanh %466 : vector<2x32xf32>
    %468 = vector.extract_strided_slice %453 {offsets = [0, 96], sizes = [2, 32], strides = [1, 1]} : vector<2x128xf32> to vector<2x32xf32>
    %469 = arith.negf %468 : vector<2x32xf32>
    %470 = math.exp %469 : vector<2x32xf32>
    %cst_237 = arith.constant 1.000000e+00 : f32
    %471 = vector.broadcast %cst_237 : f32 to vector<2x32xf32>
    %472 = arith.addf %471, %470 : vector<2x32xf32>
    %473 = arith.divf %471, %472 : vector<2x32xf32>
    %c0_238 = arith.constant 0 : index
    %c0_239 = arith.constant 0 : index
    %474 = vector.load %arg11[%c0_238, %c0_239] : memref<2x32xf32, #tpu.memory_space<vmem>>, vector<2x32xf32>
    %475 = arith.mulf %465, %474 : vector<2x32xf32>
    %476 = arith.mulf %459, %467 : vector<2x32xf32>
    %477 = arith.addf %475, %476 : vector<2x32xf32>
    %c0_240 = arith.constant 0 : index
    %c0_241 = arith.constant 0 : index
    %478 = vector.load %arg11[%c0_240, %c0_241] : memref<2x32xf32, #tpu.memory_space<vmem>>, vector<2x32xf32>
    tpu.vector_store %arg11[%c0_240, %c0_241], %477 {strides = array<i32>} : memref<2x32xf32, #tpu.memory_space<vmem>>, vector<2x32xf32>,
    %c0_242 = arith.constant 0 : index
    %c0_243 = arith.constant 0 : index
    %479 = vector.load %arg11[%c0_242, %c0_243] : memref<2x32xf32, #tpu.memory_space<vmem>>, vector<2x32xf32>
    %480 = math.tanh %479 : vector<2x32xf32>
    %481 = arith.mulf %473, %480 : vector<2x32xf32>
    %c0_244 = arith.constant 0 : index
    %c0_245 = arith.constant 0 : index
    %482 = vector.load %arg10[%c0_244, %c0_245] : memref<2x32xf32, #tpu.memory_space<vmem>>, vector<2x32xf32>
    tpu.vector_store %arg10[%c0_244, %c0_245], %481 {strides = array<i32>} : memref<2x32xf32, #tpu.memory_space<vmem>>, vector<2x32xf32>,
    %c0_246 = arith.constant 0 : index
    %c0_247 = arith.constant 0 : index
    %483 = vector.load %arg10[%c0_246, %c0_247] : memref<2x32xf32, #tpu.memory_space<vmem>>, vector<2x32xf32>
    %c0_248 = arith.constant 0 : index
    %c0_249 = arith.constant 0 : index
    %484 = vector.load %arg12[%c0_248, %c0_249] : memref<2x32xf32, #tpu.memory_space<vmem>>, vector<2x32xf32>
    %485 = tpu.concatenate %483, %484 in 1 : vector<2x32xf32>, vector<2x32xf32> -> vector<2x64xf32>
    %486 = arith.truncf %485 : vector<2x64xf32> to vector<2x64xbf16>
    %c0_250 = arith.constant 0 : index
    %c0_251 = arith.constant 0 : index
    %487 = vector.load %arg8[%c0_250, %c0_251] : memref<64x128xbf16, #tpu.memory_space<vmem>>, vector<64x128xbf16>
    %cst_252 = arith.constant dense<0.000000e+00> : vector<2x128xf32>
    %488 = tpu.matmul %486, %487, %cst_252 {dimension_numbers = #tpu.dot_dimension_numbers<[1], [0], [0], [1], [0, 0, 1, 1], [], []>} : vector<2x64xbf16>, vector<64x128xbf16>, vector<2x128xf32> -> vector<2x128xf32>
    %c0_253 = arith.constant 0 : index
    %c0_254 = arith.constant 0 : index
    %489 = vector.load %arg5[%c0_253, %c0_254] : memref<1x128xf32, #tpu.memory_space<vmem>>, vector<1x128xf32>
    %490 = vector.broadcast %489 : vector<1x128xf32> to vector<2x128xf32>
    %491 = arith.addf %488, %490 : vector<2x128xf32>
    %492 = vector.extract_strided_slice %491 {offsets = [0, 0], sizes = [2, 32], strides = [1, 1]} : vector<2x128xf32> to vector<2x32xf32>
    %493 = arith.negf %492 : vector<2x32xf32>
    %494 = math.exp %493 : vector<2x32xf32>
    %cst_255 = arith.constant 1.000000e+00 : f32
    %495 = vector.broadcast %cst_255 : f32 to vector<2x32xf32>
    %496 = arith.addf %495, %494 : vector<2x32xf32>
    %497 = arith.divf %495, %496 : vector<2x32xf32>
    %498 = vector.extract_strided_slice %491 {offsets = [0, 32], sizes = [2, 32], strides = [1, 1]} : vector<2x128xf32> to vector<2x32xf32>
    %499 = arith.negf %498 : vector<2x32xf32>
    %500 = math.exp %499 : vector<2x32xf32>
    %cst_256 = arith.constant 1.000000e+00 : f32
    %501 = vector.broadcast %cst_256 : f32 to vector<2x32xf32>
    %502 = arith.addf %501, %500 : vector<2x32xf32>
    %503 = arith.divf %501, %502 : vector<2x32xf32>
    %504 = vector.extract_strided_slice %491 {offsets = [0, 64], sizes = [2, 32], strides = [1, 1]} : vector<2x128xf32> to vector<2x32xf32>
    %505 = math.tanh %504 : vector<2x32xf32>
    %506 = vector.extract_strided_slice %491 {offsets = [0, 96], sizes = [2, 32], strides = [1, 1]} : vector<2x128xf32> to vector<2x32xf32>
    %507 = arith.negf %506 : vector<2x32xf32>
    %508 = math.exp %507 : vector<2x32xf32>
    %cst_257 = arith.constant 1.000000e+00 : f32
    %509 = vector.broadcast %cst_257 : f32 to vector<2x32xf32>
    %510 = arith.addf %509, %508 : vector<2x32xf32>
    %511 = arith.divf %509, %510 : vector<2x32xf32>
    %c0_258 = arith.constant 0 : index
    %c0_259 = arith.constant 0 : index
    %512 = vector.load %arg13[%c0_258, %c0_259] : memref<2x32xf32, #tpu.memory_space<vmem>>, vector<2x32xf32>
    %513 = arith.mulf %503, %512 : vector<2x32xf32>
    %514 = arith.mulf %497, %505 : vector<2x32xf32>
    %515 = arith.addf %513, %514 : vector<2x32xf32>
    %c0_260 = arith.constant 0 : index
    %c0_261 = arith.constant 0 : index
    %516 = vector.load %arg13[%c0_260, %c0_261] : memref<2x32xf32, #tpu.memory_space<vmem>>, vector<2x32xf32>
    tpu.vector_store %arg13[%c0_260, %c0_261], %515 {strides = array<i32>} : memref<2x32xf32, #tpu.memory_space<vmem>>, vector<2x32xf32>,
    %c0_262 = arith.constant 0 : index
    %c0_263 = arith.constant 0 : index
    %517 = vector.load %arg13[%c0_262, %c0_263] : memref<2x32xf32, #tpu.memory_space<vmem>>, vector<2x32xf32>
    %518 = math.tanh %517 : vector<2x32xf32>
    %519 = arith.mulf %511, %518 : vector<2x32xf32>
    %c0_264 = arith.constant 0 : index
    %c0_265 = arith.constant 0 : index
    %520 = vector.load %arg12[%c0_264, %c0_265] : memref<2x32xf32, #tpu.memory_space<vmem>>, vector<2x32xf32>
    tpu.vector_store %arg12[%c0_264, %c0_265], %519 {strides = array<i32>} : memref<2x32xf32, #tpu.memory_space<vmem>>, vector<2x32xf32>,
    %c0_266 = arith.constant 0 : index
    %c7 = arith.constant 7 : index
    %c0_267 = arith.constant 0 : index
    %521 = vector.load %arg2[%c0_266, %c7, %c0_267] : memref<2x16x128xf32, #tpu.memory_space<vmem>>, vector<2x1x128xf32>
    %522 = vector.shape_cast %521 : vector<2x1x128xf32> to vector<2x128xf32>
    %c0_268 = arith.constant 0 : index
    %c0_269 = arith.constant 0 : index
    %523 = vector.load %arg10[%c0_268, %c0_269] : memref<2x32xf32, #tpu.memory_space<vmem>>, vector<2x32xf32>
    %524 = arith.truncf %523 : vector<2x32xf32> to vector<2x32xbf16>
    %c0_270 = arith.constant 0 : index
    %c0_271 = arith.constant 0 : index
    %525 = vector.load %arg7[%c0_270, %c0_271] : memref<32x128xbf16, #tpu.memory_space<vmem>>, vector<32x128xbf16>
    %cst_272 = arith.constant dense<0.000000e+00> : vector<2x128xf32>
    %526 = tpu.matmul %524, %525, %cst_272 {dimension_numbers = #tpu.dot_dimension_numbers<[1], [0], [0], [1], [0, 0, 1, 1], [], []>} : vector<2x32xbf16>, vector<32x128xbf16>, vector<2x128xf32> -> vector<2x128xf32>
    %527 = arith.addf %522, %526 : vector<2x128xf32>
    %528 = vector.extract_strided_slice %527 {offsets = [0, 0], sizes = [2, 32], strides = [1, 1]} : vector<2x128xf32> to vector<2x32xf32>
    %529 = arith.negf %528 : vector<2x32xf32>
    %530 = math.exp %529 : vector<2x32xf32>
    %cst_273 = arith.constant 1.000000e+00 : f32
    %531 = vector.broadcast %cst_273 : f32 to vector<2x32xf32>
    %532 = arith.addf %531, %530 : vector<2x32xf32>
    %533 = arith.divf %531, %532 : vector<2x32xf32>
    %534 = vector.extract_strided_slice %527 {offsets = [0, 32], sizes = [2, 32], strides = [1, 1]} : vector<2x128xf32> to vector<2x32xf32>
    %535 = arith.negf %534 : vector<2x32xf32>
    %536 = math.exp %535 : vector<2x32xf32>
    %cst_274 = arith.constant 1.000000e+00 : f32
    %537 = vector.broadcast %cst_274 : f32 to vector<2x32xf32>
    %538 = arith.addf %537, %536 : vector<2x32xf32>
    %539 = arith.divf %537, %538 : vector<2x32xf32>
    %540 = vector.extract_strided_slice %527 {offsets = [0, 64], sizes = [2, 32], strides = [1, 1]} : vector<2x128xf32> to vector<2x32xf32>
    %541 = math.tanh %540 : vector<2x32xf32>
    %542 = vector.extract_strided_slice %527 {offsets = [0, 96], sizes = [2, 32], strides = [1, 1]} : vector<2x128xf32> to vector<2x32xf32>
    %543 = arith.negf %542 : vector<2x32xf32>
    %544 = math.exp %543 : vector<2x32xf32>
    %cst_275 = arith.constant 1.000000e+00 : f32
    %545 = vector.broadcast %cst_275 : f32 to vector<2x32xf32>
    %546 = arith.addf %545, %544 : vector<2x32xf32>
    %547 = arith.divf %545, %546 : vector<2x32xf32>
    %c0_276 = arith.constant 0 : index
    %c0_277 = arith.constant 0 : index
    %548 = vector.load %arg11[%c0_276, %c0_277] : memref<2x32xf32, #tpu.memory_space<vmem>>, vector<2x32xf32>
    %549 = arith.mulf %539, %548 : vector<2x32xf32>
    %550 = arith.mulf %533, %541 : vector<2x32xf32>
    %551 = arith.addf %549, %550 : vector<2x32xf32>
    %c0_278 = arith.constant 0 : index
    %c0_279 = arith.constant 0 : index
    %552 = vector.load %arg11[%c0_278, %c0_279] : memref<2x32xf32, #tpu.memory_space<vmem>>, vector<2x32xf32>
    tpu.vector_store %arg11[%c0_278, %c0_279], %551 {strides = array<i32>} : memref<2x32xf32, #tpu.memory_space<vmem>>, vector<2x32xf32>,
    %c0_280 = arith.constant 0 : index
    %c0_281 = arith.constant 0 : index
    %553 = vector.load %arg11[%c0_280, %c0_281] : memref<2x32xf32, #tpu.memory_space<vmem>>, vector<2x32xf32>
    %554 = math.tanh %553 : vector<2x32xf32>
    %555 = arith.mulf %547, %554 : vector<2x32xf32>
    %c0_282 = arith.constant 0 : index
    %c0_283 = arith.constant 0 : index
    %556 = vector.load %arg10[%c0_282, %c0_283] : memref<2x32xf32, #tpu.memory_space<vmem>>, vector<2x32xf32>
    tpu.vector_store %arg10[%c0_282, %c0_283], %555 {strides = array<i32>} : memref<2x32xf32, #tpu.memory_space<vmem>>, vector<2x32xf32>,
    %c0_284 = arith.constant 0 : index
    %c0_285 = arith.constant 0 : index
    %557 = vector.load %arg10[%c0_284, %c0_285] : memref<2x32xf32, #tpu.memory_space<vmem>>, vector<2x32xf32>
    %c0_286 = arith.constant 0 : index
    %c0_287 = arith.constant 0 : index
    %558 = vector.load %arg12[%c0_286, %c0_287] : memref<2x32xf32, #tpu.memory_space<vmem>>, vector<2x32xf32>
    %559 = tpu.concatenate %557, %558 in 1 : vector<2x32xf32>, vector<2x32xf32> -> vector<2x64xf32>
    %560 = arith.truncf %559 : vector<2x64xf32> to vector<2x64xbf16>
    %c0_288 = arith.constant 0 : index
    %c0_289 = arith.constant 0 : index
    %561 = vector.load %arg8[%c0_288, %c0_289] : memref<64x128xbf16, #tpu.memory_space<vmem>>, vector<64x128xbf16>
    %cst_290 = arith.constant dense<0.000000e+00> : vector<2x128xf32>
    %562 = tpu.matmul %560, %561, %cst_290 {dimension_numbers = #tpu.dot_dimension_numbers<[1], [0], [0], [1], [0, 0, 1, 1], [], []>} : vector<2x64xbf16>, vector<64x128xbf16>, vector<2x128xf32> -> vector<2x128xf32>
    %c0_291 = arith.constant 0 : index
    %c0_292 = arith.constant 0 : index
    %563 = vector.load %arg5[%c0_291, %c0_292] : memref<1x128xf32, #tpu.memory_space<vmem>>, vector<1x128xf32>
    %564 = vector.broadcast %563 : vector<1x128xf32> to vector<2x128xf32>
    %565 = arith.addf %562, %564 : vector<2x128xf32>
    %566 = vector.extract_strided_slice %565 {offsets = [0, 0], sizes = [2, 32], strides = [1, 1]} : vector<2x128xf32> to vector<2x32xf32>
    %567 = arith.negf %566 : vector<2x32xf32>
    %568 = math.exp %567 : vector<2x32xf32>
    %cst_293 = arith.constant 1.000000e+00 : f32
    %569 = vector.broadcast %cst_293 : f32 to vector<2x32xf32>
    %570 = arith.addf %569, %568 : vector<2x32xf32>
    %571 = arith.divf %569, %570 : vector<2x32xf32>
    %572 = vector.extract_strided_slice %565 {offsets = [0, 32], sizes = [2, 32], strides = [1, 1]} : vector<2x128xf32> to vector<2x32xf32>
    %573 = arith.negf %572 : vector<2x32xf32>
    %574 = math.exp %573 : vector<2x32xf32>
    %cst_294 = arith.constant 1.000000e+00 : f32
    %575 = vector.broadcast %cst_294 : f32 to vector<2x32xf32>
    %576 = arith.addf %575, %574 : vector<2x32xf32>
    %577 = arith.divf %575, %576 : vector<2x32xf32>
    %578 = vector.extract_strided_slice %565 {offsets = [0, 64], sizes = [2, 32], strides = [1, 1]} : vector<2x128xf32> to vector<2x32xf32>
    %579 = math.tanh %578 : vector<2x32xf32>
    %580 = vector.extract_strided_slice %565 {offsets = [0, 96], sizes = [2, 32], strides = [1, 1]} : vector<2x128xf32> to vector<2x32xf32>
    %581 = arith.negf %580 : vector<2x32xf32>
    %582 = math.exp %581 : vector<2x32xf32>
    %cst_295 = arith.constant 1.000000e+00 : f32
    %583 = vector.broadcast %cst_295 : f32 to vector<2x32xf32>
    %584 = arith.addf %583, %582 : vector<2x32xf32>
    %585 = arith.divf %583, %584 : vector<2x32xf32>
    %c0_296 = arith.constant 0 : index
    %c0_297 = arith.constant 0 : index
    %586 = vector.load %arg13[%c0_296, %c0_297] : memref<2x32xf32, #tpu.memory_space<vmem>>, vector<2x32xf32>
    %587 = arith.mulf %577, %586 : vector<2x32xf32>
    %588 = arith.mulf %571, %579 : vector<2x32xf32>
    %589 = arith.addf %587, %588 : vector<2x32xf32>
    %c0_298 = arith.constant 0 : index
    %c0_299 = arith.constant 0 : index
    %590 = vector.load %arg13[%c0_298, %c0_299] : memref<2x32xf32, #tpu.memory_space<vmem>>, vector<2x32xf32>
    tpu.vector_store %arg13[%c0_298, %c0_299], %589 {strides = array<i32>} : memref<2x32xf32, #tpu.memory_space<vmem>>, vector<2x32xf32>,
    %c0_300 = arith.constant 0 : index
    %c0_301 = arith.constant 0 : index
    %591 = vector.load %arg13[%c0_300, %c0_301] : memref<2x32xf32, #tpu.memory_space<vmem>>, vector<2x32xf32>
    %592 = math.tanh %591 : vector<2x32xf32>
    %593 = arith.mulf %585, %592 : vector<2x32xf32>
    %c0_302 = arith.constant 0 : index
    %c0_303 = arith.constant 0 : index
    %594 = vector.load %arg12[%c0_302, %c0_303] : memref<2x32xf32, #tpu.memory_space<vmem>>, vector<2x32xf32>
    tpu.vector_store %arg12[%c0_302, %c0_303], %593 {strides = array<i32>} : memref<2x32xf32, #tpu.memory_space<vmem>>, vector<2x32xf32>,
    %c0_304 = arith.constant 0 : index
    %c8 = arith.constant 8 : index
    %c0_305 = arith.constant 0 : index
    %595 = vector.load %arg2[%c0_304, %c8, %c0_305] : memref<2x16x128xf32, #tpu.memory_space<vmem>>, vector<2x1x128xf32>
    %596 = vector.shape_cast %595 : vector<2x1x128xf32> to vector<2x128xf32>
    %c0_306 = arith.constant 0 : index
    %c0_307 = arith.constant 0 : index
    %597 = vector.load %arg10[%c0_306, %c0_307] : memref<2x32xf32, #tpu.memory_space<vmem>>, vector<2x32xf32>
    %598 = arith.truncf %597 : vector<2x32xf32> to vector<2x32xbf16>
    %c0_308 = arith.constant 0 : index
    %c0_309 = arith.constant 0 : index
    %599 = vector.load %arg7[%c0_308, %c0_309] : memref<32x128xbf16, #tpu.memory_space<vmem>>, vector<32x128xbf16>
    %cst_310 = arith.constant dense<0.000000e+00> : vector<2x128xf32>
    %600 = tpu.matmul %598, %599, %cst_310 {dimension_numbers = #tpu.dot_dimension_numbers<[1], [0], [0], [1], [0, 0, 1, 1], [], []>} : vector<2x32xbf16>, vector<32x128xbf16>, vector<2x128xf32> -> vector<2x128xf32>
    %601 = arith.addf %596, %600 : vector<2x128xf32>
    %602 = vector.extract_strided_slice %601 {offsets = [0, 0], sizes = [2, 32], strides = [1, 1]} : vector<2x128xf32> to vector<2x32xf32>
    %603 = arith.negf %602 : vector<2x32xf32>
    %604 = math.exp %603 : vector<2x32xf32>
    %cst_311 = arith.constant 1.000000e+00 : f32
    %605 = vector.broadcast %cst_311 : f32 to vector<2x32xf32>
    %606 = arith.addf %605, %604 : vector<2x32xf32>
    %607 = arith.divf %605, %606 : vector<2x32xf32>
    %608 = vector.extract_strided_slice %601 {offsets = [0, 32], sizes = [2, 32], strides = [1, 1]} : vector<2x128xf32> to vector<2x32xf32>
    %609 = arith.negf %608 : vector<2x32xf32>
    %610 = math.exp %609 : vector<2x32xf32>
    %cst_312 = arith.constant 1.000000e+00 : f32
    %611 = vector.broadcast %cst_312 : f32 to vector<2x32xf32>
    %612 = arith.addf %611, %610 : vector<2x32xf32>
    %613 = arith.divf %611, %612 : vector<2x32xf32>
    %614 = vector.extract_strided_slice %601 {offsets = [0, 64], sizes = [2, 32], strides = [1, 1]} : vector<2x128xf32> to vector<2x32xf32>
    %615 = math.tanh %614 : vector<2x32xf32>
    %616 = vector.extract_strided_slice %601 {offsets = [0, 96], sizes = [2, 32], strides = [1, 1]} : vector<2x128xf32> to vector<2x32xf32>
    %617 = arith.negf %616 : vector<2x32xf32>
    %618 = math.exp %617 : vector<2x32xf32>
    %cst_313 = arith.constant 1.000000e+00 : f32
    %619 = vector.broadcast %cst_313 : f32 to vector<2x32xf32>
    %620 = arith.addf %619, %618 : vector<2x32xf32>
    %621 = arith.divf %619, %620 : vector<2x32xf32>
    %c0_314 = arith.constant 0 : index
    %c0_315 = arith.constant 0 : index
    %622 = vector.load %arg11[%c0_314, %c0_315] : memref<2x32xf32, #tpu.memory_space<vmem>>, vector<2x32xf32>
    %623 = arith.mulf %613, %622 : vector<2x32xf32>
    %624 = arith.mulf %607, %615 : vector<2x32xf32>
    %625 = arith.addf %623, %624 : vector<2x32xf32>
    %c0_316 = arith.constant 0 : index
    %c0_317 = arith.constant 0 : index
    %626 = vector.load %arg11[%c0_316, %c0_317] : memref<2x32xf32, #tpu.memory_space<vmem>>, vector<2x32xf32>
    tpu.vector_store %arg11[%c0_316, %c0_317], %625 {strides = array<i32>} : memref<2x32xf32, #tpu.memory_space<vmem>>, vector<2x32xf32>,
    %c0_318 = arith.constant 0 : index
    %c0_319 = arith.constant 0 : index
    %627 = vector.load %arg11[%c0_318, %c0_319] : memref<2x32xf32, #tpu.memory_space<vmem>>, vector<2x32xf32>
    %628 = math.tanh %627 : vector<2x32xf32>
    %629 = arith.mulf %621, %628 : vector<2x32xf32>
    %c0_320 = arith.constant 0 : index
    %c0_321 = arith.constant 0 : index
    %630 = vector.load %arg10[%c0_320, %c0_321] : memref<2x32xf32, #tpu.memory_space<vmem>>, vector<2x32xf32>
    tpu.vector_store %arg10[%c0_320, %c0_321], %629 {strides = array<i32>} : memref<2x32xf32, #tpu.memory_space<vmem>>, vector<2x32xf32>,
    %c0_322 = arith.constant 0 : index
    %c0_323 = arith.constant 0 : index
    %631 = vector.load %arg10[%c0_322, %c0_323] : memref<2x32xf32, #tpu.memory_space<vmem>>, vector<2x32xf32>
    %c0_324 = arith.constant 0 : index
    %c0_325 = arith.constant 0 : index
    %632 = vector.load %arg12[%c0_324, %c0_325] : memref<2x32xf32, #tpu.memory_space<vmem>>, vector<2x32xf32>
    %633 = tpu.concatenate %631, %632 in 1 : vector<2x32xf32>, vector<2x32xf32> -> vector<2x64xf32>
    %634 = arith.truncf %633 : vector<2x64xf32> to vector<2x64xbf16>
    %c0_326 = arith.constant 0 : index
    %c0_327 = arith.constant 0 : index
    %635 = vector.load %arg8[%c0_326, %c0_327] : memref<64x128xbf16, #tpu.memory_space<vmem>>, vector<64x128xbf16>
    %cst_328 = arith.constant dense<0.000000e+00> : vector<2x128xf32>
    %636 = tpu.matmul %634, %635, %cst_328 {dimension_numbers = #tpu.dot_dimension_numbers<[1], [0], [0], [1], [0, 0, 1, 1], [], []>} : vector<2x64xbf16>, vector<64x128xbf16>, vector<2x128xf32> -> vector<2x128xf32>
    %c0_329 = arith.constant 0 : index
    %c0_330 = arith.constant 0 : index
    %637 = vector.load %arg5[%c0_329, %c0_330] : memref<1x128xf32, #tpu.memory_space<vmem>>, vector<1x128xf32>
    %638 = vector.broadcast %637 : vector<1x128xf32> to vector<2x128xf32>
    %639 = arith.addf %636, %638 : vector<2x128xf32>
    %640 = vector.extract_strided_slice %639 {offsets = [0, 0], sizes = [2, 32], strides = [1, 1]} : vector<2x128xf32> to vector<2x32xf32>
    %641 = arith.negf %640 : vector<2x32xf32>
    %642 = math.exp %641 : vector<2x32xf32>
    %cst_331 = arith.constant 1.000000e+00 : f32
    %643 = vector.broadcast %cst_331 : f32 to vector<2x32xf32>
    %644 = arith.addf %643, %642 : vector<2x32xf32>
    %645 = arith.divf %643, %644 : vector<2x32xf32>
    %646 = vector.extract_strided_slice %639 {offsets = [0, 32], sizes = [2, 32], strides = [1, 1]} : vector<2x128xf32> to vector<2x32xf32>
    %647 = arith.negf %646 : vector<2x32xf32>
    %648 = math.exp %647 : vector<2x32xf32>
    %cst_332 = arith.constant 1.000000e+00 : f32
    %649 = vector.broadcast %cst_332 : f32 to vector<2x32xf32>
    %650 = arith.addf %649, %648 : vector<2x32xf32>
    %651 = arith.divf %649, %650 : vector<2x32xf32>
    %652 = vector.extract_strided_slice %639 {offsets = [0, 64], sizes = [2, 32], strides = [1, 1]} : vector<2x128xf32> to vector<2x32xf32>
    %653 = math.tanh %652 : vector<2x32xf32>
    %654 = vector.extract_strided_slice %639 {offsets = [0, 96], sizes = [2, 32], strides = [1, 1]} : vector<2x128xf32> to vector<2x32xf32>
    %655 = arith.negf %654 : vector<2x32xf32>
    %656 = math.exp %655 : vector<2x32xf32>
    %cst_333 = arith.constant 1.000000e+00 : f32
    %657 = vector.broadcast %cst_333 : f32 to vector<2x32xf32>
    %658 = arith.addf %657, %656 : vector<2x32xf32>
    %659 = arith.divf %657, %658 : vector<2x32xf32>
    %c0_334 = arith.constant 0 : index
    %c0_335 = arith.constant 0 : index
    %660 = vector.load %arg13[%c0_334, %c0_335] : memref<2x32xf32, #tpu.memory_space<vmem>>, vector<2x32xf32>
    %661 = arith.mulf %651, %660 : vector<2x32xf32>
    %662 = arith.mulf %645, %653 : vector<2x32xf32>
    %663 = arith.addf %661, %662 : vector<2x32xf32>
    %c0_336 = arith.constant 0 : index
    %c0_337 = arith.constant 0 : index
    %664 = vector.load %arg13[%c0_336, %c0_337] : memref<2x32xf32, #tpu.memory_space<vmem>>, vector<2x32xf32>
    tpu.vector_store %arg13[%c0_336, %c0_337], %663 {strides = array<i32>} : memref<2x32xf32, #tpu.memory_space<vmem>>, vector<2x32xf32>,
    %c0_338 = arith.constant 0 : index
    %c0_339 = arith.constant 0 : index
    %665 = vector.load %arg13[%c0_338, %c0_339] : memref<2x32xf32, #tpu.memory_space<vmem>>, vector<2x32xf32>
    %666 = math.tanh %665 : vector<2x32xf32>
    %667 = arith.mulf %659, %666 : vector<2x32xf32>
    %c0_340 = arith.constant 0 : index
    %c0_341 = arith.constant 0 : index
    %668 = vector.load %arg12[%c0_340, %c0_341] : memref<2x32xf32, #tpu.memory_space<vmem>>, vector<2x32xf32>
    tpu.vector_store %arg12[%c0_340, %c0_341], %667 {strides = array<i32>} : memref<2x32xf32, #tpu.memory_space<vmem>>, vector<2x32xf32>,
    %c0_342 = arith.constant 0 : index
    %c9 = arith.constant 9 : index
    %c0_343 = arith.constant 0 : index
    %669 = vector.load %arg2[%c0_342, %c9, %c0_343] : memref<2x16x128xf32, #tpu.memory_space<vmem>>, vector<2x1x128xf32>
    %670 = vector.shape_cast %669 : vector<2x1x128xf32> to vector<2x128xf32>
    %c0_344 = arith.constant 0 : index
    %c0_345 = arith.constant 0 : index
    %671 = vector.load %arg10[%c0_344, %c0_345] : memref<2x32xf32, #tpu.memory_space<vmem>>, vector<2x32xf32>
    %672 = arith.truncf %671 : vector<2x32xf32> to vector<2x32xbf16>
    %c0_346 = arith.constant 0 : index
    %c0_347 = arith.constant 0 : index
    %673 = vector.load %arg7[%c0_346, %c0_347] : memref<32x128xbf16, #tpu.memory_space<vmem>>, vector<32x128xbf16>
    %cst_348 = arith.constant dense<0.000000e+00> : vector<2x128xf32>
    %674 = tpu.matmul %672, %673, %cst_348 {dimension_numbers = #tpu.dot_dimension_numbers<[1], [0], [0], [1], [0, 0, 1, 1], [], []>} : vector<2x32xbf16>, vector<32x128xbf16>, vector<2x128xf32> -> vector<2x128xf32>
    %675 = arith.addf %670, %674 : vector<2x128xf32>
    %676 = vector.extract_strided_slice %675 {offsets = [0, 0], sizes = [2, 32], strides = [1, 1]} : vector<2x128xf32> to vector<2x32xf32>
    %677 = arith.negf %676 : vector<2x32xf32>
    %678 = math.exp %677 : vector<2x32xf32>
    %cst_349 = arith.constant 1.000000e+00 : f32
    %679 = vector.broadcast %cst_349 : f32 to vector<2x32xf32>
    %680 = arith.addf %679, %678 : vector<2x32xf32>
    %681 = arith.divf %679, %680 : vector<2x32xf32>
    %682 = vector.extract_strided_slice %675 {offsets = [0, 32], sizes = [2, 32], strides = [1, 1]} : vector<2x128xf32> to vector<2x32xf32>
    %683 = arith.negf %682 : vector<2x32xf32>
    %684 = math.exp %683 : vector<2x32xf32>
    %cst_350 = arith.constant 1.000000e+00 : f32
    %685 = vector.broadcast %cst_350 : f32 to vector<2x32xf32>
    %686 = arith.addf %685, %684 : vector<2x32xf32>
    %687 = arith.divf %685, %686 : vector<2x32xf32>
    %688 = vector.extract_strided_slice %675 {offsets = [0, 64], sizes = [2, 32], strides = [1, 1]} : vector<2x128xf32> to vector<2x32xf32>
    %689 = math.tanh %688 : vector<2x32xf32>
    %690 = vector.extract_strided_slice %675 {offsets = [0, 96], sizes = [2, 32], strides = [1, 1]} : vector<2x128xf32> to vector<2x32xf32>
    %691 = arith.negf %690 : vector<2x32xf32>
    %692 = math.exp %691 : vector<2x32xf32>
    %cst_351 = arith.constant 1.000000e+00 : f32
    %693 = vector.broadcast %cst_351 : f32 to vector<2x32xf32>
    %694 = arith.addf %693, %692 : vector<2x32xf32>
    %695 = arith.divf %693, %694 : vector<2x32xf32>
    %c0_352 = arith.constant 0 : index
    %c0_353 = arith.constant 0 : index
    %696 = vector.load %arg11[%c0_352, %c0_353] : memref<2x32xf32, #tpu.memory_space<vmem>>, vector<2x32xf32>
    %697 = arith.mulf %687, %696 : vector<2x32xf32>
    %698 = arith.mulf %681, %689 : vector<2x32xf32>
    %699 = arith.addf %697, %698 : vector<2x32xf32>
    %c0_354 = arith.constant 0 : index
    %c0_355 = arith.constant 0 : index
    %700 = vector.load %arg11[%c0_354, %c0_355] : memref<2x32xf32, #tpu.memory_space<vmem>>, vector<2x32xf32>
    tpu.vector_store %arg11[%c0_354, %c0_355], %699 {strides = array<i32>} : memref<2x32xf32, #tpu.memory_space<vmem>>, vector<2x32xf32>,
    %c0_356 = arith.constant 0 : index
    %c0_357 = arith.constant 0 : index
    %701 = vector.load %arg11[%c0_356, %c0_357] : memref<2x32xf32, #tpu.memory_space<vmem>>, vector<2x32xf32>
    %702 = math.tanh %701 : vector<2x32xf32>
    %703 = arith.mulf %695, %702 : vector<2x32xf32>
    %c0_358 = arith.constant 0 : index
    %c0_359 = arith.constant 0 : index
    %704 = vector.load %arg10[%c0_358, %c0_359] : memref<2x32xf32, #tpu.memory_space<vmem>>, vector<2x32xf32>
    tpu.vector_store %arg10[%c0_358, %c0_359], %703 {strides = array<i32>} : memref<2x32xf32, #tpu.memory_space<vmem>>, vector<2x32xf32>,
    %c0_360 = arith.constant 0 : index
    %c0_361 = arith.constant 0 : index
    %705 = vector.load %arg10[%c0_360, %c0_361] : memref<2x32xf32, #tpu.memory_space<vmem>>, vector<2x32xf32>
    %c0_362 = arith.constant 0 : index
    %c0_363 = arith.constant 0 : index
    %706 = vector.load %arg12[%c0_362, %c0_363] : memref<2x32xf32, #tpu.memory_space<vmem>>, vector<2x32xf32>
    %707 = tpu.concatenate %705, %706 in 1 : vector<2x32xf32>, vector<2x32xf32> -> vector<2x64xf32>
    %708 = arith.truncf %707 : vector<2x64xf32> to vector<2x64xbf16>
    %c0_364 = arith.constant 0 : index
    %c0_365 = arith.constant 0 : index
    %709 = vector.load %arg8[%c0_364, %c0_365] : memref<64x128xbf16, #tpu.memory_space<vmem>>, vector<64x128xbf16>
    %cst_366 = arith.constant dense<0.000000e+00> : vector<2x128xf32>
    %710 = tpu.matmul %708, %709, %cst_366 {dimension_numbers = #tpu.dot_dimension_numbers<[1], [0], [0], [1], [0, 0, 1, 1], [], []>} : vector<2x64xbf16>, vector<64x128xbf16>, vector<2x128xf32> -> vector<2x128xf32>
    %c0_367 = arith.constant 0 : index
    %c0_368 = arith.constant 0 : index
    %711 = vector.load %arg5[%c0_367, %c0_368] : memref<1x128xf32, #tpu.memory_space<vmem>>, vector<1x128xf32>
    %712 = vector.broadcast %711 : vector<1x128xf32> to vector<2x128xf32>
    %713 = arith.addf %710, %712 : vector<2x128xf32>
    %714 = vector.extract_strided_slice %713 {offsets = [0, 0], sizes = [2, 32], strides = [1, 1]} : vector<2x128xf32> to vector<2x32xf32>
    %715 = arith.negf %714 : vector<2x32xf32>
    %716 = math.exp %715 : vector<2x32xf32>
    %cst_369 = arith.constant 1.000000e+00 : f32
    %717 = vector.broadcast %cst_369 : f32 to vector<2x32xf32>
    %718 = arith.addf %717, %716 : vector<2x32xf32>
    %719 = arith.divf %717, %718 : vector<2x32xf32>
    %720 = vector.extract_strided_slice %713 {offsets = [0, 32], sizes = [2, 32], strides = [1, 1]} : vector<2x128xf32> to vector<2x32xf32>
    %721 = arith.negf %720 : vector<2x32xf32>
    %722 = math.exp %721 : vector<2x32xf32>
    %cst_370 = arith.constant 1.000000e+00 : f32
    %723 = vector.broadcast %cst_370 : f32 to vector<2x32xf32>
    %724 = arith.addf %723, %722 : vector<2x32xf32>
    %725 = arith.divf %723, %724 : vector<2x32xf32>
    %726 = vector.extract_strided_slice %713 {offsets = [0, 64], sizes = [2, 32], strides = [1, 1]} : vector<2x128xf32> to vector<2x32xf32>
    %727 = math.tanh %726 : vector<2x32xf32>
    %728 = vector.extract_strided_slice %713 {offsets = [0, 96], sizes = [2, 32], strides = [1, 1]} : vector<2x128xf32> to vector<2x32xf32>
    %729 = arith.negf %728 : vector<2x32xf32>
    %730 = math.exp %729 : vector<2x32xf32>
    %cst_371 = arith.constant 1.000000e+00 : f32
    %731 = vector.broadcast %cst_371 : f32 to vector<2x32xf32>
    %732 = arith.addf %731, %730 : vector<2x32xf32>
    %733 = arith.divf %731, %732 : vector<2x32xf32>
    %c0_372 = arith.constant 0 : index
    %c0_373 = arith.constant 0 : index
    %734 = vector.load %arg13[%c0_372, %c0_373] : memref<2x32xf32, #tpu.memory_space<vmem>>, vector<2x32xf32>
    %735 = arith.mulf %725, %734 : vector<2x32xf32>
    %736 = arith.mulf %719, %727 : vector<2x32xf32>
    %737 = arith.addf %735, %736 : vector<2x32xf32>
    %c0_374 = arith.constant 0 : index
    %c0_375 = arith.constant 0 : index
    %738 = vector.load %arg13[%c0_374, %c0_375] : memref<2x32xf32, #tpu.memory_space<vmem>>, vector<2x32xf32>
    tpu.vector_store %arg13[%c0_374, %c0_375], %737 {strides = array<i32>} : memref<2x32xf32, #tpu.memory_space<vmem>>, vector<2x32xf32>,
    %c0_376 = arith.constant 0 : index
    %c0_377 = arith.constant 0 : index
    %739 = vector.load %arg13[%c0_376, %c0_377] : memref<2x32xf32, #tpu.memory_space<vmem>>, vector<2x32xf32>
    %740 = math.tanh %739 : vector<2x32xf32>
    %741 = arith.mulf %733, %740 : vector<2x32xf32>
    %c0_378 = arith.constant 0 : index
    %c0_379 = arith.constant 0 : index
    %742 = vector.load %arg12[%c0_378, %c0_379] : memref<2x32xf32, #tpu.memory_space<vmem>>, vector<2x32xf32>
    tpu.vector_store %arg12[%c0_378, %c0_379], %741 {strides = array<i32>} : memref<2x32xf32, #tpu.memory_space<vmem>>, vector<2x32xf32>,
    %c0_380 = arith.constant 0 : index
    %c10 = arith.constant 10 : index
    %c0_381 = arith.constant 0 : index
    %743 = vector.load %arg2[%c0_380, %c10, %c0_381] : memref<2x16x128xf32, #tpu.memory_space<vmem>>, vector<2x1x128xf32>
    %744 = vector.shape_cast %743 : vector<2x1x128xf32> to vector<2x128xf32>
    %c0_382 = arith.constant 0 : index
    %c0_383 = arith.constant 0 : index
    %745 = vector.load %arg10[%c0_382, %c0_383] : memref<2x32xf32, #tpu.memory_space<vmem>>, vector<2x32xf32>
    %746 = arith.truncf %745 : vector<2x32xf32> to vector<2x32xbf16>
    %c0_384 = arith.constant 0 : index
    %c0_385 = arith.constant 0 : index
    %747 = vector.load %arg7[%c0_384, %c0_385] : memref<32x128xbf16, #tpu.memory_space<vmem>>, vector<32x128xbf16>
    %cst_386 = arith.constant dense<0.000000e+00> : vector<2x128xf32>
    %748 = tpu.matmul %746, %747, %cst_386 {dimension_numbers = #tpu.dot_dimension_numbers<[1], [0], [0], [1], [0, 0, 1, 1], [], []>} : vector<2x32xbf16>, vector<32x128xbf16>, vector<2x128xf32> -> vector<2x128xf32>
    %749 = arith.addf %744, %748 : vector<2x128xf32>
    %750 = vector.extract_strided_slice %749 {offsets = [0, 0], sizes = [2, 32], strides = [1, 1]} : vector<2x128xf32> to vector<2x32xf32>
    %751 = arith.negf %750 : vector<2x32xf32>
    %752 = math.exp %751 : vector<2x32xf32>
    %cst_387 = arith.constant 1.000000e+00 : f32
    %753 = vector.broadcast %cst_387 : f32 to vector<2x32xf32>
    %754 = arith.addf %753, %752 : vector<2x32xf32>
    %755 = arith.divf %753, %754 : vector<2x32xf32>
    %756 = vector.extract_strided_slice %749 {offsets = [0, 32], sizes = [2, 32], strides = [1, 1]} : vector<2x128xf32> to vector<2x32xf32>
    %757 = arith.negf %756 : vector<2x32xf32>
    %758 = math.exp %757 : vector<2x32xf32>
    %cst_388 = arith.constant 1.000000e+00 : f32
    %759 = vector.broadcast %cst_388 : f32 to vector<2x32xf32>
    %760 = arith.addf %759, %758 : vector<2x32xf32>
    %761 = arith.divf %759, %760 : vector<2x32xf32>
    %762 = vector.extract_strided_slice %749 {offsets = [0, 64], sizes = [2, 32], strides = [1, 1]} : vector<2x128xf32> to vector<2x32xf32>
    %763 = math.tanh %762 : vector<2x32xf32>
    %764 = vector.extract_strided_slice %749 {offsets = [0, 96], sizes = [2, 32], strides = [1, 1]} : vector<2x128xf32> to vector<2x32xf32>
    %765 = arith.negf %764 : vector<2x32xf32>
    %766 = math.exp %765 : vector<2x32xf32>
    %cst_389 = arith.constant 1.000000e+00 : f32
    %767 = vector.broadcast %cst_389 : f32 to vector<2x32xf32>
    %768 = arith.addf %767, %766 : vector<2x32xf32>
    %769 = arith.divf %767, %768 : vector<2x32xf32>
    %c0_390 = arith.constant 0 : index
    %c0_391 = arith.constant 0 : index
    %770 = vector.load %arg11[%c0_390, %c0_391] : memref<2x32xf32, #tpu.memory_space<vmem>>, vector<2x32xf32>
    %771 = arith.mulf %761, %770 : vector<2x32xf32>
    %772 = arith.mulf %755, %763 : vector<2x32xf32>
    %773 = arith.addf %771, %772 : vector<2x32xf32>
    %c0_392 = arith.constant 0 : index
    %c0_393 = arith.constant 0 : index
    %774 = vector.load %arg11[%c0_392, %c0_393] : memref<2x32xf32, #tpu.memory_space<vmem>>, vector<2x32xf32>
    tpu.vector_store %arg11[%c0_392, %c0_393], %773 {strides = array<i32>} : memref<2x32xf32, #tpu.memory_space<vmem>>, vector<2x32xf32>,
    %c0_394 = arith.constant 0 : index
    %c0_395 = arith.constant 0 : index
    %775 = vector.load %arg11[%c0_394, %c0_395] : memref<2x32xf32, #tpu.memory_space<vmem>>, vector<2x32xf32>
    %776 = math.tanh %775 : vector<2x32xf32>
    %777 = arith.mulf %769, %776 : vector<2x32xf32>
    %c0_396 = arith.constant 0 : index
    %c0_397 = arith.constant 0 : index
    %778 = vector.load %arg10[%c0_396, %c0_397] : memref<2x32xf32, #tpu.memory_space<vmem>>, vector<2x32xf32>
    tpu.vector_store %arg10[%c0_396, %c0_397], %777 {strides = array<i32>} : memref<2x32xf32, #tpu.memory_space<vmem>>, vector<2x32xf32>,
    %c0_398 = arith.constant 0 : index
    %c0_399 = arith.constant 0 : index
    %779 = vector.load %arg10[%c0_398, %c0_399] : memref<2x32xf32, #tpu.memory_space<vmem>>, vector<2x32xf32>
    %c0_400 = arith.constant 0 : index
    %c0_401 = arith.constant 0 : index
    %780 = vector.load %arg12[%c0_400, %c0_401] : memref<2x32xf32, #tpu.memory_space<vmem>>, vector<2x32xf32>
    %781 = tpu.concatenate %779, %780 in 1 : vector<2x32xf32>, vector<2x32xf32> -> vector<2x64xf32>
    %782 = arith.truncf %781 : vector<2x64xf32> to vector<2x64xbf16>
    %c0_402 = arith.constant 0 : index
    %c0_403 = arith.constant 0 : index
    %783 = vector.load %arg8[%c0_402, %c0_403] : memref<64x128xbf16, #tpu.memory_space<vmem>>, vector<64x128xbf16>
    %cst_404 = arith.constant dense<0.000000e+00> : vector<2x128xf32>
    %784 = tpu.matmul %782, %783, %cst_404 {dimension_numbers = #tpu.dot_dimension_numbers<[1], [0], [0], [1], [0, 0, 1, 1], [], []>} : vector<2x64xbf16>, vector<64x128xbf16>, vector<2x128xf32> -> vector<2x128xf32>
    %c0_405 = arith.constant 0 : index
    %c0_406 = arith.constant 0 : index
    %785 = vector.load %arg5[%c0_405, %c0_406] : memref<1x128xf32, #tpu.memory_space<vmem>>, vector<1x128xf32>
    %786 = vector.broadcast %785 : vector<1x128xf32> to vector<2x128xf32>
    %787 = arith.addf %784, %786 : vector<2x128xf32>
    %788 = vector.extract_strided_slice %787 {offsets = [0, 0], sizes = [2, 32], strides = [1, 1]} : vector<2x128xf32> to vector<2x32xf32>
    %789 = arith.negf %788 : vector<2x32xf32>
    %790 = math.exp %789 : vector<2x32xf32>
    %cst_407 = arith.constant 1.000000e+00 : f32
    %791 = vector.broadcast %cst_407 : f32 to vector<2x32xf32>
    %792 = arith.addf %791, %790 : vector<2x32xf32>
    %793 = arith.divf %791, %792 : vector<2x32xf32>
    %794 = vector.extract_strided_slice %787 {offsets = [0, 32], sizes = [2, 32], strides = [1, 1]} : vector<2x128xf32> to vector<2x32xf32>
    %795 = arith.negf %794 : vector<2x32xf32>
    %796 = math.exp %795 : vector<2x32xf32>
    %cst_408 = arith.constant 1.000000e+00 : f32
    %797 = vector.broadcast %cst_408 : f32 to vector<2x32xf32>
    %798 = arith.addf %797, %796 : vector<2x32xf32>
    %799 = arith.divf %797, %798 : vector<2x32xf32>
    %800 = vector.extract_strided_slice %787 {offsets = [0, 64], sizes = [2, 32], strides = [1, 1]} : vector<2x128xf32> to vector<2x32xf32>
    %801 = math.tanh %800 : vector<2x32xf32>
    %802 = vector.extract_strided_slice %787 {offsets = [0, 96], sizes = [2, 32], strides = [1, 1]} : vector<2x128xf32> to vector<2x32xf32>
    %803 = arith.negf %802 : vector<2x32xf32>
    %804 = math.exp %803 : vector<2x32xf32>
    %cst_409 = arith.constant 1.000000e+00 : f32
    %805 = vector.broadcast %cst_409 : f32 to vector<2x32xf32>
    %806 = arith.addf %805, %804 : vector<2x32xf32>
    %807 = arith.divf %805, %806 : vector<2x32xf32>
    %c0_410 = arith.constant 0 : index
    %c0_411 = arith.constant 0 : index
    %808 = vector.load %arg13[%c0_410, %c0_411] : memref<2x32xf32, #tpu.memory_space<vmem>>, vector<2x32xf32>
    %809 = arith.mulf %799, %808 : vector<2x32xf32>
    %810 = arith.mulf %793, %801 : vector<2x32xf32>
    %811 = arith.addf %809, %810 : vector<2x32xf32>
    %c0_412 = arith.constant 0 : index
    %c0_413 = arith.constant 0 : index
    %812 = vector.load %arg13[%c0_412, %c0_413] : memref<2x32xf32, #tpu.memory_space<vmem>>, vector<2x32xf32>
    tpu.vector_store %arg13[%c0_412, %c0_413], %811 {strides = array<i32>} : memref<2x32xf32, #tpu.memory_space<vmem>>, vector<2x32xf32>,
    %c0_414 = arith.constant 0 : index
    %c0_415 = arith.constant 0 : index
    %813 = vector.load %arg13[%c0_414, %c0_415] : memref<2x32xf32, #tpu.memory_space<vmem>>, vector<2x32xf32>
    %814 = math.tanh %813 : vector<2x32xf32>
    %815 = arith.mulf %807, %814 : vector<2x32xf32>
    %c0_416 = arith.constant 0 : index
    %c0_417 = arith.constant 0 : index
    %816 = vector.load %arg12[%c0_416, %c0_417] : memref<2x32xf32, #tpu.memory_space<vmem>>, vector<2x32xf32>
    tpu.vector_store %arg12[%c0_416, %c0_417], %815 {strides = array<i32>} : memref<2x32xf32, #tpu.memory_space<vmem>>, vector<2x32xf32>,
    %c0_418 = arith.constant 0 : index
    %c11 = arith.constant 11 : index
    %c0_419 = arith.constant 0 : index
    %817 = vector.load %arg2[%c0_418, %c11, %c0_419] : memref<2x16x128xf32, #tpu.memory_space<vmem>>, vector<2x1x128xf32>
    %818 = vector.shape_cast %817 : vector<2x1x128xf32> to vector<2x128xf32>
    %c0_420 = arith.constant 0 : index
    %c0_421 = arith.constant 0 : index
    %819 = vector.load %arg10[%c0_420, %c0_421] : memref<2x32xf32, #tpu.memory_space<vmem>>, vector<2x32xf32>
    %820 = arith.truncf %819 : vector<2x32xf32> to vector<2x32xbf16>
    %c0_422 = arith.constant 0 : index
    %c0_423 = arith.constant 0 : index
    %821 = vector.load %arg7[%c0_422, %c0_423] : memref<32x128xbf16, #tpu.memory_space<vmem>>, vector<32x128xbf16>
    %cst_424 = arith.constant dense<0.000000e+00> : vector<2x128xf32>
    %822 = tpu.matmul %820, %821, %cst_424 {dimension_numbers = #tpu.dot_dimension_numbers<[1], [0], [0], [1], [0, 0, 1, 1], [], []>} : vector<2x32xbf16>, vector<32x128xbf16>, vector<2x128xf32> -> vector<2x128xf32>
    %823 = arith.addf %818, %822 : vector<2x128xf32>
    %824 = vector.extract_strided_slice %823 {offsets = [0, 0], sizes = [2, 32], strides = [1, 1]} : vector<2x128xf32> to vector<2x32xf32>
    %825 = arith.negf %824 : vector<2x32xf32>
    %826 = math.exp %825 : vector<2x32xf32>
    %cst_425 = arith.constant 1.000000e+00 : f32
    %827 = vector.broadcast %cst_425 : f32 to vector<2x32xf32>
    %828 = arith.addf %827, %826 : vector<2x32xf32>
    %829 = arith.divf %827, %828 : vector<2x32xf32>
    %830 = vector.extract_strided_slice %823 {offsets = [0, 32], sizes = [2, 32], strides = [1, 1]} : vector<2x128xf32> to vector<2x32xf32>
    %831 = arith.negf %830 : vector<2x32xf32>
    %832 = math.exp %831 : vector<2x32xf32>
    %cst_426 = arith.constant 1.000000e+00 : f32
    %833 = vector.broadcast %cst_426 : f32 to vector<2x32xf32>
    %834 = arith.addf %833, %832 : vector<2x32xf32>
    %835 = arith.divf %833, %834 : vector<2x32xf32>
    %836 = vector.extract_strided_slice %823 {offsets = [0, 64], sizes = [2, 32], strides = [1, 1]} : vector<2x128xf32> to vector<2x32xf32>
    %837 = math.tanh %836 : vector<2x32xf32>
    %838 = vector.extract_strided_slice %823 {offsets = [0, 96], sizes = [2, 32], strides = [1, 1]} : vector<2x128xf32> to vector<2x32xf32>
    %839 = arith.negf %838 : vector<2x32xf32>
    %840 = math.exp %839 : vector<2x32xf32>
    %cst_427 = arith.constant 1.000000e+00 : f32
    %841 = vector.broadcast %cst_427 : f32 to vector<2x32xf32>
    %842 = arith.addf %841, %840 : vector<2x32xf32>
    %843 = arith.divf %841, %842 : vector<2x32xf32>
    %c0_428 = arith.constant 0 : index
    %c0_429 = arith.constant 0 : index
    %844 = vector.load %arg11[%c0_428, %c0_429] : memref<2x32xf32, #tpu.memory_space<vmem>>, vector<2x32xf32>
    %845 = arith.mulf %835, %844 : vector<2x32xf32>
    %846 = arith.mulf %829, %837 : vector<2x32xf32>
    %847 = arith.addf %845, %846 : vector<2x32xf32>
    %c0_430 = arith.constant 0 : index
    %c0_431 = arith.constant 0 : index
    %848 = vector.load %arg11[%c0_430, %c0_431] : memref<2x32xf32, #tpu.memory_space<vmem>>, vector<2x32xf32>
    tpu.vector_store %arg11[%c0_430, %c0_431], %847 {strides = array<i32>} : memref<2x32xf32, #tpu.memory_space<vmem>>, vector<2x32xf32>,
    %c0_432 = arith.constant 0 : index
    %c0_433 = arith.constant 0 : index
    %849 = vector.load %arg11[%c0_432, %c0_433] : memref<2x32xf32, #tpu.memory_space<vmem>>, vector<2x32xf32>
    %850 = math.tanh %849 : vector<2x32xf32>
    %851 = arith.mulf %843, %850 : vector<2x32xf32>
    %c0_434 = arith.constant 0 : index
    %c0_435 = arith.constant 0 : index
    %852 = vector.load %arg10[%c0_434, %c0_435] : memref<2x32xf32, #tpu.memory_space<vmem>>, vector<2x32xf32>
    tpu.vector_store %arg10[%c0_434, %c0_435], %851 {strides = array<i32>} : memref<2x32xf32, #tpu.memory_space<vmem>>, vector<2x32xf32>,
    %c0_436 = arith.constant 0 : index
    %c0_437 = arith.constant 0 : index
    %853 = vector.load %arg10[%c0_436, %c0_437] : memref<2x32xf32, #tpu.memory_space<vmem>>, vector<2x32xf32>
    %c0_438 = arith.constant 0 : index
    %c0_439 = arith.constant 0 : index
    %854 = vector.load %arg12[%c0_438, %c0_439] : memref<2x32xf32, #tpu.memory_space<vmem>>, vector<2x32xf32>
    %855 = tpu.concatenate %853, %854 in 1 : vector<2x32xf32>, vector<2x32xf32> -> vector<2x64xf32>
    %856 = arith.truncf %855 : vector<2x64xf32> to vector<2x64xbf16>
    %c0_440 = arith.constant 0 : index
    %c0_441 = arith.constant 0 : index
    %857 = vector.load %arg8[%c0_440, %c0_441] : memref<64x128xbf16, #tpu.memory_space<vmem>>, vector<64x128xbf16>
    %cst_442 = arith.constant dense<0.000000e+00> : vector<2x128xf32>
    %858 = tpu.matmul %856, %857, %cst_442 {dimension_numbers = #tpu.dot_dimension_numbers<[1], [0], [0], [1], [0, 0, 1, 1], [], []>} : vector<2x64xbf16>, vector<64x128xbf16>, vector<2x128xf32> -> vector<2x128xf32>
    %c0_443 = arith.constant 0 : index
    %c0_444 = arith.constant 0 : index
    %859 = vector.load %arg5[%c0_443, %c0_444] : memref<1x128xf32, #tpu.memory_space<vmem>>, vector<1x128xf32>
    %860 = vector.broadcast %859 : vector<1x128xf32> to vector<2x128xf32>
    %861 = arith.addf %858, %860 : vector<2x128xf32>
    %862 = vector.extract_strided_slice %861 {offsets = [0, 0], sizes = [2, 32], strides = [1, 1]} : vector<2x128xf32> to vector<2x32xf32>
    %863 = arith.negf %862 : vector<2x32xf32>
    %864 = math.exp %863 : vector<2x32xf32>
    %cst_445 = arith.constant 1.000000e+00 : f32
    %865 = vector.broadcast %cst_445 : f32 to vector<2x32xf32>
    %866 = arith.addf %865, %864 : vector<2x32xf32>
    %867 = arith.divf %865, %866 : vector<2x32xf32>
    %868 = vector.extract_strided_slice %861 {offsets = [0, 32], sizes = [2, 32], strides = [1, 1]} : vector<2x128xf32> to vector<2x32xf32>
    %869 = arith.negf %868 : vector<2x32xf32>
    %870 = math.exp %869 : vector<2x32xf32>
    %cst_446 = arith.constant 1.000000e+00 : f32
    %871 = vector.broadcast %cst_446 : f32 to vector<2x32xf32>
    %872 = arith.addf %871, %870 : vector<2x32xf32>
    %873 = arith.divf %871, %872 : vector<2x32xf32>
    %874 = vector.extract_strided_slice %861 {offsets = [0, 64], sizes = [2, 32], strides = [1, 1]} : vector<2x128xf32> to vector<2x32xf32>
    %875 = math.tanh %874 : vector<2x32xf32>
    %876 = vector.extract_strided_slice %861 {offsets = [0, 96], sizes = [2, 32], strides = [1, 1]} : vector<2x128xf32> to vector<2x32xf32>
    %877 = arith.negf %876 : vector<2x32xf32>
    %878 = math.exp %877 : vector<2x32xf32>
    %cst_447 = arith.constant 1.000000e+00 : f32
    %879 = vector.broadcast %cst_447 : f32 to vector<2x32xf32>
    %880 = arith.addf %879, %878 : vector<2x32xf32>
    %881 = arith.divf %879, %880 : vector<2x32xf32>
    %c0_448 = arith.constant 0 : index
    %c0_449 = arith.constant 0 : index
    %882 = vector.load %arg13[%c0_448, %c0_449] : memref<2x32xf32, #tpu.memory_space<vmem>>, vector<2x32xf32>
    %883 = arith.mulf %873, %882 : vector<2x32xf32>
    %884 = arith.mulf %867, %875 : vector<2x32xf32>
    %885 = arith.addf %883, %884 : vector<2x32xf32>
    %c0_450 = arith.constant 0 : index
    %c0_451 = arith.constant 0 : index
    %886 = vector.load %arg13[%c0_450, %c0_451] : memref<2x32xf32, #tpu.memory_space<vmem>>, vector<2x32xf32>
    tpu.vector_store %arg13[%c0_450, %c0_451], %885 {strides = array<i32>} : memref<2x32xf32, #tpu.memory_space<vmem>>, vector<2x32xf32>,
    %c0_452 = arith.constant 0 : index
    %c0_453 = arith.constant 0 : index
    %887 = vector.load %arg13[%c0_452, %c0_453] : memref<2x32xf32, #tpu.memory_space<vmem>>, vector<2x32xf32>
    %888 = math.tanh %887 : vector<2x32xf32>
    %889 = arith.mulf %881, %888 : vector<2x32xf32>
    %c0_454 = arith.constant 0 : index
    %c0_455 = arith.constant 0 : index
    %890 = vector.load %arg12[%c0_454, %c0_455] : memref<2x32xf32, #tpu.memory_space<vmem>>, vector<2x32xf32>
    tpu.vector_store %arg12[%c0_454, %c0_455], %889 {strides = array<i32>} : memref<2x32xf32, #tpu.memory_space<vmem>>, vector<2x32xf32>,
    %c0_456 = arith.constant 0 : index
    %c12 = arith.constant 12 : index
    %c0_457 = arith.constant 0 : index
    %891 = vector.load %arg2[%c0_456, %c12, %c0_457] : memref<2x16x128xf32, #tpu.memory_space<vmem>>, vector<2x1x128xf32>
    %892 = vector.shape_cast %891 : vector<2x1x128xf32> to vector<2x128xf32>
    %c0_458 = arith.constant 0 : index
    %c0_459 = arith.constant 0 : index
    %893 = vector.load %arg10[%c0_458, %c0_459] : memref<2x32xf32, #tpu.memory_space<vmem>>, vector<2x32xf32>
    %894 = arith.truncf %893 : vector<2x32xf32> to vector<2x32xbf16>
    %c0_460 = arith.constant 0 : index
    %c0_461 = arith.constant 0 : index
    %895 = vector.load %arg7[%c0_460, %c0_461] : memref<32x128xbf16, #tpu.memory_space<vmem>>, vector<32x128xbf16>
    %cst_462 = arith.constant dense<0.000000e+00> : vector<2x128xf32>
    %896 = tpu.matmul %894, %895, %cst_462 {dimension_numbers = #tpu.dot_dimension_numbers<[1], [0], [0], [1], [0, 0, 1, 1], [], []>} : vector<2x32xbf16>, vector<32x128xbf16>, vector<2x128xf32> -> vector<2x128xf32>
    %897 = arith.addf %892, %896 : vector<2x128xf32>
    %898 = vector.extract_strided_slice %897 {offsets = [0, 0], sizes = [2, 32], strides = [1, 1]} : vector<2x128xf32> to vector<2x32xf32>
    %899 = arith.negf %898 : vector<2x32xf32>
    %900 = math.exp %899 : vector<2x32xf32>
    %cst_463 = arith.constant 1.000000e+00 : f32
    %901 = vector.broadcast %cst_463 : f32 to vector<2x32xf32>
    %902 = arith.addf %901, %900 : vector<2x32xf32>
    %903 = arith.divf %901, %902 : vector<2x32xf32>
    %904 = vector.extract_strided_slice %897 {offsets = [0, 32], sizes = [2, 32], strides = [1, 1]} : vector<2x128xf32> to vector<2x32xf32>
    %905 = arith.negf %904 : vector<2x32xf32>
    %906 = math.exp %905 : vector<2x32xf32>
    %cst_464 = arith.constant 1.000000e+00 : f32
    %907 = vector.broadcast %cst_464 : f32 to vector<2x32xf32>
    %908 = arith.addf %907, %906 : vector<2x32xf32>
    %909 = arith.divf %907, %908 : vector<2x32xf32>
    %910 = vector.extract_strided_slice %897 {offsets = [0, 64], sizes = [2, 32], strides = [1, 1]} : vector<2x128xf32> to vector<2x32xf32>
    %911 = math.tanh %910 : vector<2x32xf32>
    %912 = vector.extract_strided_slice %897 {offsets = [0, 96], sizes = [2, 32], strides = [1, 1]} : vector<2x128xf32> to vector<2x32xf32>
    %913 = arith.negf %912 : vector<2x32xf32>
    %914 = math.exp %913 : vector<2x32xf32>
    %cst_465 = arith.constant 1.000000e+00 : f32
    %915 = vector.broadcast %cst_465 : f32 to vector<2x32xf32>
    %916 = arith.addf %915, %914 : vector<2x32xf32>
    %917 = arith.divf %915, %916 : vector<2x32xf32>
    %c0_466 = arith.constant 0 : index
    %c0_467 = arith.constant 0 : index
    %918 = vector.load %arg11[%c0_466, %c0_467] : memref<2x32xf32, #tpu.memory_space<vmem>>, vector<2x32xf32>
    %919 = arith.mulf %909, %918 : vector<2x32xf32>
    %920 = arith.mulf %903, %911 : vector<2x32xf32>
    %921 = arith.addf %919, %920 : vector<2x32xf32>
    %c0_468 = arith.constant 0 : index
    %c0_469 = arith.constant 0 : index
    %922 = vector.load %arg11[%c0_468, %c0_469] : memref<2x32xf32, #tpu.memory_space<vmem>>, vector<2x32xf32>
    tpu.vector_store %arg11[%c0_468, %c0_469], %921 {strides = array<i32>} : memref<2x32xf32, #tpu.memory_space<vmem>>, vector<2x32xf32>,
    %c0_470 = arith.constant 0 : index
    %c0_471 = arith.constant 0 : index
    %923 = vector.load %arg11[%c0_470, %c0_471] : memref<2x32xf32, #tpu.memory_space<vmem>>, vector<2x32xf32>
    %924 = math.tanh %923 : vector<2x32xf32>
    %925 = arith.mulf %917, %924 : vector<2x32xf32>
    %c0_472 = arith.constant 0 : index
    %c0_473 = arith.constant 0 : index
    %926 = vector.load %arg10[%c0_472, %c0_473] : memref<2x32xf32, #tpu.memory_space<vmem>>, vector<2x32xf32>
    tpu.vector_store %arg10[%c0_472, %c0_473], %925 {strides = array<i32>} : memref<2x32xf32, #tpu.memory_space<vmem>>, vector<2x32xf32>,
    %c0_474 = arith.constant 0 : index
    %c0_475 = arith.constant 0 : index
    %927 = vector.load %arg10[%c0_474, %c0_475] : memref<2x32xf32, #tpu.memory_space<vmem>>, vector<2x32xf32>
    %c0_476 = arith.constant 0 : index
    %c0_477 = arith.constant 0 : index
    %928 = vector.load %arg12[%c0_476, %c0_477] : memref<2x32xf32, #tpu.memory_space<vmem>>, vector<2x32xf32>
    %929 = tpu.concatenate %927, %928 in 1 : vector<2x32xf32>, vector<2x32xf32> -> vector<2x64xf32>
    %930 = arith.truncf %929 : vector<2x64xf32> to vector<2x64xbf16>
    %c0_478 = arith.constant 0 : index
    %c0_479 = arith.constant 0 : index
    %931 = vector.load %arg8[%c0_478, %c0_479] : memref<64x128xbf16, #tpu.memory_space<vmem>>, vector<64x128xbf16>
    %cst_480 = arith.constant dense<0.000000e+00> : vector<2x128xf32>
    %932 = tpu.matmul %930, %931, %cst_480 {dimension_numbers = #tpu.dot_dimension_numbers<[1], [0], [0], [1], [0, 0, 1, 1], [], []>} : vector<2x64xbf16>, vector<64x128xbf16>, vector<2x128xf32> -> vector<2x128xf32>
    %c0_481 = arith.constant 0 : index
    %c0_482 = arith.constant 0 : index
    %933 = vector.load %arg5[%c0_481, %c0_482] : memref<1x128xf32, #tpu.memory_space<vmem>>, vector<1x128xf32>
    %934 = vector.broadcast %933 : vector<1x128xf32> to vector<2x128xf32>
    %935 = arith.addf %932, %934 : vector<2x128xf32>
    %936 = vector.extract_strided_slice %935 {offsets = [0, 0], sizes = [2, 32], strides = [1, 1]} : vector<2x128xf32> to vector<2x32xf32>
    %937 = arith.negf %936 : vector<2x32xf32>
    %938 = math.exp %937 : vector<2x32xf32>
    %cst_483 = arith.constant 1.000000e+00 : f32
    %939 = vector.broadcast %cst_483 : f32 to vector<2x32xf32>
    %940 = arith.addf %939, %938 : vector<2x32xf32>
    %941 = arith.divf %939, %940 : vector<2x32xf32>
    %942 = vector.extract_strided_slice %935 {offsets = [0, 32], sizes = [2, 32], strides = [1, 1]} : vector<2x128xf32> to vector<2x32xf32>
    %943 = arith.negf %942 : vector<2x32xf32>
    %944 = math.exp %943 : vector<2x32xf32>
    %cst_484 = arith.constant 1.000000e+00 : f32
    %945 = vector.broadcast %cst_484 : f32 to vector<2x32xf32>
    %946 = arith.addf %945, %944 : vector<2x32xf32>
    %947 = arith.divf %945, %946 : vector<2x32xf32>
    %948 = vector.extract_strided_slice %935 {offsets = [0, 64], sizes = [2, 32], strides = [1, 1]} : vector<2x128xf32> to vector<2x32xf32>
    %949 = math.tanh %948 : vector<2x32xf32>
    %950 = vector.extract_strided_slice %935 {offsets = [0, 96], sizes = [2, 32], strides = [1, 1]} : vector<2x128xf32> to vector<2x32xf32>
    %951 = arith.negf %950 : vector<2x32xf32>
    %952 = math.exp %951 : vector<2x32xf32>
    %cst_485 = arith.constant 1.000000e+00 : f32
    %953 = vector.broadcast %cst_485 : f32 to vector<2x32xf32>
    %954 = arith.addf %953, %952 : vector<2x32xf32>
    %955 = arith.divf %953, %954 : vector<2x32xf32>
    %c0_486 = arith.constant 0 : index
    %c0_487 = arith.constant 0 : index
    %956 = vector.load %arg13[%c0_486, %c0_487] : memref<2x32xf32, #tpu.memory_space<vmem>>, vector<2x32xf32>
    %957 = arith.mulf %947, %956 : vector<2x32xf32>
    %958 = arith.mulf %941, %949 : vector<2x32xf32>
    %959 = arith.addf %957, %958 : vector<2x32xf32>
    %c0_488 = arith.constant 0 : index
    %c0_489 = arith.constant 0 : index
    %960 = vector.load %arg13[%c0_488, %c0_489] : memref<2x32xf32, #tpu.memory_space<vmem>>, vector<2x32xf32>
    tpu.vector_store %arg13[%c0_488, %c0_489], %959 {strides = array<i32>} : memref<2x32xf32, #tpu.memory_space<vmem>>, vector<2x32xf32>,
    %c0_490 = arith.constant 0 : index
    %c0_491 = arith.constant 0 : index
    %961 = vector.load %arg13[%c0_490, %c0_491] : memref<2x32xf32, #tpu.memory_space<vmem>>, vector<2x32xf32>
    %962 = math.tanh %961 : vector<2x32xf32>
    %963 = arith.mulf %955, %962 : vector<2x32xf32>
    %c0_492 = arith.constant 0 : index
    %c0_493 = arith.constant 0 : index
    %964 = vector.load %arg12[%c0_492, %c0_493] : memref<2x32xf32, #tpu.memory_space<vmem>>, vector<2x32xf32>
    tpu.vector_store %arg12[%c0_492, %c0_493], %963 {strides = array<i32>} : memref<2x32xf32, #tpu.memory_space<vmem>>, vector<2x32xf32>,
    %c0_494 = arith.constant 0 : index
    %c13 = arith.constant 13 : index
    %c0_495 = arith.constant 0 : index
    %965 = vector.load %arg2[%c0_494, %c13, %c0_495] : memref<2x16x128xf32, #tpu.memory_space<vmem>>, vector<2x1x128xf32>
    %966 = vector.shape_cast %965 : vector<2x1x128xf32> to vector<2x128xf32>
    %c0_496 = arith.constant 0 : index
    %c0_497 = arith.constant 0 : index
    %967 = vector.load %arg10[%c0_496, %c0_497] : memref<2x32xf32, #tpu.memory_space<vmem>>, vector<2x32xf32>
    %968 = arith.truncf %967 : vector<2x32xf32> to vector<2x32xbf16>
    %c0_498 = arith.constant 0 : index
    %c0_499 = arith.constant 0 : index
    %969 = vector.load %arg7[%c0_498, %c0_499] : memref<32x128xbf16, #tpu.memory_space<vmem>>, vector<32x128xbf16>
    %cst_500 = arith.constant dense<0.000000e+00> : vector<2x128xf32>
    %970 = tpu.matmul %968, %969, %cst_500 {dimension_numbers = #tpu.dot_dimension_numbers<[1], [0], [0], [1], [0, 0, 1, 1], [], []>} : vector<2x32xbf16>, vector<32x128xbf16>, vector<2x128xf32> -> vector<2x128xf32>
    %971 = arith.addf %966, %970 : vector<2x128xf32>
    %972 = vector.extract_strided_slice %971 {offsets = [0, 0], sizes = [2, 32], strides = [1, 1]} : vector<2x128xf32> to vector<2x32xf32>
    %973 = arith.negf %972 : vector<2x32xf32>
    %974 = math.exp %973 : vector<2x32xf32>
    %cst_501 = arith.constant 1.000000e+00 : f32
    %975 = vector.broadcast %cst_501 : f32 to vector<2x32xf32>
    %976 = arith.addf %975, %974 : vector<2x32xf32>
    %977 = arith.divf %975, %976 : vector<2x32xf32>
    %978 = vector.extract_strided_slice %971 {offsets = [0, 32], sizes = [2, 32], strides = [1, 1]} : vector<2x128xf32> to vector<2x32xf32>
    %979 = arith.negf %978 : vector<2x32xf32>
    %980 = math.exp %979 : vector<2x32xf32>
    %cst_502 = arith.constant 1.000000e+00 : f32
    %981 = vector.broadcast %cst_502 : f32 to vector<2x32xf32>
    %982 = arith.addf %981, %980 : vector<2x32xf32>
    %983 = arith.divf %981, %982 : vector<2x32xf32>
    %984 = vector.extract_strided_slice %971 {offsets = [0, 64], sizes = [2, 32], strides = [1, 1]} : vector<2x128xf32> to vector<2x32xf32>
    %985 = math.tanh %984 : vector<2x32xf32>
    %986 = vector.extract_strided_slice %971 {offsets = [0, 96], sizes = [2, 32], strides = [1, 1]} : vector<2x128xf32> to vector<2x32xf32>
    %987 = arith.negf %986 : vector<2x32xf32>
    %988 = math.exp %987 : vector<2x32xf32>
    %cst_503 = arith.constant 1.000000e+00 : f32
    %989 = vector.broadcast %cst_503 : f32 to vector<2x32xf32>
    %990 = arith.addf %989, %988 : vector<2x32xf32>
    %991 = arith.divf %989, %990 : vector<2x32xf32>
    %c0_504 = arith.constant 0 : index
    %c0_505 = arith.constant 0 : index
    %992 = vector.load %arg11[%c0_504, %c0_505] : memref<2x32xf32, #tpu.memory_space<vmem>>, vector<2x32xf32>
    %993 = arith.mulf %983, %992 : vector<2x32xf32>
    %994 = arith.mulf %977, %985 : vector<2x32xf32>
    %995 = arith.addf %993, %994 : vector<2x32xf32>
    %c0_506 = arith.constant 0 : index
    %c0_507 = arith.constant 0 : index
    %996 = vector.load %arg11[%c0_506, %c0_507] : memref<2x32xf32, #tpu.memory_space<vmem>>, vector<2x32xf32>
    tpu.vector_store %arg11[%c0_506, %c0_507], %995 {strides = array<i32>} : memref<2x32xf32, #tpu.memory_space<vmem>>, vector<2x32xf32>,
    %c0_508 = arith.constant 0 : index
    %c0_509 = arith.constant 0 : index
    %997 = vector.load %arg11[%c0_508, %c0_509] : memref<2x32xf32, #tpu.memory_space<vmem>>, vector<2x32xf32>
    %998 = math.tanh %997 : vector<2x32xf32>
    %999 = arith.mulf %991, %998 : vector<2x32xf32>
    %c0_510 = arith.constant 0 : index
    %c0_511 = arith.constant 0 : index
    %1000 = vector.load %arg10[%c0_510, %c0_511] : memref<2x32xf32, #tpu.memory_space<vmem>>, vector<2x32xf32>
    tpu.vector_store %arg10[%c0_510, %c0_511], %999 {strides = array<i32>} : memref<2x32xf32, #tpu.memory_space<vmem>>, vector<2x32xf32>,
    %c0_512 = arith.constant 0 : index
    %c0_513 = arith.constant 0 : index
    %1001 = vector.load %arg10[%c0_512, %c0_513] : memref<2x32xf32, #tpu.memory_space<vmem>>, vector<2x32xf32>
    %c0_514 = arith.constant 0 : index
    %c0_515 = arith.constant 0 : index
    %1002 = vector.load %arg12[%c0_514, %c0_515] : memref<2x32xf32, #tpu.memory_space<vmem>>, vector<2x32xf32>
    %1003 = tpu.concatenate %1001, %1002 in 1 : vector<2x32xf32>, vector<2x32xf32> -> vector<2x64xf32>
    %1004 = arith.truncf %1003 : vector<2x64xf32> to vector<2x64xbf16>
    %c0_516 = arith.constant 0 : index
    %c0_517 = arith.constant 0 : index
    %1005 = vector.load %arg8[%c0_516, %c0_517] : memref<64x128xbf16, #tpu.memory_space<vmem>>, vector<64x128xbf16>
    %cst_518 = arith.constant dense<0.000000e+00> : vector<2x128xf32>
    %1006 = tpu.matmul %1004, %1005, %cst_518 {dimension_numbers = #tpu.dot_dimension_numbers<[1], [0], [0], [1], [0, 0, 1, 1], [], []>} : vector<2x64xbf16>, vector<64x128xbf16>, vector<2x128xf32> -> vector<2x128xf32>
    %c0_519 = arith.constant 0 : index
    %c0_520 = arith.constant 0 : index
    %1007 = vector.load %arg5[%c0_519, %c0_520] : memref<1x128xf32, #tpu.memory_space<vmem>>, vector<1x128xf32>
    %1008 = vector.broadcast %1007 : vector<1x128xf32> to vector<2x128xf32>
    %1009 = arith.addf %1006, %1008 : vector<2x128xf32>
    %1010 = vector.extract_strided_slice %1009 {offsets = [0, 0], sizes = [2, 32], strides = [1, 1]} : vector<2x128xf32> to vector<2x32xf32>
    %1011 = arith.negf %1010 : vector<2x32xf32>
    %1012 = math.exp %1011 : vector<2x32xf32>
    %cst_521 = arith.constant 1.000000e+00 : f32
    %1013 = vector.broadcast %cst_521 : f32 to vector<2x32xf32>
    %1014 = arith.addf %1013, %1012 : vector<2x32xf32>
    %1015 = arith.divf %1013, %1014 : vector<2x32xf32>
    %1016 = vector.extract_strided_slice %1009 {offsets = [0, 32], sizes = [2, 32], strides = [1, 1]} : vector<2x128xf32> to vector<2x32xf32>
    %1017 = arith.negf %1016 : vector<2x32xf32>
    %1018 = math.exp %1017 : vector<2x32xf32>
    %cst_522 = arith.constant 1.000000e+00 : f32
    %1019 = vector.broadcast %cst_522 : f32 to vector<2x32xf32>
    %1020 = arith.addf %1019, %1018 : vector<2x32xf32>
    %1021 = arith.divf %1019, %1020 : vector<2x32xf32>
    %1022 = vector.extract_strided_slice %1009 {offsets = [0, 64], sizes = [2, 32], strides = [1, 1]} : vector<2x128xf32> to vector<2x32xf32>
    %1023 = math.tanh %1022 : vector<2x32xf32>
    %1024 = vector.extract_strided_slice %1009 {offsets = [0, 96], sizes = [2, 32], strides = [1, 1]} : vector<2x128xf32> to vector<2x32xf32>
    %1025 = arith.negf %1024 : vector<2x32xf32>
    %1026 = math.exp %1025 : vector<2x32xf32>
    %cst_523 = arith.constant 1.000000e+00 : f32
    %1027 = vector.broadcast %cst_523 : f32 to vector<2x32xf32>
    %1028 = arith.addf %1027, %1026 : vector<2x32xf32>
    %1029 = arith.divf %1027, %1028 : vector<2x32xf32>
    %c0_524 = arith.constant 0 : index
    %c0_525 = arith.constant 0 : index
    %1030 = vector.load %arg13[%c0_524, %c0_525] : memref<2x32xf32, #tpu.memory_space<vmem>>, vector<2x32xf32>
    %1031 = arith.mulf %1021, %1030 : vector<2x32xf32>
    %1032 = arith.mulf %1015, %1023 : vector<2x32xf32>
    %1033 = arith.addf %1031, %1032 : vector<2x32xf32>
    %c0_526 = arith.constant 0 : index
    %c0_527 = arith.constant 0 : index
    %1034 = vector.load %arg13[%c0_526, %c0_527] : memref<2x32xf32, #tpu.memory_space<vmem>>, vector<2x32xf32>
    tpu.vector_store %arg13[%c0_526, %c0_527], %1033 {strides = array<i32>} : memref<2x32xf32, #tpu.memory_space<vmem>>, vector<2x32xf32>,
    %c0_528 = arith.constant 0 : index
    %c0_529 = arith.constant 0 : index
    %1035 = vector.load %arg13[%c0_528, %c0_529] : memref<2x32xf32, #tpu.memory_space<vmem>>, vector<2x32xf32>
    %1036 = math.tanh %1035 : vector<2x32xf32>
    %1037 = arith.mulf %1029, %1036 : vector<2x32xf32>
    %c0_530 = arith.constant 0 : index
    %c0_531 = arith.constant 0 : index
    %1038 = vector.load %arg12[%c0_530, %c0_531] : memref<2x32xf32, #tpu.memory_space<vmem>>, vector<2x32xf32>
    tpu.vector_store %arg12[%c0_530, %c0_531], %1037 {strides = array<i32>} : memref<2x32xf32, #tpu.memory_space<vmem>>, vector<2x32xf32>,
    %c0_532 = arith.constant 0 : index
    %c14 = arith.constant 14 : index
    %c0_533 = arith.constant 0 : index
    %1039 = vector.load %arg2[%c0_532, %c14, %c0_533] : memref<2x16x128xf32, #tpu.memory_space<vmem>>, vector<2x1x128xf32>
    %1040 = vector.shape_cast %1039 : vector<2x1x128xf32> to vector<2x128xf32>
    %c0_534 = arith.constant 0 : index
    %c0_535 = arith.constant 0 : index
    %1041 = vector.load %arg10[%c0_534, %c0_535] : memref<2x32xf32, #tpu.memory_space<vmem>>, vector<2x32xf32>
    %1042 = arith.truncf %1041 : vector<2x32xf32> to vector<2x32xbf16>
    %c0_536 = arith.constant 0 : index
    %c0_537 = arith.constant 0 : index
    %1043 = vector.load %arg7[%c0_536, %c0_537] : memref<32x128xbf16, #tpu.memory_space<vmem>>, vector<32x128xbf16>
    %cst_538 = arith.constant dense<0.000000e+00> : vector<2x128xf32>
    %1044 = tpu.matmul %1042, %1043, %cst_538 {dimension_numbers = #tpu.dot_dimension_numbers<[1], [0], [0], [1], [0, 0, 1, 1], [], []>} : vector<2x32xbf16>, vector<32x128xbf16>, vector<2x128xf32> -> vector<2x128xf32>
    %1045 = arith.addf %1040, %1044 : vector<2x128xf32>
    %1046 = vector.extract_strided_slice %1045 {offsets = [0, 0], sizes = [2, 32], strides = [1, 1]} : vector<2x128xf32> to vector<2x32xf32>
    %1047 = arith.negf %1046 : vector<2x32xf32>
    %1048 = math.exp %1047 : vector<2x32xf32>
    %cst_539 = arith.constant 1.000000e+00 : f32
    %1049 = vector.broadcast %cst_539 : f32 to vector<2x32xf32>
    %1050 = arith.addf %1049, %1048 : vector<2x32xf32>
    %1051 = arith.divf %1049, %1050 : vector<2x32xf32>
    %1052 = vector.extract_strided_slice %1045 {offsets = [0, 32], sizes = [2, 32], strides = [1, 1]} : vector<2x128xf32> to vector<2x32xf32>
    %1053 = arith.negf %1052 : vector<2x32xf32>
    %1054 = math.exp %1053 : vector<2x32xf32>
    %cst_540 = arith.constant 1.000000e+00 : f32
    %1055 = vector.broadcast %cst_540 : f32 to vector<2x32xf32>
    %1056 = arith.addf %1055, %1054 : vector<2x32xf32>
    %1057 = arith.divf %1055, %1056 : vector<2x32xf32>
    %1058 = vector.extract_strided_slice %1045 {offsets = [0, 64], sizes = [2, 32], strides = [1, 1]} : vector<2x128xf32> to vector<2x32xf32>
    %1059 = math.tanh %1058 : vector<2x32xf32>
    %1060 = vector.extract_strided_slice %1045 {offsets = [0, 96], sizes = [2, 32], strides = [1, 1]} : vector<2x128xf32> to vector<2x32xf32>
    %1061 = arith.negf %1060 : vector<2x32xf32>
    %1062 = math.exp %1061 : vector<2x32xf32>
    %cst_541 = arith.constant 1.000000e+00 : f32
    %1063 = vector.broadcast %cst_541 : f32 to vector<2x32xf32>
    %1064 = arith.addf %1063, %1062 : vector<2x32xf32>
    %1065 = arith.divf %1063, %1064 : vector<2x32xf32>
    %c0_542 = arith.constant 0 : index
    %c0_543 = arith.constant 0 : index
    %1066 = vector.load %arg11[%c0_542, %c0_543] : memref<2x32xf32, #tpu.memory_space<vmem>>, vector<2x32xf32>
    %1067 = arith.mulf %1057, %1066 : vector<2x32xf32>
    %1068 = arith.mulf %1051, %1059 : vector<2x32xf32>
    %1069 = arith.addf %1067, %1068 : vector<2x32xf32>
    %c0_544 = arith.constant 0 : index
    %c0_545 = arith.constant 0 : index
    %1070 = vector.load %arg11[%c0_544, %c0_545] : memref<2x32xf32, #tpu.memory_space<vmem>>, vector<2x32xf32>
    tpu.vector_store %arg11[%c0_544, %c0_545], %1069 {strides = array<i32>} : memref<2x32xf32, #tpu.memory_space<vmem>>, vector<2x32xf32>,
    %c0_546 = arith.constant 0 : index
    %c0_547 = arith.constant 0 : index
    %1071 = vector.load %arg11[%c0_546, %c0_547] : memref<2x32xf32, #tpu.memory_space<vmem>>, vector<2x32xf32>
    %1072 = math.tanh %1071 : vector<2x32xf32>
    %1073 = arith.mulf %1065, %1072 : vector<2x32xf32>
    %c0_548 = arith.constant 0 : index
    %c0_549 = arith.constant 0 : index
    %1074 = vector.load %arg10[%c0_548, %c0_549] : memref<2x32xf32, #tpu.memory_space<vmem>>, vector<2x32xf32>
    tpu.vector_store %arg10[%c0_548, %c0_549], %1073 {strides = array<i32>} : memref<2x32xf32, #tpu.memory_space<vmem>>, vector<2x32xf32>,
    %c0_550 = arith.constant 0 : index
    %c0_551 = arith.constant 0 : index
    %1075 = vector.load %arg10[%c0_550, %c0_551] : memref<2x32xf32, #tpu.memory_space<vmem>>, vector<2x32xf32>
    %c0_552 = arith.constant 0 : index
    %c0_553 = arith.constant 0 : index
    %1076 = vector.load %arg12[%c0_552, %c0_553] : memref<2x32xf32, #tpu.memory_space<vmem>>, vector<2x32xf32>
    %1077 = tpu.concatenate %1075, %1076 in 1 : vector<2x32xf32>, vector<2x32xf32> -> vector<2x64xf32>
    %1078 = arith.truncf %1077 : vector<2x64xf32> to vector<2x64xbf16>
    %c0_554 = arith.constant 0 : index
    %c0_555 = arith.constant 0 : index
    %1079 = vector.load %arg8[%c0_554, %c0_555] : memref<64x128xbf16, #tpu.memory_space<vmem>>, vector<64x128xbf16>
    %cst_556 = arith.constant dense<0.000000e+00> : vector<2x128xf32>
    %1080 = tpu.matmul %1078, %1079, %cst_556 {dimension_numbers = #tpu.dot_dimension_numbers<[1], [0], [0], [1], [0, 0, 1, 1], [], []>} : vector<2x64xbf16>, vector<64x128xbf16>, vector<2x128xf32> -> vector<2x128xf32>
    %c0_557 = arith.constant 0 : index
    %c0_558 = arith.constant 0 : index
    %1081 = vector.load %arg5[%c0_557, %c0_558] : memref<1x128xf32, #tpu.memory_space<vmem>>, vector<1x128xf32>
    %1082 = vector.broadcast %1081 : vector<1x128xf32> to vector<2x128xf32>
    %1083 = arith.addf %1080, %1082 : vector<2x128xf32>
    %1084 = vector.extract_strided_slice %1083 {offsets = [0, 0], sizes = [2, 32], strides = [1, 1]} : vector<2x128xf32> to vector<2x32xf32>
    %1085 = arith.negf %1084 : vector<2x32xf32>
    %1086 = math.exp %1085 : vector<2x32xf32>
    %cst_559 = arith.constant 1.000000e+00 : f32
    %1087 = vector.broadcast %cst_559 : f32 to vector<2x32xf32>
    %1088 = arith.addf %1087, %1086 : vector<2x32xf32>
    %1089 = arith.divf %1087, %1088 : vector<2x32xf32>
    %1090 = vector.extract_strided_slice %1083 {offsets = [0, 32], sizes = [2, 32], strides = [1, 1]} : vector<2x128xf32> to vector<2x32xf32>
    %1091 = arith.negf %1090 : vector<2x32xf32>
    %1092 = math.exp %1091 : vector<2x32xf32>
    %cst_560 = arith.constant 1.000000e+00 : f32
    %1093 = vector.broadcast %cst_560 : f32 to vector<2x32xf32>
    %1094 = arith.addf %1093, %1092 : vector<2x32xf32>
    %1095 = arith.divf %1093, %1094 : vector<2x32xf32>
    %1096 = vector.extract_strided_slice %1083 {offsets = [0, 64], sizes = [2, 32], strides = [1, 1]} : vector<2x128xf32> to vector<2x32xf32>
    %1097 = math.tanh %1096 : vector<2x32xf32>
    %1098 = vector.extract_strided_slice %1083 {offsets = [0, 96], sizes = [2, 32], strides = [1, 1]} : vector<2x128xf32> to vector<2x32xf32>
    %1099 = arith.negf %1098 : vector<2x32xf32>
    %1100 = math.exp %1099 : vector<2x32xf32>
    %cst_561 = arith.constant 1.000000e+00 : f32
    %1101 = vector.broadcast %cst_561 : f32 to vector<2x32xf32>
    %1102 = arith.addf %1101, %1100 : vector<2x32xf32>
    %1103 = arith.divf %1101, %1102 : vector<2x32xf32>
    %c0_562 = arith.constant 0 : index
    %c0_563 = arith.constant 0 : index
    %1104 = vector.load %arg13[%c0_562, %c0_563] : memref<2x32xf32, #tpu.memory_space<vmem>>, vector<2x32xf32>
    %1105 = arith.mulf %1095, %1104 : vector<2x32xf32>
    %1106 = arith.mulf %1089, %1097 : vector<2x32xf32>
    %1107 = arith.addf %1105, %1106 : vector<2x32xf32>
    %c0_564 = arith.constant 0 : index
    %c0_565 = arith.constant 0 : index
    %1108 = vector.load %arg13[%c0_564, %c0_565] : memref<2x32xf32, #tpu.memory_space<vmem>>, vector<2x32xf32>
    tpu.vector_store %arg13[%c0_564, %c0_565], %1107 {strides = array<i32>} : memref<2x32xf32, #tpu.memory_space<vmem>>, vector<2x32xf32>,
    %c0_566 = arith.constant 0 : index
    %c0_567 = arith.constant 0 : index
    %1109 = vector.load %arg13[%c0_566, %c0_567] : memref<2x32xf32, #tpu.memory_space<vmem>>, vector<2x32xf32>
    %1110 = math.tanh %1109 : vector<2x32xf32>
    %1111 = arith.mulf %1103, %1110 : vector<2x32xf32>
    %c0_568 = arith.constant 0 : index
    %c0_569 = arith.constant 0 : index
    %1112 = vector.load %arg12[%c0_568, %c0_569] : memref<2x32xf32, #tpu.memory_space<vmem>>, vector<2x32xf32>
    tpu.vector_store %arg12[%c0_568, %c0_569], %1111 {strides = array<i32>} : memref<2x32xf32, #tpu.memory_space<vmem>>, vector<2x32xf32>,
    %c0_570 = arith.constant 0 : index
    %c15 = arith.constant 15 : index
    %c0_571 = arith.constant 0 : index
    %1113 = vector.load %arg2[%c0_570, %c15, %c0_571] : memref<2x16x128xf32, #tpu.memory_space<vmem>>, vector<2x1x128xf32>
    %1114 = vector.shape_cast %1113 : vector<2x1x128xf32> to vector<2x128xf32>
    %c0_572 = arith.constant 0 : index
    %c0_573 = arith.constant 0 : index
    %1115 = vector.load %arg10[%c0_572, %c0_573] : memref<2x32xf32, #tpu.memory_space<vmem>>, vector<2x32xf32>
    %1116 = arith.truncf %1115 : vector<2x32xf32> to vector<2x32xbf16>
    %c0_574 = arith.constant 0 : index
    %c0_575 = arith.constant 0 : index
    %1117 = vector.load %arg7[%c0_574, %c0_575] : memref<32x128xbf16, #tpu.memory_space<vmem>>, vector<32x128xbf16>
    %cst_576 = arith.constant dense<0.000000e+00> : vector<2x128xf32>
    %1118 = tpu.matmul %1116, %1117, %cst_576 {dimension_numbers = #tpu.dot_dimension_numbers<[1], [0], [0], [1], [0, 0, 1, 1], [], []>} : vector<2x32xbf16>, vector<32x128xbf16>, vector<2x128xf32> -> vector<2x128xf32>
    %1119 = arith.addf %1114, %1118 : vector<2x128xf32>
    %1120 = vector.extract_strided_slice %1119 {offsets = [0, 0], sizes = [2, 32], strides = [1, 1]} : vector<2x128xf32> to vector<2x32xf32>
    %1121 = arith.negf %1120 : vector<2x32xf32>
    %1122 = math.exp %1121 : vector<2x32xf32>
    %cst_577 = arith.constant 1.000000e+00 : f32
    %1123 = vector.broadcast %cst_577 : f32 to vector<2x32xf32>
    %1124 = arith.addf %1123, %1122 : vector<2x32xf32>
    %1125 = arith.divf %1123, %1124 : vector<2x32xf32>
    %1126 = vector.extract_strided_slice %1119 {offsets = [0, 32], sizes = [2, 32], strides = [1, 1]} : vector<2x128xf32> to vector<2x32xf32>
    %1127 = arith.negf %1126 : vector<2x32xf32>
    %1128 = math.exp %1127 : vector<2x32xf32>
    %cst_578 = arith.constant 1.000000e+00 : f32
    %1129 = vector.broadcast %cst_578 : f32 to vector<2x32xf32>
    %1130 = arith.addf %1129, %1128 : vector<2x32xf32>
    %1131 = arith.divf %1129, %1130 : vector<2x32xf32>
    %1132 = vector.extract_strided_slice %1119 {offsets = [0, 64], sizes = [2, 32], strides = [1, 1]} : vector<2x128xf32> to vector<2x32xf32>
    %1133 = math.tanh %1132 : vector<2x32xf32>
    %1134 = vector.extract_strided_slice %1119 {offsets = [0, 96], sizes = [2, 32], strides = [1, 1]} : vector<2x128xf32> to vector<2x32xf32>
    %1135 = arith.negf %1134 : vector<2x32xf32>
    %1136 = math.exp %1135 : vector<2x32xf32>
    %cst_579 = arith.constant 1.000000e+00 : f32
    %1137 = vector.broadcast %cst_579 : f32 to vector<2x32xf32>
    %1138 = arith.addf %1137, %1136 : vector<2x32xf32>
    %1139 = arith.divf %1137, %1138 : vector<2x32xf32>
    %c0_580 = arith.constant 0 : index
    %c0_581 = arith.constant 0 : index
    %1140 = vector.load %arg11[%c0_580, %c0_581] : memref<2x32xf32, #tpu.memory_space<vmem>>, vector<2x32xf32>
    %1141 = arith.mulf %1131, %1140 : vector<2x32xf32>
    %1142 = arith.mulf %1125, %1133 : vector<2x32xf32>
    %1143 = arith.addf %1141, %1142 : vector<2x32xf32>
    %c0_582 = arith.constant 0 : index
    %c0_583 = arith.constant 0 : index
    %1144 = vector.load %arg11[%c0_582, %c0_583] : memref<2x32xf32, #tpu.memory_space<vmem>>, vector<2x32xf32>
    tpu.vector_store %arg11[%c0_582, %c0_583], %1143 {strides = array<i32>} : memref<2x32xf32, #tpu.memory_space<vmem>>, vector<2x32xf32>,
    %c0_584 = arith.constant 0 : index
    %c0_585 = arith.constant 0 : index
    %1145 = vector.load %arg11[%c0_584, %c0_585] : memref<2x32xf32, #tpu.memory_space<vmem>>, vector<2x32xf32>
    %1146 = math.tanh %1145 : vector<2x32xf32>
    %1147 = arith.mulf %1139, %1146 : vector<2x32xf32>
    %c0_586 = arith.constant 0 : index
    %c0_587 = arith.constant 0 : index
    %1148 = vector.load %arg10[%c0_586, %c0_587] : memref<2x32xf32, #tpu.memory_space<vmem>>, vector<2x32xf32>
    tpu.vector_store %arg10[%c0_586, %c0_587], %1147 {strides = array<i32>} : memref<2x32xf32, #tpu.memory_space<vmem>>, vector<2x32xf32>,
    %c0_588 = arith.constant 0 : index
    %c0_589 = arith.constant 0 : index
    %1149 = vector.load %arg10[%c0_588, %c0_589] : memref<2x32xf32, #tpu.memory_space<vmem>>, vector<2x32xf32>
    %c0_590 = arith.constant 0 : index
    %c0_591 = arith.constant 0 : index
    %1150 = vector.load %arg12[%c0_590, %c0_591] : memref<2x32xf32, #tpu.memory_space<vmem>>, vector<2x32xf32>
    %1151 = tpu.concatenate %1149, %1150 in 1 : vector<2x32xf32>, vector<2x32xf32> -> vector<2x64xf32>
    %1152 = arith.truncf %1151 : vector<2x64xf32> to vector<2x64xbf16>
    %c0_592 = arith.constant 0 : index
    %c0_593 = arith.constant 0 : index
    %1153 = vector.load %arg8[%c0_592, %c0_593] : memref<64x128xbf16, #tpu.memory_space<vmem>>, vector<64x128xbf16>
    %cst_594 = arith.constant dense<0.000000e+00> : vector<2x128xf32>
    %1154 = tpu.matmul %1152, %1153, %cst_594 {dimension_numbers = #tpu.dot_dimension_numbers<[1], [0], [0], [1], [0, 0, 1, 1], [], []>} : vector<2x64xbf16>, vector<64x128xbf16>, vector<2x128xf32> -> vector<2x128xf32>
    %c0_595 = arith.constant 0 : index
    %c0_596 = arith.constant 0 : index
    %1155 = vector.load %arg5[%c0_595, %c0_596] : memref<1x128xf32, #tpu.memory_space<vmem>>, vector<1x128xf32>
    %1156 = vector.broadcast %1155 : vector<1x128xf32> to vector<2x128xf32>
    %1157 = arith.addf %1154, %1156 : vector<2x128xf32>
    %1158 = vector.extract_strided_slice %1157 {offsets = [0, 0], sizes = [2, 32], strides = [1, 1]} : vector<2x128xf32> to vector<2x32xf32>
    %1159 = arith.negf %1158 : vector<2x32xf32>
    %1160 = math.exp %1159 : vector<2x32xf32>
    %cst_597 = arith.constant 1.000000e+00 : f32
    %1161 = vector.broadcast %cst_597 : f32 to vector<2x32xf32>
    %1162 = arith.addf %1161, %1160 : vector<2x32xf32>
    %1163 = arith.divf %1161, %1162 : vector<2x32xf32>
    %1164 = vector.extract_strided_slice %1157 {offsets = [0, 32], sizes = [2, 32], strides = [1, 1]} : vector<2x128xf32> to vector<2x32xf32>
    %1165 = arith.negf %1164 : vector<2x32xf32>
    %1166 = math.exp %1165 : vector<2x32xf32>
    %cst_598 = arith.constant 1.000000e+00 : f32
    %1167 = vector.broadcast %cst_598 : f32 to vector<2x32xf32>
    %1168 = arith.addf %1167, %1166 : vector<2x32xf32>
    %1169 = arith.divf %1167, %1168 : vector<2x32xf32>
    %1170 = vector.extract_strided_slice %1157 {offsets = [0, 64], sizes = [2, 32], strides = [1, 1]} : vector<2x128xf32> to vector<2x32xf32>
    %1171 = math.tanh %1170 : vector<2x32xf32>
    %1172 = vector.extract_strided_slice %1157 {offsets = [0, 96], sizes = [2, 32], strides = [1, 1]} : vector<2x128xf32> to vector<2x32xf32>
    %1173 = arith.negf %1172 : vector<2x32xf32>
    %1174 = math.exp %1173 : vector<2x32xf32>
    %cst_599 = arith.constant 1.000000e+00 : f32
    %1175 = vector.broadcast %cst_599 : f32 to vector<2x32xf32>
    %1176 = arith.addf %1175, %1174 : vector<2x32xf32>
    %1177 = arith.divf %1175, %1176 : vector<2x32xf32>
    %c0_600 = arith.constant 0 : index
    %c0_601 = arith.constant 0 : index
    %1178 = vector.load %arg13[%c0_600, %c0_601] : memref<2x32xf32, #tpu.memory_space<vmem>>, vector<2x32xf32>
    %1179 = arith.mulf %1169, %1178 : vector<2x32xf32>
    %1180 = arith.mulf %1163, %1171 : vector<2x32xf32>
    %1181 = arith.addf %1179, %1180 : vector<2x32xf32>
    %c0_602 = arith.constant 0 : index
    %c0_603 = arith.constant 0 : index
    %1182 = vector.load %arg13[%c0_602, %c0_603] : memref<2x32xf32, #tpu.memory_space<vmem>>, vector<2x32xf32>
    tpu.vector_store %arg13[%c0_602, %c0_603], %1181 {strides = array<i32>} : memref<2x32xf32, #tpu.memory_space<vmem>>, vector<2x32xf32>,
    %c0_604 = arith.constant 0 : index
    %c0_605 = arith.constant 0 : index
    %1183 = vector.load %arg13[%c0_604, %c0_605] : memref<2x32xf32, #tpu.memory_space<vmem>>, vector<2x32xf32>
    %1184 = math.tanh %1183 : vector<2x32xf32>
    %1185 = arith.mulf %1177, %1184 : vector<2x32xf32>
    %c0_606 = arith.constant 0 : index
    %c0_607 = arith.constant 0 : index
    %1186 = vector.load %arg12[%c0_606, %c0_607] : memref<2x32xf32, #tpu.memory_space<vmem>>, vector<2x32xf32>
    tpu.vector_store %arg12[%c0_606, %c0_607], %1185 {strides = array<i32>} : memref<2x32xf32, #tpu.memory_space<vmem>>, vector<2x32xf32>,
    %c0_i32_608 = arith.constant 0 : i32
    %1187 = arith.cmpi eq, %arg1, %c0_i32_608 : i32
    %1188 = arith.extui %1187 : i1 to i32
    %c0_i32_609 = arith.constant 0 : i32
    %1189 = arith.cmpi ne, %1188, %c0_i32_609 : i32
    scf.if %1189 {
      %c0_610 = arith.constant 0 : index
      %c0_611 = arith.constant 0 : index
      %1190 = vector.load %arg12[%c0_610, %c0_611] : memref<2x32xf32, #tpu.memory_space<vmem>>, vector<2x32xf32>
      %c0_612 = arith.constant 0 : index
      %c0_613 = arith.constant 0 : index
      %1191 = vector.load %arg6[%c0_612, %c0_613] : memref<2x32xf32, #tpu.memory_space<vmem>>, vector<2x32xf32>
      tpu.vector_store %arg6[%c0_612, %c0_613], %1190 {strides = array<i32>} : memref<2x32xf32, #tpu.memory_space<vmem>>, vector<2x32xf32>,
    } else {
    }
    return
  }
  func.func @transform_0(%arg0: i32, %arg1: i32) -> (i32, i32, i32) {
    %c0_i32 = arith.constant 0 : i32
    %c0_i32_0 = arith.constant 0 : i32
    return %arg0, %arg1, %c0_i32 : i32, i32, i32
  }
  func.func @transform_3(%arg0: i32, %arg1: i32) -> (i32, i32) {
    %c0_i32 = arith.constant 0 : i32
    %c0_i32_0 = arith.constant 0 : i32
    %c0_i32_1 = arith.constant 0 : i32
    return %c0_i32, %c0_i32_0 : i32, i32
  }
  func.func @transform_4(%arg0: i32, %arg1: i32) -> (i32, i32) {
    %c0_i32 = arith.constant 0 : i32
    %c0_i32_0 = arith.constant 0 : i32
    return %arg0, %c0_i32 : i32, i32
  }
}

module attributes {stable_mosaic.version = 11 : i64} {
  func.func @kernel(%arg0: i32, %arg1: memref<2x32xf32, #tpu.memory_space<vmem>>, %arg2: memref<32x64xbf16, #tpu.memory_space<vmem>>, %arg3: memref<1x64xf32, #tpu.memory_space<vmem>>, %arg4: memref<64x4xbf16, #tpu.memory_space<vmem>>, %arg5: memref<1x4xf32, #tpu.memory_space<vmem>>, %arg6: memref<2x4xf32, #tpu.memory_space<vmem>>) attributes {dimension_semantics = [#tpu.dimension_semantics<arbitrary>], iteration_bounds = array<i64: 1>, scalar_prefetch = 0 : i64, scratch_operands = 0 : i64, tpu.core_type = #tpu.core_type<tc>, window_params = [{pipeline_mode = #tpu.pipeline_mode<synchronous>, transform_indices = @transform_0, window_bounds = array<i64: 2, 32>}, {pipeline_mode = #tpu.pipeline_mode<synchronous>, transform_indices = @transform_1, window_bounds = array<i64: 32, 64>}, {pipeline_mode = #tpu.pipeline_mode<synchronous>, transform_indices = @transform_2, window_bounds = array<i64: 1, 64>}, {pipeline_mode = #tpu.pipeline_mode<synchronous>, transform_indices = @transform_3, window_bounds = array<i64: 64, 4>}, {pipeline_mode = #tpu.pipeline_mode<synchronous>, transform_indices = @transform_4, window_bounds = array<i64: 1, 4>}, {pipeline_mode = #tpu.pipeline_mode<synchronous>, transform_indices = @transform_5, window_bounds = array<i64: 2, 4>}]} {
    %c0 = arith.constant 0 : index
    %c0_0 = arith.constant 0 : index
    %0 = vector.load %arg1[%c0, %c0_0] : memref<2x32xf32, #tpu.memory_space<vmem>>, vector<2x32xf32>
    %1 = arith.truncf %0 : vector<2x32xf32> to vector<2x32xbf16>
    %c0_1 = arith.constant 0 : index
    %c0_2 = arith.constant 0 : index
    %2 = vector.load %arg2[%c0_1, %c0_2] : memref<32x64xbf16, #tpu.memory_space<vmem>>, vector<32x64xbf16>
    %cst = arith.constant dense<0.000000e+00> : vector<2x64xf32>
    %3 = tpu.matmul %1, %2, %cst {dimension_numbers = #tpu.dot_dimension_numbers<[1], [0], [0], [1], [0, 0, 1, 1], [], []>} : vector<2x32xbf16>, vector<32x64xbf16>, vector<2x64xf32> -> vector<2x64xf32>
    %c0_3 = arith.constant 0 : index
    %c0_4 = arith.constant 0 : index
    %4 = vector.load %arg3[%c0_3, %c0_4] : memref<1x64xf32, #tpu.memory_space<vmem>>, vector<1x64xf32>
    %5 = vector.broadcast %4 : vector<1x64xf32> to vector<2x64xf32>
    %6 = arith.addf %3, %5 : vector<2x64xf32>
    %cst_5 = arith.constant 5.000000e-01 : f32
    %7 = vector.broadcast %cst_5 : f32 to vector<2x64xf32>
    %8 = arith.mulf %7, %6 : vector<2x64xf32>
    %cst_6 = arith.constant 4.471500e-02 : f32
    %9 = vector.broadcast %cst_6 : f32 to vector<2x64xf32>
    %10 = arith.mulf %9, %6 : vector<2x64xf32>
    %11 = arith.mulf %10, %6 : vector<2x64xf32>
    %12 = arith.mulf %11, %6 : vector<2x64xf32>
    %13 = arith.addf %6, %12 : vector<2x64xf32>
    %cst_7 = arith.constant 0.797884583 : f32
    %14 = vector.broadcast %cst_7 : f32 to vector<2x64xf32>
    %15 = arith.mulf %14, %13 : vector<2x64xf32>
    %16 = math.tanh %15 : vector<2x64xf32>
    %cst_8 = arith.constant 1.000000e+00 : f32
    %17 = vector.broadcast %cst_8 : f32 to vector<2x64xf32>
    %18 = arith.addf %17, %16 : vector<2x64xf32>
    %19 = arith.mulf %8, %18 : vector<2x64xf32>
    %20 = arith.truncf %19 : vector<2x64xf32> to vector<2x64xbf16>
    %c0_9 = arith.constant 0 : index
    %c0_10 = arith.constant 0 : index
    %21 = vector.load %arg4[%c0_9, %c0_10] : memref<64x4xbf16, #tpu.memory_space<vmem>>, vector<64x4xbf16>
    %cst_11 = arith.constant dense<0.000000e+00> : vector<2x4xf32>
    %22 = tpu.matmul %20, %21, %cst_11 {dimension_numbers = #tpu.dot_dimension_numbers<[1], [0], [0], [1], [0, 0, 1, 1], [], []>} : vector<2x64xbf16>, vector<64x4xbf16>, vector<2x4xf32> -> vector<2x4xf32>
    %c0_12 = arith.constant 0 : index
    %c0_13 = arith.constant 0 : index
    %23 = vector.load %arg5[%c0_12, %c0_13] : memref<1x4xf32, #tpu.memory_space<vmem>>, vector<1x4xf32>
    %24 = vector.broadcast %23 : vector<1x4xf32> to vector<2x4xf32>
    %25 = arith.addf %22, %24 : vector<2x4xf32>
    %c0_14 = arith.constant 0 : index
    %c0_15 = arith.constant 0 : index
    %26 = vector.load %arg6[%c0_14, %c0_15] : memref<2x4xf32, #tpu.memory_space<vmem>>, vector<2x4xf32>
    tpu.vector_store %arg6[%c0_14, %c0_15], %25 {strides = array<i32>} : memref<2x4xf32, #tpu.memory_space<vmem>>, vector<2x4xf32>,
    return
  }
  func.func @transform_0(%arg0: i32) -> (i32, i32) {
    %c0_i32 = arith.constant 0 : i32
    %c0_i32_0 = arith.constant 0 : i32
    %c0_i32_1 = arith.constant 0 : i32
    return %c0_i32, %c0_i32_0 : i32, i32
  }
  func.func @transform_1(%arg0: i32) -> (i32, i32) {
    %c0_i32 = arith.constant 0 : i32
    %c0_i32_0 = arith.constant 0 : i32
    %c0_i32_1 = arith.constant 0 : i32
    return %c0_i32, %c0_i32_0 : i32, i32
  }
  func.func @transform_2(%arg0: i32) -> (i32, i32) {
    %c0_i32 = arith.constant 0 : i32
    %c0_i32_0 = arith.constant 0 : i32
    %c0_i32_1 = arith.constant 0 : i32
    return %c0_i32, %c0_i32_0 : i32, i32
  }
  func.func @transform_3(%arg0: i32) -> (i32, i32) {
    %c0_i32 = arith.constant 0 : i32
    %c0_i32_0 = arith.constant 0 : i32
    %c0_i32_1 = arith.constant 0 : i32
    return %c0_i32, %c0_i32_0 : i32, i32
  }
  func.func @transform_4(%arg0: i32) -> (i32, i32) {
    %c0_i32 = arith.constant 0 : i32
    %c0_i32_0 = arith.constant 0 : i32
    %c0_i32_1 = arith.constant 0 : i32
    return %c0_i32, %c0_i32_0 : i32, i32
  }
  func.func @transform_5(%arg0: i32) -> (i32, i32) {
    %c0_i32 = arith.constant 0 : i32
    %c0_i32_0 = arith.constant 0 : i32
    %c0_i32_1 = arith.constant 0 : i32
    return %c0_i32, %c0_i32_0 : i32, i32
  }
}

</mosaic_0001>

<bundles_post_ra>
// kernel: conv_rnn_classifier_forward.6
= control target key start
LH: loop header
LB: loop body
LE: loop exit
PB: predicated region body
PF: predicated region fallthrough
CT: control target
= control target key end

     0   :  { %s1404_s24 = smov 0   ;;  %s1582_s0 = inlined_call_operand.vmem [shape: f32[2,32,32], index: 0, kind: input, shape index: {}]   ;;  %s1583_s1 = inlined_call_operand.vmem [shape: bf16[3,32,16], index: 1, kind: input, shape index: {}]   ;;  %s1584_s2 = inlined_call_operand.vmem [shape: bf16[3,16,16], index: 2, kind: input, shape index: {}]   ;;  %s1585_s3 = inlined_call_operand.vmem [shape: f32[1,16], index: 3, kind: input, shape index: {}]   ;;  %s1586_s4 = inlined_call_operand.vmem [shape: f32[1,16], index: 4, kind: input, shape index: {}]   ;;  %s1587_s5 = inlined_call_operand.vmem [shape: f32[1,16], index: 5, kind: input, shape index: {}]   ;;  %s1588_s6 = inlined_call_operand.vmem [shape: f32[1,16], index: 6, kind: input, shape index: {}]   ;;  %s1589_s7 = inlined_call_operand.vmem [shape: f32[2,16,16], index: 7, kind: output, shape index: {}]  }
   0x1 LB: > { %s1192_s25 = sadd.s32 4294967295, %s1361_s24   ;;  %p1196_p0 = scmp.ge.s32.totalorder %s1361_s24, 1  ;;  %s1361_s24 = sphi %s1404_s24, %s17_s24  }
   0x2   : > { %p237_p1 = scmp.lt.s32.totalorder %s1361_s24, 3 }
   0x4   : > { %p238_p2 = pnand %p1196_p0, %p237_p1 }
   0x5   : > { %v1330_v0 = vld [vmem:[%s1583_s1 + $0x10] sm:$0xff] (!%p238_p2)   ;;  %p269_p3 = scmp.lt.s32.totalorder (!%p238_p2), %s1192_s25, 1  ;;  %v284_v1 = vlaneseq (!%p238_p2)  ;;  %v1331_v2 = vld [vmem:[%s1583_s1 + $0x18] sm:$0xff] (!%p238_p2)   ;;  %v1332_v4 = vld [vmem:[%s1583_s1] sm:$0xff] (!%p238_p2)   ;;  %vm348_vm1 = vcmask (!%p238_p2), 261120   ;;  %vm646_vm5 = vcmask (!%p238_p2), 130048  }
   0x6   : > { %241 = sbr.rel (%p238_p2) target bundleno = 603 (0x25b), region = 48  ;;  %1263 = vmatprep.subr.bf16.mxu0 (!%p238_p2), %v1330_v0  ;;  %v1333_v14 = vld [vmem:[%s1583_s1 + $0x8] sm:$0xff] (!%p238_p2)   ;;  %v1334_v23 = vld [vmem:[%s1583_s1 + $0x20] sm:$0xff] (!%p238_p2)   ;;  %vm983_vm6 = vcmask (!%p238_p2), 123904   ;;  %vm1112_vm7 = vcmask (!%p238_p2), 1041409   ;;  %vm1114_vm8 = vcmask (!%p238_p2), 1042434  }
   0x7   : > { %1264 = vmatpush3.bf16.msra.mxu0 (!%p238_p2), %v1330_v0  ;;  %v1420_v3 = vshrl.u32 (!%p238_p2), %v284_v1, 7  ;;  %v1335_v31 = vld [vmem:[%s1583_s1 + $0x28] sm:$0xff] (!%p238_p2)   ;;  %v1477_v38 = vld [vmem:[%s1584_s2] sm:$0xff] (!%p238_p2)   ;;  %vm1116_vm9 = vcmask (!%p238_p2), 1043459   ;;  %vm1118_vm10 = vcmask (!%p238_p2), 1044484   ;;  %vm1120_vm11 = vcmask (!%p238_p2), 1045509  }
   0x8   : > { %1265 = vmatprep.subr.bf16.mxu0 (!%p238_p2), %v1331_v2  ;;  %v1336_v37 = vld [vmem:[%s1584_s2 + $0x8] sm:$0xff] (!%p238_p2)   ;;  %v1221_v39 = vld [vmem:[%s1585_s3] ss:$0 sm:$0xff] (!%p238_p2)  ;;  %vm1122_vm12 = vcmask (!%p238_p2), 1046534   ;;  %vm1124_vm13 = vcmask (!%p238_p2), 1047559  }
   0x9   : > { %vm297_vm0 = vcmp.lt.s32.totalorder (!%p238_p2), %v1420_v3, 1  ;;  %vm289_vm2 = vcmp.eq.s32.totalorder (!%p238_p2), %v1420_v3, 0  ;;  %vm314_vm3 = vcmp.lt.s32.totalorder (!%p238_p2), %v1420_v3, 7  ;;  %v1459_v32 = vadd.s32 (!%p238_p2), 24, %v1420_v3  ;;  %1287 = vmatprep.subr.bf16.mxu1 (!%p238_p2), %v1336_v37  ;;  %v1222_v41 = vld [vmem:[%s1586_s4] ss:$0 sm:$0xff] (!%p238_p2) }
   0xa   : > { %1288 = vmatpush3.bf16.msra.mxu1 (!%p238_p2), %v1336_v37 }
   0xb   : > { %1266 = vmatpush3.bf16.msra.mxu0 (!%p238_p2), %v1331_v2  ;;  %vm309_vm4 = vcmp.eq.s32.totalorder (!%p238_p2), %v1459_v32, 31  ;;  %1293 = vmatprep.subr.bf16.mxu1 (!%p238_p2), %v1477_v38 }
   0xc   : > { %1271 = vmatprep.subr.bf16.mxu0 (!%p238_p2), %v1332_v4 }
   0xd   : > { %s1591_s25 = smov (!%p269_p3, %s1192_s25), 1 }
   0xe   : > { %s1240_s30 = sshll.u32 %s1591_s25, 5 }
   0xf   : > { %s273_s12 = scalar_lea.vmem %s1582_s0, %s1240_s30 }
  0x10   : > { %v280_v5 = vld [vmem:[%s273_s12] sm:$0xff]  ;;  %v281_v6 = vld [vmem:[%s273_s12 + $0x8] sm:$0xff]  ;;  %v282_v7 = vld [vmem:[%s273_s12 + $0x10] sm:$0xff] }
  0x11   : > { %v293_v8 = vrot.slane %v280_v5, 7  ;;  %v294_v9 = vrot.slane %v281_v6, 7  ;;  %v283_v10 = vld [vmem:[%s273_s12 + $0x18] sm:$0xff]  ;;  %v329_v11 = vpack.c.bf16 %v281_v6, %v280_v5  ;;  %v295_v18 = vrot.slane %v282_v7, 7  ;;  %s1241_s12 = sshll.u32 %s1591_s25, 4 }
  0x12   : > { %v296_v12 = vrot.slane %v283_v10, 7  ;;  %v330_v13 = vpack.c.bf16 %v283_v10, %v282_v7  ;;  %v310_v20 = vrot.slane %v280_v5, 1  ;;  %v311_v21 = vrot.slane %v281_v6, 1  ;;  %s278_s15 = scalar_lea.vmem %s1589_s7, %s1241_s12 }
  0x13   : > { %v300_v15 = vsel %vm297_vm0, %v293_v8, %v294_v9  ;;  %1267 = vmatprep.mubr.msk.bf16.mxu0 %vm348_vm1, %v329_v11  ;;  %v312_v22 = vrot.slane %v282_v7, 1  ;;  %v299_v25 = vsel %vm297_vm0, %v294_v9, %v295_v18  ;;  %v313_v30 = vrot.slane %v283_v10, 1 }
  0x14   : > { %v301_v16 = vsel %vm297_vm0, %v296_v12, %v293_v8  ;;  %1268 = vmatmul.mubr.msk.bf16.vlgmr.msra.gmra.mrb[0].mxu0 %vm348_vm1, %v330_v13  ;;  %v298_v24 = vsel %vm297_vm0, %v295_v18, %v296_v12  ;;  %v317_v27 = vsel %vm314_vm3, %v310_v20, %v311_v21 }
  0x15   : > { %v302_v17 = vsel %vm289_vm2, 0.0, %v301_v16  ;;  %1272 = vmatpush3.bf16.msra.mxu0 %v1332_v4  ;;  %v316_v26 = vsel %vm314_vm3, %v311_v21, %v312_v22  ;;  %v324_v28 = vpack.c.bf16 %v298_v24, %v299_v25  ;;  %v318_v33 = vsel %vm314_vm3, %v313_v30, %v310_v20 }
  0x16   : > { %v323_v19 = vpack.c.bf16 %v300_v15, %v302_v17  ;;  %1273 = vmatprep.subr.bf16.mxu0 %v1333_v14  ;;  %v471_v29 = vpack.c.bf16 %v316_v26, %v317_v27  ;;  %v315_v34 = vsel %vm314_vm3, %v312_v22, %v313_v30  ;;  %v322_v35 = vsel %vm309_vm4, 0.0, %v318_v33  ;;  %v1338_v33 = vld [vmem:[%s1584_s2 + $0x10] sm:$0xff]  }
  0x17   : > { %v472_v36 = vpack.c.bf16 %v322_v35, %v315_v34 }
  0x18   : > { %1275 = vmatprep.mubr.msk.bf16.mxu0 %vm348_vm1, %v323_v19 }
  0x19   : > { %1274 = vmatpush3.bf16.msra.mxu0 %v1333_v14 }
  0x1a   : > { %1279 = vmatprep.subr.bf16.mxu0 %v1334_v23 }
  0x20   : > { %1276 = vmatmul.mubr.msk.bf16.vlgmr.msra.gmra.mrb[0].mxu0 %vm348_vm1, %v324_v28 }
  0x21   : > { %1280 = vmatpush3.bf16.msra.mxu0 %v1334_v23  ;;  %1283 = vmatprep.mubr.msk.bf16.mxu0 %vm348_vm1, %v471_v29 }
  0x22   : > { %1281 = vmatprep.subr.bf16.mxu0 %v1335_v31 }
  0x25   : > { %1282 = vmatpush3.bf16.msra.mxu0 %v1335_v31 }
  0x2c   : > { %1284 = vmatmul.mubr.msk.bf16.vlgmr.msra.gmra.mrb[0].mxu0 %vm348_vm1, %v472_v36 }
  0xff   : > { %v1285_v40 = vpop.f32.mrb[0].mxu0 }
 0x100   : > { %v558_v42 = vmul.f32 %v1285_v40, %v1221_v39  ;;  %v530_v43 = vpop.f32.mrb[1].mxu0 }
 0x101   : > { %v556_v44 = vmul.f32 %v1221_v39, %v530_v43  ;;  %v1286_v45 = vpop.f32.mrb[2].mxu0 }
 0x102   : > { %v569_v46 = vadd.f32 %v1222_v41, %v558_v42  ;;  %v559_v47 = vmul.f32 %v1286_v45, %v1221_v39  ;;  %v533_v48 = vpop.f32.mrb[3].mxu0 }
 0x103   : > { %v567_v49 = vadd.f32 %v1222_v41, %v556_v44  ;;  %v557_v50 = vmul.f32 %v1221_v39, %v533_v48 }
 0x104   : > { %v577_v51 = vmul.f32 0.044715, %v569_v46  ;;  %v570_v52 = vadd.f32 %v1222_v41, %v559_v47  ;;  %v573_v22 = vmul.f32 0.5, %v569_v46 }
 0x105   : > { %v575_v53 = vmul.f32 0.044715, %v567_v49  ;;  %v568_v54 = vadd.f32 %v1222_v41, %v557_v50  ;;  %v571_v13 = vmul.f32 0.5, %v567_v49 }
 0x106   : > { %v581_v55 = vmul.f32 %v577_v51, %v569_v46  ;;  %v578_v56 = vmul.f32 0.044715, %v570_v52  ;;  %v574_v16 = vmul.f32 0.5, %v570_v52 }
 0x107   : > { %v579_v57 = vmul.f32 %v575_v53, %v567_v49  ;;  %v576_v58 = vmul.f32 0.044715, %v568_v54  ;;  %v572_v19 = vmul.f32 0.5, %v568_v54  ;;  %v1236_v53 = vld [vmem:[%s1587_s5] ss:$0 sm:$0xff] }
 0x108   : > { %v585_v59 = vmul.f32 %v581_v55, %v569_v46  ;;  %v582_v60 = vmul.f32 %v578_v56, %v570_v52  ;;  %v1237_v56 = vld [vmem:[%s1588_s6] ss:$0 sm:$0xff] }
 0x109   : > { %v583_v61 = vmul.f32 %v579_v57, %v567_v49  ;;  %v580_v62 = vmul.f32 %v576_v58, %v568_v54 }
 0x10a   : > { %v589_v63 = vadd.f32 %v585_v59, %v569_v46  ;;  %v586_v0 = vmul.f32 %v582_v60, %v570_v52 }
 0x10b   : > { %v587_v1 = vadd.f32 %v583_v61, %v567_v49  ;;  %v584_v2 = vmul.f32 %v580_v62, %v568_v54 }
 0x10c   : > { %v593_v4 = vmul.f32 0.7978846, %v589_v63  ;;  %v590_v5 = vadd.f32 %v586_v0, %v570_v52 }
 0x10d   : > { %v588_v6 = vadd.f32 %v584_v2, %v568_v54  ;;  %v591_v7 = vmul.f32 0.7978846, %v587_v1 }
 0x10e   : > { %1339 = vtanh.f32 %v593_v4  ;;  %v594_v8 = vmul.f32 0.7978846, %v590_v5 }
 0x10f   : > { %v592_v9 = vmul.f32 0.7978846, %v588_v6  ;;  %1341 = vtanh.f32 %v591_v7 }
 0x110   : > { %1343 = vtanh.f32 %v594_v8 }
 0x111   : > { %1345 = vtanh.f32 %v592_v9 }
 0x118   : > { %v1340_v10 = vpop.eup %1339 }
 0x119   : > { %v1342_v11 = vpop.eup %1341  ;;  %v601_v17 = vadd.f32 1.0, %v1340_v10 }
 0x11a   : > { %v1344_v12 = vpop.eup %1343  ;;  %v599_v14 = vadd.f32 1.0, %v1342_v11 }
 0x11b   : > { %v1346_v15 = vpop.eup %1345  ;;  %v602_v18 = vadd.f32 1.0, %v1344_v12  ;;  %v605_v26 = vmul.f32 %v601_v17, %v573_v22 }
 0x11c   : > { %v600_v20 = vadd.f32 1.0, %v1346_v15  ;;  %v603_v21 = vmul.f32 %v599_v14, %v571_v13 }
 0x11d   : > { %v606_v23 = vmul.f32 %v602_v18, %v574_v16  ;;  %v609_v39 = vrot.slane %v605_v26, 7  ;;  %v621_v41 = vrot.slane %v605_v26, 1 }
 0x11e   : > { %v604_v24 = vmul.f32 %v600_v20, %v572_v19  ;;  %v607_v25 = vrot.slane %v603_v21, 7  ;;  %v619_v40 = vrot.slane %v603_v21, 1 }
 0x11f   : > { %v610_v27 = vrot.slane %v606_v23, 7  ;;  %v636_v30 = vpack.c.bf16 %v606_v23, %v605_v26  ;;  %v622_v47 = vrot.slane %v606_v23, 1 }
 0x120   : > { %v635_v28 = vpack.c.bf16 %v604_v24, %v603_v21  ;;  %v608_v29 = vrot.slane %v604_v24, 7  ;;  %v620_v37 = vrot.slane %v604_v24, 1 }
 0x121   : > { %v614_v31 = vsel %vm297_vm0, %v610_v27, %v607_v25  ;;  %v611_v42 = vsel %vm297_vm0, %v609_v39, %v610_v27  ;;  %v626_v48 = vsel %vm314_vm3, %v622_v47, %v619_v40  ;;  %v623_v49 = vsel %vm314_vm3, %v621_v41, %v622_v47 }
 0x122   : > { %1289 = vmatprep.mubr.msk.bf16.mxu1 %vm646_vm5, %v635_v28  ;;  %v613_v34 = vsel %vm297_vm0, %v607_v25, %v608_v29  ;;  %v615_v35 = vsel %vm289_vm2, 0.0, %v614_v31  ;;  %v612_v43 = vsel %vm297_vm0, %v608_v29, %v609_v39  ;;  %v624_v44 = vsel %vm314_vm3, %v620_v37, %v621_v41 }
 0x123   : > { %1290 = vmatmul.mubr.msk.bf16.vlgmr.msra.gmra.mrb[0].mxu1 %vm646_vm5, %v636_v30  ;;  %v631_v36 = vpack.c.bf16 %v613_v34, %v615_v35  ;;  %v625_v45 = vsel %vm314_vm3, %v619_v40, %v620_v37  ;;  %v630_v50 = vsel %vm309_vm4, 0.0, %v626_v48 }
 0x124   : > { %1294 = vmatpush3.bf16.msra.mxu1 %v1477_v38  ;;  %v632_v38 = vpack.c.bf16 %v611_v42, %v612_v43  ;;  %v763_v46 = vpack.c.bf16 %v624_v44, %v625_v45  ;;  %v764_v51 = vpack.c.bf16 %v630_v50, %v623_v49 }
 0x125   : > { %1295 = vmatprep.mubr.msk.bf16.mxu1 %vm646_vm5, %v631_v36  ;;  %1299 = vmatprep.subr.bf16.mxu1 %v1338_v33 }
 0x12f   : > { %1296 = vmatmul.mubr.msk.bf16.vlgmr.msra.gmra.mrb[0].mxu1 %vm646_vm5, %v632_v38 }
 0x130   : > { %1300 = vmatpush3.bf16.msra.mxu1 %v1338_v33  ;;  %1301 = vmatprep.mubr.msk.bf16.mxu1 %vm646_vm5, %v763_v46 }
 0x13b   : > { %1302 = vmatmul.mubr.msk.bf16.vlgmr.msra.gmra.mrb[0].mxu1 %vm646_vm5, %v764_v51 }
 0x20e   : > { %v1303_v52 = vpop.f32.mrb[0].mxu1 }
 0x20f   : > { %v835_v54 = vadd.f32 %v1303_v52, %v605_v26  ;;  %v814_v55 = vpop.f32.mrb[1].mxu1  ;;  %v1363_v26 = vmov 1983009808  }
 0x210   : > { %v833_v57 = vadd.f32 %v814_v55, %v603_v21  ;;  %v1304_v58 = vpop.f32.mrb[2].mxu1  ;;  %v901_v27 = vunpack.c.l.s4 %v1363_v26 }
 0x211   : > { %v846_v59 = vmul.f32 %v1236_v53, %v835_v54  ;;  %v836_v60 = vadd.f32 %v1304_v58, %v606_v23  ;;  %v817_v32 = vpop.f32.mrb[3].mxu1 }
 0x212   : > { %v844_v61 = vmul.f32 %v1236_v53, %v833_v57  ;;  %v834_v62 = vadd.f32 %v817_v32, %v604_v24  ;;  %v902_v28 = vunpack.c.0.s8 %v901_v27 }
 0x213   : > { %v857_v63 = vadd.f32 %v1237_v56, %v846_v59  ;;  %v847_v0 = vmul.f32 %v1236_v53, %v836_v60 }
 0x214   : > { %v855_v1 = vadd.f32 %v1237_v56, %v844_v61  ;;  %v845_v2 = vmul.f32 %v1236_v53, %v834_v62  ;;  %v1523_v31 = vsub.s32 %v902_v28, %v1420_v3 }
 0x215   : > { %v865_v4 = vmul.f32 0.044715, %v857_v63  ;;  %v858_v5 = vadd.f32 %v1237_v56, %v847_v0  ;;  %v861_v33 = vmul.f32 0.5, %v857_v63 }
 0x216   : > { %v863_v6 = vmul.f32 0.044715, %v855_v1  ;;  %v856_v7 = vadd.f32 %v1237_v56, %v845_v2  ;;  %v859_v36 = vmul.f32 0.5, %v855_v1 }
 0x217   : > { %v869_v8 = vmul.f32 %v865_v4, %v857_v63  ;;  %v866_v9 = vmul.f32 0.044715, %v858_v5  ;;  %v862_v41 = vmul.f32 0.5, %v858_v5 }
 0x218   : > { %v867_v10 = vmul.f32 %v863_v6, %v855_v1  ;;  %v864_v11 = vmul.f32 0.044715, %v856_v7  ;;  %v860_v44 = vmul.f32 0.5, %v856_v7 }
 0x219   : > { %v873_v12 = vmul.f32 %v869_v8, %v857_v63  ;;  %v870_v13 = vmul.f32 %v866_v9, %v858_v5 }
 0x21a   : > { %v871_v14 = vmul.f32 %v867_v10, %v855_v1  ;;  %v868_v15 = vmul.f32 %v864_v11, %v856_v7 }
 0x21b   : > { %v877_v16 = vadd.f32 %v873_v12, %v857_v63  ;;  %v874_v17 = vmul.f32 %v870_v13, %v858_v5 }
 0x21c   : > { %v875_v18 = vadd.f32 %v871_v14, %v855_v1  ;;  %v872_v19 = vmul.f32 %v868_v15, %v856_v7 }
 0x21d   : > { %v881_v20 = vmul.f32 0.7978846, %v877_v16  ;;  %v878_v21 = vadd.f32 %v874_v17, %v858_v5 }
 0x21e   : > { %v879_v22 = vmul.f32 0.7978846, %v875_v18  ;;  %v876_v23 = vadd.f32 %v872_v19, %v856_v7 }
 0x21f   : > { %1347 = vtanh.f32 %v881_v20  ;;  %v882_v24 = vmul.f32 0.7978846, %v878_v21 }
 0x220   : > { %1349 = vtanh.f32 %v879_v22  ;;  %v880_v25 = vmul.f32 0.7978846, %v876_v23 }
 0x221   : > { %1351 = vtanh.f32 %v882_v24 }
 0x222   : > { %1353 = vtanh.f32 %v880_v25 }
 0x229   : > { %v1348_v29 = vpop.eup %1347 }
 0x22a   : > { %v1350_v30 = vpop.eup %1349  ;;  %v889_v34 = vadd.f32 1.0, %v1348_v29 }
 0x22b   : > { %v1352_v35 = vpop.eup %1351  ;;  %v887_v37 = vadd.f32 1.0, %v1350_v30 }
 0x22c   : > { %v1354_v39 = vpop.eup %1353  ;;  %v893_v40 = vmul.f32 %v889_v34, %v861_v33  ;;  %v890_v42 = vadd.f32 1.0, %v1352_v35 }
 0x22d   : > { %v891_v43 = vmul.f32 %v887_v37, %v859_v36  ;;  %v888_v45 = vadd.f32 1.0, %v1354_v39 }
 0x22e   : > { %v933_v38 = vcombine.high %v893_v40, %v893_v40  ;;  %v940_v46 = vrot.slane %v893_v40, %v1523_v31  ;;  %v1526_v47 = vmul.f32 %v890_v42, %v862_v41 }
 0x22f   : > { %v899_v3 = vcombine.high %v891_v43, %v891_v43  ;;  %v906_v48 = vrot.slane %v891_v43, %v1523_v31  ;;  %v1529_v49 = vmul.f32 %v888_v45, %v860_v44 }
 0x230   : > { %v947_v50 = vrot.slane %v933_v38, %v1523_v31  ;;  %v948_v51 = vcombine.high %v940_v46, %v940_v46  ;;  %v1040_v52 = vsel %vm983_vm6, %v940_v46, -inf  ;;  %v950_v53 = vcombine.high %v1526_v47, %v1526_v47 }
 0x231   : > { %v1041_v54 = vrot.slane %v1040_v52, 4  ;;  %v913_v55 = vrot.slane %v899_v3, %v1523_v31  ;;  %v914_v56 = vcombine.high %v906_v48, %v906_v48  ;;  %v984_v57 = vsel %vm983_vm6, %v906_v48, -inf }
 0x232   : > { %v949_v58 = vcombine.high %v947_v50, %v947_v50  ;;  %v1047_v59 = vsel %vm983_vm6, %v948_v51, -inf  ;;  %v1054_v60 = vsel %vm983_vm6, %v947_v50, -inf  ;;  %v985_v32 = vrot.slane %v984_v57, 4 }
 0x233   : > { %v1042_v61 = vmax.f32 %v1040_v52, %v1041_v54  ;;  %v1048_v62 = vrot.slane %v1047_v59, 4  ;;  %v1055_v63 = vrot.slane %v1054_v60, 4  ;;  %v915_v0 = vcombine.high %v913_v55, %v913_v55 }
 0x234   : > { %v1061_v1 = vsel %vm983_vm6, %v949_v58, -inf  ;;  %v986_v2 = vmax.f32 %v984_v57, %v985_v32  ;;  %v991_v4 = vsel %vm983_vm6, %v914_v56, -inf  ;;  %v998_v5 = vsel %vm983_vm6, %v913_v55, -inf }
 0x235   : > { %v1043_v6 = vrot.slane %v1042_v61, 2  ;;  %v1049_v7 = vmax.f32 %v1047_v59, %v1048_v62  ;;  %v1056_v8 = vmax.f32 %v1054_v60, %v1055_v63  ;;  %v1062_v9 = vrot.slane %v1061_v1, 4 }
 0x236   : > { %v987_v10 = vrot.slane %v986_v2, 2  ;;  %v992_v11 = vrot.slane %v991_v4, 4  ;;  %v999_v12 = vrot.slane %v998_v5, 4  ;;  %v1005_v13 = vsel %vm983_vm6, %v915_v0, -inf }
 0x237   : > { %v1044_v14 = vmax.f32 %v1042_v61, %v1043_v6  ;;  %v1050_v15 = vrot.slane %v1049_v7, 2  ;;  %v1057_v16 = vrot.slane %v1056_v8, 2  ;;  %v1063_v17 = vmax.f32 %v1061_v1, %v1062_v9 }
 0x238   : > { %v988_v18 = vmax.f32 %v986_v2, %v987_v10  ;;  %v993_v19 = vmax.f32 %v991_v4, %v992_v11  ;;  %v1000_v20 = vmax.f32 %v998_v5, %v999_v12  ;;  %v1006_v21 = vrot.slane %v1005_v13, 4 }
 0x239   : > { %v1045_v22 = vrot.slane %v1044_v14, 1  ;;  %v1051_v23 = vmax.f32 %v1049_v7, %v1050_v15  ;;  %v1058_v24 = vmax.f32 %v1056_v8, %v1057_v16  ;;  %v1064_v25 = vrot.slane %v1063_v17, 2 }
 0x23a   : > { %v989_v26 = vrot.slane %v988_v18, 1  ;;  %v994_v27 = vrot.slane %v993_v19, 2  ;;  %v1001_v28 = vrot.slane %v1000_v20, 2  ;;  %v1007_v29 = vmax.f32 %v1005_v13, %v1006_v21 }
 0x23b   : > { %v1046_v30 = vmax.f32 %v1044_v14, %v1045_v22  ;;  %v1052_v33 = vrot.slane %v1051_v23, 1  ;;  %v1059_v34 = vrot.slane %v1058_v24, 1  ;;  %v1065_v35 = vmax.f32 %v1063_v17, %v1064_v25 }
 0x23c   : > { %v990_v36 = vmax.f32 %v988_v18, %v989_v26  ;;  %v995_v37 = vmax.f32 %v993_v19, %v994_v27  ;;  %v1002_v39 = vmax.f32 %v1000_v20, %v1001_v28  ;;  %v1008_v40 = vrot.slane %v1007_v29, 2 }
 0x23d   : > { %v1053_v41 = vmax.f32 %v1051_v23, %v1052_v33  ;;  %v1060_v42 = vmax.f32 %v1058_v24, %v1059_v34  ;;  %v1066_v43 = vrot.slane %v1065_v35, 1  ;;  %v957_v44 = vrot.slane %v1526_v47, %v1523_v31 }
 0x23e   : > { %v996_v45 = vrot.slane %v995_v37, 1  ;;  %v1003_v38 = vrot.slane %v1002_v39, 1  ;;  %v1009_v46 = vmax.f32 %v1007_v29, %v1008_v40  ;;  %v964_v3 = vrot.slane %v950_v53, %v1523_v31 }
 0x23f   : > { %v1067_v48 = vmax.f32 %v1065_v35, %v1066_v43  ;;  %v1126_v50 = vsel %vm1112_vm7, %v1053_v41, %v1046_v30  ;;  %v965_v51 = vcombine.high %v957_v44, %v957_v44  ;;  %v1068_v52 = vsel %vm983_vm6, %v957_v44, -inf }
 0x240   : > { %v1127_v54 = vsel %vm1114_vm8, %v1060_v42, %v1126_v50  ;;  %v997_v55 = vmax.f32 %v995_v37, %v996_v45  ;;  %v1004_v56 = vmax.f32 %v1002_v39, %v1003_v38  ;;  %v1010_v57 = vrot.slane %v1009_v46, 1 }
 0x241   : > { %v966_v58 = vcombine.high %v964_v3, %v964_v3  ;;  %v1069_v59 = vrot.slane %v1068_v52, 4  ;;  %v1075_v47 = vsel %vm983_vm6, %v965_v51, -inf  ;;  %v1082_v60 = vsel %vm983_vm6, %v964_v3, -inf }
 0x242   : > { %v1011_v32 = vmax.f32 %v1009_v46, %v1010_v57  ;;  %v1113_v53 = vsel %vm1112_vm7, %v997_v55, %v990_v36  ;;  %v1076_v61 = vrot.slane %v1075_v47, 4  ;;  %v1083_v62 = vrot.slane %v1082_v60, 4 }
 0x243   : > { %v1115_v63 = vsel %vm1114_vm8, %v1004_v56, %v1113_v53  ;;  %v1070_v0 = vmax.f32 %v1068_v52, %v1069_v59  ;;  %v1089_v1 = vsel %vm983_vm6, %v966_v58, -inf  ;;  %v1128_v2 = vsel %vm1116_vm9, %v1067_v48, %v1127_v54 }
 0x244   : > { %v1077_v4 = vmax.f32 %v1075_v47, %v1076_v61  ;;  %v1084_v5 = vmax.f32 %v1082_v60, %v1083_v62  ;;  %v1090_v6 = vrot.slane %v1089_v1, 4  ;;  %v916_v7 = vcombine.high %v1529_v49, %v1529_v49 }
 0x245   : > { %v1071_v8 = vrot.slane %v1070_v0, 2  ;;  %v923_v9 = vrot.slane %v1529_v49, %v1523_v31  ;;  %v1117_v10 = vsel %vm1116_vm9, %v1011_v32, %v1115_v63 }
 0x246   : > { %v1078_v11 = vrot.slane %v1077_v4, 2  ;;  %v1085_v12 = vrot.slane %v1084_v5, 2  ;;  %v1091_v13 = vmax.f32 %v1089_v1, %v1090_v6  ;;  %v930_v14 = vrot.slane %v916_v7, %v1523_v31 }
 0x247   : > { %v1072_v15 = vmax.f32 %v1070_v0, %v1071_v8  ;;  %v931_v16 = vcombine.high %v923_v9, %v923_v9  ;;  %v1012_v17 = vsel %vm983_vm6, %v923_v9, -inf }
 0x248   : > { %v1079_v18 = vmax.f32 %v1077_v4, %v1078_v11  ;;  %v1086_v19 = vmax.f32 %v1084_v5, %v1085_v12  ;;  %v1092_v20 = vrot.slane %v1091_v13, 2  ;;  %v932_v21 = vcombine.high %v930_v14, %v930_v14 }
 0x249   : > { %v1073_v22 = vrot.slane %v1072_v15, 1  ;;  %v1013_v23 = vrot.slane %v1012_v17, 4  ;;  %v1019_v49 = vsel %vm983_vm6, %v931_v16, -inf  ;;  %v1026_v24 = vsel %vm983_vm6, %v930_v14, -inf }
 0x24a   : > { %v1080_v25 = vrot.slane %v1079_v18, 1  ;;  %v1087_v26 = vrot.slane %v1086_v19, 1  ;;  %v1093_v27 = vmax.f32 %v1091_v13, %v1092_v20  ;;  %v1020_v31 = vrot.slane %v1019_v49, 4 }
 0x24b   : > { %v1074_v28 = vmax.f32 %v1072_v15, %v1073_v22  ;;  %v1014_v29 = vmax.f32 %v1012_v17, %v1013_v23  ;;  %v1027_v30 = vrot.slane %v1026_v24, 4  ;;  %v1033_v33 = vsel %vm983_vm6, %v932_v21, -inf }
 0x24c   : > { %v1081_v34 = vmax.f32 %v1079_v18, %v1080_v25  ;;  %v1088_v35 = vmax.f32 %v1086_v19, %v1087_v26  ;;  %v1094_v36 = vrot.slane %v1093_v27, 1  ;;  %v1021_v37 = vmax.f32 %v1019_v49, %v1020_v31 }
 0x24d   : > { %v1129_v39 = vsel %vm1118_vm10, %v1074_v28, %v1128_v2  ;;  %v1015_v40 = vrot.slane %v1014_v29, 2  ;;  %v1028_v41 = vmax.f32 %v1026_v24, %v1027_v30  ;;  %v1034_v42 = vrot.slane %v1033_v33, 4 }
 0x24e   : > { %v1095_v43 = vmax.f32 %v1093_v27, %v1094_v36  ;;  %v1130_v44 = vsel %vm1120_vm11, %v1081_v34, %v1129_v39  ;;  %v1022_v45 = vrot.slane %v1021_v37, 2 }
 0x24f   : > { %v1131_v38 = vsel %vm1122_vm12, %v1088_v35, %v1130_v44  ;;  %v1016_v46 = vmax.f32 %v1014_v29, %v1015_v40  ;;  %v1029_v3 = vrot.slane %v1028_v41, 2  ;;  %v1035_v48 = vmax.f32 %v1033_v33, %v1034_v42 }
 0x250   : > { %v1132_v50 = vsel %vm1124_vm13, %v1095_v43, %v1131_v38  ;;  %v1023_v51 = vmax.f32 %v1021_v37, %v1022_v45 }
 0x251   : > { %1136 = vst.msk [vmem:[%s278_s15 + $0x8] sm:$0xff] %vm646_vm5, %v1132_v50  ;;  %v1017_v52 = vrot.slane %v1016_v46, 1  ;;  %v1030_v54 = vmax.f32 %v1028_v41, %v1029_v3  ;;  %v1036_v55 = vrot.slane %v1035_v48, 2 }
 0x252   : > { %v1024_v56 = vrot.slane %v1023_v51, 1 }
 0x253   : > { %v1018_v57 = vmax.f32 %v1016_v46, %v1017_v52  ;;  %v1031_v58 = vrot.slane %v1030_v54, 1  ;;  %v1037_v59 = vmax.f32 %v1035_v48, %v1036_v55 }
 0x254   : > { %v1025_v47 = vmax.f32 %v1023_v51, %v1024_v56 }
 0x255   : > { %v1032_v60 = vmax.f32 %v1030_v54, %v1031_v58  ;;  %v1038_v32 = vrot.slane %v1037_v59, 1  ;;  %v1119_v53 = vsel %vm1118_vm10, %v1018_v57, %v1117_v10 }
 0x256   : > { %v1121_v61 = vsel %vm1120_vm11, %v1025_v47, %v1119_v53 }
 0x257   : > { %v1039_v62 = vmax.f32 %v1037_v59, %v1038_v32  ;;  %v1123_v63 = vsel %vm1122_vm12, %v1032_v60, %v1121_v61 }
 0x259   : > { %v1125_v0 = vsel %vm1124_vm13, %v1039_v62, %v1123_v63 }
 0x25a   : > { %1135 = vst.msk [vmem:[%s278_s15] sm:$0xff] %vm646_vm5, %v1125_v0 }
 0x25b PF: > { %s17_s24 = sadd.s32 1, %s1361_s24  }
 0x25c   : > { %p14_p4 = scmp.ge.s32.totalorder %s17_s24, 4  }
 0x25e   :  { %16 = sbr.rel (!%p14_p4) target bundleno = 1 (0x1), region = 82 }

// kernel: conv_rnn_classifier_forward.5
= control target key start
LH: loop header
LB: loop body
LE: loop exit
PB: predicated region body
PF: predicated region fallthrough
CT: control target
= control target key end

     0   :  { %s1164_s24 = smov 0   ;;  %s1296_s0 = inlined_call_operand.vmem [shape: f32[2,32,16], index: 0, kind: input, shape index: {}]   ;;  %s1297_s1 = inlined_call_operand.vmem [shape: bf16[3,16,32], index: 1, kind: input, shape index: {}]   ;;  %s1298_s2 = inlined_call_operand.vmem [shape: bf16[3,32,32], index: 2, kind: input, shape index: {}]   ;;  %s1299_s3 = inlined_call_operand.vmem [shape: f32[1,32], index: 3, kind: input, shape index: {}]   ;;  %s1300_s4 = inlined_call_operand.vmem [shape: f32[1,32], index: 4, kind: input, shape index: {}]   ;;  %s1301_s5 = inlined_call_operand.vmem [shape: f32[1,32], index: 5, kind: input, shape index: {}]   ;;  %s1302_s6 = inlined_call_operand.vmem [shape: f32[1,32], index: 6, kind: input, shape index: {}]   ;;  %s1303_s7 = inlined_call_operand.vmem [shape: f32[2,32,32], index: 7, kind: output, shape index: {}]  }
   0x1 LB: > { %s954_s25 = sadd.s32 4294967295, %s1122_s24   ;;  %p958_p0 = scmp.ge.s32.totalorder %s1122_s24, 1  ;;  %s1122_s24 = sphi %s1164_s24, %s17_s24  }
   0x2   : > { %p237_p1 = scmp.lt.s32.totalorder %s1122_s24, 3 }
   0x4   : > { %p238_p2 = pnand %p958_p0, %p237_p1 }
   0x5   : > { %v1091_v0 = vld [vmem:[%s1297_s1 + $0x8] sm:$0xff] (!%p238_p2)   ;;  %p269_p3 = scmp.lt.s32.totalorder (!%p238_p2), %s954_s25, 1  ;;  %v284_v1 = vlaneseq (!%p238_p2)  ;;  %v1092_v2 = vld [vmem:[%s1297_s1] sm:$0xff] (!%p238_p2)   ;;  %vm338_vm1 = vcmask (!%p238_p2), 130048   ;;  %v1093_v14 = vld [vmem:[%s1297_s1 + $0x10] sm:$0xff] (!%p238_p2)   ;;  %vm632_vm5 = vcmask (!%p238_p2), 261120  }
   0x6   : > { %241 = sbr.rel (%p238_p2) target bundleno = 562 (0x232), region = 48  ;;  %1025 = vmatprep.subr.bf16.mxu0 (!%p238_p2), %v1091_v0  ;;  %v1094_v34 = vld [vmem:[%s1298_s2 + $0x10] sm:$0xff] (!%p238_p2)   ;;  %v1095_v35 = vld [vmem:[%s1298_s2 + $0x18] sm:$0xff] (!%p238_p2)   ;;  %v1233_v36 = vld [vmem:[%s1298_s2] sm:$0xff] (!%p238_p2)  }
   0x7   : > { %v1180_v3 = vshrl.u32 (!%p238_p2), %v284_v1, 7  ;;  %1026 = vmatpush3.bf16.msra.mxu0 (!%p238_p2), %v1091_v0  ;;  %1043 = vmatprep.subr.bf16.mxu1 (!%p238_p2), %v1094_v34  ;;  %v976_v37 = vld [vmem:[%s1299_s3] ss:$0 sm:$0xff] (!%p238_p2) }
   0x8   : > { %1031 = vmatprep.subr.bf16.mxu0 (!%p238_p2), %v1092_v2  ;;  %1044 = vmatpush3.bf16.msra.mxu1 (!%p238_p2), %v1094_v34  ;;  %v977_v39 = vld [vmem:[%s1300_s4] ss:$0 sm:$0xff] (!%p238_p2) }
   0x9   : > { %vm297_vm0 = vcmp.lt.s32.totalorder (!%p238_p2), %v1180_v3, 1  ;;  %vm289_vm2 = vcmp.eq.s32.totalorder (!%p238_p2), %v1180_v3, 0  ;;  %vm314_vm3 = vcmp.lt.s32.totalorder (!%p238_p2), %v1180_v3, 7  ;;  %v1212_v29 = vadd.s32 (!%p238_p2), 24, %v1180_v3  ;;  %1045 = vmatprep.subr.bf16.mxu1 (!%p238_p2), %v1095_v35 }
   0xb   : > { %vm309_vm4 = vcmp.eq.s32.totalorder (!%p238_p2), %v1212_v29, 31 }
   0xc   : > { %1046 = vmatpush3.bf16.msra.mxu1 (!%p238_p2), %v1095_v35  ;;  %v1098_v35 = vld [vmem:[%s1298_s2 + $0x20] sm:$0xff] (!%p238_p2)  }
   0xd   : > { %s1305_s25 = smov (!%p269_p3, %s954_s25), 1  ;;  %1051 = vmatprep.subr.bf16.mxu1 %v1233_v36 }
   0xe   : > { %s1002_s30 = sshll.u32 %s1305_s25, 5 }
   0xf   : > { %s273_s10 = scalar_lea.vmem %s1296_s0, %s1002_s30  ;;  %s278_s15 = scalar_lea.vmem %s1303_s7, %s1002_s30 }
  0x10   : > { %v280_v4 = vld [vmem:[%s273_s10] sm:$0xff]  ;;  %v281_v5 = vld [vmem:[%s273_s10 + $0x8] sm:$0xff]  ;;  %v282_v6 = vld [vmem:[%s273_s10 + $0x10] sm:$0xff] }
  0x11   : > { %v293_v7 = vrot.slane %v280_v4, 7  ;;  %v294_v8 = vrot.slane %v281_v5, 7  ;;  %v283_v9 = vld [vmem:[%s273_s10 + $0x18] sm:$0xff]  ;;  %v327_v10 = vpack.c.bf16 %v281_v5, %v280_v4  ;;  %v295_v17 = vrot.slane %v282_v6, 7 }
  0x12   : > { %v296_v11 = vrot.slane %v283_v9, 7  ;;  %v328_v12 = vpack.c.bf16 %v283_v9, %v282_v6  ;;  %v310_v19 = vrot.slane %v280_v4, 1  ;;  %v311_v20 = vrot.slane %v281_v5, 1 }
  0x13   : > { %v300_v13 = vsel %vm297_vm0, %v293_v7, %v294_v8  ;;  %1027 = vmatprep.mubr.msk.bf16.mxu0 %vm338_vm1, %v327_v10  ;;  %v312_v21 = vrot.slane %v282_v6, 1  ;;  %v299_v23 = vsel %vm297_vm0, %v294_v8, %v295_v17  ;;  %v313_v28 = vrot.slane %v283_v9, 1 }
  0x14   : > { %v301_v15 = vsel %vm297_vm0, %v296_v11, %v293_v7  ;;  %1028 = vmatmul.mubr.msk.bf16.vlgmr.msra.gmra.mrb[0].mxu0 %vm338_vm1, %v328_v12  ;;  %v298_v22 = vsel %vm297_vm0, %v295_v17, %v296_v11  ;;  %v317_v25 = vsel %vm314_vm3, %v310_v19, %v311_v20 }
  0x15   : > { %v302_v16 = vsel %vm289_vm2, 0.0, %v301_v15  ;;  %1032 = vmatpush3.bf16.msra.mxu0 %v1092_v2  ;;  %v316_v24 = vsel %vm314_vm3, %v311_v20, %v312_v21  ;;  %v324_v26 = vpack.c.bf16 %v298_v22, %v299_v23  ;;  %v318_v30 = vsel %vm314_vm3, %v313_v28, %v310_v19 }
  0x16   : > { %v323_v18 = vpack.c.bf16 %v300_v13, %v302_v16  ;;  %1037 = vmatprep.subr.bf16.mxu0 %v1093_v14  ;;  %v455_v27 = vpack.c.bf16 %v316_v24, %v317_v25  ;;  %v315_v31 = vsel %vm314_vm3, %v312_v21, %v313_v28  ;;  %v322_v32 = vsel %vm309_vm4, 0.0, %v318_v30 }
  0x17   : > { %v456_v33 = vpack.c.bf16 %v322_v32, %v315_v31  ;;  %v1097_v31 = vld [vmem:[%s1298_s2 + $0x8] sm:$0xff]  }
  0x18   : > { %1033 = vmatprep.mubr.msk.bf16.mxu0 %vm338_vm1, %v323_v18 }
  0x20   : > { %1034 = vmatmul.mubr.msk.bf16.vlgmr.msra.gmra.mrb[0].mxu0 %vm338_vm1, %v324_v26 }
  0x21   : > { %1038 = vmatpush3.bf16.msra.mxu0 %v1093_v14  ;;  %1039 = vmatprep.mubr.msk.bf16.mxu0 %vm338_vm1, %v455_v27 }
  0x2c   : > { %1040 = vmatmul.mubr.msk.bf16.vlgmr.msra.gmra.mrb[0].mxu0 %vm338_vm1, %v456_v33 }
  0xff   : > { %v1041_v38 = vpop.f32.mrb[0].mxu0 }
 0x100   : > { %v534_v40 = vmul.f32 %v1041_v38, %v976_v37  ;;  %v506_v41 = vpop.f32.mrb[1].mxu0 }
 0x101   : > { %v532_v42 = vmul.f32 %v976_v37, %v506_v41  ;;  %v1042_v43 = vpop.f32.mrb[2].mxu0 }
 0x102   : > { %v545_v44 = vadd.f32 %v977_v39, %v534_v40  ;;  %v535_v45 = vmul.f32 %v1042_v43, %v976_v37  ;;  %v509_v46 = vpop.f32.mrb[3].mxu0 }
 0x103   : > { %v543_v47 = vadd.f32 %v977_v39, %v532_v42  ;;  %v533_v48 = vmul.f32 %v976_v37, %v509_v46 }
 0x104   : > { %v553_v49 = vmul.f32 0.044715, %v545_v44  ;;  %v546_v50 = vadd.f32 %v977_v39, %v535_v45  ;;  %v549_v20 = vmul.f32 0.5, %v545_v44  ;;  %v1099_v45 = vld [vmem:[%s1298_s2 + $0x28] sm:$0xff]  }
 0x105   : > { %v551_v51 = vmul.f32 0.044715, %v543_v47  ;;  %v544_v52 = vadd.f32 %v977_v39, %v533_v48  ;;  %v547_v11 = vmul.f32 0.5, %v543_v47 }
 0x106   : > { %v557_v53 = vmul.f32 %v553_v49, %v545_v44  ;;  %v554_v54 = vmul.f32 0.044715, %v546_v50  ;;  %v550_v14 = vmul.f32 0.5, %v546_v50 }
 0x107   : > { %v555_v55 = vmul.f32 %v551_v51, %v543_v47  ;;  %v552_v56 = vmul.f32 0.044715, %v544_v52  ;;  %v548_v17 = vmul.f32 0.5, %v544_v52 }
 0x108   : > { %v561_v57 = vmul.f32 %v557_v53, %v545_v44  ;;  %v558_v58 = vmul.f32 %v554_v54, %v546_v50  ;;  %v998_v53 = vld [vmem:[%s1301_s5] ss:$0 sm:$0xff] }
 0x109   : > { %v559_v59 = vmul.f32 %v555_v55, %v543_v47  ;;  %v556_v60 = vmul.f32 %v552_v56, %v544_v52  ;;  %v999_v56 = vld [vmem:[%s1302_s6] ss:$0 sm:$0xff] }
 0x10a   : > { %v565_v61 = vadd.f32 %v561_v57, %v545_v44  ;;  %v562_v62 = vmul.f32 %v558_v58, %v546_v50 }
 0x10b   : > { %v563_v63 = vadd.f32 %v559_v59, %v543_v47  ;;  %v560_v0 = vmul.f32 %v556_v60, %v544_v52 }
 0x10c   : > { %v569_v1 = vmul.f32 0.7978846, %v565_v61  ;;  %v566_v2 = vadd.f32 %v562_v62, %v546_v50 }
 0x10d   : > { %v564_v4 = vadd.f32 %v560_v0, %v544_v52  ;;  %v567_v5 = vmul.f32 0.7978846, %v563_v63 }
 0x10e   : > { %1100 = vtanh.f32 %v569_v1  ;;  %v570_v6 = vmul.f32 0.7978846, %v566_v2 }
 0x10f   : > { %v568_v7 = vmul.f32 0.7978846, %v564_v4  ;;  %1102 = vtanh.f32 %v567_v5 }
 0x110   : > { %1104 = vtanh.f32 %v570_v6 }
 0x111   : > { %1106 = vtanh.f32 %v568_v7 }
 0x118   : > { %v1101_v8 = vpop.eup %1100 }
 0x119   : > { %v1103_v9 = vpop.eup %1102  ;;  %v577_v15 = vadd.f32 1.0, %v1101_v8 }
 0x11a   : > { %v1105_v10 = vpop.eup %1104  ;;  %v575_v12 = vadd.f32 1.0, %v1103_v9 }
 0x11b   : > { %v1107_v13 = vpop.eup %1106  ;;  %v578_v16 = vadd.f32 1.0, %v1105_v10  ;;  %v581_v24 = vmul.f32 %v577_v15, %v549_v20 }
 0x11c   : > { %v576_v18 = vadd.f32 1.0, %v1107_v13  ;;  %v579_v19 = vmul.f32 %v575_v12, %v547_v11 }
 0x11d   : > { %v582_v21 = vmul.f32 %v578_v16, %v550_v14  ;;  %v585_v38 = vrot.slane %v581_v24, 7  ;;  %v597_v40 = vrot.slane %v581_v24, 1 }
 0x11e   : > { %v580_v22 = vmul.f32 %v576_v18, %v548_v17  ;;  %v583_v23 = vrot.slane %v579_v19, 7  ;;  %v595_v39 = vrot.slane %v579_v19, 1 }
 0x11f   : > { %v586_v25 = vrot.slane %v582_v21, 7  ;;  %v614_v28 = vpack.c.bf16 %v582_v21, %v581_v24  ;;  %v598_v47 = vrot.slane %v582_v21, 1 }
 0x120   : > { %v613_v26 = vpack.c.bf16 %v580_v22, %v579_v19  ;;  %v584_v27 = vrot.slane %v580_v22, 7  ;;  %v596_v37 = vrot.slane %v580_v22, 1 }
 0x121   : > { %v590_v30 = vsel %vm297_vm0, %v586_v25, %v583_v23  ;;  %v587_v41 = vsel %vm297_vm0, %v585_v38, %v586_v25  ;;  %v602_v48 = vsel %vm314_vm3, %v598_v47, %v595_v39  ;;  %v599_v49 = vsel %vm314_vm3, %v597_v40, %v598_v47 }
 0x122   : > { %1047 = vmatprep.mubr.msk.bf16.mxu1 %vm632_vm5, %v613_v26  ;;  %v589_v32 = vsel %vm297_vm0, %v583_v23, %v584_v27  ;;  %v591_v33 = vsel %vm289_vm2, 0.0, %v590_v30  ;;  %v588_v42 = vsel %vm297_vm0, %v584_v27, %v585_v38  ;;  %v601_v43 = vsel %vm314_vm3, %v595_v39, %v596_v37 }
 0x123   : > { %1048 = vmatmul.mubr.msk.bf16.vlgmr.msra.gmra.mrb[0].mxu1 %vm632_vm5, %v614_v28  ;;  %v607_v34 = vpack.c.bf16 %v589_v32, %v591_v33  ;;  %v608_v44 = vpack.c.bf16 %v587_v41, %v588_v42  ;;  %v606_v50 = vsel %vm309_vm4, 0.0, %v602_v48 }
 0x124   : > { %1052 = vmatpush3.bf16.msra.mxu1 %v1233_v36  ;;  %v600_v36 = vsel %vm314_vm3, %v596_v37, %v597_v40  ;;  %v756_v51 = vpack.c.bf16 %v606_v50, %v599_v49 }
 0x125   : > { %1055 = vmatprep.mubr.msk.bf16.mxu1 %vm632_vm5, %v607_v34  ;;  %1053 = vmatprep.subr.bf16.mxu1 %v1097_v31  ;;  %v755_v46 = vpack.c.bf16 %v600_v36, %v601_v43 }
 0x128   : > { %1054 = vmatpush3.bf16.msra.mxu1 %v1097_v31 }
 0x129   : > { %1059 = vmatprep.subr.bf16.mxu1 %v1098_v35 }
 0x12f   : > { %1056 = vmatmul.mubr.msk.bf16.vlgmr.msra.gmra.mrb[0].mxu1 %vm632_vm5, %v608_v44 }
 0x130   : > { %1060 = vmatpush3.bf16.msra.mxu1 %v1098_v35  ;;  %1063 = vmatprep.mubr.msk.bf16.mxu1 %vm632_vm5, %v755_v46 }
 0x131   : > { %1061 = vmatprep.subr.bf16.mxu1 %v1099_v45 }
 0x134   : > { %1062 = vmatpush3.bf16.msra.mxu1 %v1099_v45 }
 0x13b   : > { %1064 = vmatmul.mubr.msk.bf16.vlgmr.msra.gmra.mrb[0].mxu1 %vm632_vm5, %v756_v51 }
 0x20e   : > { %v1065_v52 = vpop.f32.mrb[0].mxu1 }
 0x20f   : > { %v835_v54 = vadd.f32 %v1065_v52, %v581_v24  ;;  %v814_v55 = vpop.f32.mrb[1].mxu1 }
 0x210   : > { %v833_v57 = vadd.f32 %v814_v55, %v579_v19  ;;  %v1066_v3 = vpop.f32.mrb[2].mxu1 }
 0x211   : > { %v846_v58 = vmul.f32 %v998_v53, %v835_v54  ;;  %v836_v59 = vadd.f32 %v1066_v3, %v582_v21  ;;  %v817_v29 = vpop.f32.mrb[3].mxu1 }
 0x212   : > { %v844_v60 = vmul.f32 %v998_v53, %v833_v57  ;;  %v834_v61 = vadd.f32 %v817_v29, %v580_v22 }
 0x213   : > { %v857_v62 = vadd.f32 %v999_v56, %v846_v58  ;;  %v847_v63 = vmul.f32 %v998_v53, %v836_v59 }
 0x214   : > { %v855_v0 = vadd.f32 %v999_v56, %v844_v60  ;;  %v845_v1 = vmul.f32 %v998_v53, %v834_v61 }
 0x215   : > { %v865_v2 = vmul.f32 0.044715, %v857_v62  ;;  %v858_v4 = vadd.f32 %v999_v56, %v847_v63  ;;  %v861_v27 = vmul.f32 0.5, %v857_v62 }
 0x216   : > { %v863_v5 = vmul.f32 0.044715, %v855_v0  ;;  %v856_v6 = vadd.f32 %v999_v56, %v845_v1  ;;  %v859_v31 = vmul.f32 0.5, %v855_v0 }
 0x217   : > { %v869_v7 = vmul.f32 %v865_v2, %v857_v62  ;;  %v866_v8 = vmul.f32 0.044715, %v858_v4  ;;  %v862_v35 = vmul.f32 0.5, %v858_v4 }
 0x218   : > { %v867_v9 = vmul.f32 %v863_v5, %v855_v0  ;;  %v864_v10 = vmul.f32 0.044715, %v856_v6  ;;  %v860_v39 = vmul.f32 0.5, %v856_v6 }
 0x219   : > { %v873_v11 = vmul.f32 %v869_v7, %v857_v62  ;;  %v870_v12 = vmul.f32 %v866_v8, %v858_v4 }
 0x21a   : > { %v871_v13 = vmul.f32 %v867_v9, %v855_v0  ;;  %v868_v14 = vmul.f32 %v864_v10, %v856_v6 }
 0x21b   : > { %v877_v15 = vadd.f32 %v873_v11, %v857_v62  ;;  %v874_v16 = vmul.f32 %v870_v12, %v858_v4 }
 0x21c   : > { %v875_v17 = vadd.f32 %v871_v13, %v855_v0  ;;  %v872_v18 = vmul.f32 %v868_v14, %v856_v6 }
 0x21d   : > { %v881_v19 = vmul.f32 0.7978846, %v877_v15  ;;  %v878_v20 = vadd.f32 %v874_v16, %v858_v4 }
 0x21e   : > { %v879_v21 = vmul.f32 0.7978846, %v875_v17  ;;  %v876_v22 = vadd.f32 %v872_v18, %v856_v6 }
 0x21f   : > { %1108 = vtanh.f32 %v881_v19  ;;  %v882_v23 = vmul.f32 0.7978846, %v878_v20 }
 0x220   : > { %1110 = vtanh.f32 %v879_v21  ;;  %v880_v24 = vmul.f32 0.7978846, %v876_v22 }
 0x221   : > { %1112 = vtanh.f32 %v882_v23 }
 0x222   : > { %1114 = vtanh.f32 %v880_v24 }
 0x229   : > { %v1109_v25 = vpop.eup %1108 }
 0x22a   : > { %v1111_v26 = vpop.eup %1110  ;;  %v889_v28 = vadd.f32 1.0, %v1109_v25 }
 0x22b   : > { %v1113_v30 = vpop.eup %1112  ;;  %v887_v32 = vadd.f32 1.0, %v1111_v26 }
 0x22c   : > { %v1115_v33 = vpop.eup %1114  ;;  %v893_v34 = vmul.f32 %v889_v28, %v861_v27  ;;  %v890_v37 = vadd.f32 1.0, %v1113_v30 }
 0x22d   : > { %v891_v38 = vmul.f32 %v887_v32, %v859_v31  ;;  %v888_v40 = vadd.f32 1.0, %v1115_v33 }
 0x22e   : > { %897 = vst.msk [vmem:[%s278_s15 + $0x10] sm:$0xff] %vm632_vm5, %v893_v34  ;;  %v894_v41 = vmul.f32 %v890_v37, %v862_v35 }
 0x22f   : > { %895 = vst.msk [vmem:[%s278_s15] sm:$0xff] %vm632_vm5, %v891_v38  ;;  %v892_v42 = vmul.f32 %v888_v40, %v860_v39 }
 0x230   : > { %898 = vst.msk [vmem:[%s278_s15 + $0x18] sm:$0xff] %vm632_vm5, %v894_v41 }
 0x231   : > { %896 = vst.msk [vmem:[%s278_s15 + $0x8] sm:$0xff] %vm632_vm5, %v892_v42 }
 0x232 PF: > { %s17_s24 = sadd.s32 1, %s1122_s24  }
 0x233   : > { %p14_p4 = scmp.ge.s32.totalorder %s17_s24, 4  }
 0x235   :  { %16 = sbr.rel (!%p14_p4) target bundleno = 1 (0x1), region = 82 }

// kernel: conv_rnn_classifier_forward.7
= control target key start
LH: loop header
LB: loop body
LE: loop exit
PB: predicated region body
PF: predicated region fallthrough
CT: control target
= control target key end

     0   :  { %s1070_s30 = smov 0   ;;  %s1191_s0 = inlined_call_operand.vmem [shape: f32[2,16,16], index: 0, kind: input, shape index: {}]   ;;  %s1192_s1 = inlined_call_operand.vmem [shape: bf16[3,16,16], index: 1, kind: input, shape index: {}]   ;;  %s1193_s2 = inlined_call_operand.vmem [shape: bf16[3,16,16], index: 2, kind: input, shape index: {}]   ;;  %s1194_s3 = inlined_call_operand.vmem [shape: f32[1,16], index: 3, kind: input, shape index: {}]   ;;  %s1195_s4 = inlined_call_operand.vmem [shape: f32[1,16], index: 4, kind: input, shape index: {}]   ;;  %s1196_s5 = inlined_call_operand.vmem [shape: f32[1,16], index: 5, kind: input, shape index: {}]   ;;  %s1197_s6 = inlined_call_operand.vmem [shape: f32[1,16], index: 6, kind: input, shape index: {}]   ;;  %s1198_s7 = inlined_call_operand.vmem [shape: bf16[16,128], index: 7, kind: input, shape index: {}]   ;;  %s1199_s8 = inlined_call_operand.vmem [shape: f32[1,128], index: 8, kind: input, shape index: {}]   ;;  %s1200_s9 = inlined_call_operand.vmem [shape: f32[2,16,128], index: 9, kind: output, shape index: {}]  }
   0x1 LB: > { %s889_s10 = sadd.s32 4294967295, %s1016_s30   ;;  %p893_p0 = scmp.ge.s32.totalorder %s1016_s30, 1  ;;  %s1016_s30 = sphi %s1070_s30, %s19_s30  }
   0x2   : > { %p287_p1 = scmp.lt.s32.totalorder %s1016_s30, 3 }
   0x4   : > { %p288_p2 = pnand %p893_p0, %p287_p1 }
   0x5   : > { %v995_v0 = vld [vmem:[%s1192_s1 + $0x8] sm:$0xff] (!%p288_p2)   ;;  %v336_v1 = vlaneseq (!%p288_p2)  ;;  %v1018_v2 = vmov (!%p288_p2), 0.0   ;;  %p323_p3 = scmp.lt.s32.totalorder (!%p288_p2), %s889_s10, 1  ;;  %vm1019_vm0 = vmmov (!%p288_p2), 0   ;;  %v997_v3 = vld [vmem:[%s1192_s1] sm:$0xff] (!%p288_p2)   ;;  %vm370_vm1 = vcmask (!%p288_p2), 130048  }
   0x6   : > { %291 = sbr.rel (%p288_p2) target bundleno = 750 (0x2ee), region = 56  ;;  %943 = vmatprep.subr.bf16.mxu0 (!%p288_p2), %v1018_v2  ;;  %949 = vmatprep.subr.bf16.mxu1 (!%p288_p2), %v1018_v2  ;;  %v996_v5 = vld [vmem:[%s1192_s1 + $0x10] sm:$0xff] (!%p288_p2)   ;;  %v998_v22 = vld [vmem:[%s1193_s2 + $0x8] sm:$0xff] (!%p288_p2)   ;;  %v999_v23 = vld [vmem:[%s1193_s2] sm:$0xff] (!%p288_p2)  }
   0x7   : > { %944 = vmatpush3.bf16.msra.mxu0 (!%p288_p2), %v995_v0  ;;  %945 = vmatprep.mubr.msk.bf16.mxu0 (!%p288_p2), %vm1019_vm0, %v1018_v2  ;;  %v1093_v4 = vshrl.u32 (!%p288_p2), %v336_v1, 7  ;;  %v908_v37 = vld [vmem:[%s1194_s3] ss:$0 sm:$0xff] (!%p288_p2) }
   0x8   : > { %955 = vmatprep.subr.bf16.mxu0 (!%p288_p2), %v1018_v2  ;;  %951 = vmatprep.mubr.msk.bf16.mxu1 (!%p288_p2), %vm1019_vm0, %v1018_v2  ;;  %v909_v42 = vld [vmem:[%s1195_s4] ss:$0 sm:$0xff] (!%p288_p2) }
   0x9   : > { %950 = vmatpush3.bf16.msra.mxu1 (!%p288_p2), %v997_v3  ;;  %vm343_vm2 = vcmp.lt.s32.totalorder (!%p288_p2), %v1093_v4, 1  ;;  %v1101_v6 = vadd.s32 (!%p288_p2), 8, %v1093_v4  ;;  %vm352_vm4 = vcmp.lt.s32.totalorder (!%p288_p2), %v1093_v4, 7  ;;  %vm339_vm5 = vcmp.eq.s32.totalorder (!%p288_p2), %v1093_v4, 0  ;;  %v1000_v3 = vld [vmem:[%s1193_s2 + $0x10] sm:$0xff] (!%p288_p2)  }
   0xa   : > { %961 = vmatprep.subr.bf16.mxu1 (!%p288_p2), %v1018_v2 }
   0xb   : > { %vm349_vm3 = vcmp.eq.s32.totalorder (!%p288_p2), %v1101_v6, 15 }
   0xd   : > { %s1202_s10 = smov (!%p323_p3, %s889_s10), 1 }
   0xe   : > { %s927_s15 = sshll.u32 %s1202_s10, 4 }
   0xf   : > { %s327_s20 = scalar_lea.vmem %s1191_s0, %s927_s15  ;;  %s332_s23 = scalar_lea.vmem %s1200_s9, %s927_s15 }
  0x10   : > { %v334_v7 = vld [vmem:[%s327_s20] sm:$0xff]  ;;  %v335_v8 = vld [vmem:[%s327_s20 + $0x8] sm:$0xff] }
  0x11   : > { %v350_v9 = vrot.slane %v334_v7, 1  ;;  %v351_v10 = vrot.slane %v335_v8, 1  ;;  %v360_v11 = vpack.c.bf16 %v335_v8, %v334_v7  ;;  %v341_v12 = vrot.slane %v334_v7, 7 }
  0x12   : > { %v342_v13 = vrot.slane %v335_v8, 7 }
  0x13   : > { %946 = vmatmul.mubr.msk.bf16.vlgmr.msra.gmra.mrb[0].mxu0 %vm370_vm1, %v360_v11  ;;  %v354_v14 = vsel %vm352_vm4, %v351_v10, %v350_v9  ;;  %v353_v17 = vsel %vm352_vm4, %v350_v9, %v351_v10 }
  0x14   : > { %956 = vmatpush3.bf16.msra.mxu0 %v996_v5  ;;  %v344_v15 = vsel %vm343_vm2, %v341_v12, %v342_v13  ;;  %v345_v16 = vsel %vm343_vm2, %v342_v13, %v341_v12  ;;  %957 = vmatprep.mubr.msk.bf16.mxu0 %vm1019_vm0, %v1018_v2  ;;  %v356_v18 = vsel %vm349_vm3, 0.0, %v354_v14 }
  0x15   : > { %v346_v19 = vsel %vm339_vm5, 0.0, %v345_v16  ;;  %967 = vmatprep.subr.bf16.mxu0 %v1018_v2  ;;  %v465_v21 = vpack.c.bf16 %v356_v18, %v353_v17 }
  0x16   : > { %v357_v20 = vpack.c.bf16 %v344_v15, %v346_v19  ;;  %v1001_v19 = vld [vmem:[%s1198_s7] sm:$0xff]  }
  0x18   : > { %952 = vmatmul.mubr.msk.bf16.vlgmr.msra.gmra.mrb[0].mxu1 %vm370_vm1, %v357_v20 }
  0x19   : > { %963 = vmatprep.mubr.msk.bf16.mxu1 %vm1019_vm0, %v1018_v2  ;;  %962 = vmatpush3.bf16.msra.mxu1 %v998_v22 }
  0x1a   : > { %973 = vmatprep.subr.bf16.mxu1 %v1018_v2 }
  0x1b   : > { %958 = vmatmul.mubr.msk.bf16.vlgmr.msra.gmra.mrb[4].mxu0 %vm370_vm1, %v465_v21 }
  0x1c   : > { %969 = vmatprep.mubr.msk.bf16.mxu0 %vm1019_vm0, %v1018_v2  ;;  %968 = vmatpush3.bf16.msra.mxu0 %v999_v23 }
  0x1d   : > { %979 = vmatprep.subr.bf16.mxu0 %v1018_v2 }
  0xe6   : > { %v408_v24 = vpop.f32.mrb[0].mxu0 }
  0xe7   : > { %v947_v25 = vpop.f32.mrb[1].mxu0 }
  0xe8   : > { %v411_v26 = vpop.f32.mrb[2].mxu0 }
  0xe9   : > { %v948_v27 = vpop.f32.mrb[3].mxu0 }
  0xeb   : > { %v458_v28 = vpop.f32.mrb[0].mxu1 }
  0xec   : > { %v459_v29 = vadd.f32 %v458_v28, %v408_v24  ;;  %v953_v30 = vpop.f32.mrb[1].mxu1 }
  0xed   : > { %v461_v31 = vpop.f32.mrb[2].mxu1  ;;  %v920_v30 = vld [vmem:[%s1196_s5] ss:$0 sm:$0xff] }
  0xee   : > { %v462_v32 = vadd.f32 %v461_v31, %v411_v26  ;;  %v954_v33 = vpop.f32.mrb[3].mxu1  ;;  %v512_v34 = vpop.f32.mrb[4].mxu0 }
  0xef   : > { %v519_v35 = vadd.f32 %v512_v34, %v459_v29  ;;  %v959_v36 = vpop.f32.mrb[5].mxu0 }
  0xf0   : > { %v515_v38 = vpop.f32.mrb[6].mxu0 }
  0xf1   : > { %v521_v39 = vadd.f32 %v519_v35, %v334_v7  ;;  %v520_v40 = vadd.f32 %v515_v38, %v462_v32  ;;  %v960_v41 = vpop.f32.mrb[7].mxu0  ;;  %v921_v35 = vld [vmem:[%s1197_s6] ss:$0 sm:$0xff] }
  0xf3   : > { %v530_v43 = vmul.f32 %v908_v37, %v521_v39  ;;  %v522_v44 = vadd.f32 %v520_v40, %v335_v8 }
  0xf5   : > { %v539_v45 = vadd.f32 %v909_v42, %v530_v43  ;;  %v531_v46 = vmul.f32 %v908_v37, %v522_v44 }
  0xf7   : > { %v543_v47 = vmul.f32 0.044715, %v539_v45  ;;  %v540_v48 = vadd.f32 %v909_v42, %v531_v46  ;;  %v541_v59 = vmul.f32 0.5, %v539_v45 }
  0xf9   : > { %v545_v49 = vmul.f32 %v543_v47, %v539_v45  ;;  %v544_v50 = vmul.f32 0.044715, %v540_v48  ;;  %v542_v62 = vmul.f32 0.5, %v540_v48 }
  0xfb   : > { %v547_v51 = vmul.f32 %v545_v49, %v539_v45  ;;  %v546_v52 = vmul.f32 %v544_v50, %v540_v48 }
  0xfd   : > { %v549_v53 = vadd.f32 %v547_v51, %v539_v45  ;;  %v548_v54 = vmul.f32 %v546_v52, %v540_v48 }
  0xff   : > { %v551_v55 = vmul.f32 0.7978846, %v549_v53  ;;  %v550_v56 = vadd.f32 %v548_v54, %v540_v48 }
 0x101   : > { %1002 = vtanh.f32 %v551_v55  ;;  %v552_v57 = vmul.f32 0.7978846, %v550_v56 }
 0x103   : > { %1004 = vtanh.f32 %v552_v57 }
 0x10b   : > { %v1003_v58 = vpop.eup %1002 }
 0x10c   : > { %v555_v60 = vadd.f32 1.0, %v1003_v58 }
 0x10d   : > { %v1005_v61 = vpop.eup %1004 }
 0x10e   : > { %v556_v63 = vadd.f32 1.0, %v1005_v61  ;;  %v557_v0 = vmul.f32 %v555_v60, %v541_v59  ;;  %v922_v60 = vld [vmem:[%s1199_s8] ss:$0 sm:$0xff] }
 0x110   : > { %v558_v1 = vmul.f32 %v556_v63, %v542_v62  ;;  %v559_v5 = vrot.slane %v557_v0, 7  ;;  %v565_v9 = vrot.slane %v557_v0, 1 }
 0x112   : > { %v574_v7 = vpack.c.bf16 %v558_v1, %v557_v0  ;;  %v560_v8 = vrot.slane %v558_v1, 7  ;;  %v566_v10 = vrot.slane %v558_v1, 1 }
 0x114   : > { %964 = vmatmul.mubr.msk.bf16.vlgmr.msra.gmra.mrb[4].mxu1 %vm370_vm1, %v574_v7  ;;  %v561_v11 = vsel %vm343_vm2, %v559_v5, %v560_v8  ;;  %v562_v12 = vsel %vm343_vm2, %v560_v8, %v559_v5  ;;  %v568_v13 = vsel %vm352_vm4, %v566_v10, %v565_v9  ;;  %v567_v16 = vsel %vm352_vm4, %v565_v9, %v566_v10 }
 0x115   : > { %974 = vmatpush3.bf16.msra.mxu1 %v1000_v3  ;;  %v563_v14 = vsel %vm339_vm5, 0.0, %v562_v12  ;;  %975 = vmatprep.mubr.msk.bf16.mxu1 %vm1019_vm0, %v1018_v2  ;;  %v570_v17 = vsel %vm349_vm3, 0.0, %v568_v13 }
 0x116   : > { %v571_v15 = vpack.c.bf16 %v561_v11, %v563_v14  ;;  %v678_v18 = vpack.c.bf16 %v570_v17, %v567_v16 }
 0x118   : > { %970 = vmatmul.mubr.msk.bf16.vlgmr.msra.gmra.mrb[8].mxu0 %vm370_vm1, %v571_v15 }
 0x119   : > { %981 = vmatprep.mubr.msk.bf16.mxu0 %vm1019_vm0, %v1018_v2  ;;  %980 = vmatpush3.bf16.msra.mxu0 %v1001_v19 }
 0x11c   : > { %976 = vmatmul.mubr.msk.bf16.vlgmr.msra.gmra.mrb[8].mxu1 %vm370_vm1, %v678_v18 }
 0x1e7   : > { %v621_v20 = vpop.f32.mrb[4].mxu1 }
 0x1e8   : > { %v965_v21 = vpop.f32.mrb[5].mxu1 }
 0x1e9   : > { %v624_v4 = vpop.f32.mrb[6].mxu1 }
 0x1ea   : > { %v966_v22 = vpop.f32.mrb[7].mxu1 }
 0x1eb   : > { %v671_v23 = vpop.f32.mrb[8].mxu0 }
 0x1ec   : > { %v672_v6 = vadd.f32 %v671_v23, %v621_v20  ;;  %v971_v24 = vpop.f32.mrb[9].mxu0 }
 0x1ed   : > { %v674_v25 = vpop.f32.mrb[10].mxu0 }
 0x1ee   : > { %v675_v26 = vadd.f32 %v674_v25, %v624_v4  ;;  %v972_v27 = vpop.f32.mrb[11].mxu0 }
 0x1ef   : > { %v725_v28 = vpop.f32.mrb[8].mxu1 }
 0x1f0   : > { %v732_v2 = vadd.f32 %v725_v28, %v672_v6  ;;  %v977_v29 = vpop.f32.mrb[9].mxu1 }
 0x1f1   : > { %v728_v31 = vpop.f32.mrb[10].mxu1 }
 0x1f2   : > { %v734_v32 = vadd.f32 %v732_v2, %v557_v0  ;;  %v733_v33 = vadd.f32 %v728_v31, %v675_v26  ;;  %v978_v34 = vpop.f32.mrb[11].mxu1 }
 0x1f4   : > { %v743_v36 = vmul.f32 %v920_v30, %v734_v32  ;;  %v735_v37 = vadd.f32 %v733_v33, %v558_v1 }
 0x1f6   : > { %v752_v38 = vadd.f32 %v921_v35, %v743_v36  ;;  %v744_v39 = vmul.f32 %v920_v30, %v735_v37 }
 0x1f8   : > { %v756_v40 = vmul.f32 0.044715, %v752_v38  ;;  %v753_v41 = vadd.f32 %v921_v35, %v744_v39  ;;  %v754_v54 = vmul.f32 0.5, %v752_v38 }
 0x1fa   : > { %v758_v42 = vmul.f32 %v756_v40, %v752_v38  ;;  %v757_v43 = vmul.f32 0.044715, %v753_v41  ;;  %v755_v55 = vmul.f32 0.5, %v753_v41 }
 0x1fc   : > { %v760_v44 = vmul.f32 %v758_v42, %v752_v38  ;;  %v759_v45 = vmul.f32 %v757_v43, %v753_v41 }
 0x1fe   : > { %v762_v46 = vadd.f32 %v760_v44, %v752_v38  ;;  %v761_v47 = vmul.f32 %v759_v45, %v753_v41 }
 0x200   : > { %v763_v48 = vadd.f32 %v761_v47, %v753_v41  ;;  %v764_v49 = vmul.f32 0.7978846, %v762_v46 }
 0x202   : > { %v765_v50 = vmul.f32 0.7978846, %v763_v48  ;;  %1006 = vtanh.f32 %v764_v49 }
 0x204   : > { %1008 = vtanh.f32 %v765_v50 }
 0x20c   : > { %v1007_v51 = vpop.eup %1006 }
 0x20d   : > { %v768_v52 = vadd.f32 1.0, %v1007_v51 }
 0x20e   : > { %v1009_v53 = vpop.eup %1008 }
 0x20f   : > { %v769_v56 = vadd.f32 1.0, %v1009_v53  ;;  %v770_v57 = vmul.f32 %v768_v52, %v754_v54 }
 0x211   : > { %v771_v58 = vmul.f32 %v769_v56, %v755_v55 }
 0x213   : > { %v772_v59 = vpack.c.bf16 %v771_v58, %v770_v57 }
 0x215   : > { %982 = vmatmul.mubr.msk.bf16.vlgmr.msra.gmra.mrb[12].mxu0 %vm370_vm1, %v772_v59 }
 0x2e8   : > { %v825_v61 = vpop.f32.mrb[12].mxu0 }
 0x2e9   : > { %v826_v62 = vadd.f32 %v922_v60, %v825_v61  ;;  %v983_v63 = vpop.f32.mrb[13].mxu0 }
 0x2ea   : > { %v828_v0 = vpop.f32.mrb[14].mxu0 }
 0x2eb   : > { %832 = vst [vmem:[%s332_s23] sm:$0xff] %v826_v62  ;;  %v829_v1 = vadd.f32 %v922_v60, %v828_v0  ;;  %v984_v3 = vpop.f32.mrb[15].mxu0 }
 0x2ed   : > { %833 = vst [vmem:[%s332_s23 + $0x8] sm:$0xff] %v829_v1 }
 0x2ee PF: > { %s19_s30 = sadd.s32 1, %s1016_s30  }
 0x2ef   : > { %p16_p4 = scmp.ge.s32.totalorder %s19_s30, 4  }
 0x2f1   :  { %18 = sbr.rel (!%p16_p4) target bundleno = 1 (0x1), region = 90 }

// kernel: conv_rnn_classifier_forward.9
= control target key start
LH: loop header
LB: loop body
LE: loop exit
PB: predicated region body
PF: predicated region fallthrough
CT: control target
= control target key end

     0   :  { %v273_v1 = vmov 0.0   ;;  %vm274_vm0 = vmmov 0   ;;  %s345_s0 = inlined_call_operand.vmem [shape: f32[2,32], index: 0, kind: input, shape index: {}]   ;;  %s346_s1 = inlined_call_operand.vmem [shape: bf16[32,64], index: 1, kind: input, shape index: {}]   ;;  %s347_s2 = inlined_call_operand.vmem [shape: f32[1,64], index: 2, kind: input, shape index: {}]   ;;  %s348_s3 = inlined_call_operand.vmem [shape: bf16[64,4], index: 3, kind: input, shape index: {}]   ;;  %s349_s4 = inlined_call_operand.vmem [shape: f32[1,4], index: 4, kind: input, shape index: {}]   ;;  %s350_s5 = inlined_call_operand.hbm [shape: f32[2,4], index: 5, kind: output, shape index: {}]  }
   0x1   :  { %v241_v0 = vld [vmem:[%s346_s1] sm:$0xff]   ;;  %218 = vmatprep.subr.bf16.mxu0 %v273_v1  ;;  %226 = vmatprep.subr.bf16.mxu1 %v273_v1  ;;  %v242_v2 = vld [vmem:[%s346_s1 + $0x8] sm:$0xff]  }
   0x2   :  { %219 = vmatpush3.bf16.msra.mxu0 %v241_v0  ;;  %222 = vmatprep.mubr.msk.bf16.mxu0 %vm274_vm0, %v273_v1  ;;  %v22_v3 = vld [vmem:[%s345_s0] sm:$0x3] }
   0x3   :  { %220 = vmatprep.subr.bf16.mxu0 %v273_v1  ;;  %234 = vmatprep.mubr.msk.bf16.mxu1 %vm274_vm0, %v273_v1  ;;  %v23_v4 = vpack.c.bf16 %v22_v3, %v22_v3 }
   0x4   :  { %10 = vsyncpa [#allocation3], 0  ;;  %vm47_vm1 = vcmask 261120   ;;  %v243_v5 = vld [vmem:[%s348_s3] sm:$0xff]   ;;  %v244_v6 = vld [vmem:[%s348_s3 + $0x8] sm:$0xff]   ;;  %vm140_vm2 = vcmask 523264  }
   0x5   :  { %227 = vmatpush3.bf16.msra.mxu1 %v243_v5  ;;  %v245_v7 = vld [vmem:[%s348_s3 + $0x10] sm:$0xff]   ;;  %v246_v8 = vld [vmem:[%s348_s3 + $0x18] sm:$0xff]   ;;  %v200_v9 = vld [vmem:[%s347_s2] ss:$0 sm:$0xff]  ;;  %s275_s7 = smov [#allocation2]   ;;  %vm184_vm3 = vcmask 25600  }
   0x6   :  { %221 = vmatpush3.bf16.msra.mxu0 %v242_v2  ;;  %228 = vmatprep.subr.bf16.mxu1 %v273_v1  ;;  %v204_v25 = vld [vmem:[%s349_s4] ss:$0 sm:$0xff]  ;;  %s192_s8 = sshll.u32 %s275_s7, 4  ;;  %s193_s8 = int_to_ptr.vmem [resolvable:$true] %s192_s8 }
   0x7   :  { %s249_s9 = scalar_lea.vmem %s193_s8, 32  ;;  %p254_p1 = scmp.lt.s32.totalorder %s193_s8, %s193_s8 }
   0x8   :  { %p250_p0 = scmp.ne.s32.totalorder %s193_s8, %s249_s9  ;;  %p255_p2 = scmp.lt.s32.totalorder %s249_s9, %s249_s9 }
   0x9   :  { %223 = vmatmul.mubr.msk.bf16.vlgmr.msra.gmra.mrb[0].mxu0 %vm47_vm1, %v23_v4  ;;  %229 = vmatpush3.bf16.msra.mxu1 %v244_v6 }
   0xa   :  { %230 = vmatprep.subr.bf16.mxu1 %v273_v1  ;;  %p256_p3 = por %p255_p2, %p254_p1 }
   0xc   :  { %p257_p4 = pnand %p256_p3, %p250_p0 }
   0xd   :  { %231 = vmatpush3.bf16.msra.mxu1 %v245_v7 }
   0xe   :  { %232 = vmatprep.subr.bf16.mxu1 %v273_v1 }
  0x11   :  { %233 = vmatpush3.bf16.msra.mxu1 %v246_v8 }
  0xdc   :  { %v85_v10 = vpop.f32.mrb[0].mxu0 }
  0xdd   :  { %v86_v11 = vadd.f32 %v200_v9, %v85_v10  ;;  %v224_v12 = vpop.f32.mrb[1].mxu0 }
  0xde   :  { %v88_v13 = vpop.f32.mrb[2].mxu0 }
  0xdf   :  { %v92_v14 = vmul.f32 0.044715, %v86_v11  ;;  %v225_v15 = vpop.f32.mrb[3].mxu0  ;;  %v91_v21 = vmul.f32 0.5, %v86_v11 }
  0xe1   :  { %v93_v16 = vmul.f32 %v92_v14, %v86_v11 }
  0xe3   :  { %v94_v17 = vmul.f32 %v93_v16, %v86_v11 }
  0xe5   :  { %v95_v18 = vadd.f32 %v94_v17, %v86_v11 }
  0xe7   :  { %v96_v19 = vmul.f32 0.7978846, %v95_v18 }
  0xe9   :  { %247 = vtanh.f32 %v96_v19 }
  0xf3   :  { %v248_v20 = vpop.eup %247 }
  0xf4   :  { %v98_v22 = vadd.f32 1.0, %v248_v20 }
  0xf6   :  { %v99_v23 = vmul.f32 %v98_v22, %v91_v21 }
  0xf8   :  { %v100_v24 = vpack.c.bf16 %v99_v23, %v99_v23 }
  0xfa   :  { %235 = vmatmul.mubr.msk.bf16.vlgmr.msra.gmra.mrb[0].mxu1 %vm140_vm2, %v100_v24 }
 0x1cd   :  { %v178_v26 = vpop.f32.mrb[0].mxu1 }
 0x1ce   :  { %v179_v27 = vadd.f32 %v204_v25, %v178_v26  ;;  %v236_v28 = vpop.f32.mrb[1].mxu1 }
 0x1cf   :  { %v181_v29 = vpop.f32.mrb[2].mxu1 }
 0x1d0   :  { %v237_v30 = vpop.f32.mrb[3].mxu1  ;;  %185 = vst.msk [vmem:[#allocation2] sm:$0x3] %vm184_vm3, %v179_v27 }
 0x1d1   :  { %260 = shalt.err (!%p257_p4)
}
 0x1d2   :  { %s261_s4 = scalar_lea.hbm %s350_s5, 32 }
 0x1d3   :  { %p262_p5 = scmp.ne.s32.totalorder %s350_s5, %s261_s4  ;;  %p265_p6 = scmp.lt.u32.totalorder %s261_s4, %s350_s5 }
 0x1d5   :  { %p267_p7 = pnand %p265_p6, %p262_p5 }
 0x1d7   :  { %270 = shalt.err (!%p267_p7)
}
 0x1d8   :  { %195 = dma.vmem_to_hbm [thread:$0]  %s193_s8, 32, %s350_s5, [#allocation3]  }
 0x1d9   :  { %271 = dma.done.wait [#allocation3], 32  }
 0x1da   :  { %272 = vsyncadd [#allocation3], 4294967264 }
 0x1db   :  { %199 = vsyncpa [#allocation3], 1 }

// kernel: conv_rnn_classifier_forward.8
= control target key start
LH: loop header
LB: loop body
LE: loop exit
PB: predicated region body
PF: predicated region fallthrough
CT: control target
= control target key end

     0   :  { %s5629_s0 = inlined_call_operand.vmem [shape: f32[2,16,128], index: 0, kind: input, shape index: {}]   ;;  %s5630_s1 = inlined_call_operand.vmem [shape: bf16[32,128], index: 1, kind: input, shape index: {}]   ;;  %s5631_s2 = inlined_call_operand.vmem [shape: bf16[64,128], index: 2, kind: input, shape index: {}]   ;;  %s5632_s3 = inlined_call_operand.vmem [shape: f32[1,128], index: 3, kind: input, shape index: {}]   ;;  %s5633_s4 = inlined_call_operand.vmem [shape: f32[2,32], index: 4, kind: output, shape index: {}]  }
   0x1   :  { %v4787_v0 = vld [vmem:[%s5630_s1] sm:$0xff]  ;;  %v4792_v1 = vld [vmem:[%s5630_s1 + $0x8] sm:$0xff] }
   0x2   :  { %61 = vsyncadd [#allocation4], 256  ;;  %v4797_v2 = vld [vmem:[%s5631_s2] sm:$0xff]  ;;  %v4802_v3 = vld [vmem:[%s5631_s2 + $0x8] sm:$0xff] }
   0x3   :  { %v4807_v4 = vld [vmem:[%s5631_s2 + $0x10] sm:$0xff]  ;;  %v4812_v5 = vld [vmem:[%s5631_s2 + $0x18] sm:$0xff] }
   0x4   :  { %110 = vsyncadd [#allocation4 + $0x1], 512 }
   0x5   :  { %4750 = dma.done.wait [#allocation4], 256 }
   0x6   :  { %4751 = vsyncadd [#allocation4], 4294967040 }
   0x7   :  { %4752 = dma.done.wait [#allocation4 + $0x1], 512 }
   0x8   :  { %4753 = vsyncadd [#allocation4 + $0x1], 4294966784  ;;  %vm119_vm0 = vcmask 254976   ;;  %v4754_v6 = vmov 0.0   ;;  %vm4755_vm1 = vmmov 0   ;;  %vm130_vm2 = vcmask 261120  }
   0x9   :  { %4072 = vmatprep.subr.bf16.mxu1 %v4754_v6  ;;  %4076 = vmatprep.mubr.msk.bf16.mxu1 %vm4755_vm1, %v4754_v6  ;;  %120 = vst.msk [vmem:[#allocation5] sm:$0x3] %vm119_vm0, %v4754_v6  ;;  %121 = vst.msk [vmem:[#allocation6] sm:$0x3] %vm119_vm0, %v4754_v6  ;;  %s4756_s1 = smov 32   ;;  %s4757_s30 = smov 64  }
   0xa   :  { %122 = vst.msk [vmem:[#allocation7] sm:$0x3] %vm119_vm0, %v4754_v6  ;;  %123 = vst.msk [vmem:[#allocation8] sm:$0x3] %vm119_vm0, %v4754_v6  ;;  %4073 = vmatpush3.bf16.msra.mxu1 %v4787_v0  ;;  %4092 = vmatprep.subr.bf16.mxu0 %v4754_v6  ;;  %v125_v11 = vld [vmem:[%s5629_s0 + $0x10] sm:$0x1] }
   0xb   :  { %4074 = vmatprep.subr.bf16.mxu1 %v4754_v6  ;;  %4093 = vmatpush3.bf16.msra.mxu0 %v4787_v0  ;;  %v124_v16 = vld [vmem:[%s5629_s0] sm:$0x1]  ;;  %vm228_vm3 = vcmask 1041409   ;;  %s4758_s5 = smov 96   ;;  %vm274_vm4 = vcmask 523264  }
   0xc   :  { %4094 = vmatprep.subr.bf16.mxu0 %v4754_v6  ;;  %4096 = vmatprep.mubr.msk.bf16.mxu0 %vm4755_vm1, %v4754_v6  ;;  %v4890_v62 = vld [vmem:[%s5632_s3] ss:$0 sm:$0xff]  ;;  %v359_v63 = vld [vmem:[%s5629_s0 + $0x11] sm:$0x1] }
   0xe   :  { %4075 = vmatpush3.bf16.msra.mxu1 %v4792_v1 }
   0xf   :  { %4080 = vmatprep.subr.bf16.mxu1 %v4754_v6  ;;  %4095 = vmatpush3.bf16.msra.mxu0 %v4792_v1 }
  0x10   :  { %v126_v7 = vld [vmem:[#allocation5] sm:$0x3]  ;;  %v194_v8 = vld [vmem:[#allocation6] sm:$0x3]  ;;  %4100 = vmatprep.subr.bf16.mxu0 %v4754_v6 }
  0x11   :  { %v127_v9 = vpack.c.bf16 %v126_v7, %v126_v7  ;;  %v196_v10 = vrot.slane %v194_v8, 1  ;;  %v256_v48 = vld [vmem:[#allocation7] sm:$0x3] }
  0x13   :  { %4077 = vmatmul.mubr.msk.bf16.vlgmr.msra.gmra.mrb[0].mxu1 %vm130_vm2, %v127_v9  ;;  %199 = vrot.lane.b32.xlu1 %v196_v10, %s4756_s1 }
  0x14   :  { %4081 = vmatpush3.bf16.msra.mxu1 %v4797_v2  ;;  %4088 = vmatprep.mubr.msk.bf16.mxu1 %vm4755_vm1, %v4754_v6 }
  0x15   :  { %4082 = vmatprep.subr.bf16.mxu1 %v4754_v6 }
  0x17   :  { %197 = vrot.lane.b32.xlu1 %v194_v8, %s4756_s1  ;;  %v358_v8 = vld [vmem:[%s5629_s0 + $0x1] sm:$0x1] }
  0x18   :  { %4083 = vmatpush3.bf16.msra.mxu1 %v4802_v3 }
  0x19   :  { %4084 = vmatprep.subr.bf16.mxu1 %v4754_v6 }
  0x1c   :  { %4085 = vmatpush3.bf16.msra.mxu1 %v4807_v4 }
  0x1d   :  { %4086 = vmatprep.subr.bf16.mxu1 %v4754_v6 }
  0x20   :  { %4087 = vmatpush3.bf16.msra.mxu1 %v4812_v5 }
  0x21   :  { %4112 = vmatprep.subr.bf16.mxu1 %v4754_v6 }
  0x85   :  { %v200_v34 = vpop.permute.xlu1 %199 }
  0x89   :  { %v198_v36 = vpop.permute.xlu1 %197 }
  0xe6   :  { %v168_v12 = vpop.f32.mrb[0].mxu1 }
  0xe7   :  { %v175_v13 = vrot.slane %v168_v12, 1  ;;  %v4078_v14 = vpop.f32.mrb[1].mxu1  ;;  %v178_v19 = vadd.f32 %v168_v12, %v124_v16 }
  0xe8   :  { %v171_v15 = vpop.f32.mrb[2].mxu1 }
  0xe9   :  { %v179_v17 = vadd.f32 %v175_v13, %v125_v11  ;;  %v4079_v18 = vpop.f32.mrb[3].mxu1  ;;  %v3847_v23 = vmul.f32 -1.442695, %v178_v19 }
  0xeb   :  { %4397 = vtanh.f32 %v179_v17  ;;  %v3848_v22 = vmul.f32 -1.442695, %v179_v17 }
  0xec   :  { %4399 = vtanh.f32 %v178_v19 }
  0xed   :  { %4401 = vpow2.f32 %v3848_v22 }
  0xee   :  { %4403 = vpow2.f32 %v3847_v23  ;;  %v325_v23 = vld [vmem:[#allocation8] sm:$0x3] }
  0xf5   :  { %v4398_v20 = vpop.eup %4397 }
  0xf6   :  { %209 = vrot.lane.b32.xlu0 %v4398_v20, %s4757_s30  ;;  %v4400_v21 = vpop.eup %4399 }
  0xf7   :  { %v4402_v24 = vpop.eup %4401 }
  0xf8   :  { %v187_v25 = vadd.f32 1.0, %v4402_v24  ;;  %v4404_v26 = vpop.eup %4403 }
  0xf9   :  { %v186_v27 = vadd.f32 1.0, %v4404_v26 }
  0xfa   :  { %207 = vrot.lane.b32.xlu0 %v4400_v21, %s4757_s30  ;;  %4405 = vrcp.f32 %v187_v25 }
  0xfb   :  { %4407 = vrcp.f32 %v186_v27 }
 0x104   :  { %v4406_v28 = vpop.eup %4405 }
 0x105   :  { %v4408_v31 = vpop.eup %4407  ;;  %v204_v35 = vmul.f32 %v4406_v28, %v200_v34 }
 0x106   :  { %v203_v39 = vmul.f32 %v4408_v31, %v198_v36 }
 0x168   :  { %v210_v29 = vpop.permute.xlu0 %209 }
 0x169   :  { %v214_v30 = vmul.f32 %v4406_v28, %v210_v29 }
 0x16b   :  { %219 = vrot.lane.b32.xlu0 %v214_v30, %s4756_s1 }
 0x16c   :  { %v208_v32 = vpop.permute.xlu0 %207 }
 0x16d   :  { %v213_v33 = vmul.f32 %v4408_v31, %v208_v32 }
 0x16f   :  { %217 = vrot.lane.b32.xlu1 %v213_v33, %s4756_s1 }
 0x1dd   :  { %v220_v37 = vpop.permute.xlu0 %219 }
 0x1de   :  { %v224_v38 = vadd.f32 %v220_v37, %v204_v35 }
 0x1e0   :  { %v227_v41 = vrot.slane %v224_v38, 7 }
 0x1e1   :  { %v218_v40 = vpop.permute.xlu1 %217 }
 0x1e2   :  { %v223_v42 = vadd.f32 %v218_v40, %v203_v39 }
 0x1e4   :  { %v229_v43 = vsel %vm228_vm3, %v227_v41, %v223_v42 }
 0x1e5   :  { %230 = vrot.lane.b32.xlu0 %v229_v43, %s4758_s5 }
 0x257   :  { %v231_v44 = vpop.permute.xlu0 %230 }
 0x258   :  { %234 = vst.msk [vmem:[#allocation6] sm:$0x3] %vm119_vm0, %v231_v44 }
 0x25f   :  { %v235_v45 = vld [vmem:[#allocation6] sm:$0x3] }
 0x260   :  { %4409 = vtanh.f32 %v235_v45  ;;  %v427_v24 = vld [vmem:[#allocation6] sm:$0x3] }
 0x261   :  { %v429_v25 = vrot.slane %v427_v24, 1 }
 0x26a   :  { %v4410_v46 = vpop.eup %4409 }
 0x26b   :  { %239 = vrot.lane.b32.xlu0 %v4410_v46, %s4758_s5  ;;  %v238_v47 = vrot.slane %v4410_v46, 1 }
 0x26d   :  { %241 = vrot.lane.b32.xlu1 %v238_v47, %s4758_s5 }
 0x26f   :  { %258 = vrot.lane.b32.xlu0 %v256_v48, %s4756_s1 }
 0x2dd   :  { %v240_v49 = vpop.permute.xlu0 %239 }
 0x2de   :  { %v245_v52 = vmul.f32 %v4408_v31, %v240_v49 }
 0x2df   :  { %v242_v50 = vpop.permute.xlu1 %241 }
 0x2e0   :  { %v246_v51 = vmul.f32 %v4406_v28, %v242_v50 }
 0x2e1   :  { %v259_v56 = vpop.permute.xlu0 %258 }
 0x2e2   :  { %v249_v53 = vrot.slane %v246_v51, 7 }
 0x2e4   :  { %v250_v54 = vsel %vm228_vm3, %v249_v53, %v245_v52 }
 0x2e5   :  { %251 = vrot.lane.b32.xlu1 %v250_v54, %s4756_s1 }
 0x357   :  { %v252_v55 = vpop.permute.xlu1 %251 }
 0x358   :  { %254 = vst.msk [vmem:[#allocation5] sm:$0x3] %vm119_vm0, %v252_v55 }
 0x35f   :  { %v255_v57 = vld [vmem:[#allocation5] sm:$0x3] }
 0x360   :  { %v360_v58 = vld [vmem:[#allocation5] sm:$0x3]  ;;  %v261_v59 = vsel %vm130_vm2, %v255_v57, %v259_v56 }
 0x361   :  { %v361_v60 = vpack.c.bf16 %v360_v58, %v360_v58  ;;  %v262_v61 = vpack.c.bf16 %v261_v59, %v261_v59 }
 0x363   :  { %4097 = vmatmul.mubr.msk.bf16.vlgmr.msra.gmra.mrb[0].mxu0 %vm130_vm2, %v361_v60  ;;  %4089 = vmatmul.mubr.msk.bf16.vlgmr.msra.gmra.mrb[4].mxu1 %vm274_vm4, %v262_v61 }
 0x364   :  { %4101 = vmatpush3.bf16.msra.mxu0 %v4797_v2  ;;  %4113 = vmatpush3.bf16.msra.mxu1 %v4787_v0 }
 0x365   :  { %4116 = vmatprep.mubr.msk.bf16.mxu1 %vm4755_vm1, %v4754_v6  ;;  %4114 = vmatprep.subr.bf16.mxu1 %v4754_v6 }
 0x366   :  { %4102 = vmatprep.subr.bf16.mxu0 %v4754_v6  ;;  %4108 = vmatprep.mubr.msk.bf16.mxu0 %vm4755_vm1, %v4754_v6 }
 0x368   :  { %4103 = vmatpush3.bf16.msra.mxu0 %v4802_v3  ;;  %4115 = vmatpush3.bf16.msra.mxu1 %v4792_v1 }
 0x369   :  { %4104 = vmatprep.subr.bf16.mxu0 %v4754_v6  ;;  %4120 = vmatprep.subr.bf16.mxu1 %v4754_v6 }
 0x36c   :  { %4105 = vmatpush3.bf16.msra.mxu0 %v4807_v4 }
 0x36d   :  { %4106 = vmatprep.subr.bf16.mxu0 %v4754_v6 }
 0x370   :  { %4107 = vmatpush3.bf16.msra.mxu0 %v4812_v5 }
 0x371   :  { %4132 = vmatprep.subr.bf16.mxu0 %v4754_v6 }
 0x436   :  { %v401_v7 = vpop.f32.mrb[0].mxu0  ;;  %v312_v10 = vpop.f32.mrb[4].mxu1 }
 0x437   :  { %v408_v9 = vrot.slane %v401_v7, 1  ;;  %v4098_v11 = vpop.f32.mrb[1].mxu0  ;;  %v313_v12 = vadd.f32 %v4890_v62, %v312_v10  ;;  %v4090_v13 = vpop.f32.mrb[5].mxu1  ;;  %v411_v18 = vadd.f32 %v401_v7, %v358_v8 }
 0x438   :  { %v404_v14 = vpop.f32.mrb[2].mxu0  ;;  %v315_v16 = vpop.f32.mrb[6].mxu1 }
 0x439   :  { %v412_v15 = vadd.f32 %v408_v9, %v359_v63  ;;  %v4099_v17 = vpop.f32.mrb[3].mxu0  ;;  %4411 = vtanh.f32 %v313_v12  ;;  %v4091_v19 = vpop.f32.mrb[7].mxu1  ;;  %v3851_v26 = vmul.f32 -1.442695, %v313_v12  ;;  %v3853_v28 = vmul.f32 -1.442695, %v411_v18 }
 0x43b   :  { %4413 = vtanh.f32 %v412_v15  ;;  %v3854_v27 = vmul.f32 -1.442695, %v412_v15 }
 0x43c   :  { %4415 = vtanh.f32 %v411_v18 }
 0x43d   :  { %4417 = vpow2.f32 %v3851_v26  ;;  %v589_v26 = vld [vmem:[%s5629_s0 + $0x12] sm:$0x1] }
 0x43e   :  { %4419 = vpow2.f32 %v3854_v27 }
 0x43f   :  { %4421 = vpow2.f32 %v3853_v28 }
 0x443   :  { %v4412_v20 = vpop.eup %4411 }
 0x444   :  { %332 = vrot.lane.b32.xlu1 %v4412_v20, %s4757_s30 }
 0x445   :  { %v4414_v21 = vpop.eup %4413 }
 0x446   :  { %442 = vrot.lane.b32.xlu0 %v4414_v21, %s4757_s30  ;;  %v4416_v22 = vpop.eup %4415 }
 0x447   :  { %v4418_v29 = vpop.eup %4417 }
 0x448   :  { %440 = vrot.lane.b32.xlu1 %v4416_v22, %s4757_s30  ;;  %v4420_v30 = vpop.eup %4419  ;;  %v321_v31 = vadd.f32 1.0, %v4418_v29 }
 0x449   :  { %v420_v32 = vadd.f32 1.0, %v4420_v30  ;;  %v4422_v33 = vpop.eup %4421 }
 0x44a   :  { %327 = vrot.lane.b32.xlu0 %v325_v23, %s4756_s1  ;;  %4423 = vrcp.f32 %v321_v31  ;;  %v419_v34 = vadd.f32 1.0, %v4422_v33 }
 0x44b   :  { %4425 = vrcp.f32 %v420_v32 }
 0x44c   :  { %4427 = vrcp.f32 %v419_v34 }
 0x44e   :  { %432 = vrot.lane.b32.xlu0 %v429_v25, %s4756_s1 }
 0x454   :  { %v4424_v35 = vpop.eup %4423 }
 0x455   :  { %v4426_v38 = vpop.eup %4425 }
 0x456   :  { %v4428_v42 = vpop.eup %4427 }
 0x4b6   :  { %v333_v36 = vpop.permute.xlu1 %332 }
 0x4b7   :  { %v335_v37 = vmul.f32 %v4424_v35, %v333_v36 }
 0x4b8   :  { %v443_v39 = vpop.permute.xlu0 %442 }
 0x4b9   :  { %v447_v40 = vmul.f32 %v4426_v38, %v443_v39  ;;  %337 = vrot.lane.b32.xlu1 %v335_v37, %s4756_s1 }
 0x4ba   :  { %v441_v41 = vpop.permute.xlu1 %440 }
 0x4bb   :  { %452 = vrot.lane.b32.xlu0 %v447_v40, %s4756_s1  ;;  %v446_v43 = vmul.f32 %v4428_v42, %v441_v41 }
 0x4bc   :  { %v328_v44 = vpop.permute.xlu0 %327 }
 0x4bd   :  { %430 = vrot.lane.b32.xlu1 %v427_v24, %s4756_s1  ;;  %v330_v46 = vmul.f32 %v4424_v35, %v328_v44 }
 0x4c0   :  { %v433_v45 = vpop.permute.xlu0 %432 }
 0x4c1   :  { %450 = vrot.lane.b32.xlu1 %v446_v43, %s4756_s1  ;;  %v437_v50 = vmul.f32 %v4426_v38, %v433_v45 }
 0x52b   :  { %v338_v47 = vpop.permute.xlu1 %337 }
 0x52c   :  { %v340_v48 = vadd.f32 %v338_v47, %v330_v46 }
 0x52d   :  { %v453_v49 = vpop.permute.xlu0 %452 }
 0x52e   :  { %342 = vrot.lane.b32.xlu0 %v340_v48, %s4758_s5  ;;  %v457_v52 = vadd.f32 %v453_v49, %v437_v50 }
 0x52f   :  { %v431_v51 = vpop.permute.xlu1 %430 }
 0x530   :  { %v436_v53 = vmul.f32 %v4428_v42, %v431_v51  ;;  %v460_v55 = vrot.slane %v457_v52, 7 }
 0x533   :  { %v451_v54 = vpop.permute.xlu1 %450 }
 0x534   :  { %v456_v56 = vadd.f32 %v451_v54, %v436_v53 }
 0x536   :  { %v461_v57 = vsel %vm228_vm3, %v460_v55, %v456_v56 }
 0x537   :  { %462 = vrot.lane.b32.xlu1 %v461_v57, %s4758_s5 }
 0x5a0   :  { %v343_v58 = vpop.permute.xlu0 %342 }
 0x5a1   :  { %345 = vst.msk [vmem:[#allocation8] sm:$0x3] %vm119_vm0, %v343_v58 }
 0x5a8   :  { %v346_v59 = vld [vmem:[#allocation8] sm:$0x3] }
 0x5a9   :  { %v463_v60 = vpop.permute.xlu1 %462  ;;  %4429 = vtanh.f32 %v346_v59  ;;  %v555_v34 = vld [vmem:[#allocation8] sm:$0x3] }
 0x5aa   :  { %465 = vst.msk [vmem:[#allocation6] sm:$0x3] %vm119_vm0, %v463_v60 }
 0x5b1   :  { %v466_v61 = vld [vmem:[#allocation6] sm:$0x3] }
 0x5b2   :  { %4431 = vtanh.f32 %v466_v61 }
 0x5b3   :  { %v4430_v63 = vpop.eup %4429 }
 0x5b4   :  { %349 = vrot.lane.b32.xlu0 %v4430_v63, %s4758_s5 }
 0x5bc   :  { %v4432_v7 = vpop.eup %4431 }
 0x5bd   :  { %470 = vrot.lane.b32.xlu0 %v4432_v7, %s4758_s5  ;;  %v469_v8 = vrot.slane %v4432_v7, 1 }
 0x5bf   :  { %472 = vrot.lane.b32.xlu1 %v469_v8, %s4758_s5 }
 0x626   :  { %v350_v9 = vpop.permute.xlu0 %349 }
 0x627   :  { %v352_v10 = vmul.f32 %v4424_v35, %v350_v9  ;;  %v657_v35 = vld [vmem:[#allocation6] sm:$0x3] }
 0x628   :  { %v659_v36 = vrot.slane %v657_v35, 1 }
 0x629   :  { %354 = vrot.lane.b32.xlu1 %v352_v10, %s4756_s1 }
 0x62f   :  { %v471_v11 = vpop.permute.xlu0 %470 }
 0x630   :  { %v476_v14 = vmul.f32 %v4428_v42, %v471_v11 }
 0x631   :  { %v473_v12 = vpop.permute.xlu1 %472 }
 0x632   :  { %v477_v13 = vmul.f32 %v4426_v38, %v473_v12  ;;  %v588_v38 = vld [vmem:[%s5629_s0 + $0x2] sm:$0x1] }
 0x634   :  { %v480_v15 = vrot.slane %v477_v13, 7 }
 0x636   :  { %v481_v16 = vsel %vm228_vm3, %v480_v15, %v476_v14 }
 0x637   :  { %482 = vrot.lane.b32.xlu0 %v481_v16, %s4756_s1 }
 0x69b   :  { %v355_v17 = vpop.permute.xlu1 %354 }
 0x69c   :  { %357 = vst.msk [vmem:[#allocation7] sm:$0x3] %vm119_vm0, %v355_v17 }
 0x6a3   :  { %v487_v18 = vld [vmem:[#allocation7] sm:$0x3] }
 0x6a4   :  { %489 = vrot.lane.b32.xlu1 %v487_v18, %s4756_s1 }
 0x6a9   :  { %v483_v19 = vpop.permute.xlu0 %482 }
 0x6aa   :  { %485 = vst.msk [vmem:[#allocation5] sm:$0x3] %vm119_vm0, %v483_v19 }
 0x6b1   :  { %v590_v20 = vld [vmem:[#allocation5] sm:$0x3] }
 0x6b2   :  { %v591_v21 = vpack.c.bf16 %v590_v20, %v590_v20  ;;  %v486_v22 = vld [vmem:[#allocation5] sm:$0x3] }
 0x6b4   :  { %4117 = vmatmul.mubr.msk.bf16.vlgmr.msra.gmra.mrb[8].mxu1 %vm130_vm2, %v591_v21 }
 0x6b5   :  { %4121 = vmatpush3.bf16.msra.mxu1 %v4797_v2  ;;  %4128 = vmatprep.mubr.msk.bf16.mxu1 %vm4755_vm1, %v4754_v6 }
 0x6b6   :  { %4122 = vmatprep.subr.bf16.mxu1 %v4754_v6 }
 0x6b9   :  { %4123 = vmatpush3.bf16.msra.mxu1 %v4802_v3 }
 0x6ba   :  { %4124 = vmatprep.subr.bf16.mxu1 %v4754_v6 }
 0x6bd   :  { %4125 = vmatpush3.bf16.msra.mxu1 %v4807_v4 }
 0x6be   :  { %4126 = vmatprep.subr.bf16.mxu1 %v4754_v6 }
 0x6c1   :  { %4127 = vmatpush3.bf16.msra.mxu1 %v4812_v5 }
 0x6c2   :  { %4152 = vmatprep.subr.bf16.mxu1 %v4754_v6 }
 0x716   :  { %v490_v23 = vpop.permute.xlu1 %489 }
 0x717   :  { %v492_v24 = vsel %vm130_vm2, %v486_v22, %v490_v23 }
 0x718   :  { %v493_v25 = vpack.c.bf16 %v492_v24, %v492_v24 }
 0x71a   :  { %4109 = vmatmul.mubr.msk.bf16.vlgmr.msra.gmra.mrb[4].mxu0 %vm274_vm4, %v493_v25 }
 0x71b   :  { %4133 = vmatpush3.bf16.msra.mxu0 %v4787_v0  ;;  %4136 = vmatprep.mubr.msk.bf16.mxu0 %vm4755_vm1, %v4754_v6 }
 0x71c   :  { %4134 = vmatprep.subr.bf16.mxu0 %v4754_v6 }
 0x71f   :  { %4135 = vmatpush3.bf16.msra.mxu0 %v4792_v1 }
 0x720   :  { %4140 = vmatprep.subr.bf16.mxu0 %v4754_v6 }
 0x787   :  { %v631_v27 = vpop.f32.mrb[8].mxu1 }
 0x788   :  { %v638_v28 = vrot.slane %v631_v27, 1  ;;  %v4118_v29 = vpop.f32.mrb[9].mxu1  ;;  %v641_v43 = vadd.f32 %v631_v27, %v588_v38 }
 0x789   :  { %v634_v30 = vpop.f32.mrb[10].mxu1 }
 0x78a   :  { %v642_v31 = vadd.f32 %v638_v28, %v589_v26  ;;  %v4119_v32 = vpop.f32.mrb[11].mxu1  ;;  %v3859_v53 = vmul.f32 -1.442695, %v641_v43 }
 0x78c   :  { %4433 = vtanh.f32 %v642_v31  ;;  %v3860_v37 = vmul.f32 -1.442695, %v642_v31 }
 0x78e   :  { %4435 = vpow2.f32 %v3860_v37 }
 0x796   :  { %v4434_v33 = vpop.eup %4433 }
 0x797   :  { %672 = vrot.lane.b32.xlu1 %v4434_v33, %s4757_s30 }
 0x798   :  { %v4436_v45 = vpop.eup %4435 }
 0x799   :  { %v650_v47 = vadd.f32 1.0, %v4436_v45 }
 0x79b   :  { %557 = vrot.lane.b32.xlu1 %v555_v34, %s4756_s1 }
 0x79f   :  { %662 = vrot.lane.b32.xlu1 %v659_v36, %s4756_s1 }
 0x7ed   :  { %v542_v39 = vpop.f32.mrb[4].mxu0 }
 0x7ee   :  { %v543_v40 = vadd.f32 %v4890_v62, %v542_v39  ;;  %v4110_v41 = vpop.f32.mrb[5].mxu0 }
 0x7ef   :  { %v545_v42 = vpop.f32.mrb[6].mxu0 }
 0x7f0   :  { %4437 = vtanh.f32 %v543_v40  ;;  %v4111_v44 = vpop.f32.mrb[7].mxu0  ;;  %v3857_v52 = vmul.f32 -1.442695, %v543_v40 }
 0x7f1   :  { %4439 = vtanh.f32 %v641_v43 }
 0x7f2   :  { %4441 = vrcp.f32 %v650_v47 }
 0x7f3   :  { %4443 = vpow2.f32 %v3857_v52 }
 0x7f4   :  { %4445 = vpow2.f32 %v3859_v53 }
 0x7fa   :  { %v4438_v46 = vpop.eup %4437 }
 0x7fb   :  { %562 = vrot.lane.b32.xlu0 %v4438_v46, %s4757_s30  ;;  %v4440_v48 = vpop.eup %4439  ;;  %v819_v46 = vld [vmem:[%s5629_s0 + $0x13] sm:$0x1] }
 0x7fc   :  { %v4442_v49 = vpop.eup %4441 }
 0x7fd   :  { %v4444_v54 = vpop.eup %4443 }
 0x7fe   :  { %v551_v55 = vadd.f32 1.0, %v4444_v54  ;;  %v4446_v56 = vpop.eup %4445 }
 0x7ff   :  { %670 = vrot.lane.b32.xlu0 %v4440_v48, %s4757_s30  ;;  %v649_v57 = vadd.f32 1.0, %v4446_v56 }
 0x800   :  { %4447 = vrcp.f32 %v551_v55 }
 0x801   :  { %4449 = vrcp.f32 %v649_v57 }
 0x809   :  { %v673_v50 = vpop.permute.xlu1 %672 }
 0x80a   :  { %v677_v51 = vmul.f32 %v4442_v49, %v673_v50  ;;  %v4448_v58 = vpop.eup %4447 }
 0x80b   :  { %v4450_v63 = vpop.eup %4449 }
 0x80c   :  { %682 = vrot.lane.b32.xlu1 %v677_v51, %s4756_s1 }
 0x80d   :  { %v558_v8 = vpop.permute.xlu1 %557 }
 0x80e   :  { %v560_v10 = vmul.f32 %v4448_v58, %v558_v8 }
 0x811   :  { %v663_v9 = vpop.permute.xlu1 %662 }
 0x812   :  { %v667_v14 = vmul.f32 %v4442_v49, %v663_v9 }
 0x86d   :  { %v563_v59 = vpop.permute.xlu0 %562 }
 0x86e   :  { %v565_v60 = vmul.f32 %v4448_v58, %v563_v59 }
 0x870   :  { %567 = vrot.lane.b32.xlu0 %v565_v60, %s4756_s1 }
 0x871   :  { %v671_v61 = vpop.permute.xlu0 %670 }
 0x872   :  { %v676_v7 = vmul.f32 %v4450_v63, %v671_v61 }
 0x874   :  { %660 = vrot.lane.b32.xlu0 %v657_v35, %s4756_s1 }
 0x878   :  { %680 = vrot.lane.b32.xlu0 %v676_v7, %s4756_s1 }
 0x87e   :  { %v683_v13 = vpop.permute.xlu1 %682 }
 0x87f   :  { %v687_v16 = vadd.f32 %v683_v13, %v667_v14 }
 0x881   :  { %v690_v19 = vrot.slane %v687_v16, 7 }
 0x8e2   :  { %v568_v11 = vpop.permute.xlu0 %567 }
 0x8e3   :  { %v570_v12 = vadd.f32 %v568_v11, %v560_v10 }
 0x8e5   :  { %572 = vrot.lane.b32.xlu1 %v570_v12, %s4758_s5 }
 0x8e6   :  { %v661_v15 = vpop.permute.xlu0 %660 }
 0x8e7   :  { %v666_v17 = vmul.f32 %v4450_v63, %v661_v15 }
 0x8ea   :  { %v681_v18 = vpop.permute.xlu0 %680 }
 0x8eb   :  { %v686_v20 = vadd.f32 %v681_v18, %v666_v17 }
 0x8ed   :  { %v691_v21 = vsel %vm228_vm3, %v690_v19, %v686_v20 }
 0x8ee   :  { %692 = vrot.lane.b32.xlu0 %v691_v21, %s4758_s5 }
 0x957   :  { %v573_v22 = vpop.permute.xlu1 %572 }
 0x958   :  { %575 = vst.msk [vmem:[#allocation8] sm:$0x3] %vm119_vm0, %v573_v22 }
 0x95f   :  { %v576_v23 = vld [vmem:[#allocation8] sm:$0x3] }
 0x960   :  { %v693_v24 = vpop.permute.xlu0 %692  ;;  %4451 = vtanh.f32 %v576_v23  ;;  %v785_v54 = vld [vmem:[#allocation8] sm:$0x3] }
 0x961   :  { %695 = vst.msk [vmem:[#allocation6] sm:$0x3] %vm119_vm0, %v693_v24 }
 0x968   :  { %v696_v25 = vld [vmem:[#allocation6] sm:$0x3] }
 0x969   :  { %4453 = vtanh.f32 %v696_v25  ;;  %v887_v55 = vld [vmem:[#allocation6] sm:$0x3] }
 0x96a   :  { %v4452_v26 = vpop.eup %4451  ;;  %v889_v56 = vrot.slane %v887_v55, 1 }
 0x96b   :  { %579 = vrot.lane.b32.xlu1 %v4452_v26, %s4758_s5 }
 0x973   :  { %v4454_v27 = vpop.eup %4453 }
 0x974   :  { %700 = vrot.lane.b32.xlu1 %v4454_v27, %s4758_s5  ;;  %v699_v28 = vrot.slane %v4454_v27, 1 }
 0x976   :  { %702 = vrot.lane.b32.xlu0 %v699_v28, %s4758_s5 }
 0x9dd   :  { %v580_v29 = vpop.permute.xlu1 %579 }
 0x9de   :  { %v582_v30 = vmul.f32 %v4448_v58, %v580_v29  ;;  %v818_v58 = vld [vmem:[%s5629_s0 + $0x3] sm:$0x1] }
 0x9e0   :  { %584 = vrot.lane.b32.xlu0 %v582_v30, %s4756_s1 }
 0x9e6   :  { %v701_v31 = vpop.permute.xlu1 %700 }
 0x9e7   :  { %v706_v34 = vmul.f32 %v4450_v63, %v701_v31 }
 0x9e8   :  { %v703_v32 = vpop.permute.xlu0 %702 }
 0x9e9   :  { %v707_v33 = vmul.f32 %v4442_v49, %v703_v32 }
 0x9eb   :  { %v710_v35 = vrot.slane %v707_v33, 7 }
 0x9ed   :  { %v711_v36 = vsel %vm228_vm3, %v710_v35, %v706_v34 }
 0x9ee   :  { %712 = vrot.lane.b32.xlu1 %v711_v36, %s4756_s1 }
 0xa52   :  { %v585_v37 = vpop.permute.xlu0 %584 }
 0xa53   :  { %587 = vst.msk [vmem:[#allocation7] sm:$0x3] %vm119_vm0, %v585_v37 }
 0xa5a   :  { %v717_v38 = vld [vmem:[#allocation7] sm:$0x3] }
 0xa5b   :  { %719 = vrot.lane.b32.xlu0 %v717_v38, %s4756_s1 }
 0xa60   :  { %v713_v39 = vpop.permute.xlu1 %712 }
 0xa61   :  { %715 = vst.msk [vmem:[#allocation5] sm:$0x3] %vm119_vm0, %v713_v39 }
 0xa68   :  { %v820_v40 = vld [vmem:[#allocation5] sm:$0x3] }
 0xa69   :  { %v821_v41 = vpack.c.bf16 %v820_v40, %v820_v40  ;;  %v716_v42 = vld [vmem:[#allocation5] sm:$0x3] }
 0xa6b   :  { %4137 = vmatmul.mubr.msk.bf16.vlgmr.msra.gmra.mrb[8].mxu0 %vm130_vm2, %v821_v41 }
 0xa6c   :  { %4141 = vmatpush3.bf16.msra.mxu0 %v4797_v2  ;;  %4148 = vmatprep.mubr.msk.bf16.mxu0 %vm4755_vm1, %v4754_v6 }
 0xa6d   :  { %4142 = vmatprep.subr.bf16.mxu0 %v4754_v6 }
 0xa70   :  { %4143 = vmatpush3.bf16.msra.mxu0 %v4802_v3 }
 0xa71   :  { %4144 = vmatprep.subr.bf16.mxu0 %v4754_v6 }
 0xa74   :  { %4145 = vmatpush3.bf16.msra.mxu0 %v4807_v4 }
 0xa75   :  { %4146 = vmatprep.subr.bf16.mxu0 %v4754_v6 }
 0xa78   :  { %4147 = vmatpush3.bf16.msra.mxu0 %v4812_v5 }
 0xa79   :  { %4172 = vmatprep.subr.bf16.mxu0 %v4754_v6 }
 0xacd   :  { %v720_v43 = vpop.permute.xlu0 %719 }
 0xace   :  { %v722_v44 = vsel %vm130_vm2, %v716_v42, %v720_v43 }
 0xacf   :  { %v723_v45 = vpack.c.bf16 %v722_v44, %v722_v44 }
 0xad1   :  { %4129 = vmatmul.mubr.msk.bf16.vlgmr.msra.gmra.mrb[12].mxu1 %vm274_vm4, %v723_v45 }
 0xad2   :  { %4153 = vmatpush3.bf16.msra.mxu1 %v4787_v0  ;;  %4156 = vmatprep.mubr.msk.bf16.mxu1 %vm4755_vm1, %v4754_v6 }
 0xad3   :  { %4154 = vmatprep.subr.bf16.mxu1 %v4754_v6 }
 0xad6   :  { %4155 = vmatpush3.bf16.msra.mxu1 %v4792_v1 }
 0xad7   :  { %4160 = vmatprep.subr.bf16.mxu1 %v4754_v6 }
 0xb3e   :  { %v861_v47 = vpop.f32.mrb[8].mxu0 }
 0xb3f   :  { %v868_v48 = vrot.slane %v861_v47, 1  ;;  %v4138_v49 = vpop.f32.mrb[9].mxu0  ;;  %v871_v7 = vadd.f32 %v861_v47, %v818_v58 }
 0xb40   :  { %v864_v50 = vpop.f32.mrb[10].mxu0 }
 0xb41   :  { %v872_v51 = vadd.f32 %v868_v48, %v819_v46  ;;  %v4139_v52 = vpop.f32.mrb[11].mxu0  ;;  %v3865_v17 = vmul.f32 -1.442695, %v871_v7 }
 0xb43   :  { %4455 = vtanh.f32 %v872_v51  ;;  %v3866_v57 = vmul.f32 -1.442695, %v872_v51 }
 0xb45   :  { %4457 = vpow2.f32 %v3866_v57 }
 0xb4d   :  { %v4456_v53 = vpop.eup %4455 }
 0xb4e   :  { %902 = vrot.lane.b32.xlu0 %v4456_v53, %s4757_s30 }
 0xb4f   :  { %v4458_v9 = vpop.eup %4457 }
 0xb50   :  { %v880_v11 = vadd.f32 1.0, %v4458_v9 }
 0xb52   :  { %787 = vrot.lane.b32.xlu0 %v785_v54, %s4756_s1 }
 0xb56   :  { %892 = vrot.lane.b32.xlu0 %v889_v56, %s4756_s1 }
 0xba4   :  { %v772_v59 = vpop.f32.mrb[12].mxu1 }
 0xba5   :  { %v773_v60 = vadd.f32 %v4890_v62, %v772_v59  ;;  %v4130_v61 = vpop.f32.mrb[13].mxu1 }
 0xba6   :  { %v775_v63 = vpop.f32.mrb[14].mxu1 }
 0xba7   :  { %4459 = vtanh.f32 %v773_v60  ;;  %v4131_v8 = vpop.f32.mrb[15].mxu1  ;;  %v3863_v16 = vmul.f32 -1.442695, %v773_v60 }
 0xba8   :  { %4461 = vtanh.f32 %v871_v7 }
 0xba9   :  { %4463 = vrcp.f32 %v880_v11 }
 0xbaa   :  { %4465 = vpow2.f32 %v3863_v16 }
 0xbab   :  { %4467 = vpow2.f32 %v3865_v17 }
 0xbb1   :  { %v4460_v10 = vpop.eup %4459 }
 0xbb2   :  { %792 = vrot.lane.b32.xlu1 %v4460_v10, %s4757_s30  ;;  %v4462_v12 = vpop.eup %4461  ;;  %v1049_v10 = vld [vmem:[%s5629_s0 + $0x14] sm:$0x1] }
 0xbb3   :  { %v4464_v13 = vpop.eup %4463 }
 0xbb4   :  { %v4466_v18 = vpop.eup %4465 }
 0xbb5   :  { %v781_v19 = vadd.f32 1.0, %v4466_v18  ;;  %v4468_v20 = vpop.eup %4467 }
 0xbb6   :  { %900 = vrot.lane.b32.xlu1 %v4462_v12, %s4757_s30  ;;  %v879_v21 = vadd.f32 1.0, %v4468_v20 }
 0xbb7   :  { %4469 = vrcp.f32 %v781_v19 }
 0xbb8   :  { %4471 = vrcp.f32 %v879_v21 }
 0xbc0   :  { %v903_v14 = vpop.permute.xlu0 %902 }
 0xbc1   :  { %v907_v15 = vmul.f32 %v4464_v13, %v903_v14  ;;  %v4470_v22 = vpop.eup %4469 }
 0xbc2   :  { %v4472_v26 = vpop.eup %4471 }
 0xbc3   :  { %912 = vrot.lane.b32.xlu0 %v907_v15, %s4756_s1 }
 0xbc4   :  { %v788_v28 = vpop.permute.xlu0 %787 }
 0xbc5   :  { %v790_v30 = vmul.f32 %v4470_v22, %v788_v28 }
 0xbc8   :  { %v893_v29 = vpop.permute.xlu0 %892 }
 0xbc9   :  { %v897_v34 = vmul.f32 %v4464_v13, %v893_v29 }
 0xc24   :  { %v793_v23 = vpop.permute.xlu1 %792 }
 0xc25   :  { %v795_v24 = vmul.f32 %v4470_v22, %v793_v23 }
 0xc27   :  { %797 = vrot.lane.b32.xlu1 %v795_v24, %s4756_s1 }
 0xc28   :  { %v901_v25 = vpop.permute.xlu1 %900 }
 0xc29   :  { %v906_v27 = vmul.f32 %v4472_v26, %v901_v25 }
 0xc2b   :  { %890 = vrot.lane.b32.xlu1 %v887_v55, %s4756_s1 }
 0xc2f   :  { %910 = vrot.lane.b32.xlu1 %v906_v27, %s4756_s1 }
 0xc35   :  { %v913_v33 = vpop.permute.xlu0 %912 }
 0xc36   :  { %v917_v36 = vadd.f32 %v913_v33, %v897_v34 }
 0xc38   :  { %v920_v39 = vrot.slane %v917_v36, 7 }
 0xc99   :  { %v798_v31 = vpop.permute.xlu1 %797 }
 0xc9a   :  { %v800_v32 = vadd.f32 %v798_v31, %v790_v30 }
 0xc9c   :  { %802 = vrot.lane.b32.xlu0 %v800_v32, %s4758_s5 }
 0xc9d   :  { %v891_v35 = vpop.permute.xlu1 %890 }
 0xc9e   :  { %v896_v37 = vmul.f32 %v4472_v26, %v891_v35 }
 0xca1   :  { %v911_v38 = vpop.permute.xlu1 %910 }
 0xca2   :  { %v916_v40 = vadd.f32 %v911_v38, %v896_v37 }
 0xca4   :  { %v921_v41 = vsel %vm228_vm3, %v920_v39, %v916_v40 }
 0xca5   :  { %922 = vrot.lane.b32.xlu1 %v921_v41, %s4758_s5 }
 0xd0e   :  { %v803_v42 = vpop.permute.xlu0 %802 }
 0xd0f   :  { %805 = vst.msk [vmem:[#allocation8] sm:$0x3] %vm119_vm0, %v803_v42 }
 0xd16   :  { %v806_v43 = vld [vmem:[#allocation8] sm:$0x3] }
 0xd17   :  { %v923_v44 = vpop.permute.xlu1 %922  ;;  %4473 = vtanh.f32 %v806_v43  ;;  %v1015_v18 = vld [vmem:[#allocation8] sm:$0x3] }
 0xd18   :  { %925 = vst.msk [vmem:[#allocation6] sm:$0x3] %vm119_vm0, %v923_v44 }
 0xd1f   :  { %v926_v45 = vld [vmem:[#allocation6] sm:$0x3] }
 0xd20   :  { %4475 = vtanh.f32 %v926_v45  ;;  %v1117_v19 = vld [vmem:[#allocation6] sm:$0x3] }
 0xd21   :  { %v4474_v46 = vpop.eup %4473  ;;  %v1119_v20 = vrot.slane %v1117_v19, 1 }
 0xd22   :  { %809 = vrot.lane.b32.xlu0 %v4474_v46, %s4758_s5 }
 0xd2a   :  { %v4476_v47 = vpop.eup %4475 }
 0xd2b   :  { %930 = vrot.lane.b32.xlu0 %v4476_v47, %s4758_s5  ;;  %v929_v48 = vrot.slane %v4476_v47, 1 }
 0xd2d   :  { %932 = vrot.lane.b32.xlu1 %v929_v48, %s4758_s5 }
 0xd94   :  { %v810_v49 = vpop.permute.xlu0 %809 }
 0xd95   :  { %v812_v50 = vmul.f32 %v4470_v22, %v810_v49  ;;  %v1048_v22 = vld [vmem:[%s5629_s0 + $0x4] sm:$0x1] }
 0xd97   :  { %814 = vrot.lane.b32.xlu1 %v812_v50, %s4756_s1 }
 0xd9d   :  { %v931_v51 = vpop.permute.xlu0 %930 }
 0xd9e   :  { %v936_v54 = vmul.f32 %v4472_v26, %v931_v51 }
 0xd9f   :  { %v933_v52 = vpop.permute.xlu1 %932 }
 0xda0   :  { %v937_v53 = vmul.f32 %v4464_v13, %v933_v52 }
 0xda2   :  { %v940_v55 = vrot.slane %v937_v53, 7 }
 0xda4   :  { %v941_v56 = vsel %vm228_vm3, %v940_v55, %v936_v54 }
 0xda5   :  { %942 = vrot.lane.b32.xlu0 %v941_v56, %s4756_s1 }
 0xe09   :  { %v815_v57 = vpop.permute.xlu1 %814 }
 0xe0a   :  { %817 = vst.msk [vmem:[#allocation7] sm:$0x3] %vm119_vm0, %v815_v57 }
 0xe11   :  { %v947_v58 = vld [vmem:[#allocation7] sm:$0x3] }
 0xe12   :  { %949 = vrot.lane.b32.xlu1 %v947_v58, %s4756_s1 }
 0xe17   :  { %v943_v59 = vpop.permute.xlu0 %942 }
 0xe18   :  { %945 = vst.msk [vmem:[#allocation5] sm:$0x3] %vm119_vm0, %v943_v59 }
 0xe1f   :  { %v1050_v60 = vld [vmem:[#allocation5] sm:$0x3] }
 0xe20   :  { %v1051_v61 = vpack.c.bf16 %v1050_v60, %v1050_v60  ;;  %v946_v7 = vld [vmem:[#allocation5] sm:$0x3] }
 0xe22   :  { %4157 = vmatmul.mubr.msk.bf16.vlgmr.msra.gmra.mrb[16].mxu1 %vm130_vm2, %v1051_v61 }
 0xe23   :  { %4161 = vmatpush3.bf16.msra.mxu1 %v4797_v2  ;;  %4168 = vmatprep.mubr.msk.bf16.mxu1 %vm4755_vm1, %v4754_v6 }
 0xe24   :  { %4162 = vmatprep.subr.bf16.mxu1 %v4754_v6 }
 0xe27   :  { %4163 = vmatpush3.bf16.msra.mxu1 %v4802_v3 }
 0xe28   :  { %4164 = vmatprep.subr.bf16.mxu1 %v4754_v6 }
 0xe2b   :  { %4165 = vmatpush3.bf16.msra.mxu1 %v4807_v4 }
 0xe2c   :  { %4166 = vmatprep.subr.bf16.mxu1 %v4754_v6 }
 0xe2f   :  { %4167 = vmatpush3.bf16.msra.mxu1 %v4812_v5 }
 0xe30   :  { %4192 = vmatprep.subr.bf16.mxu1 %v4754_v6 }
 0xe84   :  { %v950_v63 = vpop.permute.xlu1 %949 }
 0xe85   :  { %v952_v8 = vsel %vm130_vm2, %v946_v7, %v950_v63 }
 0xe86   :  { %v953_v9 = vpack.c.bf16 %v952_v8, %v952_v8 }
 0xe88   :  { %4149 = vmatmul.mubr.msk.bf16.vlgmr.msra.gmra.mrb[12].mxu0 %vm274_vm4, %v953_v9 }
 0xe89   :  { %4173 = vmatpush3.bf16.msra.mxu0 %v4787_v0  ;;  %4176 = vmatprep.mubr.msk.bf16.mxu0 %vm4755_vm1, %v4754_v6 }
 0xe8a   :  { %4174 = vmatprep.subr.bf16.mxu0 %v4754_v6 }
 0xe8d   :  { %4175 = vmatpush3.bf16.msra.mxu0 %v4792_v1 }
 0xe8e   :  { %4180 = vmatprep.subr.bf16.mxu0 %v4754_v6 }
 0xef5   :  { %v1091_v11 = vpop.f32.mrb[16].mxu1 }
 0xef6   :  { %v1098_v12 = vrot.slane %v1091_v11, 1  ;;  %v4158_v13 = vpop.f32.mrb[17].mxu1  ;;  %v1101_v27 = vadd.f32 %v1091_v11, %v1048_v22 }
 0xef7   :  { %v1094_v14 = vpop.f32.mrb[18].mxu1 }
 0xef8   :  { %v1102_v15 = vadd.f32 %v1098_v12, %v1049_v10  ;;  %v4159_v16 = vpop.f32.mrb[19].mxu1  ;;  %v3871_v36 = vmul.f32 -1.442695, %v1101_v27 }
 0xefa   :  { %4477 = vtanh.f32 %v1102_v15  ;;  %v3872_v21 = vmul.f32 -1.442695, %v1102_v15 }
 0xefc   :  { %4479 = vpow2.f32 %v3872_v21 }
 0xf04   :  { %v4478_v17 = vpop.eup %4477 }
 0xf05   :  { %1132 = vrot.lane.b32.xlu1 %v4478_v17, %s4757_s30 }
 0xf06   :  { %v4480_v29 = vpop.eup %4479 }
 0xf07   :  { %v1110_v31 = vadd.f32 1.0, %v4480_v29  ;;  %v1279_v29 = vld [vmem:[%s5629_s0 + $0x15] sm:$0x1] }
 0xf09   :  { %1017 = vrot.lane.b32.xlu1 %v1015_v18, %s4756_s1 }
 0xf0d   :  { %1122 = vrot.lane.b32.xlu1 %v1119_v20, %s4756_s1 }
 0xf5b   :  { %v1002_v23 = vpop.f32.mrb[12].mxu0 }
 0xf5c   :  { %v1003_v24 = vadd.f32 %v4890_v62, %v1002_v23  ;;  %v4150_v25 = vpop.f32.mrb[13].mxu0 }
 0xf5d   :  { %v1005_v26 = vpop.f32.mrb[14].mxu0 }
 0xf5e   :  { %4481 = vtanh.f32 %v1003_v24  ;;  %v4151_v28 = vpop.f32.mrb[15].mxu0  ;;  %v3869_v62 = vmul.f32 -1.442695, %v1003_v24 }
 0xf5f   :  { %4483 = vtanh.f32 %v1101_v27 }
 0xf60   :  { %4485 = vrcp.f32 %v1110_v31 }
 0xf61   :  { %4487 = vpow2.f32 %v3869_v62 }
 0xf62   :  { %4489 = vpow2.f32 %v3871_v36 }
 0xf68   :  { %v4482_v30 = vpop.eup %4481 }
 0xf69   :  { %1022 = vrot.lane.b32.xlu0 %v4482_v30, %s4757_s30  ;;  %v4484_v32 = vpop.eup %4483 }
 0xf6a   :  { %v4486_v33 = vpop.eup %4485 }
 0xf6b   :  { %v4488_v37 = vpop.eup %4487 }
 0xf6c   :  { %v1011_v38 = vadd.f32 1.0, %v4488_v37  ;;  %v4490_v39 = vpop.eup %4489 }
 0xf6d   :  { %1130 = vrot.lane.b32.xlu0 %v4484_v32, %s4757_s30  ;;  %v1109_v40 = vadd.f32 1.0, %v4490_v39 }
 0xf6e   :  { %4491 = vrcp.f32 %v1011_v38 }
 0xf6f   :  { %4493 = vrcp.f32 %v1109_v40  ;;  %v1278_v40 = vld [vmem:[%s5629_s0 + $0x5] sm:$0x1] }
 0xf77   :  { %v1133_v34 = vpop.permute.xlu1 %1132 }
 0xf78   :  { %v1137_v35 = vmul.f32 %v4486_v33, %v1133_v34  ;;  %v4492_v41 = vpop.eup %4491 }
 0xf79   :  { %v4494_v45 = vpop.eup %4493 }
 0xf7a   :  { %1142 = vrot.lane.b32.xlu1 %v1137_v35, %s4756_s1 }
 0xf7b   :  { %v1018_v47 = vpop.permute.xlu1 %1017 }
 0xf7c   :  { %v1020_v49 = vmul.f32 %v4492_v41, %v1018_v47 }
 0xf7f   :  { %v1123_v48 = vpop.permute.xlu1 %1122 }
 0xf80   :  { %v1127_v53 = vmul.f32 %v4486_v33, %v1123_v48 }
 0xfdb   :  { %v1023_v42 = vpop.permute.xlu0 %1022 }
 0xfdc   :  { %v1025_v43 = vmul.f32 %v4492_v41, %v1023_v42  ;;  %v4749_v42 = vld [vmem:[%s5632_s3] ss:$0 sm:$0xff] }
 0xfde   :  { %1027 = vrot.lane.b32.xlu0 %v1025_v43, %s4756_s1 }
 0xfdf   :  { %v1131_v44 = vpop.permute.xlu0 %1130 }
 0xfe0   :  { %v1136_v46 = vmul.f32 %v4494_v45, %v1131_v44 }
 0xfe2   :  { %1120 = vrot.lane.b32.xlu0 %v1117_v19, %s4756_s1 }
 0xfe6   :  { %1140 = vrot.lane.b32.xlu0 %v1136_v46, %s4756_s1 }
 0xfec   :  { %v1143_v52 = vpop.permute.xlu1 %1142 }
 0xfed   :  { %v1147_v55 = vadd.f32 %v1143_v52, %v1127_v53 }
 0xfef   :  { %v1150_v58 = vrot.slane %v1147_v55, 7 }
0x1050   :  { %v1028_v50 = vpop.permute.xlu0 %1027 }
0x1051   :  { %v1030_v51 = vadd.f32 %v1028_v50, %v1020_v49 }
0x1053   :  { %1032 = vrot.lane.b32.xlu1 %v1030_v51, %s4758_s5 }
0x1054   :  { %v1121_v54 = vpop.permute.xlu0 %1120 }
0x1055   :  { %v1126_v56 = vmul.f32 %v4494_v45, %v1121_v54 }
0x1058   :  { %v1141_v57 = vpop.permute.xlu0 %1140 }
0x1059   :  { %v1146_v59 = vadd.f32 %v1141_v57, %v1126_v56 }
0x105b   :  { %v1151_v60 = vsel %vm228_vm3, %v1150_v58, %v1146_v59 }
0x105c   :  { %1152 = vrot.lane.b32.xlu0 %v1151_v60, %s4758_s5 }
0x10c5   :  { %v1033_v61 = vpop.permute.xlu1 %1032 }
0x10c6   :  { %1035 = vst.msk [vmem:[#allocation8] sm:$0x3] %vm119_vm0, %v1033_v61 }
0x10cd   :  { %v1036_v63 = vld [vmem:[#allocation8] sm:$0x3] }
0x10ce   :  { %v1153_v7 = vpop.permute.xlu0 %1152  ;;  %4495 = vtanh.f32 %v1036_v63  ;;  %v1245_v36 = vld [vmem:[#allocation8] sm:$0x3] }
0x10cf   :  { %1155 = vst.msk [vmem:[#allocation6] sm:$0x3] %vm119_vm0, %v1153_v7 }
0x10d6   :  { %v1156_v8 = vld [vmem:[#allocation6] sm:$0x3] }
0x10d7   :  { %4497 = vtanh.f32 %v1156_v8  ;;  %v1347_v37 = vld [vmem:[#allocation6] sm:$0x3] }
0x10d8   :  { %v4496_v9 = vpop.eup %4495  ;;  %v1349_v38 = vrot.slane %v1347_v37, 1 }
0x10d9   :  { %1039 = vrot.lane.b32.xlu1 %v4496_v9, %s4758_s5 }
0x10e1   :  { %v4498_v10 = vpop.eup %4497 }
0x10e2   :  { %1160 = vrot.lane.b32.xlu1 %v4498_v10, %s4758_s5  ;;  %v1159_v11 = vrot.slane %v4498_v10, 1 }
0x10e4   :  { %1162 = vrot.lane.b32.xlu0 %v1159_v11, %s4758_s5 }
0x114b   :  { %v1040_v12 = vpop.permute.xlu1 %1039 }
0x114c   :  { %v1042_v13 = vmul.f32 %v4492_v41, %v1040_v12 }
0x114e   :  { %1044 = vrot.lane.b32.xlu0 %v1042_v13, %s4756_s1 }
0x1154   :  { %v1161_v14 = vpop.permute.xlu1 %1160 }
0x1155   :  { %v1166_v17 = vmul.f32 %v4494_v45, %v1161_v14 }
0x1156   :  { %v1163_v15 = vpop.permute.xlu0 %1162 }
0x1157   :  { %v1167_v16 = vmul.f32 %v4486_v33, %v1163_v15 }
0x1159   :  { %v1170_v18 = vrot.slane %v1167_v16, 7 }
0x115b   :  { %v1171_v19 = vsel %vm228_vm3, %v1170_v18, %v1166_v17 }
0x115c   :  { %1172 = vrot.lane.b32.xlu1 %v1171_v19, %s4756_s1 }
0x11c0   :  { %v1045_v20 = vpop.permute.xlu0 %1044 }
0x11c1   :  { %1047 = vst.msk [vmem:[#allocation7] sm:$0x3] %vm119_vm0, %v1045_v20 }
0x11c8   :  { %v1177_v21 = vld [vmem:[#allocation7] sm:$0x3] }
0x11c9   :  { %1179 = vrot.lane.b32.xlu0 %v1177_v21, %s4756_s1 }
0x11ce   :  { %v1173_v22 = vpop.permute.xlu1 %1172 }
0x11cf   :  { %1175 = vst.msk [vmem:[#allocation5] sm:$0x3] %vm119_vm0, %v1173_v22 }
0x11d6   :  { %v1280_v23 = vld [vmem:[#allocation5] sm:$0x3] }
0x11d7   :  { %v1281_v24 = vpack.c.bf16 %v1280_v23, %v1280_v23  ;;  %v1176_v25 = vld [vmem:[#allocation5] sm:$0x3] }
0x11d9   :  { %4177 = vmatmul.mubr.msk.bf16.vlgmr.msra.gmra.mrb[16].mxu0 %vm130_vm2, %v1281_v24 }
0x11da   :  { %4181 = vmatpush3.bf16.msra.mxu0 %v4797_v2  ;;  %4188 = vmatprep.mubr.msk.bf16.mxu0 %vm4755_vm1, %v4754_v6 }
0x11db   :  { %4182 = vmatprep.subr.bf16.mxu0 %v4754_v6 }
0x11de   :  { %4183 = vmatpush3.bf16.msra.mxu0 %v4802_v3 }
0x11df   :  { %4184 = vmatprep.subr.bf16.mxu0 %v4754_v6 }
0x11e2   :  { %4185 = vmatpush3.bf16.msra.mxu0 %v4807_v4 }
0x11e3   :  { %4186 = vmatprep.subr.bf16.mxu0 %v4754_v6 }
0x11e6   :  { %4187 = vmatpush3.bf16.msra.mxu0 %v4812_v5 }
0x11e7   :  { %4212 = vmatprep.subr.bf16.mxu0 %v4754_v6 }
0x123b   :  { %v1180_v26 = vpop.permute.xlu0 %1179 }
0x123c   :  { %v1182_v27 = vsel %vm130_vm2, %v1176_v25, %v1180_v26 }
0x123d   :  { %v1183_v28 = vpack.c.bf16 %v1182_v27, %v1182_v27 }
0x123f   :  { %4169 = vmatmul.mubr.msk.bf16.vlgmr.msra.gmra.mrb[20].mxu1 %vm274_vm4, %v1183_v28 }
0x1240   :  { %4193 = vmatpush3.bf16.msra.mxu1 %v4787_v0  ;;  %4196 = vmatprep.mubr.msk.bf16.mxu1 %vm4755_vm1, %v4754_v6 }
0x1241   :  { %4194 = vmatprep.subr.bf16.mxu1 %v4754_v6 }
0x1244   :  { %4195 = vmatpush3.bf16.msra.mxu1 %v4792_v1 }
0x1245   :  { %4200 = vmatprep.subr.bf16.mxu1 %v4754_v6 }
0x12ac   :  { %v1321_v30 = vpop.f32.mrb[16].mxu0 }
0x12ad   :  { %v1328_v31 = vrot.slane %v1321_v30, 1  ;;  %v4178_v32 = vpop.f32.mrb[17].mxu0  ;;  %v1331_v46 = vadd.f32 %v1321_v30, %v1278_v40 }
0x12ae   :  { %v1324_v33 = vpop.f32.mrb[18].mxu0 }
0x12af   :  { %v1332_v34 = vadd.f32 %v1328_v31, %v1279_v29  ;;  %v4179_v35 = vpop.f32.mrb[19].mxu0  ;;  %v3877_v56 = vmul.f32 -1.442695, %v1331_v46 }
0x12b1   :  { %4499 = vtanh.f32 %v1332_v34  ;;  %v3878_v39 = vmul.f32 -1.442695, %v1332_v34 }
0x12b3   :  { %4501 = vpow2.f32 %v3878_v39 }
0x12bb   :  { %v4500_v62 = vpop.eup %4499 }
0x12bc   :  { %1362 = vrot.lane.b32.xlu0 %v4500_v62, %s4757_s30 }
0x12bd   :  { %v4502_v48 = vpop.eup %4501 }
0x12be   :  { %v1340_v50 = vadd.f32 1.0, %v4502_v48  ;;  %v1509_v48 = vld [vmem:[%s5629_s0 + $0x16] sm:$0x1] }
0x12c0   :  { %1247 = vrot.lane.b32.xlu0 %v1245_v36, %s4756_s1 }
0x12c4   :  { %1352 = vrot.lane.b32.xlu0 %v1349_v38, %s4756_s1 }
0x1312   :  { %v1232_v41 = vpop.f32.mrb[20].mxu1 }
0x1313   :  { %v1233_v43 = vadd.f32 %v4749_v42, %v1232_v41  ;;  %v4170_v44 = vpop.f32.mrb[21].mxu1 }
0x1314   :  { %v1235_v45 = vpop.f32.mrb[22].mxu1 }
0x1315   :  { %4503 = vtanh.f32 %v1233_v43  ;;  %v4171_v47 = vpop.f32.mrb[23].mxu1  ;;  %v3875_v55 = vmul.f32 -1.442695, %v1233_v43 }
0x1316   :  { %4505 = vtanh.f32 %v1331_v46 }
0x1317   :  { %4507 = vrcp.f32 %v1340_v50 }
0x1318   :  { %4509 = vpow2.f32 %v3875_v55 }
0x1319   :  { %4511 = vpow2.f32 %v3877_v56 }
0x131f   :  { %v4504_v49 = vpop.eup %4503 }
0x1320   :  { %1252 = vrot.lane.b32.xlu1 %v4504_v49, %s4757_s30  ;;  %v4506_v51 = vpop.eup %4505 }
0x1321   :  { %v4508_v52 = vpop.eup %4507 }
0x1322   :  { %v4510_v57 = vpop.eup %4509 }
0x1323   :  { %v1241_v58 = vadd.f32 1.0, %v4510_v57  ;;  %v4512_v59 = vpop.eup %4511 }
0x1324   :  { %1360 = vrot.lane.b32.xlu1 %v4506_v51, %s4757_s30  ;;  %v1339_v60 = vadd.f32 1.0, %v4512_v59 }
0x1325   :  { %4513 = vrcp.f32 %v1241_v58 }
0x1326   :  { %4515 = vrcp.f32 %v1339_v60  ;;  %v5148_v60 = vld [vmem:[%s5632_s3] ss:$0 sm:$0xff] }
0x132e   :  { %v1363_v53 = vpop.permute.xlu0 %1362 }
0x132f   :  { %v1367_v54 = vmul.f32 %v4508_v52, %v1363_v53  ;;  %v4514_v61 = vpop.eup %4513 }
0x1330   :  { %v4516_v9 = vpop.eup %4515 }
0x1331   :  { %1372 = vrot.lane.b32.xlu0 %v1367_v54, %s4756_s1 }
0x1332   :  { %v1248_v11 = vpop.permute.xlu0 %1247 }
0x1333   :  { %v1250_v13 = vmul.f32 %v4514_v61, %v1248_v11 }
0x1336   :  { %v1353_v12 = vpop.permute.xlu0 %1352 }
0x1337   :  { %v1357_v17 = vmul.f32 %v4508_v52, %v1353_v12 }
0x1392   :  { %v1253_v63 = vpop.permute.xlu1 %1252 }
0x1393   :  { %v1255_v7 = vmul.f32 %v4514_v61, %v1253_v63 }
0x1395   :  { %1257 = vrot.lane.b32.xlu1 %v1255_v7, %s4756_s1 }
0x1396   :  { %v1361_v8 = vpop.permute.xlu1 %1360 }
0x1397   :  { %v1366_v10 = vmul.f32 %v4516_v9, %v1361_v8 }
0x1399   :  { %1350 = vrot.lane.b32.xlu1 %v1347_v37, %s4756_s1 }
0x139d   :  { %1370 = vrot.lane.b32.xlu1 %v1366_v10, %s4756_s1 }
0x13a3   :  { %v1373_v16 = vpop.permute.xlu0 %1372 }
0x13a4   :  { %v1377_v19 = vadd.f32 %v1373_v16, %v1357_v17 }
0x13a6   :  { %v1380_v22 = vrot.slane %v1377_v19, 7 }
0x1407   :  { %v1258_v14 = vpop.permute.xlu1 %1257 }
0x1408   :  { %v1260_v15 = vadd.f32 %v1258_v14, %v1250_v13 }
0x140a   :  { %1262 = vrot.lane.b32.xlu0 %v1260_v15, %s4758_s5 }
0x140b   :  { %v1351_v18 = vpop.permute.xlu1 %1350 }
0x140c   :  { %v1356_v20 = vmul.f32 %v4516_v9, %v1351_v18 }
0x140f   :  { %v1371_v21 = vpop.permute.xlu1 %1370 }
0x1410   :  { %v1376_v23 = vadd.f32 %v1371_v21, %v1356_v20 }
0x1412   :  { %v1381_v24 = vsel %vm228_vm3, %v1380_v22, %v1376_v23 }
0x1413   :  { %1382 = vrot.lane.b32.xlu1 %v1381_v24, %s4758_s5 }
0x147c   :  { %v1263_v25 = vpop.permute.xlu0 %1262 }
0x147d   :  { %1265 = vst.msk [vmem:[#allocation8] sm:$0x3] %vm119_vm0, %v1263_v25 }
0x1484   :  { %v1266_v26 = vld [vmem:[#allocation8] sm:$0x3] }
0x1485   :  { %v1383_v27 = vpop.permute.xlu1 %1382  ;;  %4517 = vtanh.f32 %v1266_v26  ;;  %v1475_v56 = vld [vmem:[#allocation8] sm:$0x3] }
0x1486   :  { %1385 = vst.msk [vmem:[#allocation6] sm:$0x3] %vm119_vm0, %v1383_v27 }
0x148d   :  { %v1386_v28 = vld [vmem:[#allocation6] sm:$0x3] }
0x148e   :  { %4519 = vtanh.f32 %v1386_v28  ;;  %v1577_v57 = vld [vmem:[#allocation6] sm:$0x3] }
0x148f   :  { %v4518_v29 = vpop.eup %4517  ;;  %v1579_v58 = vrot.slane %v1577_v57, 1 }
0x1490   :  { %1269 = vrot.lane.b32.xlu0 %v4518_v29, %s4758_s5 }
0x1498   :  { %v4520_v30 = vpop.eup %4519 }
0x1499   :  { %1390 = vrot.lane.b32.xlu0 %v4520_v30, %s4758_s5  ;;  %v1389_v31 = vrot.slane %v4520_v30, 1 }
0x149b   :  { %1392 = vrot.lane.b32.xlu1 %v1389_v31, %s4758_s5 }
0x1502   :  { %v1270_v32 = vpop.permute.xlu0 %1269 }
0x1503   :  { %v1272_v33 = vmul.f32 %v4514_v61, %v1270_v32  ;;  %v1508_v61 = vld [vmem:[%s5629_s0 + $0x6] sm:$0x1] }
0x1505   :  { %1274 = vrot.lane.b32.xlu1 %v1272_v33, %s4756_s1 }
0x150b   :  { %v1391_v34 = vpop.permute.xlu0 %1390 }
0x150c   :  { %v1396_v36 = vmul.f32 %v4516_v9, %v1391_v34 }
0x150d   :  { %v1393_v35 = vpop.permute.xlu1 %1392 }
0x150e   :  { %v1397_v62 = vmul.f32 %v4508_v52, %v1393_v35 }
0x1510   :  { %v1400_v37 = vrot.slane %v1397_v62, 7 }
0x1512   :  { %v1401_v38 = vsel %vm228_vm3, %v1400_v37, %v1396_v36 }
0x1513   :  { %1402 = vrot.lane.b32.xlu0 %v1401_v38, %s4756_s1 }
0x1577   :  { %v1275_v39 = vpop.permute.xlu1 %1274 }
0x1578   :  { %1277 = vst.msk [vmem:[#allocation7] sm:$0x3] %vm119_vm0, %v1275_v39 }
0x157f   :  { %v1407_v40 = vld [vmem:[#allocation7] sm:$0x3] }
0x1580   :  { %1409 = vrot.lane.b32.xlu1 %v1407_v40, %s4756_s1 }
0x1585   :  { %v1403_v41 = vpop.permute.xlu0 %1402 }
0x1586   :  { %1405 = vst.msk [vmem:[#allocation5] sm:$0x3] %vm119_vm0, %v1403_v41 }
0x158d   :  { %v1510_v42 = vld [vmem:[#allocation5] sm:$0x3] }
0x158e   :  { %v1511_v43 = vpack.c.bf16 %v1510_v42, %v1510_v42  ;;  %v1406_v45 = vld [vmem:[#allocation5] sm:$0x3] }
0x1590   :  { %4197 = vmatmul.mubr.msk.bf16.vlgmr.msra.gmra.mrb[24].mxu1 %vm130_vm2, %v1511_v43 }
0x1591   :  { %4201 = vmatpush3.bf16.msra.mxu1 %v4797_v2  ;;  %4208 = vmatprep.mubr.msk.bf16.mxu1 %vm4755_vm1, %v4754_v6 }
0x1592   :  { %4202 = vmatprep.subr.bf16.mxu1 %v4754_v6 }
0x1595   :  { %4203 = vmatpush3.bf16.msra.mxu1 %v4802_v3 }
0x1596   :  { %4204 = vmatprep.subr.bf16.mxu1 %v4754_v6 }
0x1599   :  { %4205 = vmatpush3.bf16.msra.mxu1 %v4807_v4 }
0x159a   :  { %4206 = vmatprep.subr.bf16.mxu1 %v4754_v6 }
0x159d   :  { %4207 = vmatpush3.bf16.msra.mxu1 %v4812_v5 }
0x159e   :  { %4232 = vmatprep.subr.bf16.mxu1 %v4754_v6 }
0x15f2   :  { %v1410_v44 = vpop.permute.xlu1 %1409 }
0x15f3   :  { %v1412_v46 = vsel %vm130_vm2, %v1406_v45, %v1410_v44 }
0x15f4   :  { %v1413_v47 = vpack.c.bf16 %v1412_v46, %v1412_v46 }
0x15f6   :  { %4189 = vmatmul.mubr.msk.bf16.vlgmr.msra.gmra.mrb[20].mxu0 %vm274_vm4, %v1413_v47 }
0x15f7   :  { %4213 = vmatpush3.bf16.msra.mxu0 %v4787_v0  ;;  %4216 = vmatprep.mubr.msk.bf16.mxu0 %vm4755_vm1, %v4754_v6 }
0x15f8   :  { %4214 = vmatprep.subr.bf16.mxu0 %v4754_v6 }
0x15fb   :  { %4215 = vmatpush3.bf16.msra.mxu0 %v4792_v1 }
0x15fc   :  { %4220 = vmatprep.subr.bf16.mxu0 %v4754_v6 }
0x1663   :  { %v1551_v49 = vpop.f32.mrb[24].mxu1 }
0x1664   :  { %v1558_v50 = vrot.slane %v1551_v49, 1  ;;  %v4198_v51 = vpop.f32.mrb[25].mxu1  ;;  %v1561_v10 = vadd.f32 %v1551_v49, %v1508_v61 }
0x1665   :  { %v1554_v52 = vpop.f32.mrb[26].mxu1 }
0x1666   :  { %v1562_v53 = vadd.f32 %v1558_v50, %v1509_v48  ;;  %v4199_v54 = vpop.f32.mrb[27].mxu1  ;;  %v3883_v20 = vmul.f32 -1.442695, %v1561_v10 }
0x1668   :  { %4521 = vtanh.f32 %v1562_v53  ;;  %v3884_v59 = vmul.f32 -1.442695, %v1562_v53 }
0x166a   :  { %4523 = vpow2.f32 %v3884_v59 }
0x1672   :  { %v4522_v55 = vpop.eup %4521 }
0x1673   :  { %1592 = vrot.lane.b32.xlu1 %v4522_v55, %s4757_s30 }
0x1674   :  { %v4524_v12 = vpop.eup %4523 }
0x1675   :  { %v1570_v14 = vadd.f32 1.0, %v4524_v12 }
0x1677   :  { %1477 = vrot.lane.b32.xlu1 %v1475_v56, %s4756_s1 }
0x167b   :  { %1582 = vrot.lane.b32.xlu1 %v1579_v58, %s4756_s1 }
0x16c9   :  { %v1462_v63 = vpop.f32.mrb[20].mxu0 }
0x16ca   :  { %v1463_v7 = vadd.f32 %v5148_v60, %v1462_v63  ;;  %v4190_v8 = vpop.f32.mrb[21].mxu0 }
0x16cb   :  { %v1465_v9 = vpop.f32.mrb[22].mxu0 }
0x16cc   :  { %4525 = vtanh.f32 %v1463_v7  ;;  %v4191_v11 = vpop.f32.mrb[23].mxu0  ;;  %v3881_v19 = vmul.f32 -1.442695, %v1463_v7 }
0x16cd   :  { %4527 = vtanh.f32 %v1561_v10 }
0x16ce   :  { %4529 = vrcp.f32 %v1570_v14 }
0x16cf   :  { %4531 = vpow2.f32 %v3881_v19 }
0x16d0   :  { %4533 = vpow2.f32 %v3883_v20 }
0x16d6   :  { %v4526_v13 = vpop.eup %4525 }
0x16d7   :  { %1482 = vrot.lane.b32.xlu0 %v4526_v13, %s4757_s30  ;;  %v4528_v15 = vpop.eup %4527  ;;  %v1739_v13 = vld [vmem:[%s5629_s0 + $0x17] sm:$0x1] }
0x16d8   :  { %v4530_v16 = vpop.eup %4529 }
0x16d9   :  { %v4532_v21 = vpop.eup %4531 }
0x16da   :  { %v1471_v22 = vadd.f32 1.0, %v4532_v21  ;;  %v4534_v23 = vpop.eup %4533 }
0x16db   :  { %1590 = vrot.lane.b32.xlu0 %v4528_v15, %s4757_s30  ;;  %v1569_v24 = vadd.f32 1.0, %v4534_v23 }
0x16dc   :  { %4535 = vrcp.f32 %v1471_v22 }
0x16dd   :  { %4537 = vrcp.f32 %v1569_v24 }
0x16e5   :  { %v1593_v17 = vpop.permute.xlu1 %1592 }
0x16e6   :  { %v1597_v18 = vmul.f32 %v4530_v16, %v1593_v17  ;;  %v4536_v25 = vpop.eup %4535 }
0x16e7   :  { %v4538_v29 = vpop.eup %4537 }
0x16e8   :  { %1602 = vrot.lane.b32.xlu1 %v1597_v18, %s4756_s1 }
0x16e9   :  { %v1478_v31 = vpop.permute.xlu1 %1477 }
0x16ea   :  { %v1480_v33 = vmul.f32 %v4536_v25, %v1478_v31 }
0x16ed   :  { %v1583_v32 = vpop.permute.xlu1 %1582 }
0x16ee   :  { %v1587_v36 = vmul.f32 %v4530_v16, %v1583_v32 }
0x1749   :  { %v1483_v26 = vpop.permute.xlu0 %1482 }
0x174a   :  { %v1485_v27 = vmul.f32 %v4536_v25, %v1483_v26 }
0x174c   :  { %1487 = vrot.lane.b32.xlu0 %v1485_v27, %s4756_s1 }
0x174d   :  { %v1591_v28 = vpop.permute.xlu0 %1590 }
0x174e   :  { %v1596_v30 = vmul.f32 %v4538_v29, %v1591_v28 }
0x1750   :  { %1580 = vrot.lane.b32.xlu0 %v1577_v57, %s4756_s1 }
0x1754   :  { %1600 = vrot.lane.b32.xlu0 %v1596_v30, %s4756_s1 }
0x175a   :  { %v1603_v62 = vpop.permute.xlu1 %1602 }
0x175b   :  { %v1607_v38 = vadd.f32 %v1603_v62, %v1587_v36 }
0x175d   :  { %v1610_v41 = vrot.slane %v1607_v38, 7 }
0x17be   :  { %v1488_v34 = vpop.permute.xlu0 %1487 }
0x17bf   :  { %v1490_v35 = vadd.f32 %v1488_v34, %v1480_v33 }
0x17c1   :  { %1492 = vrot.lane.b32.xlu1 %v1490_v35, %s4758_s5 }
0x17c2   :  { %v1581_v37 = vpop.permute.xlu0 %1580 }
0x17c3   :  { %v1586_v39 = vmul.f32 %v4538_v29, %v1581_v37 }
0x17c6   :  { %v1601_v40 = vpop.permute.xlu0 %1600 }
0x17c7   :  { %v1606_v42 = vadd.f32 %v1601_v40, %v1586_v39 }
0x17c9   :  { %v1611_v43 = vsel %vm228_vm3, %v1610_v41, %v1606_v42 }
0x17ca   :  { %1612 = vrot.lane.b32.xlu0 %v1611_v43, %s4758_s5 }
0x1833   :  { %v1493_v44 = vpop.permute.xlu1 %1492 }
0x1834   :  { %1495 = vst.msk [vmem:[#allocation8] sm:$0x3] %vm119_vm0, %v1493_v44 }
0x183b   :  { %v1496_v45 = vld [vmem:[#allocation8] sm:$0x3] }
0x183c   :  { %v1613_v46 = vpop.permute.xlu0 %1612  ;;  %4539 = vtanh.f32 %v1496_v45  ;;  %v1705_v21 = vld [vmem:[#allocation8] sm:$0x3] }
0x183d   :  { %1615 = vst.msk [vmem:[#allocation6] sm:$0x3] %vm119_vm0, %v1613_v46 }
0x1844   :  { %v1616_v47 = vld [vmem:[#allocation6] sm:$0x3] }
0x1845   :  { %4541 = vtanh.f32 %v1616_v47  ;;  %v1807_v22 = vld [vmem:[#allocation6] sm:$0x3] }
0x1846   :  { %v4540_v48 = vpop.eup %4539  ;;  %v1809_v23 = vrot.slane %v1807_v22, 1 }
0x1847   :  { %1499 = vrot.lane.b32.xlu1 %v4540_v48, %s4758_s5 }
0x184f   :  { %v4542_v49 = vpop.eup %4541 }
0x1850   :  { %1620 = vrot.lane.b32.xlu1 %v4542_v49, %s4758_s5  ;;  %v1619_v50 = vrot.slane %v4542_v49, 1 }
0x1852   :  { %1622 = vrot.lane.b32.xlu0 %v1619_v50, %s4758_s5 }
0x18b9   :  { %v1500_v51 = vpop.permute.xlu1 %1499 }
0x18ba   :  { %v1502_v52 = vmul.f32 %v4536_v25, %v1500_v51  ;;  %v1738_v25 = vld [vmem:[%s5629_s0 + $0x7] sm:$0x1] }
0x18bc   :  { %1504 = vrot.lane.b32.xlu0 %v1502_v52, %s4756_s1 }
0x18c2   :  { %v1621_v53 = vpop.permute.xlu1 %1620 }
0x18c3   :  { %v1626_v56 = vmul.f32 %v4538_v29, %v1621_v53 }
0x18c4   :  { %v1623_v54 = vpop.permute.xlu0 %1622 }
0x18c5   :  { %v1627_v55 = vmul.f32 %v4530_v16, %v1623_v54 }
0x18c7   :  { %v1630_v57 = vrot.slane %v1627_v55, 7 }
0x18c9   :  { %v1631_v58 = vsel %vm228_vm3, %v1630_v57, %v1626_v56 }
0x18ca   :  { %1632 = vrot.lane.b32.xlu1 %v1631_v58, %s4756_s1 }
0x192e   :  { %v1505_v59 = vpop.permute.xlu0 %1504 }
0x192f   :  { %1507 = vst.msk [vmem:[#allocation7] sm:$0x3] %vm119_vm0, %v1505_v59 }
0x1936   :  { %v1637_v61 = vld [vmem:[#allocation7] sm:$0x3] }
0x1937   :  { %1639 = vrot.lane.b32.xlu0 %v1637_v61, %s4756_s1 }
0x193c   :  { %v1633_v63 = vpop.permute.xlu1 %1632 }
0x193d   :  { %1635 = vst.msk [vmem:[#allocation5] sm:$0x3] %vm119_vm0, %v1633_v63 }
0x1944   :  { %v1740_v7 = vld [vmem:[#allocation5] sm:$0x3] }
0x1945   :  { %v1741_v8 = vpack.c.bf16 %v1740_v7, %v1740_v7  ;;  %v1636_v9 = vld [vmem:[#allocation5] sm:$0x3] }
0x1947   :  { %4217 = vmatmul.mubr.msk.bf16.vlgmr.msra.gmra.mrb[24].mxu0 %vm130_vm2, %v1741_v8 }
0x1948   :  { %4221 = vmatpush3.bf16.msra.mxu0 %v4797_v2  ;;  %4228 = vmatprep.mubr.msk.bf16.mxu0 %vm4755_vm1, %v4754_v6 }
0x1949   :  { %4222 = vmatprep.subr.bf16.mxu0 %v4754_v6 }
0x194c   :  { %4223 = vmatpush3.bf16.msra.mxu0 %v4802_v3 }
0x194d   :  { %4224 = vmatprep.subr.bf16.mxu0 %v4754_v6 }
0x1950   :  { %4225 = vmatpush3.bf16.msra.mxu0 %v4807_v4 }
0x1951   :  { %4226 = vmatprep.subr.bf16.mxu0 %v4754_v6 }
0x1954   :  { %4227 = vmatpush3.bf16.msra.mxu0 %v4812_v5 }
0x1955   :  { %4252 = vmatprep.subr.bf16.mxu0 %v4754_v6 }
0x19a9   :  { %v1640_v10 = vpop.permute.xlu0 %1639 }
0x19aa   :  { %v1642_v11 = vsel %vm130_vm2, %v1636_v9, %v1640_v10 }
0x19ab   :  { %v1643_v12 = vpack.c.bf16 %v1642_v11, %v1642_v11 }
0x19ad   :  { %4209 = vmatmul.mubr.msk.bf16.vlgmr.msra.gmra.mrb[28].mxu1 %vm274_vm4, %v1643_v12 }
0x19ae   :  { %4233 = vmatpush3.bf16.msra.mxu1 %v4787_v0  ;;  %4236 = vmatprep.mubr.msk.bf16.mxu1 %vm4755_vm1, %v4754_v6 }
0x19af   :  { %4234 = vmatprep.subr.bf16.mxu1 %v4754_v6 }
0x19b2   :  { %4235 = vmatpush3.bf16.msra.mxu1 %v4792_v1 }
0x19b3   :  { %4240 = vmatprep.subr.bf16.mxu1 %v4754_v6 }
0x1a1a   :  { %v1781_v14 = vpop.f32.mrb[24].mxu0 }
0x1a1b   :  { %v1788_v15 = vrot.slane %v1781_v14, 1  ;;  %v4218_v16 = vpop.f32.mrb[25].mxu0  ;;  %v1791_v30 = vadd.f32 %v1781_v14, %v1738_v25 }
0x1a1c   :  { %v1784_v17 = vpop.f32.mrb[26].mxu0 }
0x1a1d   :  { %v1792_v18 = vadd.f32 %v1788_v15, %v1739_v13  ;;  %v4219_v19 = vpop.f32.mrb[27].mxu0  ;;  %v3889_v39 = vmul.f32 -1.442695, %v1791_v30 }
0x1a1f   :  { %4543 = vtanh.f32 %v1792_v18  ;;  %v3890_v24 = vmul.f32 -1.442695, %v1792_v18 }
0x1a21   :  { %4545 = vpow2.f32 %v3890_v24 }
0x1a29   :  { %v4544_v20 = vpop.eup %4543 }
0x1a2a   :  { %1822 = vrot.lane.b32.xlu0 %v4544_v20, %s4757_s30 }
0x1a2b   :  { %v4546_v32 = vpop.eup %4545 }
0x1a2c   :  { %v1800_v34 = vadd.f32 1.0, %v4546_v32 }
0x1a2e   :  { %1707 = vrot.lane.b32.xlu0 %v1705_v21, %s4756_s1 }
0x1a32   :  { %1812 = vrot.lane.b32.xlu0 %v1809_v23, %s4756_s1 }
0x1a80   :  { %v1692_v26 = vpop.f32.mrb[28].mxu1 }
0x1a81   :  { %v1693_v27 = vadd.f32 %v5148_v60, %v1692_v26  ;;  %v4210_v28 = vpop.f32.mrb[29].mxu1 }
0x1a82   :  { %v1695_v29 = vpop.f32.mrb[30].mxu1 }
0x1a83   :  { %4547 = vtanh.f32 %v1693_v27  ;;  %v4211_v31 = vpop.f32.mrb[31].mxu1  ;;  %v3887_v38 = vmul.f32 -1.442695, %v1693_v27 }
0x1a84   :  { %4549 = vtanh.f32 %v1791_v30 }
0x1a85   :  { %4551 = vrcp.f32 %v1800_v34 }
0x1a86   :  { %4553 = vpow2.f32 %v3887_v38 }
0x1a87   :  { %4555 = vpow2.f32 %v3889_v39 }
0x1a8d   :  { %v4548_v33 = vpop.eup %4547 }
0x1a8e   :  { %1712 = vrot.lane.b32.xlu1 %v4548_v33, %s4757_s30  ;;  %v4550_v35 = vpop.eup %4549  ;;  %v1969_v33 = vld [vmem:[%s5629_s0 + $0x18] sm:$0x1] }
0x1a8f   :  { %v4552_v62 = vpop.eup %4551 }
0x1a90   :  { %v4554_v40 = vpop.eup %4553 }
0x1a91   :  { %v1701_v41 = vadd.f32 1.0, %v4554_v40  ;;  %v4556_v42 = vpop.eup %4555 }
0x1a92   :  { %1820 = vrot.lane.b32.xlu1 %v4550_v35, %s4757_s30  ;;  %v1799_v43 = vadd.f32 1.0, %v4556_v42 }
0x1a93   :  { %4557 = vrcp.f32 %v1701_v41 }
0x1a94   :  { %4559 = vrcp.f32 %v1799_v43 }
0x1a9c   :  { %v1823_v36 = vpop.permute.xlu0 %1822 }
0x1a9d   :  { %v1827_v37 = vmul.f32 %v4552_v62, %v1823_v36  ;;  %v4558_v44 = vpop.eup %4557 }
0x1a9e   :  { %v4560_v48 = vpop.eup %4559 }
0x1a9f   :  { %1832 = vrot.lane.b32.xlu0 %v1827_v37, %s4756_s1 }
0x1aa0   :  { %v1708_v50 = vpop.permute.xlu0 %1707 }
0x1aa1   :  { %v1710_v52 = vmul.f32 %v4558_v44, %v1708_v50 }
0x1aa4   :  { %v1813_v51 = vpop.permute.xlu0 %1812 }
0x1aa5   :  { %v1817_v56 = vmul.f32 %v4552_v62, %v1813_v51 }
0x1b00   :  { %v1713_v45 = vpop.permute.xlu1 %1712 }
0x1b01   :  { %v1715_v46 = vmul.f32 %v4558_v44, %v1713_v45 }
0x1b03   :  { %1717 = vrot.lane.b32.xlu1 %v1715_v46, %s4756_s1 }
0x1b04   :  { %v1821_v47 = vpop.permute.xlu1 %1820 }
0x1b05   :  { %v1826_v49 = vmul.f32 %v4560_v48, %v1821_v47 }
0x1b07   :  { %1810 = vrot.lane.b32.xlu1 %v1807_v22, %s4756_s1 }
0x1b0b   :  { %1830 = vrot.lane.b32.xlu1 %v1826_v49, %s4756_s1 }
0x1b11   :  { %v1833_v55 = vpop.permute.xlu0 %1832 }
0x1b12   :  { %v1837_v58 = vadd.f32 %v1833_v55, %v1817_v56 }
0x1b14   :  { %v1840_v63 = vrot.slane %v1837_v58, 7 }
0x1b75   :  { %v1718_v53 = vpop.permute.xlu1 %1717 }
0x1b76   :  { %v1720_v54 = vadd.f32 %v1718_v53, %v1710_v52 }
0x1b78   :  { %1722 = vrot.lane.b32.xlu0 %v1720_v54, %s4758_s5 }
0x1b79   :  { %v1811_v57 = vpop.permute.xlu1 %1810 }
0x1b7a   :  { %v1816_v59 = vmul.f32 %v4560_v48, %v1811_v57 }
0x1b7d   :  { %v1831_v61 = vpop.permute.xlu1 %1830 }
0x1b7e   :  { %v1836_v7 = vadd.f32 %v1831_v61, %v1816_v59 }
0x1b80   :  { %v1841_v8 = vsel %vm228_vm3, %v1840_v63, %v1836_v7 }
0x1b81   :  { %1842 = vrot.lane.b32.xlu1 %v1841_v8, %s4758_s5 }
0x1bea   :  { %v1723_v9 = vpop.permute.xlu0 %1722 }
0x1beb   :  { %1725 = vst.msk [vmem:[#allocation8] sm:$0x3] %vm119_vm0, %v1723_v9 }
0x1bf2   :  { %v1726_v10 = vld [vmem:[#allocation8] sm:$0x3] }
0x1bf3   :  { %v1843_v11 = vpop.permute.xlu1 %1842  ;;  %4561 = vtanh.f32 %v1726_v10  ;;  %v1935_v40 = vld [vmem:[#allocation8] sm:$0x3] }
0x1bf4   :  { %1845 = vst.msk [vmem:[#allocation6] sm:$0x3] %vm119_vm0, %v1843_v11 }
0x1bfb   :  { %v1846_v12 = vld [vmem:[#allocation6] sm:$0x3] }
0x1bfc   :  { %4563 = vtanh.f32 %v1846_v12  ;;  %v2037_v41 = vld [vmem:[#allocation6] sm:$0x3] }
0x1bfd   :  { %v4562_v13 = vpop.eup %4561  ;;  %v2039_v42 = vrot.slane %v2037_v41, 1 }
0x1bfe   :  { %1729 = vrot.lane.b32.xlu0 %v4562_v13, %s4758_s5 }
0x1c06   :  { %v4564_v14 = vpop.eup %4563 }
0x1c07   :  { %1850 = vrot.lane.b32.xlu0 %v4564_v14, %s4758_s5  ;;  %v1849_v15 = vrot.slane %v4564_v14, 1 }
0x1c09   :  { %1852 = vrot.lane.b32.xlu1 %v1849_v15, %s4758_s5 }
0x1c70   :  { %v1730_v16 = vpop.permute.xlu0 %1729 }
0x1c71   :  { %v1732_v17 = vmul.f32 %v4558_v44, %v1730_v16  ;;  %v1968_v44 = vld [vmem:[%s5629_s0 + $0x8] sm:$0x1] }
0x1c73   :  { %1734 = vrot.lane.b32.xlu1 %v1732_v17, %s4756_s1 }
0x1c79   :  { %v1851_v18 = vpop.permute.xlu0 %1850 }
0x1c7a   :  { %v1856_v21 = vmul.f32 %v4560_v48, %v1851_v18 }
0x1c7b   :  { %v1853_v19 = vpop.permute.xlu1 %1852 }
0x1c7c   :  { %v1857_v20 = vmul.f32 %v4552_v62, %v1853_v19 }
0x1c7e   :  { %v1860_v22 = vrot.slane %v1857_v20, 7 }
0x1c80   :  { %v1861_v23 = vsel %vm228_vm3, %v1860_v22, %v1856_v21 }
0x1c81   :  { %1862 = vrot.lane.b32.xlu0 %v1861_v23, %s4756_s1 }
0x1ce5   :  { %v1735_v24 = vpop.permute.xlu1 %1734 }
0x1ce6   :  { %1737 = vst.msk [vmem:[#allocation7] sm:$0x3] %vm119_vm0, %v1735_v24 }
0x1ced   :  { %v1867_v25 = vld [vmem:[#allocation7] sm:$0x3] }
0x1cee   :  { %1869 = vrot.lane.b32.xlu1 %v1867_v25, %s4756_s1 }
0x1cf3   :  { %v1863_v26 = vpop.permute.xlu0 %1862 }
0x1cf4   :  { %1865 = vst.msk [vmem:[#allocation5] sm:$0x3] %vm119_vm0, %v1863_v26 }
0x1cfb   :  { %v1970_v27 = vld [vmem:[#allocation5] sm:$0x3] }
0x1cfc   :  { %v1971_v28 = vpack.c.bf16 %v1970_v27, %v1970_v27  ;;  %v1866_v30 = vld [vmem:[#allocation5] sm:$0x3] }
0x1cfe   :  { %4237 = vmatmul.mubr.msk.bf16.vlgmr.msra.gmra.mrb[32].mxu1 %vm130_vm2, %v1971_v28 }
0x1cff   :  { %4241 = vmatpush3.bf16.msra.mxu1 %v4797_v2  ;;  %4248 = vmatprep.mubr.msk.bf16.mxu1 %vm4755_vm1, %v4754_v6 }
0x1d00   :  { %4242 = vmatprep.subr.bf16.mxu1 %v4754_v6 }
0x1d03   :  { %4243 = vmatpush3.bf16.msra.mxu1 %v4802_v3 }
0x1d04   :  { %4244 = vmatprep.subr.bf16.mxu1 %v4754_v6 }
0x1d07   :  { %4245 = vmatpush3.bf16.msra.mxu1 %v4807_v4 }
0x1d08   :  { %4246 = vmatprep.subr.bf16.mxu1 %v4754_v6 }
0x1d0b   :  { %4247 = vmatpush3.bf16.msra.mxu1 %v4812_v5 }
0x1d0c   :  { %4272 = vmatprep.subr.bf16.mxu1 %v4754_v6 }
0x1d60   :  { %v1870_v29 = vpop.permute.xlu1 %1869 }
0x1d61   :  { %v1872_v31 = vsel %vm130_vm2, %v1866_v30, %v1870_v29 }
0x1d62   :  { %v1873_v32 = vpack.c.bf16 %v1872_v31, %v1872_v31 }
0x1d64   :  { %4229 = vmatmul.mubr.msk.bf16.vlgmr.msra.gmra.mrb[28].mxu0 %vm274_vm4, %v1873_v32 }
0x1d65   :  { %4253 = vmatpush3.bf16.msra.mxu0 %v4787_v0  ;;  %4256 = vmatprep.mubr.msk.bf16.mxu0 %vm4755_vm1, %v4754_v6 }
0x1d66   :  { %4254 = vmatprep.subr.bf16.mxu0 %v4754_v6 }
0x1d69   :  { %4255 = vmatpush3.bf16.msra.mxu0 %v4792_v1 }
0x1d6a   :  { %4260 = vmatprep.subr.bf16.mxu0 %v4754_v6 }
0x1dd1   :  { %v2011_v34 = vpop.f32.mrb[32].mxu1 }
0x1dd2   :  { %v2018_v35 = vrot.slane %v2011_v34, 1  ;;  %v4238_v62 = vpop.f32.mrb[33].mxu1  ;;  %v2021_v49 = vadd.f32 %v2011_v34, %v1968_v44 }
0x1dd3   :  { %v2014_v36 = vpop.f32.mrb[34].mxu1 }
0x1dd4   :  { %v2022_v37 = vadd.f32 %v2018_v35, %v1969_v33  ;;  %v4239_v38 = vpop.f32.mrb[35].mxu1  ;;  %v3895_v59 = vmul.f32 -1.442695, %v2021_v49 }
0x1dd6   :  { %4565 = vtanh.f32 %v2022_v37  ;;  %v3896_v43 = vmul.f32 -1.442695, %v2022_v37 }
0x1dd8   :  { %4567 = vpow2.f32 %v3896_v43 }
0x1de0   :  { %v4566_v39 = vpop.eup %4565 }
0x1de1   :  { %2052 = vrot.lane.b32.xlu1 %v4566_v39, %s4757_s30 }
0x1de2   :  { %v4568_v51 = vpop.eup %4567 }
0x1de3   :  { %v2030_v53 = vadd.f32 1.0, %v4568_v51 }
0x1de5   :  { %1937 = vrot.lane.b32.xlu1 %v1935_v40, %s4756_s1 }
0x1de9   :  { %2042 = vrot.lane.b32.xlu1 %v2039_v42, %s4756_s1 }
0x1e37   :  { %v1922_v45 = vpop.f32.mrb[28].mxu0 }
0x1e38   :  { %v1923_v46 = vadd.f32 %v5148_v60, %v1922_v45  ;;  %v4230_v47 = vpop.f32.mrb[29].mxu0 }
0x1e39   :  { %v1925_v48 = vpop.f32.mrb[30].mxu0 }
0x1e3a   :  { %4569 = vtanh.f32 %v1923_v46  ;;  %v4231_v50 = vpop.f32.mrb[31].mxu0  ;;  %v3893_v58 = vmul.f32 -1.442695, %v1923_v46 }
0x1e3b   :  { %4571 = vtanh.f32 %v2021_v49 }
0x1e3c   :  { %4573 = vrcp.f32 %v2030_v53 }
0x1e3d   :  { %4575 = vpow2.f32 %v3893_v58 }
0x1e3e   :  { %4577 = vpow2.f32 %v3895_v59 }
0x1e44   :  { %v4570_v52 = vpop.eup %4569 }
0x1e45   :  { %1942 = vrot.lane.b32.xlu0 %v4570_v52, %s4757_s30  ;;  %v4572_v54 = vpop.eup %4571  ;;  %v2199_v52 = vld [vmem:[%s5629_s0 + $0x19] sm:$0x1] }
0x1e46   :  { %v4574_v55 = vpop.eup %4573 }
0x1e47   :  { %v4576_v61 = vpop.eup %4575 }
0x1e48   :  { %v1931_v63 = vadd.f32 1.0, %v4576_v61  ;;  %v4578_v7 = vpop.eup %4577 }
0x1e49   :  { %2050 = vrot.lane.b32.xlu0 %v4572_v54, %s4757_s30  ;;  %v2029_v8 = vadd.f32 1.0, %v4578_v7 }
0x1e4a   :  { %4579 = vrcp.f32 %v1931_v63 }
0x1e4b   :  { %4581 = vrcp.f32 %v2029_v8 }
0x1e53   :  { %v2053_v56 = vpop.permute.xlu1 %2052 }
0x1e54   :  { %v2057_v57 = vmul.f32 %v4574_v55, %v2053_v56  ;;  %v4580_v9 = vpop.eup %4579 }
0x1e55   :  { %v4582_v13 = vpop.eup %4581 }
0x1e56   :  { %2062 = vrot.lane.b32.xlu1 %v2057_v57, %s4756_s1 }
0x1e57   :  { %v1938_v15 = vpop.permute.xlu1 %1937 }
0x1e58   :  { %v1940_v17 = vmul.f32 %v4580_v9, %v1938_v15 }
0x1e5b   :  { %v2043_v16 = vpop.permute.xlu1 %2042 }
0x1e5c   :  { %v2047_v21 = vmul.f32 %v4574_v55, %v2043_v16 }
0x1eb7   :  { %v1943_v10 = vpop.permute.xlu0 %1942 }
0x1eb8   :  { %v1945_v11 = vmul.f32 %v4580_v9, %v1943_v10 }
0x1eba   :  { %1947 = vrot.lane.b32.xlu0 %v1945_v11, %s4756_s1 }
0x1ebb   :  { %v2051_v12 = vpop.permute.xlu0 %2050 }
0x1ebc   :  { %v2056_v14 = vmul.f32 %v4582_v13, %v2051_v12 }
0x1ebe   :  { %2040 = vrot.lane.b32.xlu0 %v2037_v41, %s4756_s1 }
0x1ec2   :  { %2060 = vrot.lane.b32.xlu0 %v2056_v14, %s4756_s1 }
0x1ec8   :  { %v2063_v20 = vpop.permute.xlu1 %2062 }
0x1ec9   :  { %v2067_v23 = vadd.f32 %v2063_v20, %v2047_v21 }
0x1ecb   :  { %v2070_v26 = vrot.slane %v2067_v23, 7 }
0x1f2c   :  { %v1948_v18 = vpop.permute.xlu0 %1947 }
0x1f2d   :  { %v1950_v19 = vadd.f32 %v1948_v18, %v1940_v17 }
0x1f2f   :  { %1952 = vrot.lane.b32.xlu1 %v1950_v19, %s4758_s5 }
0x1f30   :  { %v2041_v22 = vpop.permute.xlu0 %2040 }
0x1f31   :  { %v2046_v24 = vmul.f32 %v4582_v13, %v2041_v22 }
0x1f34   :  { %v2061_v25 = vpop.permute.xlu0 %2060 }
0x1f35   :  { %v2066_v27 = vadd.f32 %v2061_v25, %v2046_v24 }
0x1f37   :  { %v2071_v28 = vsel %vm228_vm3, %v2070_v26, %v2066_v27 }
0x1f38   :  { %2072 = vrot.lane.b32.xlu0 %v2071_v28, %s4758_s5 }
0x1fa1   :  { %v1953_v29 = vpop.permute.xlu1 %1952 }
0x1fa2   :  { %1955 = vst.msk [vmem:[#allocation8] sm:$0x3] %vm119_vm0, %v1953_v29 }
0x1fa9   :  { %v1956_v30 = vld [vmem:[#allocation8] sm:$0x3] }
0x1faa   :  { %v2073_v31 = vpop.permute.xlu0 %2072  ;;  %4583 = vtanh.f32 %v1956_v30  ;;  %v2165_v61 = vld [vmem:[#allocation8] sm:$0x3] }
0x1fab   :  { %2075 = vst.msk [vmem:[#allocation6] sm:$0x3] %vm119_vm0, %v2073_v31 }
0x1fb2   :  { %v2076_v32 = vld [vmem:[#allocation6] sm:$0x3] }
0x1fb3   :  { %4585 = vtanh.f32 %v2076_v32  ;;  %v2267_v63 = vld [vmem:[#allocation6] sm:$0x3] }
0x1fb4   :  { %v4584_v33 = vpop.eup %4583  ;;  %v2269_v7 = vrot.slane %v2267_v63, 1 }
0x1fb5   :  { %1959 = vrot.lane.b32.xlu1 %v4584_v33, %s4758_s5 }
0x1fbd   :  { %v4586_v34 = vpop.eup %4585 }
0x1fbe   :  { %2080 = vrot.lane.b32.xlu1 %v4586_v34, %s4758_s5  ;;  %v2079_v35 = vrot.slane %v4586_v34, 1 }
0x1fc0   :  { %2082 = vrot.lane.b32.xlu0 %v2079_v35, %s4758_s5 }
0x2027   :  { %v1960_v62 = vpop.permute.xlu1 %1959 }
0x2028   :  { %v1962_v36 = vmul.f32 %v4580_v9, %v1960_v62  ;;  %v2198_v9 = vld [vmem:[%s5629_s0 + $0x9] sm:$0x1] }
0x202a   :  { %1964 = vrot.lane.b32.xlu0 %v1962_v36, %s4756_s1 }
0x2030   :  { %v2081_v37 = vpop.permute.xlu1 %2080 }
0x2031   :  { %v2086_v40 = vmul.f32 %v4582_v13, %v2081_v37 }
0x2032   :  { %v2083_v38 = vpop.permute.xlu0 %2082 }
0x2033   :  { %v2087_v39 = vmul.f32 %v4574_v55, %v2083_v38 }
0x2035   :  { %v2090_v41 = vrot.slane %v2087_v39, 7 }
0x2037   :  { %v2091_v42 = vsel %vm228_vm3, %v2090_v41, %v2086_v40 }
0x2038   :  { %2092 = vrot.lane.b32.xlu1 %v2091_v42, %s4756_s1 }
0x209c   :  { %v1965_v43 = vpop.permute.xlu0 %1964 }
0x209d   :  { %1967 = vst.msk [vmem:[#allocation7] sm:$0x3] %vm119_vm0, %v1965_v43 }
0x20a4   :  { %v2097_v44 = vld [vmem:[#allocation7] sm:$0x3] }
0x20a5   :  { %2099 = vrot.lane.b32.xlu0 %v2097_v44, %s4756_s1 }
0x20aa   :  { %v2093_v45 = vpop.permute.xlu1 %2092 }
0x20ab   :  { %2095 = vst.msk [vmem:[#allocation5] sm:$0x3] %vm119_vm0, %v2093_v45 }
0x20b2   :  { %v2200_v46 = vld [vmem:[#allocation5] sm:$0x3] }
0x20b3   :  { %v2201_v47 = vpack.c.bf16 %v2200_v46, %v2200_v46  ;;  %v2096_v48 = vld [vmem:[#allocation5] sm:$0x3] }
0x20b5   :  { %4257 = vmatmul.mubr.msk.bf16.vlgmr.msra.gmra.mrb[32].mxu0 %vm130_vm2, %v2201_v47 }
0x20b6   :  { %4261 = vmatpush3.bf16.msra.mxu0 %v4797_v2  ;;  %4268 = vmatprep.mubr.msk.bf16.mxu0 %vm4755_vm1, %v4754_v6 }
0x20b7   :  { %4262 = vmatprep.subr.bf16.mxu0 %v4754_v6 }
0x20ba   :  { %4263 = vmatpush3.bf16.msra.mxu0 %v4802_v3 }
0x20bb   :  { %4264 = vmatprep.subr.bf16.mxu0 %v4754_v6 }
0x20be   :  { %4265 = vmatpush3.bf16.msra.mxu0 %v4807_v4 }
0x20bf   :  { %4266 = vmatprep.subr.bf16.mxu0 %v4754_v6 }
0x20c2   :  { %4267 = vmatpush3.bf16.msra.mxu0 %v4812_v5 }
0x20c3   :  { %4292 = vmatprep.subr.bf16.mxu0 %v4754_v6 }
0x2117   :  { %v2100_v49 = vpop.permute.xlu0 %2099 }
0x2118   :  { %v2102_v50 = vsel %vm130_vm2, %v2096_v48, %v2100_v49 }
0x2119   :  { %v2103_v51 = vpack.c.bf16 %v2102_v50, %v2102_v50 }
0x211b   :  { %4249 = vmatmul.mubr.msk.bf16.vlgmr.msra.gmra.mrb[36].mxu1 %vm274_vm4, %v2103_v51 }
0x211c   :  { %4273 = vmatpush3.bf16.msra.mxu1 %v4787_v0  ;;  %4276 = vmatprep.mubr.msk.bf16.mxu1 %vm4755_vm1, %v4754_v6 }
0x211d   :  { %4274 = vmatprep.subr.bf16.mxu1 %v4754_v6 }
0x2120   :  { %4275 = vmatpush3.bf16.msra.mxu1 %v4792_v1 }
0x2121   :  { %4280 = vmatprep.subr.bf16.mxu1 %v4754_v6 }
0x2188   :  { %v2241_v53 = vpop.f32.mrb[32].mxu0 }
0x2189   :  { %v2248_v54 = vrot.slane %v2241_v53, 1  ;;  %v4258_v55 = vpop.f32.mrb[33].mxu0  ;;  %v2251_v14 = vadd.f32 %v2241_v53, %v2198_v9 }
0x218a   :  { %v2244_v56 = vpop.f32.mrb[34].mxu0 }
0x218b   :  { %v2252_v57 = vadd.f32 %v2248_v54, %v2199_v52  ;;  %v4259_v58 = vpop.f32.mrb[35].mxu0  ;;  %v3901_v24 = vmul.f32 -1.442695, %v2251_v14 }
0x218d   :  { %4587 = vtanh.f32 %v2252_v57  ;;  %v3902_v8 = vmul.f32 -1.442695, %v2252_v57 }
0x218f   :  { %4589 = vpow2.f32 %v3902_v8 }
0x2197   :  { %v4588_v59 = vpop.eup %4587 }
0x2198   :  { %2282 = vrot.lane.b32.xlu0 %v4588_v59, %s4757_s30 }
0x2199   :  { %v4590_v16 = vpop.eup %4589 }
0x219a   :  { %v2260_v18 = vadd.f32 1.0, %v4590_v16 }
0x219c   :  { %2167 = vrot.lane.b32.xlu0 %v2165_v61, %s4756_s1 }
0x21a0   :  { %2272 = vrot.lane.b32.xlu0 %v2269_v7, %s4756_s1 }
0x21ee   :  { %v2152_v10 = vpop.f32.mrb[36].mxu1 }
0x21ef   :  { %v2153_v11 = vadd.f32 %v5148_v60, %v2152_v10  ;;  %v4250_v12 = vpop.f32.mrb[37].mxu1 }
0x21f0   :  { %v2155_v13 = vpop.f32.mrb[38].mxu1 }
0x21f1   :  { %4591 = vtanh.f32 %v2153_v11  ;;  %v4251_v15 = vpop.f32.mrb[39].mxu1  ;;  %v3899_v23 = vmul.f32 -1.442695, %v2153_v11 }
0x21f2   :  { %4593 = vtanh.f32 %v2251_v14 }
0x21f3   :  { %4595 = vrcp.f32 %v2260_v18 }
0x21f4   :  { %4597 = vpow2.f32 %v3899_v23 }
0x21f5   :  { %4599 = vpow2.f32 %v3901_v24 }
0x21fb   :  { %v4592_v17 = vpop.eup %4591 }
0x21fc   :  { %2172 = vrot.lane.b32.xlu1 %v4592_v17, %s4757_s30  ;;  %v4594_v19 = vpop.eup %4593  ;;  %v2429_v17 = vld [vmem:[%s5629_s0 + $0x1a] sm:$0x1] }
0x21fd   :  { %v4596_v20 = vpop.eup %4595 }
0x21fe   :  { %v4598_v25 = vpop.eup %4597 }
0x21ff   :  { %v2161_v26 = vadd.f32 1.0, %v4598_v25  ;;  %v4600_v27 = vpop.eup %4599 }
0x2200   :  { %2280 = vrot.lane.b32.xlu1 %v4594_v19, %s4757_s30  ;;  %v2259_v28 = vadd.f32 1.0, %v4600_v27 }
0x2201   :  { %4601 = vrcp.f32 %v2161_v26 }
0x2202   :  { %4603 = vrcp.f32 %v2259_v28 }
0x220a   :  { %v2283_v21 = vpop.permute.xlu0 %2282 }
0x220b   :  { %v2287_v22 = vmul.f32 %v4596_v20, %v2283_v21  ;;  %v4602_v29 = vpop.eup %4601 }
0x220c   :  { %v4604_v33 = vpop.eup %4603 }
0x220d   :  { %2292 = vrot.lane.b32.xlu0 %v2287_v22, %s4756_s1 }
0x220e   :  { %v2168_v35 = vpop.permute.xlu0 %2167 }
0x220f   :  { %v2170_v36 = vmul.f32 %v4602_v29, %v2168_v35 }
0x2212   :  { %v2273_v62 = vpop.permute.xlu0 %2272 }
0x2213   :  { %v2277_v40 = vmul.f32 %v4596_v20, %v2273_v62 }
0x226e   :  { %v2173_v30 = vpop.permute.xlu1 %2172 }
0x226f   :  { %v2175_v31 = vmul.f32 %v4602_v29, %v2173_v30 }
0x2271   :  { %2177 = vrot.lane.b32.xlu1 %v2175_v31, %s4756_s1 }
0x2272   :  { %v2281_v32 = vpop.permute.xlu1 %2280 }
0x2273   :  { %v2286_v34 = vmul.f32 %v4604_v33, %v2281_v32 }
0x2275   :  { %2270 = vrot.lane.b32.xlu1 %v2267_v63, %s4756_s1 }
0x2279   :  { %2290 = vrot.lane.b32.xlu1 %v2286_v34, %s4756_s1 }
0x227f   :  { %v2293_v39 = vpop.permute.xlu0 %2292 }
0x2280   :  { %v2297_v42 = vadd.f32 %v2293_v39, %v2277_v40 }
0x2282   :  { %v2300_v45 = vrot.slane %v2297_v42, 7 }
0x22e3   :  { %v2178_v37 = vpop.permute.xlu1 %2177 }
0x22e4   :  { %v2180_v38 = vadd.f32 %v2178_v37, %v2170_v36 }
0x22e6   :  { %2182 = vrot.lane.b32.xlu0 %v2180_v38, %s4758_s5 }
0x22e7   :  { %v2271_v41 = vpop.permute.xlu1 %2270 }
0x22e8   :  { %v2276_v43 = vmul.f32 %v4604_v33, %v2271_v41 }
0x22eb   :  { %v2291_v44 = vpop.permute.xlu1 %2290 }
0x22ec   :  { %v2296_v46 = vadd.f32 %v2291_v44, %v2276_v43 }
0x22ee   :  { %v2301_v47 = vsel %vm228_vm3, %v2300_v45, %v2296_v46 }
0x22ef   :  { %2302 = vrot.lane.b32.xlu1 %v2301_v47, %s4758_s5 }
0x2358   :  { %v2183_v48 = vpop.permute.xlu0 %2182 }
0x2359   :  { %2185 = vst.msk [vmem:[#allocation8] sm:$0x3] %vm119_vm0, %v2183_v48 }
0x2360   :  { %v2186_v49 = vld [vmem:[#allocation8] sm:$0x3] }
0x2361   :  { %v2303_v50 = vpop.permute.xlu1 %2302  ;;  %4605 = vtanh.f32 %v2186_v49  ;;  %v2395_v25 = vld [vmem:[#allocation8] sm:$0x3] }
0x2362   :  { %2305 = vst.msk [vmem:[#allocation6] sm:$0x3] %vm119_vm0, %v2303_v50 }
0x2369   :  { %v2306_v51 = vld [vmem:[#allocation6] sm:$0x3] }
0x236a   :  { %4607 = vtanh.f32 %v2306_v51  ;;  %v2497_v26 = vld [vmem:[#allocation6] sm:$0x3] }
0x236b   :  { %v4606_v52 = vpop.eup %4605  ;;  %v2499_v27 = vrot.slane %v2497_v26, 1 }
0x236c   :  { %2189 = vrot.lane.b32.xlu0 %v4606_v52, %s4758_s5 }
0x2374   :  { %v4608_v53 = vpop.eup %4607 }
0x2375   :  { %2310 = vrot.lane.b32.xlu0 %v4608_v53, %s4758_s5  ;;  %v2309_v54 = vrot.slane %v4608_v53, 1 }
0x2377   :  { %2312 = vrot.lane.b32.xlu1 %v2309_v54, %s4758_s5 }
0x23de   :  { %v2190_v55 = vpop.permute.xlu0 %2189 }
0x23df   :  { %v2192_v56 = vmul.f32 %v4602_v29, %v2190_v55  ;;  %v2428_v29 = vld [vmem:[%s5629_s0 + $0xa] sm:$0x1] }
0x23e1   :  { %2194 = vrot.lane.b32.xlu1 %v2192_v56, %s4756_s1 }
0x23e7   :  { %v2311_v57 = vpop.permute.xlu0 %2310 }
0x23e8   :  { %v2316_v61 = vmul.f32 %v4604_v33, %v2311_v57 }
0x23e9   :  { %v2313_v58 = vpop.permute.xlu1 %2312 }
0x23ea   :  { %v2317_v59 = vmul.f32 %v4596_v20, %v2313_v58 }
0x23ec   :  { %v2320_v63 = vrot.slane %v2317_v59, 7 }
0x23ee   :  { %v2321_v7 = vsel %vm228_vm3, %v2320_v63, %v2316_v61 }
0x23ef   :  { %2322 = vrot.lane.b32.xlu0 %v2321_v7, %s4756_s1 }
0x2453   :  { %v2195_v8 = vpop.permute.xlu1 %2194 }
0x2454   :  { %2197 = vst.msk [vmem:[#allocation7] sm:$0x3] %vm119_vm0, %v2195_v8 }
0x245b   :  { %v2327_v9 = vld [vmem:[#allocation7] sm:$0x3] }
0x245c   :  { %2329 = vrot.lane.b32.xlu1 %v2327_v9, %s4756_s1 }
0x2461   :  { %v2323_v10 = vpop.permute.xlu0 %2322 }
0x2462   :  { %2325 = vst.msk [vmem:[#allocation5] sm:$0x3] %vm119_vm0, %v2323_v10 }
0x2469   :  { %v2430_v11 = vld [vmem:[#allocation5] sm:$0x3] }
0x246a   :  { %v2431_v12 = vpack.c.bf16 %v2430_v11, %v2430_v11  ;;  %v2326_v14 = vld [vmem:[#allocation5] sm:$0x3] }
0x246c   :  { %4277 = vmatmul.mubr.msk.bf16.vlgmr.msra.gmra.mrb[40].mxu1 %vm130_vm2, %v2431_v12 }
0x246d   :  { %4281 = vmatpush3.bf16.msra.mxu1 %v4797_v2  ;;  %4288 = vmatprep.mubr.msk.bf16.mxu1 %vm4755_vm1, %v4754_v6 }
0x246e   :  { %4282 = vmatprep.subr.bf16.mxu1 %v4754_v6 }
0x2471   :  { %4283 = vmatpush3.bf16.msra.mxu1 %v4802_v3 }
0x2472   :  { %4284 = vmatprep.subr.bf16.mxu1 %v4754_v6 }
0x2475   :  { %4285 = vmatpush3.bf16.msra.mxu1 %v4807_v4 }
0x2476   :  { %4286 = vmatprep.subr.bf16.mxu1 %v4754_v6 }
0x2479   :  { %4287 = vmatpush3.bf16.msra.mxu1 %v4812_v5 }
0x247a   :  { %4312 = vmatprep.subr.bf16.mxu1 %v4754_v6 }
0x24ce   :  { %v2330_v13 = vpop.permute.xlu1 %2329 }
0x24cf   :  { %v2332_v15 = vsel %vm130_vm2, %v2326_v14, %v2330_v13 }
0x24d0   :  { %v2333_v16 = vpack.c.bf16 %v2332_v15, %v2332_v15 }
0x24d2   :  { %4269 = vmatmul.mubr.msk.bf16.vlgmr.msra.gmra.mrb[36].mxu0 %vm274_vm4, %v2333_v16 }
0x24d3   :  { %4293 = vmatpush3.bf16.msra.mxu0 %v4787_v0  ;;  %4296 = vmatprep.mubr.msk.bf16.mxu0 %vm4755_vm1, %v4754_v6 }
0x24d4   :  { %4294 = vmatprep.subr.bf16.mxu0 %v4754_v6 }
0x24d7   :  { %4295 = vmatpush3.bf16.msra.mxu0 %v4792_v1 }
0x24d8   :  { %4300 = vmatprep.subr.bf16.mxu0 %v4754_v6 }
0x253f   :  { %v2471_v18 = vpop.f32.mrb[40].mxu1 }
0x2540   :  { %v2478_v19 = vrot.slane %v2471_v18, 1  ;;  %v4278_v20 = vpop.f32.mrb[41].mxu1  ;;  %v2481_v34 = vadd.f32 %v2471_v18, %v2428_v29 }
0x2541   :  { %v2474_v21 = vpop.f32.mrb[42].mxu1 }
0x2542   :  { %v2482_v22 = vadd.f32 %v2478_v19, %v2429_v17  ;;  %v4279_v23 = vpop.f32.mrb[43].mxu1  ;;  %v3907_v42 = vmul.f32 -1.442695, %v2481_v34 }
0x2544   :  { %4609 = vtanh.f32 %v2482_v22  ;;  %v3908_v28 = vmul.f32 -1.442695, %v2482_v22 }
0x2546   :  { %4611 = vpow2.f32 %v3908_v28 }
0x254e   :  { %v4610_v24 = vpop.eup %4609 }
0x254f   :  { %2512 = vrot.lane.b32.xlu1 %v4610_v24, %s4757_s30 }
0x2550   :  { %v4612_v62 = vpop.eup %4611 }
0x2551   :  { %v2490_v37 = vadd.f32 1.0, %v4612_v62  ;;  %v2659_v62 = vld [vmem:[%s5629_s0 + $0x1b] sm:$0x1] }
0x2553   :  { %2397 = vrot.lane.b32.xlu1 %v2395_v25, %s4756_s1 }
0x2557   :  { %2502 = vrot.lane.b32.xlu1 %v2499_v27, %s4756_s1 }
0x25a5   :  { %v2382_v30 = vpop.f32.mrb[36].mxu0 }
0x25a6   :  { %v2383_v31 = vadd.f32 %v5148_v60, %v2382_v30  ;;  %v4270_v32 = vpop.f32.mrb[37].mxu0 }
0x25a7   :  { %v2385_v33 = vpop.f32.mrb[38].mxu0 }
0x25a8   :  { %4613 = vtanh.f32 %v2383_v31  ;;  %v4271_v35 = vpop.f32.mrb[39].mxu0  ;;  %v3905_v60 = vmul.f32 -1.442695, %v2383_v31 }
0x25a9   :  { %4615 = vtanh.f32 %v2481_v34 }
0x25aa   :  { %4617 = vrcp.f32 %v2490_v37 }
0x25ab   :  { %4619 = vpow2.f32 %v3905_v60 }
0x25ac   :  { %4621 = vpow2.f32 %v3907_v42 }
0x25b2   :  { %v4614_v36 = vpop.eup %4613 }
0x25b3   :  { %2402 = vrot.lane.b32.xlu0 %v4614_v36, %s4757_s30  ;;  %v4616_v38 = vpop.eup %4615 }
0x25b4   :  { %v4618_v39 = vpop.eup %4617 }
0x25b5   :  { %v4620_v43 = vpop.eup %4619 }
0x25b6   :  { %v2391_v44 = vadd.f32 1.0, %v4620_v43  ;;  %v4622_v45 = vpop.eup %4621 }
0x25b7   :  { %2510 = vrot.lane.b32.xlu0 %v4616_v38, %s4757_s30  ;;  %v2489_v46 = vadd.f32 1.0, %v4622_v45 }
0x25b8   :  { %4623 = vrcp.f32 %v2391_v44 }
0x25b9   :  { %4625 = vrcp.f32 %v2489_v46  ;;  %v5398_v46 = vld [vmem:[%s5632_s3] ss:$0 sm:$0xff] }
0x25c1   :  { %v2513_v40 = vpop.permute.xlu1 %2512 }
0x25c2   :  { %v2517_v41 = vmul.f32 %v4618_v39, %v2513_v40  ;;  %v4624_v47 = vpop.eup %4623 }
0x25c3   :  { %v4626_v51 = vpop.eup %4625 }
0x25c4   :  { %2522 = vrot.lane.b32.xlu1 %v2517_v41, %s4756_s1 }
0x25c5   :  { %v2398_v53 = vpop.permute.xlu1 %2397 }
0x25c6   :  { %v2400_v55 = vmul.f32 %v4624_v47, %v2398_v53 }
0x25c9   :  { %v2503_v54 = vpop.permute.xlu1 %2502 }
0x25ca   :  { %v2507_v59 = vmul.f32 %v4618_v39, %v2503_v54 }
0x2625   :  { %v2403_v48 = vpop.permute.xlu0 %2402 }
0x2626   :  { %v2405_v49 = vmul.f32 %v4624_v47, %v2403_v48 }
0x2628   :  { %2407 = vrot.lane.b32.xlu0 %v2405_v49, %s4756_s1 }
0x2629   :  { %v2511_v50 = vpop.permute.xlu0 %2510 }
0x262a   :  { %v2516_v52 = vmul.f32 %v4626_v51, %v2511_v50 }
0x262c   :  { %2500 = vrot.lane.b32.xlu0 %v2497_v26, %s4756_s1 }
0x2630   :  { %2520 = vrot.lane.b32.xlu0 %v2516_v52, %s4756_s1 }
0x2636   :  { %v2523_v58 = vpop.permute.xlu1 %2522 }
0x2637   :  { %v2527_v63 = vadd.f32 %v2523_v58, %v2507_v59 }
0x2639   :  { %v2530_v9 = vrot.slane %v2527_v63, 7 }
0x269a   :  { %v2408_v56 = vpop.permute.xlu0 %2407 }
0x269b   :  { %v2410_v57 = vadd.f32 %v2408_v56, %v2400_v55 }
0x269d   :  { %2412 = vrot.lane.b32.xlu1 %v2410_v57, %s4758_s5 }
0x269e   :  { %v2501_v61 = vpop.permute.xlu0 %2500 }
0x269f   :  { %v2506_v7 = vmul.f32 %v4626_v51, %v2501_v61 }
0x26a2   :  { %v2521_v8 = vpop.permute.xlu0 %2520 }
0x26a3   :  { %v2526_v10 = vadd.f32 %v2521_v8, %v2506_v7 }
0x26a5   :  { %v2531_v11 = vsel %vm228_vm3, %v2530_v9, %v2526_v10 }
0x26a6   :  { %2532 = vrot.lane.b32.xlu0 %v2531_v11, %s4758_s5 }
0x270f   :  { %v2413_v12 = vpop.permute.xlu1 %2412 }
0x2710   :  { %2415 = vst.msk [vmem:[#allocation8] sm:$0x3] %vm119_vm0, %v2413_v12 }
0x2717   :  { %v2416_v13 = vld [vmem:[#allocation8] sm:$0x3] }
0x2718   :  { %v2533_v14 = vpop.permute.xlu0 %2532  ;;  %4627 = vtanh.f32 %v2416_v13  ;;  %v2625_v42 = vld [vmem:[#allocation8] sm:$0x3] }
0x2719   :  { %2535 = vst.msk [vmem:[#allocation6] sm:$0x3] %vm119_vm0, %v2533_v14 }
0x2720   :  { %v2536_v15 = vld [vmem:[#allocation6] sm:$0x3] }
0x2721   :  { %4629 = vtanh.f32 %v2536_v15  ;;  %v2727_v43 = vld [vmem:[#allocation6] sm:$0x3] }
0x2722   :  { %v4628_v16 = vpop.eup %4627  ;;  %v2729_v44 = vrot.slane %v2727_v43, 1 }
0x2723   :  { %2419 = vrot.lane.b32.xlu1 %v4628_v16, %s4758_s5 }
0x272b   :  { %v4630_v17 = vpop.eup %4629 }
0x272c   :  { %2540 = vrot.lane.b32.xlu1 %v4630_v17, %s4758_s5  ;;  %v2539_v18 = vrot.slane %v4630_v17, 1 }
0x272e   :  { %2542 = vrot.lane.b32.xlu0 %v2539_v18, %s4758_s5 }
0x2795   :  { %v2420_v19 = vpop.permute.xlu1 %2419 }
0x2796   :  { %v2422_v20 = vmul.f32 %v4624_v47, %v2420_v19  ;;  %v2658_v47 = vld [vmem:[%s5629_s0 + $0xb] sm:$0x1] }
0x2798   :  { %2424 = vrot.lane.b32.xlu0 %v2422_v20, %s4756_s1 }
0x279e   :  { %v2541_v21 = vpop.permute.xlu1 %2540 }
0x279f   :  { %v2546_v24 = vmul.f32 %v4626_v51, %v2541_v21 }
0x27a0   :  { %v2543_v22 = vpop.permute.xlu0 %2542 }
0x27a1   :  { %v2547_v23 = vmul.f32 %v4618_v39, %v2543_v22 }
0x27a3   :  { %v2550_v25 = vrot.slane %v2547_v23, 7 }
0x27a5   :  { %v2551_v26 = vsel %vm228_vm3, %v2550_v25, %v2546_v24 }
0x27a6   :  { %2552 = vrot.lane.b32.xlu1 %v2551_v26, %s4756_s1 }
0x280a   :  { %v2425_v27 = vpop.permute.xlu0 %2424 }
0x280b   :  { %2427 = vst.msk [vmem:[#allocation7] sm:$0x3] %vm119_vm0, %v2425_v27 }
0x2812   :  { %v2557_v28 = vld [vmem:[#allocation7] sm:$0x3] }
0x2813   :  { %2559 = vrot.lane.b32.xlu0 %v2557_v28, %s4756_s1 }
0x2818   :  { %v2553_v29 = vpop.permute.xlu1 %2552 }
0x2819   :  { %2555 = vst.msk [vmem:[#allocation5] sm:$0x3] %vm119_vm0, %v2553_v29 }
0x2820   :  { %v2660_v30 = vld [vmem:[#allocation5] sm:$0x3] }
0x2821   :  { %v2661_v31 = vpack.c.bf16 %v2660_v30, %v2660_v30  ;;  %v2556_v32 = vld [vmem:[#allocation5] sm:$0x3] }
0x2823   :  { %4297 = vmatmul.mubr.msk.bf16.vlgmr.msra.gmra.mrb[40].mxu0 %vm130_vm2, %v2661_v31 }
0x2824   :  { %4301 = vmatpush3.bf16.msra.mxu0 %v4797_v2  ;;  %4308 = vmatprep.mubr.msk.bf16.mxu0 %vm4755_vm1, %v4754_v6 }
0x2825   :  { %4302 = vmatprep.subr.bf16.mxu0 %v4754_v6 }
0x2828   :  { %4303 = vmatpush3.bf16.msra.mxu0 %v4802_v3 }
0x2829   :  { %4304 = vmatprep.subr.bf16.mxu0 %v4754_v6 }
0x282c   :  { %4305 = vmatpush3.bf16.msra.mxu0 %v4807_v4 }
0x282d   :  { %4306 = vmatprep.subr.bf16.mxu0 %v4754_v6 }
0x2830   :  { %4307 = vmatpush3.bf16.msra.mxu0 %v4812_v5 }
0x2831   :  { %4332 = vmatprep.subr.bf16.mxu0 %v4754_v6 }
0x2885   :  { %v2560_v33 = vpop.permute.xlu0 %2559 }
0x2886   :  { %v2562_v34 = vsel %vm130_vm2, %v2556_v32, %v2560_v33 }
0x2887   :  { %v2563_v35 = vpack.c.bf16 %v2562_v34, %v2562_v34 }
0x2889   :  { %4289 = vmatmul.mubr.msk.bf16.vlgmr.msra.gmra.mrb[44].mxu1 %vm274_vm4, %v2563_v35 }
0x288a   :  { %4313 = vmatpush3.bf16.msra.mxu1 %v4787_v0  ;;  %4316 = vmatprep.mubr.msk.bf16.mxu1 %vm4755_vm1, %v4754_v6 }
0x288b   :  { %4314 = vmatprep.subr.bf16.mxu1 %v4754_v6 }
0x288e   :  { %4315 = vmatpush3.bf16.msra.mxu1 %v4792_v1 }
0x288f   :  { %4320 = vmatprep.subr.bf16.mxu1 %v4754_v6 }
0x28f6   :  { %v2701_v36 = vpop.f32.mrb[40].mxu0 }
0x28f7   :  { %v2708_v37 = vrot.slane %v2701_v36, 1  ;;  %v4298_v38 = vpop.f32.mrb[41].mxu0  ;;  %v2711_v52 = vadd.f32 %v2701_v36, %v2658_v47 }
0x28f8   :  { %v2704_v39 = vpop.f32.mrb[42].mxu0 }
0x28f9   :  { %v2712_v40 = vadd.f32 %v2708_v37, %v2659_v62  ;;  %v4299_v41 = vpop.f32.mrb[43].mxu0  ;;  %v3913_v7 = vmul.f32 -1.442695, %v2711_v52 }
0x28fb   :  { %4631 = vtanh.f32 %v2712_v40  ;;  %v3914_v45 = vmul.f32 -1.442695, %v2712_v40 }
0x28fd   :  { %4633 = vpow2.f32 %v3914_v45 }
0x2905   :  { %v4632_v60 = vpop.eup %4631 }
0x2906   :  { %2742 = vrot.lane.b32.xlu0 %v4632_v60, %s4757_s30 }
0x2907   :  { %v4634_v54 = vpop.eup %4633 }
0x2908   :  { %v2720_v56 = vadd.f32 1.0, %v4634_v54 }
0x290a   :  { %2627 = vrot.lane.b32.xlu0 %v2625_v42, %s4756_s1 }
0x290e   :  { %2732 = vrot.lane.b32.xlu0 %v2729_v44, %s4756_s1 }
0x295c   :  { %v2612_v48 = vpop.f32.mrb[44].mxu1 }
0x295d   :  { %v2613_v49 = vadd.f32 %v5398_v46, %v2612_v48  ;;  %v4290_v50 = vpop.f32.mrb[45].mxu1 }
0x295e   :  { %v2615_v51 = vpop.f32.mrb[46].mxu1 }
0x295f   :  { %4635 = vtanh.f32 %v2613_v49  ;;  %v4291_v53 = vpop.f32.mrb[47].mxu1  ;;  %v3911_v63 = vmul.f32 -1.442695, %v2613_v49 }
0x2960   :  { %4637 = vtanh.f32 %v2711_v52 }
0x2961   :  { %4639 = vrcp.f32 %v2720_v56 }
0x2962   :  { %4641 = vpow2.f32 %v3911_v63 }
0x2963   :  { %4643 = vpow2.f32 %v3913_v7 }
0x2969   :  { %v4636_v55 = vpop.eup %4635 }
0x296a   :  { %2632 = vrot.lane.b32.xlu1 %v4636_v55, %s4757_s30  ;;  %v4638_v57 = vpop.eup %4637  ;;  %v2889_v55 = vld [vmem:[%s5629_s0 + $0x1c] sm:$0x1] }
0x296b   :  { %v4640_v58 = vpop.eup %4639 }
0x296c   :  { %v4642_v8 = vpop.eup %4641 }
0x296d   :  { %v2621_v9 = vadd.f32 1.0, %v4642_v8  ;;  %v4644_v10 = vpop.eup %4643 }
0x296e   :  { %2740 = vrot.lane.b32.xlu1 %v4638_v57, %s4757_s30  ;;  %v2719_v11 = vadd.f32 1.0, %v4644_v10 }
0x296f   :  { %4645 = vrcp.f32 %v2621_v9 }
0x2970   :  { %4647 = vrcp.f32 %v2719_v11 }
0x2978   :  { %v2743_v59 = vpop.permute.xlu0 %2742 }
0x2979   :  { %v2747_v61 = vmul.f32 %v4640_v58, %v2743_v59  ;;  %v4646_v12 = vpop.eup %4645 }
0x297a   :  { %v4648_v16 = vpop.eup %4647 }
0x297b   :  { %2752 = vrot.lane.b32.xlu0 %v2747_v61, %s4756_s1 }
0x297c   :  { %v2628_v18 = vpop.permute.xlu0 %2627 }
0x297d   :  { %v2630_v20 = vmul.f32 %v4646_v12, %v2628_v18 }
0x2980   :  { %v2733_v19 = vpop.permute.xlu0 %2732 }
0x2981   :  { %v2737_v24 = vmul.f32 %v4640_v58, %v2733_v19 }
0x29dc   :  { %v2633_v13 = vpop.permute.xlu1 %2632 }
0x29dd   :  { %v2635_v14 = vmul.f32 %v4646_v12, %v2633_v13 }
0x29df   :  { %2637 = vrot.lane.b32.xlu1 %v2635_v14, %s4756_s1 }
0x29e0   :  { %v2741_v15 = vpop.permute.xlu1 %2740 }
0x29e1   :  { %v2746_v17 = vmul.f32 %v4648_v16, %v2741_v15 }
0x29e3   :  { %2730 = vrot.lane.b32.xlu1 %v2727_v43, %s4756_s1 }
0x29e7   :  { %2750 = vrot.lane.b32.xlu1 %v2746_v17, %s4756_s1 }
0x29ed   :  { %v2753_v23 = vpop.permute.xlu0 %2752 }
0x29ee   :  { %v2757_v26 = vadd.f32 %v2753_v23, %v2737_v24 }
0x29f0   :  { %v2760_v29 = vrot.slane %v2757_v26, 7 }
0x2a51   :  { %v2638_v21 = vpop.permute.xlu1 %2637 }
0x2a52   :  { %v2640_v22 = vadd.f32 %v2638_v21, %v2630_v20 }
0x2a54   :  { %2642 = vrot.lane.b32.xlu0 %v2640_v22, %s4758_s5 }
0x2a55   :  { %v2731_v25 = vpop.permute.xlu1 %2730 }
0x2a56   :  { %v2736_v27 = vmul.f32 %v4648_v16, %v2731_v25 }
0x2a59   :  { %v2751_v28 = vpop.permute.xlu1 %2750 }
0x2a5a   :  { %v2756_v30 = vadd.f32 %v2751_v28, %v2736_v27 }
0x2a5c   :  { %v2761_v31 = vsel %vm228_vm3, %v2760_v29, %v2756_v30 }
0x2a5d   :  { %2762 = vrot.lane.b32.xlu1 %v2761_v31, %s4758_s5 }
0x2ac6   :  { %v2643_v32 = vpop.permute.xlu0 %2642 }
0x2ac7   :  { %2645 = vst.msk [vmem:[#allocation8] sm:$0x3] %vm119_vm0, %v2643_v32 }
0x2ace   :  { %v2646_v33 = vld [vmem:[#allocation8] sm:$0x3] }
0x2acf   :  { %v2763_v34 = vpop.permute.xlu1 %2762  ;;  %4649 = vtanh.f32 %v2646_v33  ;;  %v2855_v8 = vld [vmem:[#allocation8] sm:$0x3] }
0x2ad0   :  { %2765 = vst.msk [vmem:[#allocation6] sm:$0x3] %vm119_vm0, %v2763_v34 }
0x2ad7   :  { %v2766_v35 = vld [vmem:[#allocation6] sm:$0x3] }
0x2ad8   :  { %4651 = vtanh.f32 %v2766_v35  ;;  %v2957_v9 = vld [vmem:[#allocation6] sm:$0x3] }
0x2ad9   :  { %v4650_v62 = vpop.eup %4649  ;;  %v2959_v10 = vrot.slane %v2957_v9, 1 }
0x2ada   :  { %2649 = vrot.lane.b32.xlu0 %v4650_v62, %s4758_s5 }
0x2ae2   :  { %v4652_v36 = vpop.eup %4651 }
0x2ae3   :  { %2770 = vrot.lane.b32.xlu0 %v4652_v36, %s4758_s5  ;;  %v2769_v37 = vrot.slane %v4652_v36, 1 }
0x2ae5   :  { %2772 = vrot.lane.b32.xlu1 %v2769_v37, %s4758_s5 }
0x2b4c   :  { %v2650_v38 = vpop.permute.xlu0 %2649 }
0x2b4d   :  { %v2652_v39 = vmul.f32 %v4646_v12, %v2650_v38  ;;  %v2888_v12 = vld [vmem:[%s5629_s0 + $0xc] sm:$0x1] }
0x2b4f   :  { %2654 = vrot.lane.b32.xlu1 %v2652_v39, %s4756_s1 }
0x2b55   :  { %v2771_v40 = vpop.permute.xlu0 %2770 }
0x2b56   :  { %v2776_v42 = vmul.f32 %v4648_v16, %v2771_v40 }
0x2b57   :  { %v2773_v41 = vpop.permute.xlu1 %2772 }
0x2b58   :  { %v2777_v60 = vmul.f32 %v4640_v58, %v2773_v41 }
0x2b5a   :  { %v2780_v43 = vrot.slane %v2777_v60, 7 }
0x2b5c   :  { %v2781_v44 = vsel %vm228_vm3, %v2780_v43, %v2776_v42 }
0x2b5d   :  { %2782 = vrot.lane.b32.xlu0 %v2781_v44, %s4756_s1 }
0x2bc1   :  { %v2655_v45 = vpop.permute.xlu1 %2654 }
0x2bc2   :  { %2657 = vst.msk [vmem:[#allocation7] sm:$0x3] %vm119_vm0, %v2655_v45 }
0x2bc9   :  { %v2787_v47 = vld [vmem:[#allocation7] sm:$0x3] }
0x2bca   :  { %2789 = vrot.lane.b32.xlu1 %v2787_v47, %s4756_s1 }
0x2bcf   :  { %v2783_v48 = vpop.permute.xlu0 %2782 }
0x2bd0   :  { %2785 = vst.msk [vmem:[#allocation5] sm:$0x3] %vm119_vm0, %v2783_v48 }
0x2bd7   :  { %v2890_v49 = vld [vmem:[#allocation5] sm:$0x3] }
0x2bd8   :  { %v2891_v50 = vpack.c.bf16 %v2890_v49, %v2890_v49  ;;  %v2786_v52 = vld [vmem:[#allocation5] sm:$0x3] }
0x2bda   :  { %4317 = vmatmul.mubr.msk.bf16.vlgmr.msra.gmra.mrb[48].mxu1 %vm130_vm2, %v2891_v50 }
0x2bdb   :  { %4321 = vmatpush3.bf16.msra.mxu1 %v4797_v2  ;;  %4328 = vmatprep.mubr.msk.bf16.mxu1 %vm4755_vm1, %v4754_v6 }
0x2bdc   :  { %4322 = vmatprep.subr.bf16.mxu1 %v4754_v6 }
0x2bdf   :  { %4323 = vmatpush3.bf16.msra.mxu1 %v4802_v3 }
0x2be0   :  { %4324 = vmatprep.subr.bf16.mxu1 %v4754_v6 }
0x2be3   :  { %4325 = vmatpush3.bf16.msra.mxu1 %v4807_v4 }
0x2be4   :  { %4326 = vmatprep.subr.bf16.mxu1 %v4754_v6 }
0x2be7   :  { %4327 = vmatpush3.bf16.msra.mxu1 %v4812_v5 }
0x2be8   :  { %4352 = vmatprep.subr.bf16.mxu1 %v4754_v6 }
0x2c3c   :  { %v2790_v51 = vpop.permute.xlu1 %2789 }
0x2c3d   :  { %v2792_v53 = vsel %vm130_vm2, %v2786_v52, %v2790_v51 }
0x2c3e   :  { %v2793_v54 = vpack.c.bf16 %v2792_v53, %v2792_v53 }
0x2c40   :  { %4309 = vmatmul.mubr.msk.bf16.vlgmr.msra.gmra.mrb[44].mxu0 %vm274_vm4, %v2793_v54 }
0x2c41   :  { %4333 = vmatpush3.bf16.msra.mxu0 %v4787_v0  ;;  %4336 = vmatprep.mubr.msk.bf16.mxu0 %vm4755_vm1, %v4754_v6 }
0x2c42   :  { %4334 = vmatprep.subr.bf16.mxu0 %v4754_v6 }
0x2c45   :  { %4335 = vmatpush3.bf16.msra.mxu0 %v4792_v1 }
0x2c46   :  { %4340 = vmatprep.subr.bf16.mxu0 %v4754_v6 }
0x2cad   :  { %v2931_v56 = vpop.f32.mrb[48].mxu1 }
0x2cae   :  { %v2938_v57 = vrot.slane %v2931_v56, 1  ;;  %v4318_v58 = vpop.f32.mrb[49].mxu1  ;;  %v2941_v17 = vadd.f32 %v2931_v56, %v2888_v12 }
0x2caf   :  { %v2934_v59 = vpop.f32.mrb[50].mxu1 }
0x2cb0   :  { %v2942_v61 = vadd.f32 %v2938_v57, %v2889_v55  ;;  %v4319_v63 = vpop.f32.mrb[51].mxu1  ;;  %v3919_v27 = vmul.f32 -1.442695, %v2941_v17 }
0x2cb2   :  { %4653 = vtanh.f32 %v2942_v61  ;;  %v3920_v11 = vmul.f32 -1.442695, %v2942_v61 }
0x2cb4   :  { %4655 = vpow2.f32 %v3920_v11 }
0x2cbc   :  { %v4654_v7 = vpop.eup %4653 }
0x2cbd   :  { %2972 = vrot.lane.b32.xlu1 %v4654_v7, %s4757_s30 }
0x2cbe   :  { %v4656_v19 = vpop.eup %4655 }
0x2cbf   :  { %v2950_v21 = vadd.f32 1.0, %v4656_v19 }
0x2cc1   :  { %2857 = vrot.lane.b32.xlu1 %v2855_v8, %s4756_s1 }
0x2cc5   :  { %2962 = vrot.lane.b32.xlu1 %v2959_v10, %s4756_s1 }
0x2d13   :  { %v2842_v13 = vpop.f32.mrb[44].mxu0 }
0x2d14   :  { %v2843_v14 = vadd.f32 %v5398_v46, %v2842_v13  ;;  %v4310_v15 = vpop.f32.mrb[45].mxu0 }
0x2d15   :  { %v2845_v16 = vpop.f32.mrb[46].mxu0 }
0x2d16   :  { %4657 = vtanh.f32 %v2843_v14  ;;  %v4311_v18 = vpop.f32.mrb[47].mxu0  ;;  %v3917_v26 = vmul.f32 -1.442695, %v2843_v14 }
0x2d17   :  { %4659 = vtanh.f32 %v2941_v17 }
0x2d18   :  { %4661 = vrcp.f32 %v2950_v21 }
0x2d19   :  { %4663 = vpow2.f32 %v3917_v26 }
0x2d1a   :  { %4665 = vpow2.f32 %v3919_v27 }
0x2d20   :  { %v4658_v20 = vpop.eup %4657 }
0x2d21   :  { %2862 = vrot.lane.b32.xlu0 %v4658_v20, %s4757_s30  ;;  %v4660_v22 = vpop.eup %4659  ;;  %v3119_v20 = vld [vmem:[%s5629_s0 + $0x1d] sm:$0x1] }
0x2d22   :  { %v4662_v23 = vpop.eup %4661 }
0x2d23   :  { %v4664_v28 = vpop.eup %4663 }
0x2d24   :  { %v2851_v29 = vadd.f32 1.0, %v4664_v28  ;;  %v4666_v30 = vpop.eup %4665 }
0x2d25   :  { %2970 = vrot.lane.b32.xlu0 %v4660_v22, %s4757_s30  ;;  %v2949_v31 = vadd.f32 1.0, %v4666_v30 }
0x2d26   :  { %4667 = vrcp.f32 %v2851_v29 }
0x2d27   :  { %4669 = vrcp.f32 %v2949_v31 }
0x2d2f   :  { %v2973_v24 = vpop.permute.xlu1 %2972 }
0x2d30   :  { %v2977_v25 = vmul.f32 %v4662_v23, %v2973_v24  ;;  %v4668_v32 = vpop.eup %4667 }
0x2d31   :  { %v4670_v62 = vpop.eup %4669 }
0x2d32   :  { %2982 = vrot.lane.b32.xlu1 %v2977_v25, %s4756_s1 }
0x2d33   :  { %v2858_v37 = vpop.permute.xlu1 %2857 }
0x2d34   :  { %v2860_v39 = vmul.f32 %v4668_v32, %v2858_v37 }
0x2d37   :  { %v2963_v38 = vpop.permute.xlu1 %2962 }
0x2d38   :  { %v2967_v42 = vmul.f32 %v4662_v23, %v2963_v38 }
0x2d93   :  { %v2863_v33 = vpop.permute.xlu0 %2862 }
0x2d94   :  { %v2865_v34 = vmul.f32 %v4668_v32, %v2863_v33 }
0x2d96   :  { %2867 = vrot.lane.b32.xlu0 %v2865_v34, %s4756_s1 }
0x2d97   :  { %v2971_v35 = vpop.permute.xlu0 %2970 }
0x2d98   :  { %v2976_v36 = vmul.f32 %v4670_v62, %v2971_v35 }
0x2d9a   :  { %2960 = vrot.lane.b32.xlu0 %v2957_v9, %s4756_s1 }
0x2d9e   :  { %2980 = vrot.lane.b32.xlu0 %v2976_v36, %s4756_s1 }
0x2da4   :  { %v2983_v60 = vpop.permute.xlu1 %2982 }
0x2da5   :  { %v2987_v44 = vadd.f32 %v2983_v60, %v2967_v42 }
0x2da7   :  { %v2990_v48 = vrot.slane %v2987_v44, 7 }
0x2e08   :  { %v2868_v40 = vpop.permute.xlu0 %2867 }
0x2e09   :  { %v2870_v41 = vadd.f32 %v2868_v40, %v2860_v39 }
0x2e0b   :  { %2872 = vrot.lane.b32.xlu1 %v2870_v41, %s4758_s5 }
0x2e0c   :  { %v2961_v43 = vpop.permute.xlu0 %2960 }
0x2e0d   :  { %v2966_v45 = vmul.f32 %v4670_v62, %v2961_v43 }
0x2e10   :  { %v2981_v47 = vpop.permute.xlu0 %2980 }
0x2e11   :  { %v2986_v49 = vadd.f32 %v2981_v47, %v2966_v45 }
0x2e13   :  { %v2991_v50 = vsel %vm228_vm3, %v2990_v48, %v2986_v49 }
0x2e14   :  { %2992 = vrot.lane.b32.xlu0 %v2991_v50, %s4758_s5 }
0x2e7d   :  { %v2873_v51 = vpop.permute.xlu1 %2872 }
0x2e7e   :  { %2875 = vst.msk [vmem:[#allocation8] sm:$0x3] %vm119_vm0, %v2873_v51 }
0x2e85   :  { %v2876_v52 = vld [vmem:[#allocation8] sm:$0x3] }
0x2e86   :  { %v2993_v53 = vpop.permute.xlu0 %2992  ;;  %4671 = vtanh.f32 %v2876_v52  ;;  %v3085_v28 = vld [vmem:[#allocation8] sm:$0x3] }
0x2e87   :  { %2995 = vst.msk [vmem:[#allocation6] sm:$0x3] %vm119_vm0, %v2993_v53 }
0x2e8e   :  { %v2996_v54 = vld [vmem:[#allocation6] sm:$0x3] }
0x2e8f   :  { %4673 = vtanh.f32 %v2996_v54  ;;  %v3187_v29 = vld [vmem:[#allocation6] sm:$0x3] }
0x2e90   :  { %v4672_v55 = vpop.eup %4671  ;;  %v3189_v30 = vrot.slane %v3187_v29, 1 }
0x2e91   :  { %2879 = vrot.lane.b32.xlu1 %v4672_v55, %s4758_s5 }
0x2e99   :  { %v4674_v56 = vpop.eup %4673 }
0x2e9a   :  { %3000 = vrot.lane.b32.xlu1 %v4674_v56, %s4758_s5  ;;  %v2999_v57 = vrot.slane %v4674_v56, 1 }
0x2e9c   :  { %3002 = vrot.lane.b32.xlu0 %v2999_v57, %s4758_s5 }
0x2f03   :  { %v2880_v58 = vpop.permute.xlu1 %2879 }
0x2f04   :  { %v2882_v59 = vmul.f32 %v4668_v32, %v2880_v58  ;;  %v3118_v32 = vld [vmem:[%s5629_s0 + $0xd] sm:$0x1] }
0x2f06   :  { %2884 = vrot.lane.b32.xlu0 %v2882_v59, %s4756_s1 }
0x2f0c   :  { %v3001_v61 = vpop.permute.xlu1 %3000 }
0x2f0d   :  { %v3006_v8 = vmul.f32 %v4670_v62, %v3001_v61 }
0x2f0e   :  { %v3003_v63 = vpop.permute.xlu0 %3002 }
0x2f0f   :  { %v3007_v7 = vmul.f32 %v4662_v23, %v3003_v63 }
0x2f11   :  { %v3010_v9 = vrot.slane %v3007_v7, 7 }
0x2f13   :  { %v3011_v10 = vsel %vm228_vm3, %v3010_v9, %v3006_v8 }
0x2f14   :  { %3012 = vrot.lane.b32.xlu1 %v3011_v10, %s4756_s1 }
0x2f78   :  { %v2885_v11 = vpop.permute.xlu0 %2884 }
0x2f79   :  { %2887 = vst.msk [vmem:[#allocation7] sm:$0x3] %vm119_vm0, %v2885_v11 }
0x2f80   :  { %v3017_v12 = vld [vmem:[#allocation7] sm:$0x3] }
0x2f81   :  { %3019 = vrot.lane.b32.xlu0 %v3017_v12, %s4756_s1 }
0x2f86   :  { %v3013_v13 = vpop.permute.xlu1 %3012 }
0x2f87   :  { %3015 = vst.msk [vmem:[#allocation5] sm:$0x3] %vm119_vm0, %v3013_v13 }
0x2f8e   :  { %v3120_v14 = vld [vmem:[#allocation5] sm:$0x3] }
0x2f8f   :  { %v3121_v15 = vpack.c.bf16 %v3120_v14, %v3120_v14  ;;  %v3016_v16 = vld [vmem:[#allocation5] sm:$0x3] }
0x2f91   :  { %4337 = vmatmul.mubr.msk.bf16.vlgmr.msra.gmra.mrb[48].mxu0 %vm130_vm2, %v3121_v15 }
0x2f92   :  { %4341 = vmatpush3.bf16.msra.mxu0 %v4797_v2  ;;  %4348 = vmatprep.mubr.msk.bf16.mxu0 %vm4755_vm1, %v4754_v6 }
0x2f93   :  { %4342 = vmatprep.subr.bf16.mxu0 %v4754_v6 }
0x2f96   :  { %4343 = vmatpush3.bf16.msra.mxu0 %v4802_v3 }
0x2f97   :  { %4344 = vmatprep.subr.bf16.mxu0 %v4754_v6 }
0x2f9a   :  { %4345 = vmatpush3.bf16.msra.mxu0 %v4807_v4 }
0x2f9b   :  { %4346 = vmatprep.subr.bf16.mxu0 %v4754_v6 }
0x2f9e   :  { %4347 = vmatpush3.bf16.msra.mxu0 %v4812_v5 }
0x2f9f   :  { %4372 = vmatprep.subr.bf16.mxu0 %v4754_v6 }
0x2ff3   :  { %v3020_v17 = vpop.permute.xlu0 %3019 }
0x2ff4   :  { %v3022_v18 = vsel %vm130_vm2, %v3016_v16, %v3020_v17 }
0x2ff5   :  { %v3023_v19 = vpack.c.bf16 %v3022_v18, %v3022_v18 }
0x2ff7   :  { %4329 = vmatmul.mubr.msk.bf16.vlgmr.msra.gmra.mrb[52].mxu1 %vm274_vm4, %v3023_v19 }
0x2ff8   :  { %4353 = vmatpush3.bf16.msra.mxu1 %v4787_v0  ;;  %4356 = vmatprep.mubr.msk.bf16.mxu1 %vm4755_vm1, %v4754_v6 }
0x2ff9   :  { %4354 = vmatprep.subr.bf16.mxu1 %v4754_v6 }
0x2ffc   :  { %4355 = vmatpush3.bf16.msra.mxu1 %v4792_v1 }
0x2ffd   :  { %4360 = vmatprep.subr.bf16.mxu1 %v4754_v6 }
0x3064   :  { %v3161_v21 = vpop.f32.mrb[48].mxu0 }
0x3065   :  { %v3168_v22 = vrot.slane %v3161_v21, 1  ;;  %v4338_v23 = vpop.f32.mrb[49].mxu0  ;;  %v3171_v36 = vadd.f32 %v3161_v21, %v3118_v32 }
0x3066   :  { %v3164_v24 = vpop.f32.mrb[50].mxu0 }
0x3067   :  { %v3172_v25 = vadd.f32 %v3168_v22, %v3119_v20  ;;  %v4339_v26 = vpop.f32.mrb[51].mxu0  ;;  %v3925_v45 = vmul.f32 -1.442695, %v3171_v36 }
0x3069   :  { %4675 = vtanh.f32 %v3172_v25  ;;  %v3926_v31 = vmul.f32 -1.442695, %v3172_v25 }
0x306b   :  { %4677 = vpow2.f32 %v3926_v31 }
0x3073   :  { %v4676_v27 = vpop.eup %4675 }
0x3074   :  { %3202 = vrot.lane.b32.xlu0 %v4676_v27, %s4757_s30 }
0x3075   :  { %v4678_v38 = vpop.eup %4677 }
0x3076   :  { %v3180_v40 = vadd.f32 1.0, %v4678_v38 }
0x3078   :  { %3087 = vrot.lane.b32.xlu0 %v3085_v28, %s4756_s1 }
0x307c   :  { %3192 = vrot.lane.b32.xlu0 %v3189_v30, %s4756_s1 }
0x30ca   :  { %v3072_v33 = vpop.f32.mrb[52].mxu1 }
0x30cb   :  { %v3073_v34 = vadd.f32 %v5398_v46, %v3072_v33  ;;  %v4330_v35 = vpop.f32.mrb[53].mxu1 }
0x30cc   :  { %v3075_v62 = vpop.f32.mrb[54].mxu1 }
0x30cd   :  { %4679 = vtanh.f32 %v3073_v34  ;;  %v4331_v37 = vpop.f32.mrb[55].mxu1  ;;  %v3923_v44 = vmul.f32 -1.442695, %v3073_v34 }
0x30ce   :  { %4681 = vtanh.f32 %v3171_v36 }
0x30cf   :  { %4683 = vrcp.f32 %v3180_v40 }
0x30d0   :  { %4685 = vpow2.f32 %v3923_v44 }
0x30d1   :  { %4687 = vpow2.f32 %v3925_v45 }
0x30d7   :  { %v4680_v39 = vpop.eup %4679 }
0x30d8   :  { %3092 = vrot.lane.b32.xlu1 %v4680_v39, %s4757_s30  ;;  %v4682_v41 = vpop.eup %4681  ;;  %v3349_v39 = vld [vmem:[%s5629_s0 + $0x1e] sm:$0x1] }
0x30d9   :  { %v4684_v60 = vpop.eup %4683 }
0x30da   :  { %v4686_v47 = vpop.eup %4685 }
0x30db   :  { %v3081_v48 = vadd.f32 1.0, %v4686_v47  ;;  %v4688_v49 = vpop.eup %4687 }
0x30dc   :  { %3200 = vrot.lane.b32.xlu1 %v4682_v41, %s4757_s30  ;;  %v3179_v50 = vadd.f32 1.0, %v4688_v49  ;;  %v3348_v49 = vld [vmem:[%s5629_s0 + $0xe] sm:$0x1] }
0x30dd   :  { %4689 = vrcp.f32 %v3081_v48 }
0x30de   :  { %4691 = vrcp.f32 %v3179_v50 }
0x30e6   :  { %v3203_v42 = vpop.permute.xlu0 %3202 }
0x30e7   :  { %v3207_v43 = vmul.f32 %v4684_v60, %v3203_v42  ;;  %v4690_v51 = vpop.eup %4689 }
0x30e8   :  { %v4692_v55 = vpop.eup %4691 }
0x30e9   :  { %3212 = vrot.lane.b32.xlu0 %v3207_v43, %s4756_s1 }
0x30ea   :  { %v3088_v57 = vpop.permute.xlu0 %3087 }
0x30eb   :  { %v3090_v59 = vmul.f32 %v4690_v51, %v3088_v57 }
0x30ee   :  { %v3193_v58 = vpop.permute.xlu0 %3192 }
0x30ef   :  { %v3197_v8 = vmul.f32 %v4684_v60, %v3193_v58 }
0x314a   :  { %v3093_v52 = vpop.permute.xlu1 %3092 }
0x314b   :  { %v3095_v53 = vmul.f32 %v4690_v51, %v3093_v52 }
0x314d   :  { %3097 = vrot.lane.b32.xlu1 %v3095_v53, %s4756_s1 }
0x314e   :  { %v3201_v54 = vpop.permute.xlu1 %3200 }
0x314f   :  { %v3206_v56 = vmul.f32 %v4692_v55, %v3201_v54 }
0x3151   :  { %3190 = vrot.lane.b32.xlu1 %v3187_v29, %s4756_s1 }
0x3155   :  { %3210 = vrot.lane.b32.xlu1 %v3206_v56, %s4756_s1 }
0x315b   :  { %v3213_v7 = vpop.permute.xlu0 %3212 }
0x315c   :  { %v3217_v10 = vadd.f32 %v3213_v7, %v3197_v8 }
0x315e   :  { %v3220_v13 = vrot.slane %v3217_v10, 7 }
0x31bf   :  { %v3098_v61 = vpop.permute.xlu1 %3097 }
0x31c0   :  { %v3100_v63 = vadd.f32 %v3098_v61, %v3090_v59 }
0x31c2   :  { %3102 = vrot.lane.b32.xlu0 %v3100_v63, %s4758_s5 }
0x31c3   :  { %v3191_v9 = vpop.permute.xlu1 %3190 }
0x31c4   :  { %v3196_v11 = vmul.f32 %v4692_v55, %v3191_v9 }
0x31c7   :  { %v3211_v12 = vpop.permute.xlu1 %3210 }
0x31c8   :  { %v3216_v14 = vadd.f32 %v3211_v12, %v3196_v11 }
0x31ca   :  { %v3221_v15 = vsel %vm228_vm3, %v3220_v13, %v3216_v14 }
0x31cb   :  { %3222 = vrot.lane.b32.xlu1 %v3221_v15, %s4758_s5 }
0x3234   :  { %v3103_v16 = vpop.permute.xlu0 %3102 }
0x3235   :  { %3105 = vst.msk [vmem:[#allocation8] sm:$0x3] %vm119_vm0, %v3103_v16 }
0x323c   :  { %v3106_v17 = vld [vmem:[#allocation8] sm:$0x3] }
0x323d   :  { %v3223_v18 = vpop.permute.xlu1 %3222  ;;  %4693 = vtanh.f32 %v3106_v17  ;;  %v3315_v45 = vld [vmem:[#allocation8] sm:$0x3] }
0x323e   :  { %3225 = vst.msk [vmem:[#allocation6] sm:$0x3] %vm119_vm0, %v3223_v18 }
0x3245   :  { %v3226_v19 = vld [vmem:[#allocation6] sm:$0x3] }
0x3246   :  { %4695 = vtanh.f32 %v3226_v19  ;;  %v3417_v47 = vld [vmem:[#allocation6] sm:$0x3] }
0x3247   :  { %v4694_v20 = vpop.eup %4693 }
0x3248   :  { %3109 = vrot.lane.b32.xlu0 %v4694_v20, %s4758_s5 }
0x3250   :  { %v4696_v21 = vpop.eup %4695 }
0x3251   :  { %3230 = vrot.lane.b32.xlu0 %v4696_v21, %s4758_s5  ;;  %v3229_v22 = vrot.slane %v4696_v21, 1 }
0x3253   :  { %3232 = vrot.lane.b32.xlu1 %v3229_v22, %s4758_s5 }
0x32ba   :  { %v3110_v23 = vpop.permute.xlu0 %3109 }
0x32bb   :  { %v3112_v24 = vmul.f32 %v4690_v51, %v3110_v23 }
0x32bd   :  { %3114 = vrot.lane.b32.xlu1 %v3112_v24, %s4756_s1 }
0x32c3   :  { %v3231_v25 = vpop.permute.xlu0 %3230 }
0x32c4   :  { %v3236_v28 = vmul.f32 %v4692_v55, %v3231_v25 }
0x32c5   :  { %v3233_v26 = vpop.permute.xlu1 %3232 }
0x32c6   :  { %v3237_v27 = vmul.f32 %v4684_v60, %v3233_v26 }
0x32c8   :  { %v3240_v29 = vrot.slane %v3237_v27, 7 }
0x32ca   :  { %v3241_v30 = vsel %vm228_vm3, %v3240_v29, %v3236_v28 }
0x32cb   :  { %3242 = vrot.lane.b32.xlu0 %v3241_v30, %s4756_s1 }
0x332f   :  { %v3115_v31 = vpop.permute.xlu1 %3114 }
0x3330   :  { %3117 = vst.msk [vmem:[#allocation7] sm:$0x3] %vm119_vm0, %v3115_v31 }
0x3337   :  { %v3247_v32 = vld [vmem:[#allocation7] sm:$0x3] }
0x3338   :  { %3249 = vrot.lane.b32.xlu1 %v3247_v32, %s4756_s1 }
0x333d   :  { %v3243_v33 = vpop.permute.xlu0 %3242 }
0x333e   :  { %3245 = vst.msk [vmem:[#allocation5] sm:$0x3] %vm119_vm0, %v3243_v33 }
0x3345   :  { %v3350_v34 = vld [vmem:[#allocation5] sm:$0x3] }
0x3346   :  { %v3351_v35 = vpack.c.bf16 %v3350_v34, %v3350_v34  ;;  %v3246_v36 = vld [vmem:[#allocation5] sm:$0x3] }
0x3348   :  { %4357 = vmatmul.mubr.msk.bf16.vlgmr.msra.gmra.mrb[56].mxu1 %vm130_vm2, %v3351_v35 }
0x3349   :  { %4361 = vmatpush3.bf16.msra.mxu1 %v4797_v2  ;;  %4368 = vmatprep.mubr.msk.bf16.mxu1 %vm4755_vm1, %v4754_v6 }
0x334a   :  { %4362 = vmatprep.subr.bf16.mxu1 %v4754_v6 }
0x334d   :  { %4363 = vmatpush3.bf16.msra.mxu1 %v4802_v3 }
0x334e   :  { %4364 = vmatprep.subr.bf16.mxu1 %v4754_v6 }
0x3351   :  { %4365 = vmatpush3.bf16.msra.mxu1 %v4807_v4 }
0x3352   :  { %4366 = vmatprep.subr.bf16.mxu1 %v4754_v6 }
0x3355   :  { %4367 = vmatpush3.bf16.msra.mxu1 %v4812_v5 }
0x33aa   :  { %v3250_v62 = vpop.permute.xlu1 %3249 }
0x33ab   :  { %v3252_v37 = vsel %vm130_vm2, %v3246_v36, %v3250_v62 }
0x33ac   :  { %v3253_v38 = vpack.c.bf16 %v3252_v37, %v3252_v37 }
0x33ae   :  { %4349 = vmatmul.mubr.msk.bf16.vlgmr.msra.gmra.mrb[52].mxu0 %vm274_vm4, %v3253_v38 }
0x33af   :  { %4373 = vmatpush3.bf16.msra.mxu0 %v4787_v0  ;;  %4376 = vmatprep.mubr.msk.bf16.mxu0 %vm4755_vm1, %v4754_v6 }
0x33b0   :  { %4374 = vmatprep.subr.bf16.mxu0 %v4754_v6 }
0x33b3   :  { %4375 = vmatpush3.bf16.msra.mxu0 %v4792_v1  ;;  %v3419_v1 = vrot.slane %v3417_v47, 1 }
0x33b4   :  { %4380 = vmatprep.subr.bf16.mxu0 %v4754_v6 }
0x341b   :  { %v3391_v40 = vpop.f32.mrb[56].mxu1 }
0x341c   :  { %v3398_v41 = vrot.slane %v3391_v40, 1  ;;  %v4358_v60 = vpop.f32.mrb[57].mxu1  ;;  %v3401_v54 = vadd.f32 %v3391_v40, %v3348_v49 }
0x341d   :  { %v3394_v42 = vpop.f32.mrb[58].mxu1 }
0x341e   :  { %v3402_v43 = vadd.f32 %v3398_v41, %v3349_v39  ;;  %v4359_v44 = vpop.f32.mrb[59].mxu1  ;;  %v3931_v9 = vmul.f32 -1.442695, %v3401_v54 }
0x3420   :  { %4697 = vtanh.f32 %v3402_v43  ;;  %v3932_v48 = vmul.f32 -1.442695, %v3402_v43 }
0x3422   :  { %4699 = vpow2.f32 %v3932_v48 }
0x342a   :  { %v4698_v0 = vpop.eup %4697 }
0x342b   :  { %3432 = vrot.lane.b32.xlu1 %v4698_v0, %s4757_s30 }
0x342c   :  { %v4700_v56 = vpop.eup %4699 }
0x342d   :  { %v3410_v58 = vadd.f32 1.0, %v4700_v56 }
0x342f   :  { %3317 = vrot.lane.b32.xlu1 %v3315_v45, %s4756_s1 }
0x3433   :  { %3422 = vrot.lane.b32.xlu1 %v3419_v1, %s4756_s1 }
0x3481   :  { %v3302_v50 = vpop.f32.mrb[52].mxu0 }
0x3482   :  { %v3303_v51 = vadd.f32 %v5398_v46, %v3302_v50  ;;  %v4350_v52 = vpop.f32.mrb[53].mxu0 }
0x3483   :  { %v3305_v53 = vpop.f32.mrb[54].mxu0 }
0x3484   :  { %4701 = vtanh.f32 %v3303_v51  ;;  %v4351_v55 = vpop.f32.mrb[55].mxu0  ;;  %v3929_v8 = vmul.f32 -1.442695, %v3303_v51 }
0x3485   :  { %4703 = vtanh.f32 %v3401_v54  ;;  %v3579_v54 = vld [vmem:[%s5629_s0 + $0x1f] sm:$0x1] }
0x3486   :  { %4705 = vrcp.f32 %v3410_v58 }
0x3487   :  { %4707 = vpow2.f32 %v3929_v8 }
0x3488   :  { %4709 = vpow2.f32 %v3931_v9 }
0x348e   :  { %v4702_v57 = vpop.eup %4701 }
0x348f   :  { %3322 = vrot.lane.b32.xlu0 %v4702_v57, %s4757_s30  ;;  %v4704_v59 = vpop.eup %4703 }
0x3490   :  { %v4706_v61 = vpop.eup %4705 }
0x3491   :  { %v4708_v10 = vpop.eup %4707 }
0x3492   :  { %v3311_v11 = vadd.f32 1.0, %v4708_v10  ;;  %v4710_v12 = vpop.eup %4709 }
0x3493   :  { %3430 = vrot.lane.b32.xlu0 %v4704_v59, %s4757_s30  ;;  %v3409_v13 = vadd.f32 1.0, %v4710_v12 }
0x3494   :  { %4711 = vrcp.f32 %v3311_v11 }
0x3495   :  { %4713 = vrcp.f32 %v3409_v13 }
0x349d   :  { %v3433_v63 = vpop.permute.xlu1 %3432 }
0x349e   :  { %v3437_v7 = vmul.f32 %v4706_v61, %v3433_v63  ;;  %v4712_v14 = vpop.eup %4711 }
0x349f   :  { %v4714_v18 = vpop.eup %4713 }
0x34a0   :  { %3442 = vrot.lane.b32.xlu1 %v3437_v7, %s4756_s1  ;;  %v3578_v7 = vld [vmem:[%s5629_s0 + $0xf] sm:$0x1] }
0x34a1   :  { %v3318_v20 = vpop.permute.xlu1 %3317 }
0x34a2   :  { %v3320_v22 = vmul.f32 %v4712_v14, %v3318_v20 }
0x34a5   :  { %v3423_v21 = vpop.permute.xlu1 %3422 }
0x34a6   :  { %v3427_v26 = vmul.f32 %v4706_v61, %v3423_v21 }
0x3501   :  { %v3323_v15 = vpop.permute.xlu0 %3322 }
0x3502   :  { %v3325_v16 = vmul.f32 %v4712_v14, %v3323_v15 }
0x3504   :  { %3327 = vrot.lane.b32.xlu0 %v3325_v16, %s4756_s1 }
0x3505   :  { %v3431_v17 = vpop.permute.xlu0 %3430 }
0x3506   :  { %v3436_v19 = vmul.f32 %v4714_v18, %v3431_v17 }
0x3508   :  { %3420 = vrot.lane.b32.xlu0 %v3417_v47, %s4756_s1 }
0x350c   :  { %3440 = vrot.lane.b32.xlu0 %v3436_v19, %s4756_s1 }
0x3512   :  { %v3443_v25 = vpop.permute.xlu1 %3442 }
0x3513   :  { %v3447_v28 = vadd.f32 %v3443_v25, %v3427_v26 }
0x3515   :  { %v3450_v31 = vrot.slane %v3447_v28, 7 }
0x3576   :  { %v3328_v23 = vpop.permute.xlu0 %3327 }
0x3577   :  { %v3330_v24 = vadd.f32 %v3328_v23, %v3320_v22 }
0x3579   :  { %3332 = vrot.lane.b32.xlu1 %v3330_v24, %s4758_s5 }
0x357a   :  { %v3421_v27 = vpop.permute.xlu0 %3420 }
0x357b   :  { %v3426_v29 = vmul.f32 %v4714_v18, %v3421_v27 }
0x357e   :  { %v3441_v30 = vpop.permute.xlu0 %3440 }
0x357f   :  { %v3446_v32 = vadd.f32 %v3441_v30, %v3426_v29 }
0x3581   :  { %v3451_v33 = vsel %vm228_vm3, %v3450_v31, %v3446_v32 }
0x3582   :  { %3452 = vrot.lane.b32.xlu0 %v3451_v33, %s4758_s5 }
0x35eb   :  { %v3333_v34 = vpop.permute.xlu1 %3332 }
0x35ec   :  { %3335 = vst.msk [vmem:[#allocation8] sm:$0x3] %vm119_vm0, %v3333_v34 }
0x35f3   :  { %v3336_v35 = vld [vmem:[#allocation8] sm:$0x3] }
0x35f4   :  { %v3453_v62 = vpop.permute.xlu0 %3452  ;;  %4715 = vtanh.f32 %v3336_v35 }
0x35f5   :  { %3455 = vst.msk [vmem:[#allocation6] sm:$0x3] %vm119_vm0, %v3453_v62 }
0x35fc   :  { %v3456_v36 = vld [vmem:[#allocation6] sm:$0x3] }
0x35fd   :  { %4717 = vtanh.f32 %v3456_v36  ;;  %v3647_v59 = vld [vmem:[#allocation6] sm:$0x3] }
0x35fe   :  { %v4716_v37 = vpop.eup %4715 }
0x35ff   :  { %3339 = vrot.lane.b32.xlu1 %v4716_v37, %s4758_s5 }
0x3607   :  { %v4718_v38 = vpop.eup %4717 }
0x3608   :  { %3460 = vrot.lane.b32.xlu1 %v4718_v38, %s4758_s5  ;;  %v3459_v39 = vrot.slane %v4718_v38, 1 }
0x360a   :  { %3462 = vrot.lane.b32.xlu0 %v3459_v39, %s4758_s5 }
0x3671   :  { %v3340_v40 = vpop.permute.xlu1 %3339 }
0x3672   :  { %v3342_v41 = vmul.f32 %v4712_v14, %v3340_v40 }
0x3674   :  { %3344 = vrot.lane.b32.xlu0 %v3342_v41, %s4756_s1 }
0x367a   :  { %v3461_v60 = vpop.permute.xlu1 %3460 }
0x367b   :  { %v3466_v44 = vmul.f32 %v4714_v18, %v3461_v60 }
0x367c   :  { %v3463_v42 = vpop.permute.xlu0 %3462 }
0x367d   :  { %v3467_v43 = vmul.f32 %v4706_v61, %v3463_v42  ;;  %v3649_v61 = vrot.slane %v3647_v59, 1 }
0x367f   :  { %v3470_v0 = vrot.slane %v3467_v43, 7 }
0x3681   :  { %v3471_v45 = vsel %vm228_vm3, %v3470_v0, %v3466_v44 }
0x3682   :  { %3472 = vrot.lane.b32.xlu1 %v3471_v45, %s4756_s1 }
0x36e6   :  { %v3345_v47 = vpop.permute.xlu0 %3344 }
0x36e7   :  { %3347 = vst.msk [vmem:[#allocation7] sm:$0x3] %vm119_vm0, %v3345_v47 }
0x36ee   :  { %v3477_v1 = vld [vmem:[#allocation7] sm:$0x3] }
0x36ef   :  { %3479 = vrot.lane.b32.xlu0 %v3477_v1, %s4756_s1 }
0x36f4   :  { %v3473_v48 = vpop.permute.xlu1 %3472 }
0x36f5   :  { %3475 = vst.msk [vmem:[#allocation5] sm:$0x3] %vm119_vm0, %v3473_v48 }
0x36fc   :  { %v3580_v49 = vld [vmem:[#allocation5] sm:$0x3] }
0x36fd   :  { %v3581_v50 = vpack.c.bf16 %v3580_v49, %v3580_v49  ;;  %v3476_v51 = vld [vmem:[#allocation5] sm:$0x3] }
0x36ff   :  { %4377 = vmatmul.mubr.msk.bf16.vlgmr.msra.gmra.mrb[56].mxu0 %vm130_vm2, %v3581_v50 }
0x3700   :  { %4381 = vmatpush3.bf16.msra.mxu0 %v4797_v2  ;;  %4388 = vmatprep.mubr.msk.bf16.mxu0 %vm4755_vm1, %v4754_v6 }
0x3701   :  { %4382 = vmatprep.subr.bf16.mxu0 %v4754_v6 }
0x3704   :  { %4383 = vmatpush3.bf16.msra.mxu0 %v4802_v3 }
0x3705   :  { %4384 = vmatprep.subr.bf16.mxu0 %v4754_v6 }
0x3708   :  { %4385 = vmatpush3.bf16.msra.mxu0 %v4807_v4 }
0x3709   :  { %4386 = vmatprep.subr.bf16.mxu0 %v4754_v6 }
0x370c   :  { %4387 = vmatpush3.bf16.msra.mxu0 %v4812_v5  ;;  %v3545_v5 = vld [vmem:[#allocation8] sm:$0x3] }
0x3761   :  { %v3480_v52 = vpop.permute.xlu0 %3479 }
0x3762   :  { %v3482_v53 = vsel %vm130_vm2, %v3476_v51, %v3480_v52 }
0x3763   :  { %v3483_v2 = vpack.c.bf16 %v3482_v53, %v3482_v53 }
0x3765   :  { %4369 = vmatmul.mubr.msk.bf16.vlgmr.msra.gmra.mrb[60].mxu1 %vm274_vm4, %v3483_v2 }
0x37d2   :  { %v3621_v3 = vpop.f32.mrb[56].mxu0 }
0x37d3   :  { %v3628_v55 = vrot.slane %v3621_v3, 1  ;;  %v4378_v56 = vpop.f32.mrb[57].mxu0  ;;  %v3631_v12 = vadd.f32 %v3621_v3, %v3578_v7 }
0x37d4   :  { %v3624_v57 = vpop.f32.mrb[58].mxu0 }
0x37d5   :  { %v3632_v4 = vadd.f32 %v3628_v55, %v3579_v54  ;;  %v4379_v58 = vpop.f32.mrb[59].mxu0  ;;  %v3937_v21 = vmul.f32 -1.442695, %v3631_v12 }
0x37d7   :  { %4719 = vtanh.f32 %v3632_v4  ;;  %v3938_v63 = vmul.f32 -1.442695, %v3632_v4 }
0x37d9   :  { %4721 = vpow2.f32 %v3938_v63  ;;  %v3939_v63 = vld [vmem:[%s5632_s3] ss:$0 sm:$0xff] }
0x37e1   :  { %v4720_v6 = vpop.eup %4719 }
0x37e2   :  { %3662 = vrot.lane.b32.xlu0 %v4720_v6, %s4757_s30 }
0x37e3   :  { %v4722_v14 = vpop.eup %4721 }
0x37e4   :  { %v3640_v16 = vadd.f32 1.0, %v4722_v14 }
0x37e6   :  { %3547 = vrot.lane.b32.xlu0 %v3545_v5, %s4756_s1 }
0x37ea   :  { %3652 = vrot.lane.b32.xlu0 %v3649_v61, %s4756_s1 }
0x3838   :  { %v3532_v8 = vpop.f32.mrb[60].mxu1 }
0x3839   :  { %v3533_v9 = vadd.f32 %v5398_v46, %v3532_v8  ;;  %v4370_v10 = vpop.f32.mrb[61].mxu1 }
0x383a   :  { %v3535_v11 = vpop.f32.mrb[62].mxu1 }
0x383b   :  { %4723 = vtanh.f32 %v3533_v9  ;;  %v4371_v13 = vpop.f32.mrb[63].mxu1  ;;  %v3935_v46 = vmul.f32 -1.442695, %v3533_v9 }
0x383c   :  { %4725 = vtanh.f32 %v3631_v12 }
0x383d   :  { %4727 = vrcp.f32 %v3640_v16 }
0x383e   :  { %4729 = vpow2.f32 %v3935_v46 }
0x383f   :  { %4731 = vpow2.f32 %v3937_v21 }
0x3845   :  { %v4724_v15 = vpop.eup %4723 }
0x3846   :  { %3552 = vrot.lane.b32.xlu1 %v4724_v15, %s4757_s30  ;;  %v4726_v17 = vpop.eup %4725 }
0x3847   :  { %v4728_v18 = vpop.eup %4727 }
0x3848   :  { %v4730_v22 = vpop.eup %4729 }
0x3849   :  { %v3541_v23 = vadd.f32 1.0, %v4730_v22  ;;  %v4732_v24 = vpop.eup %4731 }
0x384a   :  { %3660 = vrot.lane.b32.xlu1 %v4726_v17, %s4757_s30  ;;  %v3639_v25 = vadd.f32 1.0, %v4732_v24 }
0x384b   :  { %4733 = vrcp.f32 %v3541_v23 }
0x384c   :  { %4735 = vrcp.f32 %v3639_v25 }
0x3854   :  { %v3663_v19 = vpop.permute.xlu0 %3662 }
0x3855   :  { %v3667_v20 = vmul.f32 %v4728_v18, %v3663_v19  ;;  %v4734_v26 = vpop.eup %4733 }
0x3856   :  { %v4736_v30 = vpop.eup %4735 }
0x3857   :  { %3672 = vrot.lane.b32.xlu0 %v3667_v20, %s4756_s1 }
0x3858   :  { %v3548_v32 = vpop.permute.xlu0 %3547 }
0x3859   :  { %v3550_v34 = vmul.f32 %v4734_v26, %v3548_v32 }
0x385c   :  { %v3653_v33 = vpop.permute.xlu0 %3652 }
0x385d   :  { %v3657_v37 = vmul.f32 %v4728_v18, %v3653_v33 }
0x38b8   :  { %v3553_v27 = vpop.permute.xlu1 %3552 }
0x38b9   :  { %v3555_v28 = vmul.f32 %v4734_v26, %v3553_v27 }
0x38bb   :  { %3557 = vrot.lane.b32.xlu1 %v3555_v28, %s4756_s1 }
0x38bc   :  { %v3661_v29 = vpop.permute.xlu1 %3660 }
0x38bd   :  { %v3666_v31 = vmul.f32 %v4736_v30, %v3661_v29 }
0x38bf   :  { %3650 = vrot.lane.b32.xlu1 %v3647_v59, %s4756_s1 }
0x38c3   :  { %3670 = vrot.lane.b32.xlu1 %v3666_v31, %s4756_s1 }
0x38c9   :  { %v3673_v36 = vpop.permute.xlu0 %3672 }
0x38ca   :  { %v3677_v39 = vadd.f32 %v3673_v36, %v3657_v37 }
0x38cc   :  { %v3680_v60 = vrot.slane %v3677_v39, 7 }
0x392d   :  { %v3558_v35 = vpop.permute.xlu1 %3557 }
0x392e   :  { %v3560_v62 = vadd.f32 %v3558_v35, %v3550_v34 }
0x3930   :  { %3562 = vrot.lane.b32.xlu0 %v3560_v62, %s4758_s5 }
0x3931   :  { %v3651_v38 = vpop.permute.xlu1 %3650 }
0x3932   :  { %v3656_v40 = vmul.f32 %v4736_v30, %v3651_v38 }
0x3935   :  { %v3671_v41 = vpop.permute.xlu1 %3670 }
0x3936   :  { %v3676_v42 = vadd.f32 %v3671_v41, %v3656_v40 }
0x3938   :  { %v3681_v43 = vsel %vm228_vm3, %v3680_v60, %v3676_v42 }
0x3939   :  { %3682 = vrot.lane.b32.xlu1 %v3681_v43, %s4758_s5 }
0x39a2   :  { %v3563_v44 = vpop.permute.xlu0 %3562 }
0x39a3   :  { %3565 = vst.msk [vmem:[#allocation8] sm:$0x3] %vm119_vm0, %v3563_v44 }
0x39aa   :  { %v3566_v0 = vld [vmem:[#allocation8] sm:$0x3] }
0x39ab   :  { %v3683_v45 = vpop.permute.xlu1 %3682  ;;  %4737 = vtanh.f32 %v3566_v0  ;;  %v3775_v4 = vld [vmem:[#allocation8] sm:$0x3] }
0x39ac   :  { %3685 = vst.msk [vmem:[#allocation6] sm:$0x3] %vm119_vm0, %v3683_v45 }
0x39b3   :  { %v3686_v47 = vld [vmem:[#allocation6] sm:$0x3] }
0x39b4   :  { %4739 = vtanh.f32 %v3686_v47 }
0x39b5   :  { %v4738_v1 = vpop.eup %4737 }
0x39b6   :  { %3569 = vrot.lane.b32.xlu0 %v4738_v1, %s4758_s5 }
0x39be   :  { %v4740_v48 = vpop.eup %4739 }
0x39bf   :  { %3690 = vrot.lane.b32.xlu0 %v4740_v48, %s4758_s5  ;;  %v3689_v49 = vrot.slane %v4740_v48, 1 }
0x39c1   :  { %3692 = vrot.lane.b32.xlu1 %v3689_v49, %s4758_s5 }
0x3a28   :  { %v3570_v50 = vpop.permute.xlu0 %3569 }
0x3a29   :  { %v3572_v51 = vmul.f32 %v4734_v26, %v3570_v50 }
0x3a2b   :  { %3574 = vrot.lane.b32.xlu1 %v3572_v51, %s4756_s1 }
0x3a31   :  { %v3691_v52 = vpop.permute.xlu0 %3690 }
0x3a32   :  { %v3696_v54 = vmul.f32 %v4736_v30, %v3691_v52 }
0x3a33   :  { %v3693_v53 = vpop.permute.xlu1 %3692 }
0x3a34   :  { %v3697_v2 = vmul.f32 %v4728_v18, %v3693_v53 }
0x3a36   :  { %v3700_v3 = vrot.slane %v3697_v2, 7 }
0x3a38   :  { %v3701_v55 = vsel %vm228_vm3, %v3700_v3, %v3696_v54 }
0x3a39   :  { %3702 = vrot.lane.b32.xlu0 %v3701_v55, %s4756_s1 }
0x3a9d   :  { %v3575_v56 = vpop.permute.xlu1 %3574 }
0x3a9e   :  { %3577 = vst.msk [vmem:[#allocation7] sm:$0x3] %vm119_vm0, %v3575_v56 }
0x3aa5   :  { %v3707_v57 = vld [vmem:[#allocation7] sm:$0x3] }
0x3aa6   :  { %3709 = vrot.lane.b32.xlu1 %v3707_v57, %s4756_s1 }
0x3aaa   :  { %3777 = vrot.lane.b32.xlu1 %v3775_v4, %s4756_s1 }
0x3aab   :  { %v3703_v58 = vpop.permute.xlu0 %3702 }
0x3aac   :  { %3705 = vst.msk [vmem:[#allocation5] sm:$0x3] %vm119_vm0, %v3703_v58 }
0x3ab3   :  { %v3706_v5 = vld [vmem:[#allocation5] sm:$0x3] }
0x3b18   :  { %v3710_v6 = vpop.permute.xlu1 %3709 }
0x3b19   :  { %v3712_v59 = vsel %vm130_vm2, %v3706_v5, %v3710_v6 }
0x3b1a   :  { %v3713_v61 = vpack.c.bf16 %v3712_v59, %v3712_v59 }
0x3b1c   :  { %4389 = vmatmul.mubr.msk.bf16.vlgmr.msra.gmra.mrb[60].mxu0 %vm274_vm4, %v3713_v61  ;;  %v3778_v19 = vpop.permute.xlu1 %3777 }
0x3bef   :  { %v3762_v7 = vpop.f32.mrb[60].mxu0 }
0x3bf0   :  { %v3763_v8 = vadd.f32 %v3939_v63, %v3762_v7  ;;  %v4390_v9 = vpop.f32.mrb[61].mxu0 }
0x3bf1   :  { %v3765_v10 = vpop.f32.mrb[62].mxu0 }
0x3bf2   :  { %4741 = vtanh.f32 %v3763_v8  ;;  %v4391_v11 = vpop.f32.mrb[63].mxu0  ;;  %v3941_v13 = vmul.f32 -1.442695, %v3763_v8 }
0x3bf4   :  { %4743 = vpow2.f32 %v3941_v13 }
0x3bfc   :  { %v4742_v12 = vpop.eup %4741 }
0x3bfd   :  { %3782 = vrot.lane.b32.xlu0 %v4742_v12, %s4757_s30 }
0x3bfe   :  { %v4744_v14 = vpop.eup %4743 }
0x3bff   :  { %v3771_v15 = vadd.f32 1.0, %v4744_v14 }
0x3c01   :  { %4745 = vrcp.f32 %v3771_v15 }
0x3c0b   :  { %v4746_v16 = vpop.eup %4745 }
0x3c0c   :  { %v3780_v20 = vmul.f32 %v4746_v16, %v3778_v19 }
0x3c6f   :  { %v3783_v17 = vpop.permute.xlu0 %3782 }
0x3c70   :  { %v3785_v18 = vmul.f32 %v4746_v16, %v3783_v17 }
0x3c72   :  { %3787 = vrot.lane.b32.xlu0 %v3785_v18, %s4756_s1 }
0x3ce4   :  { %v3788_v46 = vpop.permute.xlu0 %3787 }
0x3ce5   :  { %v3790_v21 = vadd.f32 %v3788_v46, %v3780_v20 }
0x3ce7   :  { %3792 = vrot.lane.b32.xlu1 %v3790_v21, %s4758_s5 }
0x3d59   :  { %v3793_v22 = vpop.permute.xlu1 %3792 }
0x3d5a   :  { %3795 = vst.msk [vmem:[#allocation8] sm:$0x3] %vm119_vm0, %v3793_v22 }
0x3d61   :  { %v3796_v23 = vld [vmem:[#allocation8] sm:$0x3] }
0x3d62   :  { %4747 = vtanh.f32 %v3796_v23 }
0x3d6c   :  { %v4748_v24 = vpop.eup %4747 }
0x3d6d   :  { %3799 = vrot.lane.b32.xlu0 %v4748_v24, %s4758_s5 }
0x3ddf   :  { %v3800_v25 = vpop.permute.xlu0 %3799 }
0x3de0   :  { %v3802_v26 = vmul.f32 %v4746_v16, %v3800_v25 }
0x3de2   :  { %3804 = vrot.lane.b32.xlu1 %v3802_v26, %s4756_s1 }
0x3e54   :  { %v3805_v27 = vpop.permute.xlu1 %3804 }
0x3e55   :  { %3807 = vst.msk [vmem:[#allocation7] sm:$0x3] %vm119_vm0, %v3805_v27 }
0x3e5c   :  { %v3811_v28 = vld [vmem:[#allocation7] sm:$0x3] }
0x3e5d   :  { %3812 = vst.msk [vmem:[%s5633_s4] sm:$0x3] %vm119_vm0, %v3811_v28 }
0x3e5e   :  { %3817 = vsyncmov [#allocation4] }
0x3e61   :  { %s3818_s25 = vpop.sfrf %3817 }
0x3e62   :  { %p3942_p0 = scmp.ne.s32.totalorder %s3818_s25, 0 }
0x3e64   :  { %3822 = shalt.err (%p3942_p0)  }
0x3e65   :  { %3824 = vsyncmov [#allocation4 + $0x1] }
0x3e68   :  { %s3825_s26 = vpop.sfrf %3824 }
0x3e69   :  { %p3943_p1 = scmp.ne.s32.totalorder %s3825_s26, 0 }
0x3e6b   :  { %3829 = shalt.err (%p3943_p1)  }

</bundles_post_ra>
